<compile_context>
chip_gen: v6e
topology: v6e:2x2x1
jax: 0.10.0
libtpu: 0.0.40
codegen_flags: <defaults>
</compile_context>

<pallas_src>
import math

import jax
import jax.numpy as jnp
from jax.experimental import pallas as pl
from jax.experimental.pallas import tpu as pltpu


def _round_up(a, m):
    return ((a + m - 1) // m) * m


# -----------------------------------------------------------------------------
# Kernel: one (tm, tn) output tile, accumulated in-place in o_ref (f32) over
# the K grid axis (axis 2).  No scratch accumulator — the output BlockSpec
# ignores k, so the f32 output tile stays resident in VMEM across the whole
# reduction.
# -----------------------------------------------------------------------------
def fc_kernel(x_ref, w_ref, b_ref, o_ref):
    k = pl.program_id(2)

    @pl.when(k == 0)
    def _init():
        o_ref[...] = jnp.zeros_like(o_ref)

    o_ref[...] += jnp.dot(
        x_ref[...], w_ref[...], preferred_element_type=jnp.float32
    )

    @pl.when(k == pl.num_programs(2) - 1)
    def _finalize():
        o_ref[...] += b_ref[...]        # (1, tn) broadcasts over the tm rows


# -----------------------------------------------------------------------------
# Parameter prep — done ONCE (hoisted out of the forward pass): pad K/N up to
# tile multiples and cast W to the compute dtype.
# -----------------------------------------------------------------------------
def prepare_fc_params(w_t, b, *, compute_dtype=jnp.float32, tk=512, tn=512):
    """w_t : (in_dim, out_dim)  — PyTorch weight already transposed.
       b   : (out_dim,)"""
    K, N = w_t.shape
    tk_e = min(tk, _round_up(K, 128))
    tn_e = min(tn, _round_up(N, 128))
    Kp = _round_up(K, tk_e)
    Np = _round_up(N, tn_e)

    wp = w_t.astype(jnp.float32)
    if (Kp, Np) != (K, N):
        wp = jnp.pad(wp, ((0, Kp - K), (0, Np - N)))
    wp = wp.astype(compute_dtype)

    bp = b.astype(jnp.float32)
    if Np != N:
        bp = jnp.pad(bp, ((0, Np - N),))
    bp = bp.reshape(1, Np)

    return {
        "w_full": w_t.astype(jnp.float32),   # unpadded, for the tiny-shape path
        "b_full": b.astype(jnp.float32),
        "wp": wp, "bp": bp,
        "K": K, "N": N, "Kp": Kp, "Np": Np,
        "tk": tk_e, "tn": tn_e,
        "compute_dtype": compute_dtype,
    }


def fc_forward(x, params, *, tm=512):
    """y = x @ W.T + b over the last dim of x (nn.Linear forward)."""
    lead = x.shape[:-1]
    K = x.shape[-1]
    assert K == params["K"], "in_dim mismatch"
    N = params["N"]
    M = int(math.prod(lead)) if lead else 1

    # Tiny problems (the module's actual use): padding K->128 / N->128 wastes
    # the MXU and launch overhead dominates — XLA's fused GEMM wins here.
    if M < 64 or K < 128 or N < 128:
        y = x.reshape(M, K).astype(jnp.float32) @ params["w_full"] + params["b_full"]
        return y.reshape(lead + (N,))

    cdt = params["compute_dtype"]
    Kp, Np = params["Kp"], params["Np"]
    tk, tn = params["tk"], params["tn"]

    tm_e = min(tm, _round_up(M, 8))
    Mp = _round_up(M, tm_e)
    # Keep the parallel (i, j) grid at >= 2 steps when possible so both v7x
    # TensorCores get work (no-op on single-TC v5e/v6e).
    if (Mp // tm_e) * (Np // tn) == 1 and tm_e % 16 == 0:
        tm_e //= 2

    x2 = x.reshape(M, K).astype(cdt)
    if (Mp, Kp) != (M, K):                 # skip the no-op pad on aligned shapes
        x2 = jnp.pad(x2, ((0, Mp - M), (0, Kp - K)))

    grid = (Mp // tm_e, Np // tn, Kp // tk)
    in_item = jnp.dtype(cdt).itemsize

    out = pl.pallas_call(
        fc_kernel,
        out_shape=jax.ShapeDtypeStruct((Mp, Np), jnp.float32),
        grid_spec=pltpu.PrefetchScalarGridSpec(
            num_scalar_prefetch=0,
            grid=grid,
            in_specs=[
                pl.BlockSpec((tm_e, tk), lambda i, j, k: (i, k)),
                pl.BlockSpec((tk, tn), lambda i, j, k: (k, j)),
                pl.BlockSpec((1, tn), lambda i, j, k: (0, j)),
            ],
            out_specs=pl.BlockSpec((tm_e, tn), lambda i, j, k: (i, j)),
        ),
        compiler_params=pltpu.CompilerParams(
            dimension_semantics=("parallel", "parallel", "arbitrary"),
        ),
        cost_estimate=pl.CostEstimate(
            flops=2 * Mp * Kp * Np,
            transcendentals=0,
            bytes_accessed=in_item * (Mp * Kp + Kp * Np) + 4 * (Mp * Np + Np),
        ),
    )(x2, params["wp"], params["bp"])

    out = out[:M, :N]
    return out.reshape(lead + (N,))


def init_params(key, in_dim, out_dim):
    """PyTorch nn.Linear default init: uniform(-1/sqrt(in_dim), 1/sqrt(in_dim)).
    Weight returned already transposed to (in_dim, out_dim)."""
    kw, kb = jax.random.split(key)
    bound = 1.0 / (in_dim ** 0.5)
    w_t = jax.random.uniform(kw, (in_dim, out_dim), jnp.float32, -bound, bound)
    b = jax.random.uniform(kb, (out_dim,), jnp.float32, -bound, bound)
    return w_t, b


def fc_ref(x, w_t, b):
    """Pure-JAX reference of nn.Linear for verification."""
    return x.astype(jnp.float32) @ w_t + b


if __name__ == "__main__":
    key = jax.random.PRNGKey(0)
    k1, k2, k3, k4 = jax.random.split(key, 4)

    # Case 1: the module's tiny shape (batch=2, seq=8, hidden=32 -> 16).
    # Routed to the XLA fallback path by design.
    B, S, IN1, OUT1 = 2, 8, 32, 16
    x1 = jax.random.normal(k1, (B, S, IN1), dtype=jnp.float32)
    w1, b1 = init_params(k2, IN1, OUT1)
    p1 = prepare_fc_params(w1, b1)
    y1 = jax.block_until_ready(fc_forward(x1, p1))
    ref1 = fc_ref(x1, w1, b1)
    assert y1.shape == (B, S, OUT1)
    assert jnp.allclose(y1, ref1, atol=1e-5, rtol=1e-5), "tiny-shape path mismatch"

    # Case 2: larger shape -> Pallas kernel (f32 compute), exercises padding,
    # multi-step parallel grid and the K-axis accumulate/finalize phases.
    B2, S2, IN2, OUT2 = 4, 160, 1024, 640
    x2 = jax.random.normal(k3, (B2, S2, IN2), dtype=jnp.float32)
    w2, b2 = init_params(k4, IN2, OUT2)
    p2_f32 = prepare_fc_params(w2, b2, compute_dtype=jnp.float32)
    y2 = jax.block_until_ready(fc_forward(x2, p2_f32))
    ref2 = fc_ref(x2, w2, b2)
    assert y2.shape == (B2, S2, OUT2)
    assert jnp.allclose(y2, ref2, atol=1e-3, rtol=1e-3), "f32 Pallas path mismatch"

    # Case 3: same problem with bf16 inputs / f32 accumulation (perf mode).
    p2_bf16 = prepare_fc_params(w2, b2, compute_dtype=jnp.bfloat16)
    y2b = jax.block_until_ready(fc_forward(x2, p2_bf16))
    assert y2b.shape == (B2, S2, OUT2)
    assert jnp.allclose(y2b, ref2, atol=3e-2, rtol=2e-2), "bf16 Pallas path mismatch"

    print("KERNEL_OK")
</pallas_src>

<mosaic_0001>
module attributes {stable_mosaic.version = 11 : i64} {
  func.func @fc_kernel(%arg0: i32, %arg1: i32, %arg2: i32, %arg3: memref<512x512xf32, #tpu.memory_space<vmem>>, %arg4: memref<512x512xf32, #tpu.memory_space<vmem>>, %arg5: memref<1x512xf32, #tpu.memory_space<vmem>>, %arg6: memref<512x512xf32, #tpu.memory_space<vmem>>) attributes {dimension_semantics = [#tpu.dimension_semantics<parallel>, #tpu.dimension_semantics<parallel>, #tpu.dimension_semantics<arbitrary>], iteration_bounds = array<i64: 2, 2, 2>, scalar_prefetch = 0 : i64, scratch_operands = 0 : i64, tpu.core_type = #tpu.core_type<tc>, window_params = [{transform_indices = @transform_0, window_bounds = array<i64: 512, 512>}, {transform_indices = @transform_1, window_bounds = array<i64: 512, 512>}, {transform_indices = @transform_2, window_bounds = array<i64: 1, 512>}, {transform_indices = @transform_3, window_bounds = array<i64: 512, 512>}]} {
    %c0_i32 = arith.constant 0 : i32
    %0 = arith.cmpi eq, %arg2, %c0_i32 : i32
    %1 = arith.extui %0 : i1 to i32
    %c0_i32_0 = arith.constant 0 : i32
    %2 = arith.cmpi ne, %1, %c0_i32_0 : i32
    scf.if %2 {
      %cst_9 = arith.constant 0.000000e+00 : f32
      %12 = vector.broadcast %cst_9 : f32 to vector<512x512xf32>
      %c0_10 = arith.constant 0 : index
      %c0_11 = arith.constant 0 : index
      %13 = vector.load %arg6[%c0_10, %c0_11] : memref<512x512xf32, #tpu.memory_space<vmem>>, vector<512x512xf32>
      tpu.vector_store %arg6[%c0_10, %c0_11], %12 {strides = array<i32>} : memref<512x512xf32, #tpu.memory_space<vmem>>, vector<512x512xf32>,
    } else {
    }
    %c0 = arith.constant 0 : index
    %c0_1 = arith.constant 0 : index
    %3 = vector.load %arg6[%c0, %c0_1] : memref<512x512xf32, #tpu.memory_space<vmem>>, vector<512x512xf32>
    %c0_2 = arith.constant 0 : index
    %c0_3 = arith.constant 0 : index
    %4 = vector.load %arg3[%c0_2, %c0_3] : memref<512x512xf32, #tpu.memory_space<vmem>>, vector<512x512xf32>
    %c0_4 = arith.constant 0 : index
    %c0_5 = arith.constant 0 : index
    %5 = vector.load %arg4[%c0_4, %c0_5] : memref<512x512xf32, #tpu.memory_space<vmem>>, vector<512x512xf32>
    %cst = arith.constant dense<0.000000e+00> : vector<512x512xf32>
    %6 = tpu.matmul %4, %5, %cst {dimension_numbers = #tpu.dot_dimension_numbers<[1], [0], [0], [1], [0, 0, 1, 1], [], []>} : vector<512x512xf32>, vector<512x512xf32>, vector<512x512xf32> -> vector<512x512xf32>
    %7 = arith.addf %3, %6 : vector<512x512xf32>
    %c0_6 = arith.constant 0 : index
    %c0_7 = arith.constant 0 : index
    %8 = vector.load %arg6[%c0_6, %c0_7] : memref<512x512xf32, #tpu.memory_space<vmem>>, vector<512x512xf32>
    tpu.vector_store %arg6[%c0_6, %c0_7], %7 {strides = array<i32>} : memref<512x512xf32, #tpu.memory_space<vmem>>, vector<512x512xf32>,
    %c1_i32 = arith.constant 1 : i32
    %9 = arith.cmpi eq, %arg2, %c1_i32 : i32
    %10 = arith.extui %9 : i1 to i32
    %c0_i32_8 = arith.constant 0 : i32
    %11 = arith.cmpi ne, %10, %c0_i32_8 : i32
    scf.if %11 {
      %c0_9 = arith.constant 0 : index
      %c0_10 = arith.constant 0 : index
      %12 = vector.load %arg6[%c0_9, %c0_10] : memref<512x512xf32, #tpu.memory_space<vmem>>, vector<512x512xf32>
      %c0_11 = arith.constant 0 : index
      %c0_12 = arith.constant 0 : index
      %13 = vector.load %arg5[%c0_11, %c0_12] : memref<1x512xf32, #tpu.memory_space<vmem>>, vector<1x512xf32>
      %14 = vector.broadcast %13 : vector<1x512xf32> to vector<512x512xf32>
      %15 = arith.addf %12, %14 : vector<512x512xf32>
      %c0_13 = arith.constant 0 : index
      %c0_14 = arith.constant 0 : index
      %16 = vector.load %arg6[%c0_13, %c0_14] : memref<512x512xf32, #tpu.memory_space<vmem>>, vector<512x512xf32>
      tpu.vector_store %arg6[%c0_13, %c0_14], %15 {strides = array<i32>} : memref<512x512xf32, #tpu.memory_space<vmem>>, vector<512x512xf32>,
    } else {
    }
    return
  }
  func.func @transform_0(%arg0: i32, %arg1: i32, %arg2: i32) -> (i32, i32) {
    %c0_i32 = arith.constant 0 : i32
    return %arg0, %arg2 : i32, i32
  }
  func.func @transform_1(%arg0: i32, %arg1: i32, %arg2: i32) -> (i32, i32) {
    %c0_i32 = arith.constant 0 : i32
    return %arg2, %arg1 : i32, i32
  }
  func.func @transform_2(%arg0: i32, %arg1: i32, %arg2: i32) -> (i32, i32) {
    %c0_i32 = arith.constant 0 : i32
    %c0_i32_0 = arith.constant 0 : i32
    return %c0_i32, %arg1 : i32, i32
  }
  func.func @transform_3(%arg0: i32, %arg1: i32, %arg2: i32) -> (i32, i32) {
    %c0_i32 = arith.constant 0 : i32
    return %arg0, %arg1 : i32, i32
  }
}

</mosaic_0001>

<bundles_post_ra>
// kernel: tpu_custom_call.1
= control target key start
LH: loop header
LB: loop body
LE: loop exit
PB: predicated region body
PF: predicated region fallthrough
CT: control target
= control target key end

     0   :  { %s8365_s0 = inlined_call_operand.hbm [shape: f32[1024,1024], index: 0, kind: input, shape index: {}]   ;;  %s8366_s1 = inlined_call_operand.hbm [shape: f32[1024,1024], index: 1, kind: input, shape index: {}]   ;;  %s8367_s2 = inlined_call_operand.hbm [shape: f32[1,1024], index: 2, kind: input, shape index: {}]   ;;  %s8368_s3 = inlined_call_operand.hbm [shape: f32[1024,1024], index: 3, kind: output, shape index: {}]  }
   0x1   :  { %8387 = sst [smem:[#allocation29_spill]] %s8365_s0 }
   0x2   :  { %8388 = sst [smem:[#allocation30_spill]] %s8366_s1 }
   0x3   :  { %8389 = sst [smem:[#allocation31_spill]] %s8367_s2 }
   0x4   :  { %8390 = sst [smem:[#allocation32_spill]] %s8368_s3 }
   0x5   :  { %8 = vsyncpa [#allocation3], 0 }
   0x6   :  { %10 = vsyncpa [#allocation3 + $0x1], 0 }
   0x7   :  { %11 = vsyncpa [#allocation6], 0 }
   0x8   :  { %13 = vsyncpa [#allocation6 + $0x1], 0 }
   0x9   :  { %14 = vsyncpa [#allocation4], 0 }
   0xa   :  { %16 = vsyncpa [#allocation4 + $0x1], 0  ;;  %s5374_s12 = smov 0   ;;  %s5376_s13 = smov 0  }
   0xb   :  { %s5378_s14 = smov 0   ;;  %s5380_s15 = smov 0  }
   0xc   :  { %s5382_s16 = smov 0   ;;  %s5384_s17 = smov 0  }
   0xd   :  { %s5386_s18 = smov 0   ;;  %s5388_s19 = smov 0  }
   0xe   :  { %s5390_s20 = smov 0   ;;  %s5392_s21 = smov 0  }
   0xf   :  { %s5394_s22 = smov 0   ;;  %s5396_s23 = smov 0  }
  0x10   :  { %s5398_s24 = smov 0   ;;  %s5400_s25 = smov 0  }
  0x11   :  { %s5402_s26 = smov 0   ;;  %s5404_s27 = smov 0  }
  0x12   :  { %s5406_s28 = smov 0   ;;  %s5408_s29 = smov 0  }
  0x13   :  { %s5410_s30 = smov 0  }
  0x14 LB: > { %8391 = sst [smem:[#allocation13_spill]] %s5269_s12  ;;  %s34_s4 = sadd.s32 1, %s5329_s27  ;;  %s5341_s30 = sphi %s5410_s30, %s22_s30   ;;  %s5337_s29 = sphi %s5408_s29, %s8473_s29   ;;  %s5333_s28 = sphi %s5406_s28, %s8472_s28   ;;  %s5329_s27 = sphi %s5404_s27, %s8458_s27   ;;  %s5325_s26 = sphi %s5402_s26, %s8471_s26   ;;  %s5321_s25 = sphi %s5400_s25, %s8470_s25   ;;  %s5317_s24 = sphi %s5398_s24, %s8469_s24   ;;  %s5313_s23 = sphi %s5396_s23, %s8468_s23   ;;  %s5309_s22 = sphi %s5394_s22, %s8467_s22   ;;  %s5305_s21 = sphi %s5392_s21, %s8466_s21   ;;  %s5301_s20 = sphi %s5390_s20, %s8455_s20   ;;  %s5297_s19 = sphi %s5388_s19, %s8454_s19   ;;  %s5293_s18 = sphi %s5386_s18, %s8453_s18   ;;  %s5289_s17 = sphi %s5384_s17, %s8465_s17   ;;  %s5285_s16 = sphi %s5382_s16, %s8464_s16   ;;  %s5281_s15 = sphi %s5380_s15, %s8462_s15   ;;  %s5277_s14 = sphi %s5378_s14, %s8461_s14   ;;  %s5273_s13 = sphi %s5376_s13, %s8460_s13   ;;  %s5269_s12 = sphi %s5374_s12, %s8450_s12  }
  0x15   : > { %8392 = sst [smem:[#allocation14_spill]] %s5273_s13  ;;  %s37_s5 = sadd.s32 1, %s5333_s28 }
  0x16   : > { %8393 = sst [smem:[#allocation15_spill]] %s5281_s15  ;;  %p35_p0 = scmp.ge.s32.totalorder %s34_s4, 2 }
  0x17   : > { %8394 = sst [smem:[#allocation16_spill]] %s5285_s16  ;;  %p58_p1 = scmp.eq.s32.totalorder %s5341_s30, 0 }
  0x18   : > { %8395 = sst [smem:[#allocation17_spill]] %s5289_s17  ;;  %s78_s6 = sadd.s32 1, %s5301_s20 }
  0x19   : > { %8396 = sst [smem:[#allocation18_spill]] %s5293_s18  ;;  %p85_p2 = scmp.ne.s32.totalorder %s5301_s20, %s5297_s19 }
  0x1a   : > { %8397 = sst [smem:[#allocation19_spill]] %s5297_s19  ;;  %s8475_s4 = smov (%p35_p0, %s34_s4), 0 }
  0x1b   : > { %8398 = sst [smem:[#allocation20_spill]] %s5301_s20  ;;  %s8477_s5 = smov (!%p35_p0, %s37_s5), %s5333_s28 }
  0x1c   : > { %8399 = sst [smem:[#allocation21_spill]] %s5317_s24  ;;  %s5482_s7 = ssub.s32 %s5329_s27, %s8475_s4 }
  0x1d   : > { %8400 = sst [smem:[#allocation22_spill]] %s5321_s25  ;;  %p5486_p3 = por %p85_p2, %p58_p1 }
  0x1e   : > { %8401 = sst [smem:[#allocation23_spill]] %s5325_s26  ;;  %p39_p4 = scmp.ge.s32.totalorder %s8477_s5, 2 }
  0x1f   : > { %8402 = sst [smem:[#allocation24_spill]] %s5329_s27  ;;  %p8384_p6 = scmp.lt.s32.totalorder %s5341_s30, 8 }
  0x20   : > { %8403 = sst [smem:[#allocation25_spill]] %s8475_s4  ;;  %s193_s4 = sand.u32 1, %s5341_s30  }
  0x21   : > { %s5497_s9 = scalar_select %p39_p4, 0, %s8477_s5  }
  0x22   : > { %s195_s3 = sand.u32 1, %s5301_s20   ;;  %s4602_s26 = sshll.u32 %s5333_s28, 2 }
  0x23   : > { %8405 = sst [smem:[#allocation26_spill]] %s5497_s9  ;;  %s5501_s10 = ssub.s32 %s5333_s28, %s5497_s9 }
  0x24   : > { %s75_s11 = sor.u32 %s5501_s10, %s5482_s7  ;;  %s4600_s24 = sshll.u32 %s195_s3, 11 }
  0x25   : > { %p76_p7 = scmp.eq.s32.totalorder %s75_s11, 0  ;;  %s4623_s2 = sshll.u32 %s5329_s27, 9 }
  0x26   : > { %s204_s12 = sadd.s32 %s4623_s2, %s4602_s26  ;;  %s197_s15 = scalar_lea.vmem [#allocation5], %s4600_s24 }
  0x27   : > { %s5509_s25 = scalar_select %p76_p7, %s5301_s20, %s78_s6  }
  0x28   : > { %s4604_s13 = sshll.u32 %s204_s12, 7  ;;  %s207_s18 = sshll.u32 %s197_s15, 4  ;;  %s208_s18 = int_to_ptr.vmem [resolvable:$true] %s207_s18 }
  0x29   : > { %8406 = sst [smem:[#allocation27_spill]] %s5509_s25  ;;  %p5519_p8 = pnand %p8384_p6, %p5486_p3 }
  0x2a   : > { %s8407_s1 = sld [smem:[#allocation30_spill]]  ;;  %p4608_p9 = scmp.ge.s32.totalorder %s5341_s30, 1 }
  0x2b   : > { %p234_p10 = scmp.lt.s32.totalorder %s5341_s30, 9  ;;  %s5525_s3 = scalar_lea.sflag [#allocation6], %s193_s4 }
  0x2c   : > { %p5067_p11 = pneg %p5519_p8  ;;  %s5078_s2 = scalar_lea.vmem %s208_s18, 32768 }
  0x2d   : > { %p5079_p12 = scmp.ne.s32.totalorder %s208_s18, %s5078_s2  ;;  %s5343_s12 = smov [#allocation5]  }
  0x2f   : > { %p5081_p13 = pnand %p5079_p12, %p5067_p11 }
  0x30   : > { %s206_s9 = scalar_lea.hbm %s8407_s1, %s4604_s13  ;;  %s5083_s13 = sshll.u32 %s5343_s12, 4  ;;  %s5084_s13 = int_to_ptr.vmem [resolvable:$false] %s5083_s13 }
  0x31   : > { %p5082_p0 = pneg %p5081_p13  ;;  %s5085_s15 = scalar_lea.vmem %s5084_s13, 65536 }
  0x32   : > { %p5086_p2 = scmp.lt.s32.totalorder %s208_s18, %s5084_s13  ;;  %p5087_p3 = scmp.lt.s32.totalorder %s5085_s15, %s5078_s2 }
  0x34   : > { %p5088_p7 = por %p5087_p3, %p5086_p2 }
  0x36   : > { %p5089_p5 = pnand %p5088_p7, %p5082_p0 }
  0x38   : > { %5092 = shalt.err (!%p5089_p5)
}
  0x39   : > { %s8378_s16 = smov 1024   ;;  %s8379_s19 = smov 512  }
  0x3a   : > { %s8380_s24 = smov 32   ;;  %p5539_p5 = pnand %p4608_p9, %p234_p10 }
  0x3b   : > { %4640 = dma.hbm_to_vmem [thread:$0]  (!%p5519_p8), %s206_s9, 32768, %s208_s18, %s5525_s3, %s8378_s16, %s8379_s19, %s8380_s24  }
  0x3c   : > { %s8409_s26 = scalar_select %p5539_p5, 1, 0 }
  0x3d   : > { %s41_s4 = sadd.s32 1, %s5337_s29  ;;  %s50_s6 = sadd.s32 1, %s5313_s23 }
  0x3e   : > { %8410 = sst [smem:[#allocation28_spill]] %s8409_s26  ;;  %s8479_s4 = smov (!%p39_p4, %s41_s4), %s5337_s29 }
  0x3f   : > { %p57_p11 = scmp.ne.s32.totalorder %s5313_s23, %s5309_s22  ;;  %p43_p12 = scmp.ge.s32.totalorder %s8479_s4, 2 }
  0x40   : > { %p63_p13 = scmp.ne.s32.totalorder %s5309_s22, %s5305_s21  ;;  %s132_s18 = sadd.s32 1, %s5277_s14 }
  0x41   : > { %p5554_p0 = por %p58_p1, %p57_p11  ;;  %s8481_s4 = smov (%p43_p12, %s8479_s4), 0 }
  0x42   : > { %s169_s8 = sand.u32 1, %s5313_s23   ;;  %s4597_s9 = sshll.u32 %s5329_s27, 2 }
  0x43   : > { %s45_s5 = ssub.s32 %s5337_s29, %s8481_s4  ;;  %s4595_s12 = sshll.u32 %s169_s8, 11 }
  0x44   : > { %s47_s11 = sor.u32 %s5482_s7, %s45_s5  ;;  %s129_s2 = sor.u32 %s5501_s10, %s45_s5 }
  0x45   : > { %p48_p4 = scmp.eq.s32.totalorder %s47_s11, 0  ;;  %p130_p8 = scmp.eq.s32.totalorder %s129_s2, 0 }
  0x46   : > { %s4622_s13 = sshll.u32 %s5337_s29, 9  ;;  %s173_s1 = scalar_lea.vmem [#allocation2], %s4595_s12 }
  0x47   : > { %s5569_s15 = scalar_select %p48_p4, %s5313_s23, %s50_s6  }
  0x48   : > { %s5572_s16 = scalar_select %p130_p8, %s5277_s14, %s132_s18  }
  0x49   : > { %s180_s19 = sadd.s32 %s4622_s13, %s4597_s9  ;;  %s183_s25 = sshll.u32 %s173_s1, 4  ;;  %s184_s25 = int_to_ptr.vmem [resolvable:$true] %s183_s25 }
  0x4a   : > { %s4599_s24 = sshll.u32 %s180_s19, 7  ;;  %s8412_s0 = sld [smem:[#allocation29_spill]] }
  0x4b   : > { %p5581_p9 = pnand %p8384_p6, %p5554_p0  ;;  %s170_s6 = scalar_lea.sflag [#allocation3], %s169_s8 }
  0x4c   : > { %s5106_s18 = scalar_lea.vmem %s184_s25, 32768  ;;  %s5347_s1 = smov [#allocation2]  }
  0x4d   : > { %p5095_p10 = pneg %p5581_p9  ;;  %p5107_p2 = scmp.ne.s32.totalorder %s184_s25, %s5106_s18 }
  0x4e   : > { %s5111_s19 = sshll.u32 %s5347_s1, 4  ;;  %s5112_s19 = int_to_ptr.vmem [resolvable:$false] %s5111_s19 }
  0x4f   : > { %p5109_p3 = pnand %p5107_p2, %p5095_p10  ;;  %s5113_s20 = scalar_lea.vmem %s5112_s19, 65536 }
  0x50   : > { %s182_s27 = scalar_lea.hbm %s8412_s0, %s4599_s24  ;;  %p5114_p11 = scmp.lt.s32.totalorder %s184_s25, %s5112_s19 }
  0x51   : > { %p5110_p7 = pneg %p5109_p3  ;;  %p5115_p12 = scmp.lt.s32.totalorder %s5113_s20, %s5106_s18 }
  0x53   : > { %p5116_p4 = por %p5115_p12, %p5114_p11 }
  0x55   : > { %p5117_p8 = pnand %p5116_p4, %p5110_p7 }
  0x57   : > { %5120 = shalt.err (!%p5117_p8)
}
  0x58   : > { %s8414_s24 = smov 32   ;;  %s8415_s26 = smov 512  }
  0x59   : > { %s8416_s17 = smov 1024   ;;  %s8417_s8 = sld [smem:[#allocation17_spill]] }
  0x5a   : > { %s8418_s9 = sld [smem:[#allocation16_spill]]  ;;  %s5593_s7 = sadd.s32 4294967295, %s5341_s30  }
  0x5b   : > { %s8419_s5 = sld [smem:[#allocation19_spill]]  ;;  %s4592_s18 = sadd.s32 4294967294, %s5341_s30  }
  0x5c   : > { %s8420_s11 = sld [smem:[#allocation18_spill]]  ;;  %p64_p0 = scmp.eq.s32.totalorder %s5593_s7, 0 }
  0x5d   : > { %s8421_s2 = sld [smem:[#allocation15_spill]]  ;;  %p102_p10 = scmp.eq.s32.totalorder %s5501_s10, 0 }
  0x5e   : > { %s8422_s12 = sld [smem:[#allocation14_spill]]  ;;  %p5604_p3 = por %p64_p0, %p63_p13 }
  0x5f   : > { %s8423_s13 = sld [smem:[#allocation13_spill]]  ;;  %s104_s1 = sadd.s32 1, %s8417_s8 }
  0x60   : > { %4637 = dma.hbm_to_vmem [thread:$0]  (!%p5581_p9), %s182_s27, 32768, %s184_s25, %s170_s6, %s8416_s17, %s8415_s26, %s8414_s24  }
  0x61   : > { %p111_p2 = scmp.ne.s32.totalorder %s8417_s8, %s8418_s9  ;;  %p143_p13 = scmp.eq.s32.totalorder %s5593_s7, 7 }
  0x62   : > { %p8425_p7 = scmp.ne.s32.totalorder %s8419_s5, %s8420_s11  ;;  %s219_s6 = sand.u32 1, %s8417_s8  }
  0x63   : > { %s5616_s25 = scalar_select %p102_p10, %s8417_s8, %s104_s1  }
  0x64   : > { %p5611_p11 = por %p8425_p7, %p64_p0  ;;  %p5620_p9 = por %p111_p2, %p58_p1 }
  0x65   : > { %p117_p12 = scmp.ne.s32.totalorder %s8418_s9, %s8421_s2  ;;  %p142_p4 = scmp.ne.s32.totalorder %s5277_s14, %s8422_s12 }
  0x66   : > { %p148_p7 = scmp.ne.s32.totalorder %s8422_s12, %s8423_s13  ;;  %p149_p10 = scmp.eq.s32.totalorder %s4592_s18, 7 }
  0x67   : > { %p5629_p8 = por %p117_p12, %p64_p0  ;;  %p5635_p6 = por %p143_p13, %p142_p4 }
  0x68   : > { %s4624_s24 = sshll.u32 %s5333_s28, 6  ;;  %p5641_p1 = por %p149_p10, %p148_p7 }
  0x69   : > { %s8428_s21 = scalar_select %p5629_p8, 1, 0 }
  0x6a   : > { %s8429_s10 = scalar_select %p5635_p6, 1, 0 }
  0x6b   : > { %s8430_s26 = scalar_select %p5641_p1, 1, 0 }
  0x6c   : > { %s4605_s17 = sshll.u32 %s219_s6, 2  ;;  %s8431_s11 = sld [smem:[#allocation31_spill]] }
  0x6d   : > { %s221_s1 = scalar_lea.vmem [#allocation7], %s4605_s17  ;;  %p8432_p0 = scmp.lt.s32.totalorder %s5341_s30, 8 }
  0x6e   : > { %s229_s0 = sshll.u32 %s221_s1, 4  ;;  %s5348_s13 = smov [#allocation7]   ;;  %s230_s0 = int_to_ptr.vmem [resolvable:$true] %s229_s0 }
  0x6f   : > { %p5652_p2 = pnand %p8432_p0, %p5620_p9  ;;  %s5134_s8 = scalar_lea.vmem %s230_s0, 64 }
  0x70   : > { %p5135_p4 = scmp.ne.s32.totalorder %s230_s0, %s5134_s8  ;;  %s5139_s18 = sshll.u32 %s5348_s13, 4  ;;  %s5140_s18 = int_to_ptr.vmem [resolvable:$false] %s5139_s18 }
  0x71   : > { %p5123_p12 = pneg %p5652_p2  ;;  %s5141_s6 = scalar_lea.vmem %s5140_s18, 128 }
  0x72   : > { %s227_s2 = scalar_lea.hbm %s8431_s11, %s4624_s24  ;;  %p5142_p10 = scmp.lt.s32.totalorder %s230_s0, %s5140_s18 }
  0x73   : > { %p5137_p13 = pnand %p5135_p4, %p5123_p12  ;;  %p5143_p1 = scmp.lt.s32.totalorder %s5141_s6, %s5134_s8 }
  0x75   : > { %p5138_p7 = pneg %p5137_p13  ;;  %p5144_p6 = por %p5143_p1, %p5142_p10 }
  0x77   : > { %p5145_p8 = pnand %p5144_p6, %p5138_p7 }
  0x79   : > { %5148 = shalt.err (!%p5145_p8)
}
  0x7a   : > { %4643 = dma.hbm_to_vmem [thread:$0]  (!%p5652_p2), %s227_s2, 64, %s230_s0, %s5525_s3  }
  0x7b   : > { %238 = sbr.rel (%p5539_p5) target bundleno = 1235 (0x4d3), region = 32  ;;  %s240_s24 = sand.u32 (!%p5539_p5), 1, %s5309_s22  }
  0x7c   : > { %s4609_s17 = sshll.u32 (!%p5539_p5), %s240_s24, 11  ;;  %s241_s9 = scalar_lea.sflag (!%p5539_p5), [#allocation3], %s240_s24 }
  0x7d   : > { %s5664_s5 = scalar_lea.vmem (!%p5539_p5), [#allocation2], %s4609_s17 }
  0x80   : > { %5252 = dma.done.wait (%p5604_p3), %s241_s9, 32768  }
  0x81   : > { %5254 = vsyncadd (%p5604_p3), %s241_s9, 4294934528  ;;  %s8435_s11 = sld [smem:[#allocation19_spill]]  ;;  %s249_s1 = sand.u32 1, %s5593_s7  }
  0x82   : > { %s250_s2 = scalar_lea.sflag [#allocation6], %s249_s1 }
  0x87   : > { %s251_s0 = sand.u32 1, %s8435_s11  }
  0x88   : > { %s4610_s3 = sshll.u32 %s251_s0, 11 }
  0x89   : > { %s5672_s12 = scalar_lea.vmem [#allocation5], %s4610_s3 }
  0x8a   : > { %5256 = dma.done.wait (%p5611_p11), %s250_s2, 32768  }
  0x8b   : > { %5258 = vsyncadd (%p5611_p11), %s250_s2, 4294934528  ;;  %s8436_s8 = sld [smem:[#allocation16_spill]]  ;;  %p8437_p6 = scmp.ne.s32.totalorder %s8428_s21, 0 }
  0x91   : > { %s260_s13 = sand.u32 1, %s8436_s8  }
  0x92   : > { %s5679_s18 = sshll.u32 %s260_s13, 2 }
  0x93   : > { %s262_s19 = scalar_lea.vmem [#allocation7], %s5679_s18 }
  0x94   : > { %5260 = dma.done.wait (%p8437_p6), %s250_s2, 64  }
  0x95   : > { %5262 = vsyncadd (%p8437_p6), %s250_s2, 4294967232  ;;  %s8438_s7 = sld [smem:[#allocation14_spill]] }
  0x96   : > { %s8439_s20 = sld [smem:[#allocation21_spill]] }
  0x9b   : > { %s292_s6 = sand.u32 1, %s8438_s7  }
  0x9c   : > { %s4612_s27 = sshll.u32 %s292_s6, 11  ;;  %p4613_p5 = scmp.ne.s32.totalorder %s8439_s20, 0 }
  0x9d   : > { %s5689_s24 = scalar_lea.vmem [#allocation8], %s4612_s27 }
  0x9e   : > { %305 = sbr.rel (%p4613_p5) target bundleno = 292 (0x124), region = 48 }
  0xa3   : > { %v5349_v0 = vmov 0.0  }
  0xa4   : > { %306 = vst [vmem:[%s5689_s24] sm:$0xff] %v5349_v0  ;;  %307 = vst [vmem:[%s5689_s24 + $0x8] sm:$0xff] %v5349_v0 }
  0xa5   : > { %308 = vst [vmem:[%s5689_s24 + $0x10] sm:$0xff] %v5349_v0  ;;  %309 = vst [vmem:[%s5689_s24 + $0x18] sm:$0xff] %v5349_v0 }
  0xa6   : > { %310 = vst [vmem:[%s5689_s24 + $0x20] sm:$0xff] %v5349_v0  ;;  %311 = vst [vmem:[%s5689_s24 + $0x28] sm:$0xff] %v5349_v0 }
  0xa7   : > { %312 = vst [vmem:[%s5689_s24 + $0x30] sm:$0xff] %v5349_v0  ;;  %313 = vst [vmem:[%s5689_s24 + $0x38] sm:$0xff] %v5349_v0 }
  0xa8   : > { %314 = vst [vmem:[%s5689_s24 + $0x40] sm:$0xff] %v5349_v0  ;;  %315 = vst [vmem:[%s5689_s24 + $0x48] sm:$0xff] %v5349_v0 }
  0xa9   : > { %316 = vst [vmem:[%s5689_s24 + $0x50] sm:$0xff] %v5349_v0  ;;  %317 = vst [vmem:[%s5689_s24 + $0x58] sm:$0xff] %v5349_v0 }
  0xaa   : > { %318 = vst [vmem:[%s5689_s24 + $0x60] sm:$0xff] %v5349_v0  ;;  %319 = vst [vmem:[%s5689_s24 + $0x68] sm:$0xff] %v5349_v0 }
  0xab   : > { %320 = vst [vmem:[%s5689_s24 + $0x70] sm:$0xff] %v5349_v0  ;;  %321 = vst [vmem:[%s5689_s24 + $0x78] sm:$0xff] %v5349_v0 }
  0xac   : > { %322 = vst [vmem:[%s5689_s24 + $0x80] sm:$0xff] %v5349_v0  ;;  %323 = vst [vmem:[%s5689_s24 + $0x88] sm:$0xff] %v5349_v0 }
  0xad   : > { %324 = vst [vmem:[%s5689_s24 + $0x90] sm:$0xff] %v5349_v0  ;;  %325 = vst [vmem:[%s5689_s24 + $0x98] sm:$0xff] %v5349_v0 }
  0xae   : > { %326 = vst [vmem:[%s5689_s24 + $0xa0] sm:$0xff] %v5349_v0  ;;  %327 = vst [vmem:[%s5689_s24 + $0xa8] sm:$0xff] %v5349_v0 }
  0xaf   : > { %328 = vst [vmem:[%s5689_s24 + $0xb0] sm:$0xff] %v5349_v0  ;;  %329 = vst [vmem:[%s5689_s24 + $0xb8] sm:$0xff] %v5349_v0 }
  0xb0   : > { %330 = vst [vmem:[%s5689_s24 + $0xc0] sm:$0xff] %v5349_v0  ;;  %331 = vst [vmem:[%s5689_s24 + $0xc8] sm:$0xff] %v5349_v0 }
  0xb1   : > { %332 = vst [vmem:[%s5689_s24 + $0xd0] sm:$0xff] %v5349_v0  ;;  %333 = vst [vmem:[%s5689_s24 + $0xd8] sm:$0xff] %v5349_v0 }
  0xb2   : > { %334 = vst [vmem:[%s5689_s24 + $0xe0] sm:$0xff] %v5349_v0  ;;  %335 = vst [vmem:[%s5689_s24 + $0xe8] sm:$0xff] %v5349_v0 }
  0xb3   : > { %336 = vst [vmem:[%s5689_s24 + $0xf0] sm:$0xff] %v5349_v0  ;;  %337 = vst [vmem:[%s5689_s24 + $0xf8] sm:$0xff] %v5349_v0 }
  0xb4   : > { %338 = vst [vmem:[%s5689_s24 + $0x100] sm:$0xff] %v5349_v0  ;;  %339 = vst [vmem:[%s5689_s24 + $0x108] sm:$0xff] %v5349_v0 }
  0xb5   : > { %340 = vst [vmem:[%s5689_s24 + $0x110] sm:$0xff] %v5349_v0  ;;  %341 = vst [vmem:[%s5689_s24 + $0x118] sm:$0xff] %v5349_v0 }
  0xb6   : > { %342 = vst [vmem:[%s5689_s24 + $0x120] sm:$0xff] %v5349_v0  ;;  %343 = vst [vmem:[%s5689_s24 + $0x128] sm:$0xff] %v5349_v0 }
  0xb7   : > { %344 = vst [vmem:[%s5689_s24 + $0x130] sm:$0xff] %v5349_v0  ;;  %345 = vst [vmem:[%s5689_s24 + $0x138] sm:$0xff] %v5349_v0 }
  0xb8   : > { %346 = vst [vmem:[%s5689_s24 + $0x140] sm:$0xff] %v5349_v0  ;;  %347 = vst [vmem:[%s5689_s24 + $0x148] sm:$0xff] %v5349_v0 }
  0xb9   : > { %348 = vst [vmem:[%s5689_s24 + $0x150] sm:$0xff] %v5349_v0  ;;  %349 = vst [vmem:[%s5689_s24 + $0x158] sm:$0xff] %v5349_v0 }
  0xba   : > { %350 = vst [vmem:[%s5689_s24 + $0x160] sm:$0xff] %v5349_v0  ;;  %351 = vst [vmem:[%s5689_s24 + $0x168] sm:$0xff] %v5349_v0 }
  0xbb   : > { %352 = vst [vmem:[%s5689_s24 + $0x170] sm:$0xff] %v5349_v0  ;;  %353 = vst [vmem:[%s5689_s24 + $0x178] sm:$0xff] %v5349_v0 }
  0xbc   : > { %354 = vst [vmem:[%s5689_s24 + $0x180] sm:$0xff] %v5349_v0  ;;  %355 = vst [vmem:[%s5689_s24 + $0x188] sm:$0xff] %v5349_v0 }
  0xbd   : > { %356 = vst [vmem:[%s5689_s24 + $0x190] sm:$0xff] %v5349_v0  ;;  %357 = vst [vmem:[%s5689_s24 + $0x198] sm:$0xff] %v5349_v0 }
  0xbe   : > { %358 = vst [vmem:[%s5689_s24 + $0x1a0] sm:$0xff] %v5349_v0  ;;  %359 = vst [vmem:[%s5689_s24 + $0x1a8] sm:$0xff] %v5349_v0 }
  0xbf   : > { %360 = vst [vmem:[%s5689_s24 + $0x1b0] sm:$0xff] %v5349_v0  ;;  %361 = vst [vmem:[%s5689_s24 + $0x1b8] sm:$0xff] %v5349_v0 }
  0xc0   : > { %362 = vst [vmem:[%s5689_s24 + $0x1c0] sm:$0xff] %v5349_v0  ;;  %363 = vst [vmem:[%s5689_s24 + $0x1c8] sm:$0xff] %v5349_v0 }
  0xc1   : > { %364 = vst [vmem:[%s5689_s24 + $0x1d0] sm:$0xff] %v5349_v0  ;;  %365 = vst [vmem:[%s5689_s24 + $0x1d8] sm:$0xff] %v5349_v0 }
  0xc2   : > { %366 = vst [vmem:[%s5689_s24 + $0x1e0] sm:$0xff] %v5349_v0  ;;  %367 = vst [vmem:[%s5689_s24 + $0x1e8] sm:$0xff] %v5349_v0 }
  0xc3   : > { %368 = vst [vmem:[%s5689_s24 + $0x1f0] sm:$0xff] %v5349_v0  ;;  %369 = vst [vmem:[%s5689_s24 + $0x1f8] sm:$0xff] %v5349_v0 }
  0xc4   : > { %370 = vst [vmem:[%s5689_s24 + $0x200] sm:$0xff] %v5349_v0  ;;  %371 = vst [vmem:[%s5689_s24 + $0x208] sm:$0xff] %v5349_v0 }
  0xc5   : > { %372 = vst [vmem:[%s5689_s24 + $0x210] sm:$0xff] %v5349_v0  ;;  %373 = vst [vmem:[%s5689_s24 + $0x218] sm:$0xff] %v5349_v0 }
  0xc6   : > { %374 = vst [vmem:[%s5689_s24 + $0x220] sm:$0xff] %v5349_v0  ;;  %375 = vst [vmem:[%s5689_s24 + $0x228] sm:$0xff] %v5349_v0 }
  0xc7   : > { %376 = vst [vmem:[%s5689_s24 + $0x230] sm:$0xff] %v5349_v0  ;;  %377 = vst [vmem:[%s5689_s24 + $0x238] sm:$0xff] %v5349_v0 }
  0xc8   : > { %378 = vst [vmem:[%s5689_s24 + $0x240] sm:$0xff] %v5349_v0  ;;  %379 = vst [vmem:[%s5689_s24 + $0x248] sm:$0xff] %v5349_v0 }
  0xc9   : > { %380 = vst [vmem:[%s5689_s24 + $0x250] sm:$0xff] %v5349_v0  ;;  %381 = vst [vmem:[%s5689_s24 + $0x258] sm:$0xff] %v5349_v0 }
  0xca   : > { %382 = vst [vmem:[%s5689_s24 + $0x260] sm:$0xff] %v5349_v0  ;;  %383 = vst [vmem:[%s5689_s24 + $0x268] sm:$0xff] %v5349_v0 }
  0xcb   : > { %384 = vst [vmem:[%s5689_s24 + $0x270] sm:$0xff] %v5349_v0  ;;  %385 = vst [vmem:[%s5689_s24 + $0x278] sm:$0xff] %v5349_v0 }
  0xcc   : > { %386 = vst [vmem:[%s5689_s24 + $0x280] sm:$0xff] %v5349_v0  ;;  %387 = vst [vmem:[%s5689_s24 + $0x288] sm:$0xff] %v5349_v0 }
  0xcd   : > { %388 = vst [vmem:[%s5689_s24 + $0x290] sm:$0xff] %v5349_v0  ;;  %389 = vst [vmem:[%s5689_s24 + $0x298] sm:$0xff] %v5349_v0 }
  0xce   : > { %390 = vst [vmem:[%s5689_s24 + $0x2a0] sm:$0xff] %v5349_v0  ;;  %391 = vst [vmem:[%s5689_s24 + $0x2a8] sm:$0xff] %v5349_v0 }
  0xcf   : > { %392 = vst [vmem:[%s5689_s24 + $0x2b0] sm:$0xff] %v5349_v0  ;;  %393 = vst [vmem:[%s5689_s24 + $0x2b8] sm:$0xff] %v5349_v0 }
  0xd0   : > { %394 = vst [vmem:[%s5689_s24 + $0x2c0] sm:$0xff] %v5349_v0  ;;  %395 = vst [vmem:[%s5689_s24 + $0x2c8] sm:$0xff] %v5349_v0 }
  0xd1   : > { %396 = vst [vmem:[%s5689_s24 + $0x2d0] sm:$0xff] %v5349_v0  ;;  %397 = vst [vmem:[%s5689_s24 + $0x2d8] sm:$0xff] %v5349_v0 }
  0xd2   : > { %398 = vst [vmem:[%s5689_s24 + $0x2e0] sm:$0xff] %v5349_v0  ;;  %399 = vst [vmem:[%s5689_s24 + $0x2e8] sm:$0xff] %v5349_v0 }
  0xd3   : > { %400 = vst [vmem:[%s5689_s24 + $0x2f0] sm:$0xff] %v5349_v0  ;;  %401 = vst [vmem:[%s5689_s24 + $0x2f8] sm:$0xff] %v5349_v0 }
  0xd4   : > { %402 = vst [vmem:[%s5689_s24 + $0x300] sm:$0xff] %v5349_v0  ;;  %403 = vst [vmem:[%s5689_s24 + $0x308] sm:$0xff] %v5349_v0 }
  0xd5   : > { %404 = vst [vmem:[%s5689_s24 + $0x310] sm:$0xff] %v5349_v0  ;;  %405 = vst [vmem:[%s5689_s24 + $0x318] sm:$0xff] %v5349_v0 }
  0xd6   : > { %406 = vst [vmem:[%s5689_s24 + $0x320] sm:$0xff] %v5349_v0  ;;  %407 = vst [vmem:[%s5689_s24 + $0x328] sm:$0xff] %v5349_v0 }
  0xd7   : > { %408 = vst [vmem:[%s5689_s24 + $0x330] sm:$0xff] %v5349_v0  ;;  %409 = vst [vmem:[%s5689_s24 + $0x338] sm:$0xff] %v5349_v0 }
  0xd8   : > { %410 = vst [vmem:[%s5689_s24 + $0x340] sm:$0xff] %v5349_v0  ;;  %411 = vst [vmem:[%s5689_s24 + $0x348] sm:$0xff] %v5349_v0 }
  0xd9   : > { %412 = vst [vmem:[%s5689_s24 + $0x350] sm:$0xff] %v5349_v0  ;;  %413 = vst [vmem:[%s5689_s24 + $0x358] sm:$0xff] %v5349_v0 }
  0xda   : > { %414 = vst [vmem:[%s5689_s24 + $0x360] sm:$0xff] %v5349_v0  ;;  %415 = vst [vmem:[%s5689_s24 + $0x368] sm:$0xff] %v5349_v0 }
  0xdb   : > { %416 = vst [vmem:[%s5689_s24 + $0x370] sm:$0xff] %v5349_v0  ;;  %417 = vst [vmem:[%s5689_s24 + $0x378] sm:$0xff] %v5349_v0 }
  0xdc   : > { %418 = vst [vmem:[%s5689_s24 + $0x380] sm:$0xff] %v5349_v0  ;;  %419 = vst [vmem:[%s5689_s24 + $0x388] sm:$0xff] %v5349_v0 }
  0xdd   : > { %420 = vst [vmem:[%s5689_s24 + $0x390] sm:$0xff] %v5349_v0  ;;  %421 = vst [vmem:[%s5689_s24 + $0x398] sm:$0xff] %v5349_v0 }
  0xde   : > { %422 = vst [vmem:[%s5689_s24 + $0x3a0] sm:$0xff] %v5349_v0  ;;  %423 = vst [vmem:[%s5689_s24 + $0x3a8] sm:$0xff] %v5349_v0 }
  0xdf   : > { %424 = vst [vmem:[%s5689_s24 + $0x3b0] sm:$0xff] %v5349_v0  ;;  %425 = vst [vmem:[%s5689_s24 + $0x3b8] sm:$0xff] %v5349_v0 }
  0xe0   : > { %426 = vst [vmem:[%s5689_s24 + $0x3c0] sm:$0xff] %v5349_v0  ;;  %427 = vst [vmem:[%s5689_s24 + $0x3c8] sm:$0xff] %v5349_v0 }
  0xe1   : > { %428 = vst [vmem:[%s5689_s24 + $0x3d0] sm:$0xff] %v5349_v0  ;;  %429 = vst [vmem:[%s5689_s24 + $0x3d8] sm:$0xff] %v5349_v0 }
  0xe2   : > { %430 = vst [vmem:[%s5689_s24 + $0x3e0] sm:$0xff] %v5349_v0  ;;  %431 = vst [vmem:[%s5689_s24 + $0x3e8] sm:$0xff] %v5349_v0 }
  0xe3   : > { %432 = vst [vmem:[%s5689_s24 + $0x3f0] sm:$0xff] %v5349_v0  ;;  %433 = vst [vmem:[%s5689_s24 + $0x3f8] sm:$0xff] %v5349_v0 }
  0xe4   : > { %434 = vst [vmem:[%s5689_s24 + $0x400] sm:$0xff] %v5349_v0  ;;  %435 = vst [vmem:[%s5689_s24 + $0x408] sm:$0xff] %v5349_v0 }
  0xe5   : > { %436 = vst [vmem:[%s5689_s24 + $0x410] sm:$0xff] %v5349_v0  ;;  %437 = vst [vmem:[%s5689_s24 + $0x418] sm:$0xff] %v5349_v0 }
  0xe6   : > { %438 = vst [vmem:[%s5689_s24 + $0x420] sm:$0xff] %v5349_v0  ;;  %439 = vst [vmem:[%s5689_s24 + $0x428] sm:$0xff] %v5349_v0 }
  0xe7   : > { %440 = vst [vmem:[%s5689_s24 + $0x430] sm:$0xff] %v5349_v0  ;;  %441 = vst [vmem:[%s5689_s24 + $0x438] sm:$0xff] %v5349_v0 }
  0xe8   : > { %442 = vst [vmem:[%s5689_s24 + $0x440] sm:$0xff] %v5349_v0  ;;  %443 = vst [vmem:[%s5689_s24 + $0x448] sm:$0xff] %v5349_v0 }
  0xe9   : > { %444 = vst [vmem:[%s5689_s24 + $0x450] sm:$0xff] %v5349_v0  ;;  %445 = vst [vmem:[%s5689_s24 + $0x458] sm:$0xff] %v5349_v0 }
  0xea   : > { %446 = vst [vmem:[%s5689_s24 + $0x460] sm:$0xff] %v5349_v0  ;;  %447 = vst [vmem:[%s5689_s24 + $0x468] sm:$0xff] %v5349_v0 }
  0xeb   : > { %448 = vst [vmem:[%s5689_s24 + $0x470] sm:$0xff] %v5349_v0  ;;  %449 = vst [vmem:[%s5689_s24 + $0x478] sm:$0xff] %v5349_v0 }
  0xec   : > { %450 = vst [vmem:[%s5689_s24 + $0x480] sm:$0xff] %v5349_v0  ;;  %451 = vst [vmem:[%s5689_s24 + $0x488] sm:$0xff] %v5349_v0 }
  0xed   : > { %452 = vst [vmem:[%s5689_s24 + $0x490] sm:$0xff] %v5349_v0  ;;  %453 = vst [vmem:[%s5689_s24 + $0x498] sm:$0xff] %v5349_v0 }
  0xee   : > { %454 = vst [vmem:[%s5689_s24 + $0x4a0] sm:$0xff] %v5349_v0  ;;  %455 = vst [vmem:[%s5689_s24 + $0x4a8] sm:$0xff] %v5349_v0 }
  0xef   : > { %456 = vst [vmem:[%s5689_s24 + $0x4b0] sm:$0xff] %v5349_v0  ;;  %457 = vst [vmem:[%s5689_s24 + $0x4b8] sm:$0xff] %v5349_v0 }
  0xf0   : > { %458 = vst [vmem:[%s5689_s24 + $0x4c0] sm:$0xff] %v5349_v0  ;;  %459 = vst [vmem:[%s5689_s24 + $0x4c8] sm:$0xff] %v5349_v0 }
  0xf1   : > { %460 = vst [vmem:[%s5689_s24 + $0x4d0] sm:$0xff] %v5349_v0  ;;  %461 = vst [vmem:[%s5689_s24 + $0x4d8] sm:$0xff] %v5349_v0 }
  0xf2   : > { %462 = vst [vmem:[%s5689_s24 + $0x4e0] sm:$0xff] %v5349_v0  ;;  %463 = vst [vmem:[%s5689_s24 + $0x4e8] sm:$0xff] %v5349_v0 }
  0xf3   : > { %464 = vst [vmem:[%s5689_s24 + $0x4f0] sm:$0xff] %v5349_v0  ;;  %465 = vst [vmem:[%s5689_s24 + $0x4f8] sm:$0xff] %v5349_v0 }
  0xf4   : > { %466 = vst [vmem:[%s5689_s24 + $0x500] sm:$0xff] %v5349_v0  ;;  %467 = vst [vmem:[%s5689_s24 + $0x508] sm:$0xff] %v5349_v0 }
  0xf5   : > { %468 = vst [vmem:[%s5689_s24 + $0x510] sm:$0xff] %v5349_v0  ;;  %469 = vst [vmem:[%s5689_s24 + $0x518] sm:$0xff] %v5349_v0 }
  0xf6   : > { %470 = vst [vmem:[%s5689_s24 + $0x520] sm:$0xff] %v5349_v0  ;;  %471 = vst [vmem:[%s5689_s24 + $0x528] sm:$0xff] %v5349_v0 }
  0xf7   : > { %472 = vst [vmem:[%s5689_s24 + $0x530] sm:$0xff] %v5349_v0  ;;  %473 = vst [vmem:[%s5689_s24 + $0x538] sm:$0xff] %v5349_v0 }
  0xf8   : > { %474 = vst [vmem:[%s5689_s24 + $0x540] sm:$0xff] %v5349_v0  ;;  %475 = vst [vmem:[%s5689_s24 + $0x548] sm:$0xff] %v5349_v0 }
  0xf9   : > { %476 = vst [vmem:[%s5689_s24 + $0x550] sm:$0xff] %v5349_v0  ;;  %477 = vst [vmem:[%s5689_s24 + $0x558] sm:$0xff] %v5349_v0 }
  0xfa   : > { %478 = vst [vmem:[%s5689_s24 + $0x560] sm:$0xff] %v5349_v0  ;;  %479 = vst [vmem:[%s5689_s24 + $0x568] sm:$0xff] %v5349_v0 }
  0xfb   : > { %480 = vst [vmem:[%s5689_s24 + $0x570] sm:$0xff] %v5349_v0  ;;  %481 = vst [vmem:[%s5689_s24 + $0x578] sm:$0xff] %v5349_v0 }
  0xfc   : > { %482 = vst [vmem:[%s5689_s24 + $0x580] sm:$0xff] %v5349_v0  ;;  %483 = vst [vmem:[%s5689_s24 + $0x588] sm:$0xff] %v5349_v0 }
  0xfd   : > { %484 = vst [vmem:[%s5689_s24 + $0x590] sm:$0xff] %v5349_v0  ;;  %485 = vst [vmem:[%s5689_s24 + $0x598] sm:$0xff] %v5349_v0 }
  0xfe   : > { %486 = vst [vmem:[%s5689_s24 + $0x5a0] sm:$0xff] %v5349_v0  ;;  %487 = vst [vmem:[%s5689_s24 + $0x5a8] sm:$0xff] %v5349_v0 }
  0xff   : > { %488 = vst [vmem:[%s5689_s24 + $0x5b0] sm:$0xff] %v5349_v0  ;;  %489 = vst [vmem:[%s5689_s24 + $0x5b8] sm:$0xff] %v5349_v0 }
 0x100   : > { %490 = vst [vmem:[%s5689_s24 + $0x5c0] sm:$0xff] %v5349_v0  ;;  %491 = vst [vmem:[%s5689_s24 + $0x5c8] sm:$0xff] %v5349_v0 }
 0x101   : > { %492 = vst [vmem:[%s5689_s24 + $0x5d0] sm:$0xff] %v5349_v0  ;;  %493 = vst [vmem:[%s5689_s24 + $0x5d8] sm:$0xff] %v5349_v0 }
 0x102   : > { %494 = vst [vmem:[%s5689_s24 + $0x5e0] sm:$0xff] %v5349_v0  ;;  %495 = vst [vmem:[%s5689_s24 + $0x5e8] sm:$0xff] %v5349_v0 }
 0x103   : > { %496 = vst [vmem:[%s5689_s24 + $0x5f0] sm:$0xff] %v5349_v0  ;;  %497 = vst [vmem:[%s5689_s24 + $0x5f8] sm:$0xff] %v5349_v0 }
 0x104   : > { %498 = vst [vmem:[%s5689_s24 + $0x600] sm:$0xff] %v5349_v0  ;;  %499 = vst [vmem:[%s5689_s24 + $0x608] sm:$0xff] %v5349_v0 }
 0x105   : > { %500 = vst [vmem:[%s5689_s24 + $0x610] sm:$0xff] %v5349_v0  ;;  %501 = vst [vmem:[%s5689_s24 + $0x618] sm:$0xff] %v5349_v0 }
 0x106   : > { %502 = vst [vmem:[%s5689_s24 + $0x620] sm:$0xff] %v5349_v0  ;;  %503 = vst [vmem:[%s5689_s24 + $0x628] sm:$0xff] %v5349_v0 }
 0x107   : > { %504 = vst [vmem:[%s5689_s24 + $0x630] sm:$0xff] %v5349_v0  ;;  %505 = vst [vmem:[%s5689_s24 + $0x638] sm:$0xff] %v5349_v0 }
 0x108   : > { %506 = vst [vmem:[%s5689_s24 + $0x640] sm:$0xff] %v5349_v0  ;;  %507 = vst [vmem:[%s5689_s24 + $0x648] sm:$0xff] %v5349_v0 }
 0x109   : > { %508 = vst [vmem:[%s5689_s24 + $0x650] sm:$0xff] %v5349_v0  ;;  %509 = vst [vmem:[%s5689_s24 + $0x658] sm:$0xff] %v5349_v0 }
 0x10a   : > { %510 = vst [vmem:[%s5689_s24 + $0x660] sm:$0xff] %v5349_v0  ;;  %511 = vst [vmem:[%s5689_s24 + $0x668] sm:$0xff] %v5349_v0 }
 0x10b   : > { %512 = vst [vmem:[%s5689_s24 + $0x670] sm:$0xff] %v5349_v0  ;;  %513 = vst [vmem:[%s5689_s24 + $0x678] sm:$0xff] %v5349_v0 }
 0x10c   : > { %514 = vst [vmem:[%s5689_s24 + $0x680] sm:$0xff] %v5349_v0  ;;  %515 = vst [vmem:[%s5689_s24 + $0x688] sm:$0xff] %v5349_v0 }
 0x10d   : > { %516 = vst [vmem:[%s5689_s24 + $0x690] sm:$0xff] %v5349_v0  ;;  %517 = vst [vmem:[%s5689_s24 + $0x698] sm:$0xff] %v5349_v0 }
 0x10e   : > { %518 = vst [vmem:[%s5689_s24 + $0x6a0] sm:$0xff] %v5349_v0  ;;  %519 = vst [vmem:[%s5689_s24 + $0x6a8] sm:$0xff] %v5349_v0 }
 0x10f   : > { %520 = vst [vmem:[%s5689_s24 + $0x6b0] sm:$0xff] %v5349_v0  ;;  %521 = vst [vmem:[%s5689_s24 + $0x6b8] sm:$0xff] %v5349_v0 }
 0x110   : > { %522 = vst [vmem:[%s5689_s24 + $0x6c0] sm:$0xff] %v5349_v0  ;;  %523 = vst [vmem:[%s5689_s24 + $0x6c8] sm:$0xff] %v5349_v0 }
 0x111   : > { %524 = vst [vmem:[%s5689_s24 + $0x6d0] sm:$0xff] %v5349_v0  ;;  %525 = vst [vmem:[%s5689_s24 + $0x6d8] sm:$0xff] %v5349_v0 }
 0x112   : > { %526 = vst [vmem:[%s5689_s24 + $0x6e0] sm:$0xff] %v5349_v0  ;;  %527 = vst [vmem:[%s5689_s24 + $0x6e8] sm:$0xff] %v5349_v0 }
 0x113   : > { %528 = vst [vmem:[%s5689_s24 + $0x6f0] sm:$0xff] %v5349_v0  ;;  %529 = vst [vmem:[%s5689_s24 + $0x6f8] sm:$0xff] %v5349_v0 }
 0x114   : > { %530 = vst [vmem:[%s5689_s24 + $0x700] sm:$0xff] %v5349_v0  ;;  %531 = vst [vmem:[%s5689_s24 + $0x708] sm:$0xff] %v5349_v0 }
 0x115   : > { %532 = vst [vmem:[%s5689_s24 + $0x710] sm:$0xff] %v5349_v0  ;;  %533 = vst [vmem:[%s5689_s24 + $0x718] sm:$0xff] %v5349_v0 }
 0x116   : > { %534 = vst [vmem:[%s5689_s24 + $0x720] sm:$0xff] %v5349_v0  ;;  %535 = vst [vmem:[%s5689_s24 + $0x728] sm:$0xff] %v5349_v0 }
 0x117   : > { %536 = vst [vmem:[%s5689_s24 + $0x730] sm:$0xff] %v5349_v0  ;;  %537 = vst [vmem:[%s5689_s24 + $0x738] sm:$0xff] %v5349_v0 }
 0x118   : > { %538 = vst [vmem:[%s5689_s24 + $0x740] sm:$0xff] %v5349_v0  ;;  %539 = vst [vmem:[%s5689_s24 + $0x748] sm:$0xff] %v5349_v0 }
 0x119   : > { %540 = vst [vmem:[%s5689_s24 + $0x750] sm:$0xff] %v5349_v0  ;;  %541 = vst [vmem:[%s5689_s24 + $0x758] sm:$0xff] %v5349_v0 }
 0x11a   : > { %542 = vst [vmem:[%s5689_s24 + $0x760] sm:$0xff] %v5349_v0  ;;  %543 = vst [vmem:[%s5689_s24 + $0x768] sm:$0xff] %v5349_v0 }
 0x11b   : > { %544 = vst [vmem:[%s5689_s24 + $0x770] sm:$0xff] %v5349_v0  ;;  %545 = vst [vmem:[%s5689_s24 + $0x778] sm:$0xff] %v5349_v0 }
 0x11c   : > { %546 = vst [vmem:[%s5689_s24 + $0x780] sm:$0xff] %v5349_v0  ;;  %547 = vst [vmem:[%s5689_s24 + $0x788] sm:$0xff] %v5349_v0 }
 0x11d   : > { %548 = vst [vmem:[%s5689_s24 + $0x790] sm:$0xff] %v5349_v0  ;;  %549 = vst [vmem:[%s5689_s24 + $0x798] sm:$0xff] %v5349_v0 }
 0x11e   : > { %550 = vst [vmem:[%s5689_s24 + $0x7a0] sm:$0xff] %v5349_v0  ;;  %551 = vst [vmem:[%s5689_s24 + $0x7a8] sm:$0xff] %v5349_v0 }
 0x11f   : > { %552 = vst [vmem:[%s5689_s24 + $0x7b0] sm:$0xff] %v5349_v0  ;;  %553 = vst [vmem:[%s5689_s24 + $0x7b8] sm:$0xff] %v5349_v0 }
 0x120   : > { %554 = vst [vmem:[%s5689_s24 + $0x7c0] sm:$0xff] %v5349_v0  ;;  %555 = vst [vmem:[%s5689_s24 + $0x7c8] sm:$0xff] %v5349_v0 }
 0x121   : > { %556 = vst [vmem:[%s5689_s24 + $0x7d0] sm:$0xff] %v5349_v0  ;;  %557 = vst [vmem:[%s5689_s24 + $0x7d8] sm:$0xff] %v5349_v0 }
 0x122   : > { %558 = vst [vmem:[%s5689_s24 + $0x7e0] sm:$0xff] %v5349_v0  ;;  %559 = vst [vmem:[%s5689_s24 + $0x7e8] sm:$0xff] %v5349_v0 }
 0x123   : > { %560 = vst [vmem:[%s5689_s24 + $0x7f0] sm:$0xff] %v5349_v0  ;;  %561 = vst [vmem:[%s5689_s24 + $0x7f8] sm:$0xff] %v5349_v0 }
 0x124 PF: > { %v1135_v1 = vld [vmem:[%s5672_s12 + $0x1e8] sm:$0xff]  ;;  %v1134_v3 = vld [vmem:[%s5672_s12 + $0x1e0] sm:$0xff]  ;;  %s8440_s21 = sld [smem:[#allocation21_spill]] }
 0x125   : > { %v1263_v2 = vld [vmem:[%s5672_s12 + $0x5e8] sm:$0xff]  ;;  %1330 = vmatprep.subr.mxu0 %v1135_v1  ;;  %v1262_v4 = vld [vmem:[%s5672_s12 + $0x5e0] sm:$0xff] }
 0x126   : > { %1779 = vmatprep.subr.mxu1 %v1263_v2  ;;  %v1131_v5 = vld [vmem:[%s5672_s12 + $0x1c8] sm:$0xff]  ;;  %1331 = vmatpush1.msra.mxu0 %v1134_v3  ;;  %v1130_v7 = vld [vmem:[%s5672_s12 + $0x1c0] sm:$0xff] }
 0x127   : > { %v1259_v6 = vld [vmem:[%s5672_s12 + $0x5c8] sm:$0xff]  ;;  %1780 = vmatpush1.msra.mxu1 %v1262_v4  ;;  %v1258_v8 = vld [vmem:[%s5672_s12 + $0x5c0] sm:$0xff]  ;;  %1332 = vmatprep.subr.mxu0 %v1131_v5 }
 0x128   : > { %v1127_v9 = vld [vmem:[%s5672_s12 + $0x1a8] sm:$0xff]  ;;  %1781 = vmatprep.subr.mxu1 %v1259_v6  ;;  %v1126_v11 = vld [vmem:[%s5672_s12 + $0x1a0] sm:$0xff]  ;;  %1333 = vmatpush1.msra.mxu0 %v1130_v7 }
 0x129   : > { %v1255_v10 = vld [vmem:[%s5672_s12 + $0x5a8] sm:$0xff]  ;;  %v1254_v12 = vld [vmem:[%s5672_s12 + $0x5a0] sm:$0xff]  ;;  %1782 = vmatpush1.msra.mxu1 %v1258_v8  ;;  %1334 = vmatprep.subr.mxu0 %v1127_v9 }
 0x12a   : > { %v1123_v13 = vld [vmem:[%s5672_s12 + $0x188] sm:$0xff]  ;;  %1783 = vmatprep.subr.mxu1 %v1255_v10  ;;  %v1122_v15 = vld [vmem:[%s5672_s12 + $0x180] sm:$0xff]  ;;  %1335 = vmatpush1.msra.mxu0 %v1126_v11  ;;  %p4614_p3 = scmp.ne.s32.totalorder %s8440_s21, 1 }
 0x12b   : > { %v1251_v14 = vld [vmem:[%s5672_s12 + $0x588] sm:$0xff]  ;;  %v1250_v16 = vld [vmem:[%s5672_s12 + $0x580] sm:$0xff]  ;;  %1784 = vmatpush1.msra.mxu1 %v1254_v12  ;;  %1336 = vmatprep.subr.mxu0 %v1123_v13 }
 0x12c   : > { %v1119_v17 = vld [vmem:[%s5672_s12 + $0x168] sm:$0xff]  ;;  %1785 = vmatprep.subr.mxu1 %v1251_v14  ;;  %v1118_v19 = vld [vmem:[%s5672_s12 + $0x160] sm:$0xff]  ;;  %1337 = vmatpush1.msra.mxu0 %v1122_v15 }
 0x12d   : > { %v1247_v18 = vld [vmem:[%s5672_s12 + $0x568] sm:$0xff]  ;;  %v1246_v20 = vld [vmem:[%s5672_s12 + $0x560] sm:$0xff]  ;;  %1786 = vmatpush1.msra.mxu1 %v1250_v16  ;;  %1338 = vmatprep.subr.mxu0 %v1119_v17 }
 0x12e   : > { %v1115_v21 = vld [vmem:[%s5672_s12 + $0x148] sm:$0xff]  ;;  %1787 = vmatprep.subr.mxu1 %v1247_v18  ;;  %v1114_v23 = vld [vmem:[%s5672_s12 + $0x140] sm:$0xff]  ;;  %1339 = vmatpush1.msra.mxu0 %v1118_v19 }
 0x12f   : > { %v1243_v22 = vld [vmem:[%s5672_s12 + $0x548] sm:$0xff]  ;;  %v1242_v24 = vld [vmem:[%s5672_s12 + $0x540] sm:$0xff]  ;;  %1788 = vmatpush1.msra.mxu1 %v1246_v20  ;;  %1340 = vmatprep.subr.mxu0 %v1115_v21 }
 0x130   : > { %v1111_v25 = vld [vmem:[%s5672_s12 + $0x128] sm:$0xff]  ;;  %1789 = vmatprep.subr.mxu1 %v1243_v22  ;;  %v1110_v27 = vld [vmem:[%s5672_s12 + $0x120] sm:$0xff]  ;;  %1341 = vmatpush1.msra.mxu0 %v1114_v23 }
 0x131   : > { %v1239_v26 = vld [vmem:[%s5672_s12 + $0x528] sm:$0xff]  ;;  %v1238_v28 = vld [vmem:[%s5672_s12 + $0x520] sm:$0xff]  ;;  %1790 = vmatpush1.msra.mxu1 %v1242_v24  ;;  %1342 = vmatprep.subr.mxu0 %v1111_v25 }
 0x132   : > { %v1107_v29 = vld [vmem:[%s5672_s12 + $0x108] sm:$0xff]  ;;  %1791 = vmatprep.subr.mxu1 %v1239_v26  ;;  %v1106_v31 = vld [vmem:[%s5672_s12 + $0x100] sm:$0xff]  ;;  %1343 = vmatpush1.msra.mxu0 %v1110_v27 }
 0x133   : > { %v1235_v30 = vld [vmem:[%s5672_s12 + $0x508] sm:$0xff]  ;;  %v1234_v32 = vld [vmem:[%s5672_s12 + $0x500] sm:$0xff]  ;;  %1792 = vmatpush1.msra.mxu1 %v1238_v28  ;;  %1344 = vmatprep.subr.mxu0 %v1107_v29 }
 0x134   : > { %v1103_v33 = vld [vmem:[%s5672_s12 + $0xe8] sm:$0xff]  ;;  %1793 = vmatprep.subr.mxu1 %v1235_v30  ;;  %v1102_v35 = vld [vmem:[%s5672_s12 + $0xe0] sm:$0xff]  ;;  %1345 = vmatpush1.msra.mxu0 %v1106_v31 }
 0x135   : > { %v1231_v34 = vld [vmem:[%s5672_s12 + $0x4e8] sm:$0xff]  ;;  %v1230_v36 = vld [vmem:[%s5672_s12 + $0x4e0] sm:$0xff]  ;;  %1794 = vmatpush1.msra.mxu1 %v1234_v32  ;;  %1346 = vmatprep.subr.mxu0 %v1103_v33 }
 0x136   : > { %v1099_v37 = vld [vmem:[%s5672_s12 + $0xc8] sm:$0xff]  ;;  %1795 = vmatprep.subr.mxu1 %v1231_v34  ;;  %v1098_v39 = vld [vmem:[%s5672_s12 + $0xc0] sm:$0xff]  ;;  %1347 = vmatpush1.msra.mxu0 %v1102_v35 }
 0x137   : > { %v1227_v38 = vld [vmem:[%s5672_s12 + $0x4c8] sm:$0xff]  ;;  %v1226_v40 = vld [vmem:[%s5672_s12 + $0x4c0] sm:$0xff]  ;;  %1796 = vmatpush1.msra.mxu1 %v1230_v36  ;;  %1348 = vmatprep.subr.mxu0 %v1099_v37 }
 0x138   : > { %v1095_v41 = vld [vmem:[%s5672_s12 + $0xa8] sm:$0xff]  ;;  %1797 = vmatprep.subr.mxu1 %v1227_v38  ;;  %v1094_v43 = vld [vmem:[%s5672_s12 + $0xa0] sm:$0xff]  ;;  %1349 = vmatpush1.msra.mxu0 %v1098_v39 }
 0x139   : > { %v1223_v42 = vld [vmem:[%s5672_s12 + $0x4a8] sm:$0xff]  ;;  %v1222_v44 = vld [vmem:[%s5672_s12 + $0x4a0] sm:$0xff]  ;;  %1798 = vmatpush1.msra.mxu1 %v1226_v40  ;;  %1350 = vmatprep.subr.mxu0 %v1095_v41 }
 0x13a   : > { %v1091_v45 = vld [vmem:[%s5672_s12 + $0x88] sm:$0xff]  ;;  %1799 = vmatprep.subr.mxu1 %v1223_v42  ;;  %v1090_v47 = vld [vmem:[%s5672_s12 + $0x80] sm:$0xff]  ;;  %1351 = vmatpush1.msra.mxu0 %v1094_v43 }
 0x13b   : > { %v1219_v46 = vld [vmem:[%s5672_s12 + $0x488] sm:$0xff]  ;;  %v1218_v48 = vld [vmem:[%s5672_s12 + $0x480] sm:$0xff]  ;;  %1800 = vmatpush1.msra.mxu1 %v1222_v44  ;;  %1352 = vmatprep.subr.mxu0 %v1091_v45 }
 0x13c   : > { %v1087_v49 = vld [vmem:[%s5672_s12 + $0x68] sm:$0xff]  ;;  %1801 = vmatprep.subr.mxu1 %v1219_v46  ;;  %v1086_v51 = vld [vmem:[%s5672_s12 + $0x60] sm:$0xff]  ;;  %1353 = vmatpush1.msra.mxu0 %v1090_v47 }
 0x13d   : > { %v1215_v50 = vld [vmem:[%s5672_s12 + $0x468] sm:$0xff]  ;;  %v1214_v52 = vld [vmem:[%s5672_s12 + $0x460] sm:$0xff]  ;;  %1802 = vmatpush1.msra.mxu1 %v1218_v48  ;;  %1354 = vmatprep.subr.mxu0 %v1087_v49 }
 0x13e   : > { %v1083_v53 = vld [vmem:[%s5672_s12 + $0x48] sm:$0xff]  ;;  %1803 = vmatprep.subr.mxu1 %v1215_v50  ;;  %v1082_v55 = vld [vmem:[%s5672_s12 + $0x40] sm:$0xff]  ;;  %1355 = vmatpush1.msra.mxu0 %v1086_v51 }
 0x13f   : > { %v1211_v54 = vld [vmem:[%s5672_s12 + $0x448] sm:$0xff]  ;;  %v1210_v56 = vld [vmem:[%s5672_s12 + $0x440] sm:$0xff]  ;;  %1804 = vmatpush1.msra.mxu1 %v1214_v52  ;;  %1356 = vmatprep.subr.mxu0 %v1083_v53 }
 0x140   : > { %v1079_v57 = vld [vmem:[%s5672_s12 + $0x28] sm:$0xff]  ;;  %1805 = vmatprep.subr.mxu1 %v1211_v54  ;;  %v1078_v59 = vld [vmem:[%s5672_s12 + $0x20] sm:$0xff]  ;;  %1357 = vmatpush1.msra.mxu0 %v1082_v55 }
 0x141   : > { %v1207_v58 = vld [vmem:[%s5672_s12 + $0x428] sm:$0xff]  ;;  %v1206_v60 = vld [vmem:[%s5672_s12 + $0x420] sm:$0xff]  ;;  %1806 = vmatpush1.msra.mxu1 %v1210_v56  ;;  %1358 = vmatprep.subr.mxu0 %v1079_v57 }
 0x142   : > { %v1075_v61 = vld [vmem:[%s5672_s12 + $0x8] sm:$0xff]  ;;  %1807 = vmatprep.subr.mxu1 %v1207_v58  ;;  %v1074_v63 = vld [vmem:[%s5672_s12] sm:$0xff]  ;;  %1359 = vmatpush1.msra.mxu0 %v1078_v59 }
 0x143   : > { %v1203_v62 = vld [vmem:[%s5672_s12 + $0x408] sm:$0xff]  ;;  %v1202_v0 = vld [vmem:[%s5672_s12 + $0x400] sm:$0xff]  ;;  %1808 = vmatpush1.msra.mxu1 %v1206_v60  ;;  %1360 = vmatprep.subr.mxu0 %v1075_v61 }
 0x144   : > { %v1199_v1 = vld [vmem:[%s5672_s12 + $0x3e8] sm:$0xff]  ;;  %1809 = vmatprep.subr.mxu1 %v1203_v62  ;;  %v1198_v3 = vld [vmem:[%s5672_s12 + $0x3e0] sm:$0xff]  ;;  %1361 = vmatpush1.msra.mxu0 %v1074_v63 }
 0x145   : > { %v1327_v2 = vld [vmem:[%s5672_s12 + $0x7e8] sm:$0xff]  ;;  %v1326_v4 = vld [vmem:[%s5672_s12 + $0x7e0] sm:$0xff]  ;;  %1810 = vmatpush1.msra.mxu1 %v1202_v0  ;;  %1362 = vmatprep.subr.mxu0 %v1199_v1 }
 0x146   : > { %v1195_v5 = vld [vmem:[%s5672_s12 + $0x3c8] sm:$0xff]  ;;  %1811 = vmatprep.subr.mxu1 %v1327_v2  ;;  %v1194_v7 = vld [vmem:[%s5672_s12 + $0x3c0] sm:$0xff]  ;;  %1363 = vmatpush2.msra.mxu0 %v1198_v3  ;;  %v821_v2 = vld [vmem:[%s5664_s5 + $0x18] sm:$0xff] }
 0x147   : > { %v1323_v6 = vld [vmem:[%s5672_s12 + $0x7c8] sm:$0xff]  ;;  %v1322_v8 = vld [vmem:[%s5672_s12 + $0x7c0] sm:$0xff]  ;;  %1812 = vmatpush2.msra.mxu1 %v1326_v4  ;;  %1364 = vmatprep.subr.mxu0 %v1195_v5  ;;  %v820_v4 = vld [vmem:[%s5664_s5 + $0x10] sm:$0xff] }
 0x148   : > { %v1191_v9 = vld [vmem:[%s5672_s12 + $0x3a8] sm:$0xff]  ;;  %1813 = vmatprep.subr.mxu1 %v1323_v6  ;;  %v1190_v11 = vld [vmem:[%s5672_s12 + $0x3a0] sm:$0xff]  ;;  %1365 = vmatpush2.msra.mxu0 %v1194_v7  ;;  %v1137_v5 = vld [vmem:[%s5672_s12 + $0x1f8] sm:$0xff] }
 0x149   : > { %v1319_v10 = vld [vmem:[%s5672_s12 + $0x7a8] sm:$0xff]  ;;  %v1318_v12 = vld [vmem:[%s5672_s12 + $0x7a0] sm:$0xff]  ;;  %1814 = vmatpush2.msra.mxu1 %v1322_v8  ;;  %1366 = vmatprep.subr.mxu0 %v1191_v9  ;;  %v1265_v6 = vld [vmem:[%s5672_s12 + $0x5f8] sm:$0xff] }
 0x14a   : > { %v1187_v13 = vld [vmem:[%s5672_s12 + $0x388] sm:$0xff]  ;;  %1815 = vmatprep.subr.mxu1 %v1319_v10  ;;  %v1186_v15 = vld [vmem:[%s5672_s12 + $0x380] sm:$0xff]  ;;  %1367 = vmatpush2.msra.mxu0 %v1190_v11  ;;  %v1136_v7 = vld [vmem:[%s5672_s12 + $0x1f0] sm:$0xff] }
 0x14b   : > { %v1315_v14 = vld [vmem:[%s5672_s12 + $0x788] sm:$0xff]  ;;  %v1314_v16 = vld [vmem:[%s5672_s12 + $0x780] sm:$0xff]  ;;  %1816 = vmatpush2.msra.mxu1 %v1318_v12  ;;  %1368 = vmatprep.subr.mxu0 %v1187_v13  ;;  %v1264_v8 = vld [vmem:[%s5672_s12 + $0x5f0] sm:$0xff] }
 0x14c   : > { %v1183_v17 = vld [vmem:[%s5672_s12 + $0x368] sm:$0xff]  ;;  %1817 = vmatprep.subr.mxu1 %v1315_v14  ;;  %v1182_v19 = vld [vmem:[%s5672_s12 + $0x360] sm:$0xff]  ;;  %1369 = vmatpush2.msra.mxu0 %v1186_v15  ;;  %v825_v10 = vld [vmem:[%s5664_s5 + $0x38] sm:$0xff] }
 0x14d   : > { %v1311_v18 = vld [vmem:[%s5672_s12 + $0x768] sm:$0xff]  ;;  %v1310_v20 = vld [vmem:[%s5672_s12 + $0x760] sm:$0xff]  ;;  %1818 = vmatpush2.msra.mxu1 %v1314_v16  ;;  %1370 = vmatprep.subr.mxu0 %v1183_v17  ;;  %v824_v12 = vld [vmem:[%s5664_s5 + $0x30] sm:$0xff] }
 0x14e   : > { %v1179_v21 = vld [vmem:[%s5672_s12 + $0x348] sm:$0xff]  ;;  %1819 = vmatprep.subr.mxu1 %v1311_v18  ;;  %v1178_v23 = vld [vmem:[%s5672_s12 + $0x340] sm:$0xff]  ;;  %1371 = vmatpush2.msra.mxu0 %v1182_v19  ;;  %v829_v14 = vld [vmem:[%s5664_s5 + $0x58] sm:$0xff] }
 0x14f   : > { %v1307_v22 = vld [vmem:[%s5672_s12 + $0x748] sm:$0xff]  ;;  %v1306_v24 = vld [vmem:[%s5672_s12 + $0x740] sm:$0xff]  ;;  %1820 = vmatpush2.msra.mxu1 %v1310_v20  ;;  %1372 = vmatprep.subr.mxu0 %v1179_v21  ;;  %v1133_v15 = vld [vmem:[%s5672_s12 + $0x1d8] sm:$0xff] }
 0x150   : > { %v1175_v25 = vld [vmem:[%s5672_s12 + $0x328] sm:$0xff]  ;;  %1821 = vmatprep.subr.mxu1 %v1307_v22  ;;  %v1174_v27 = vld [vmem:[%s5672_s12 + $0x320] sm:$0xff]  ;;  %1373 = vmatpush2.msra.mxu0 %v1178_v23  ;;  %v1261_v16 = vld [vmem:[%s5672_s12 + $0x5d8] sm:$0xff] }
 0x151   : > { %v1303_v26 = vld [vmem:[%s5672_s12 + $0x728] sm:$0xff]  ;;  %v1302_v28 = vld [vmem:[%s5672_s12 + $0x720] sm:$0xff]  ;;  %1822 = vmatpush2.msra.mxu1 %v1306_v24  ;;  %1374 = vmatprep.subr.mxu0 %v1175_v25  ;;  %v1132_v17 = vld [vmem:[%s5672_s12 + $0x1d0] sm:$0xff] }
 0x152   : > { %v1171_v29 = vld [vmem:[%s5672_s12 + $0x308] sm:$0xff]  ;;  %1823 = vmatprep.subr.mxu1 %v1303_v26  ;;  %v1170_v31 = vld [vmem:[%s5672_s12 + $0x300] sm:$0xff]  ;;  %1375 = vmatpush2.msra.mxu0 %v1174_v27  ;;  %v1260_v18 = vld [vmem:[%s5672_s12 + $0x5d0] sm:$0xff] }
 0x153   : > { %v1299_v30 = vld [vmem:[%s5672_s12 + $0x708] sm:$0xff]  ;;  %v1298_v32 = vld [vmem:[%s5672_s12 + $0x700] sm:$0xff]  ;;  %1824 = vmatpush2.msra.mxu1 %v1302_v28  ;;  %1376 = vmatprep.subr.mxu0 %v1171_v29  ;;  %v828_v20 = vld [vmem:[%s5664_s5 + $0x50] sm:$0xff] }
 0x154   : > { %v1167_v33 = vld [vmem:[%s5672_s12 + $0x2e8] sm:$0xff]  ;;  %1825 = vmatprep.subr.mxu1 %v1299_v30  ;;  %v1166_v35 = vld [vmem:[%s5672_s12 + $0x2e0] sm:$0xff]  ;;  %1377 = vmatpush2.msra.mxu0 %v1170_v31  ;;  %v833_v22 = vld [vmem:[%s5664_s5 + $0x78] sm:$0xff] }
 0x155   : > { %v1295_v34 = vld [vmem:[%s5672_s12 + $0x6e8] sm:$0xff]  ;;  %v1294_v36 = vld [vmem:[%s5672_s12 + $0x6e0] sm:$0xff]  ;;  %1826 = vmatpush2.msra.mxu1 %v1298_v32  ;;  %1378 = vmatprep.subr.mxu0 %v1167_v33  ;;  %v1129_v23 = vld [vmem:[%s5672_s12 + $0x1b8] sm:$0xff] }
 0x156   : > { %v1163_v37 = vld [vmem:[%s5672_s12 + $0x2c8] sm:$0xff]  ;;  %1827 = vmatprep.subr.mxu1 %v1295_v34  ;;  %v1162_v39 = vld [vmem:[%s5672_s12 + $0x2c0] sm:$0xff]  ;;  %1379 = vmatpush2.msra.mxu0 %v1166_v35  ;;  %v1257_v24 = vld [vmem:[%s5672_s12 + $0x5b8] sm:$0xff] }
 0x157   : > { %v1291_v38 = vld [vmem:[%s5672_s12 + $0x6c8] sm:$0xff]  ;;  %v1290_v40 = vld [vmem:[%s5672_s12 + $0x6c0] sm:$0xff]  ;;  %1828 = vmatpush2.msra.mxu1 %v1294_v36  ;;  %1380 = vmatprep.subr.mxu0 %v1163_v37  ;;  %v1128_v25 = vld [vmem:[%s5672_s12 + $0x1b0] sm:$0xff] }
 0x158   : > { %v1159_v41 = vld [vmem:[%s5672_s12 + $0x2a8] sm:$0xff]  ;;  %1829 = vmatprep.subr.mxu1 %v1291_v38  ;;  %v1158_v43 = vld [vmem:[%s5672_s12 + $0x2a0] sm:$0xff]  ;;  %1381 = vmatpush2.msra.mxu0 %v1162_v39  ;;  %v1256_v26 = vld [vmem:[%s5672_s12 + $0x5b0] sm:$0xff] }
 0x159   : > { %v1287_v42 = vld [vmem:[%s5672_s12 + $0x6a8] sm:$0xff]  ;;  %v1286_v44 = vld [vmem:[%s5672_s12 + $0x6a0] sm:$0xff]  ;;  %1830 = vmatpush2.msra.mxu1 %v1290_v40  ;;  %1382 = vmatprep.subr.mxu0 %v1159_v41  ;;  %v832_v28 = vld [vmem:[%s5664_s5 + $0x70] sm:$0xff] }
 0x15a   : > { %v1155_v45 = vld [vmem:[%s5672_s12 + $0x288] sm:$0xff]  ;;  %1831 = vmatprep.subr.mxu1 %v1287_v42  ;;  %v1154_v47 = vld [vmem:[%s5672_s12 + $0x280] sm:$0xff]  ;;  %1383 = vmatpush2.msra.mxu0 %v1158_v43  ;;  %v837_v30 = vld [vmem:[%s5664_s5 + $0x98] sm:$0xff] }
 0x15b   : > { %v1283_v46 = vld [vmem:[%s5672_s12 + $0x688] sm:$0xff]  ;;  %v1282_v48 = vld [vmem:[%s5672_s12 + $0x680] sm:$0xff]  ;;  %1832 = vmatpush2.msra.mxu1 %v1286_v44  ;;  %1384 = vmatprep.subr.mxu0 %v1155_v45  ;;  %v1125_v31 = vld [vmem:[%s5672_s12 + $0x198] sm:$0xff] }
 0x15c   : > { %v1151_v49 = vld [vmem:[%s5672_s12 + $0x268] sm:$0xff]  ;;  %1833 = vmatprep.subr.mxu1 %v1283_v46  ;;  %v1150_v51 = vld [vmem:[%s5672_s12 + $0x260] sm:$0xff]  ;;  %1385 = vmatpush2.msra.mxu0 %v1154_v47  ;;  %v1253_v32 = vld [vmem:[%s5672_s12 + $0x598] sm:$0xff] }
 0x15d   : > { %v1279_v50 = vld [vmem:[%s5672_s12 + $0x668] sm:$0xff]  ;;  %v1278_v52 = vld [vmem:[%s5672_s12 + $0x660] sm:$0xff]  ;;  %1834 = vmatpush2.msra.mxu1 %v1282_v48  ;;  %1386 = vmatprep.subr.mxu0 %v1151_v49  ;;  %v1124_v33 = vld [vmem:[%s5672_s12 + $0x190] sm:$0xff] }
 0x15e   : > { %v1147_v53 = vld [vmem:[%s5672_s12 + $0x248] sm:$0xff]  ;;  %1835 = vmatprep.subr.mxu1 %v1279_v50  ;;  %v1146_v55 = vld [vmem:[%s5672_s12 + $0x240] sm:$0xff]  ;;  %1387 = vmatpush2.msra.mxu0 %v1150_v51  ;;  %v1252_v34 = vld [vmem:[%s5672_s12 + $0x590] sm:$0xff] }
 0x15f   : > { %v1275_v54 = vld [vmem:[%s5672_s12 + $0x648] sm:$0xff]  ;;  %v1274_v56 = vld [vmem:[%s5672_s12 + $0x640] sm:$0xff]  ;;  %1836 = vmatpush2.msra.mxu1 %v1278_v52  ;;  %1388 = vmatprep.subr.mxu0 %v1147_v53  ;;  %v836_v36 = vld [vmem:[%s5664_s5 + $0x90] sm:$0xff] }
 0x160   : > { %v1143_v57 = vld [vmem:[%s5672_s12 + $0x228] sm:$0xff]  ;;  %1837 = vmatprep.subr.mxu1 %v1275_v54  ;;  %v1142_v59 = vld [vmem:[%s5672_s12 + $0x220] sm:$0xff]  ;;  %1389 = vmatpush2.msra.mxu0 %v1146_v55  ;;  %v841_v38 = vld [vmem:[%s5664_s5 + $0xb8] sm:$0xff] }
 0x161   : > { %v1271_v58 = vld [vmem:[%s5672_s12 + $0x628] sm:$0xff]  ;;  %v1270_v60 = vld [vmem:[%s5672_s12 + $0x620] sm:$0xff]  ;;  %1838 = vmatpush2.msra.mxu1 %v1274_v56  ;;  %1390 = vmatprep.subr.mxu0 %v1143_v57  ;;  %v1121_v39 = vld [vmem:[%s5672_s12 + $0x178] sm:$0xff] }
 0x162   : > { %v1139_v61 = vld [vmem:[%s5672_s12 + $0x208] sm:$0xff]  ;;  %1839 = vmatprep.subr.mxu1 %v1271_v58  ;;  %v1138_v63 = vld [vmem:[%s5672_s12 + $0x200] sm:$0xff]  ;;  %1391 = vmatpush2.msra.mxu0 %v1142_v59  ;;  %v1249_v40 = vld [vmem:[%s5672_s12 + $0x578] sm:$0xff] }
 0x163   : > { %v1267_v62 = vld [vmem:[%s5672_s12 + $0x608] sm:$0xff]  ;;  %1840 = vmatpush2.msra.mxu1 %v1270_v60  ;;  %v1266_v1 = vld [vmem:[%s5672_s12 + $0x600] sm:$0xff]  ;;  %1392 = vmatprep.subr.mxu0 %v1139_v61  ;;  %v1120_v41 = vld [vmem:[%s5672_s12 + $0x170] sm:$0xff] }
 0x164   : > { %v819_v0 = vld [vmem:[%s5664_s5 + $0x8] sm:$0xff]  ;;  %1841 = vmatprep.subr.mxu1 %v1267_v62  ;;  %v818_v3 = vld [vmem:[%s5664_s5] sm:$0xff]  ;;  %1393 = vmatpush2.msra.mxu0 %v1138_v63  ;;  %v1248_v42 = vld [vmem:[%s5672_s12 + $0x570] sm:$0xff] }
 0x165   : > { %1394 = vmatprep.mubr.f32.mxu0 %v819_v0  ;;  %1842 = vmatpush2.msra.mxu1 %v1266_v1  ;;  %v823_v9 = vld [vmem:[%s5664_s5 + $0x28] sm:$0xff]  ;;  %v822_v11 = vld [vmem:[%s5664_s5 + $0x20] sm:$0xff]  ;;  %v840_v44 = vld [vmem:[%s5664_s5 + $0xb0] sm:$0xff] }
 0x166   : > { %1843 = vmatprep.mubr.f32.mxu1 %v821_v2  ;;  %1395 = vmatmul.mubr.f32.vlgmr.msra.gmra.mxu0 %v818_v3  ;;  %v827_v13 = vld [vmem:[%s5664_s5 + $0x48] sm:$0xff]  ;;  %v826_v19 = vld [vmem:[%s5664_s5 + $0x40] sm:$0xff]  ;;  %v845_v46 = vld [vmem:[%s5664_s5 + $0xd8] sm:$0xff] }
 0x167   : > { %1844 = vmatmul.mubr.f32.vlgmr.msra.gmra.mxu1 %v820_v4  ;;  %2228 = vmatprep.subr.mxu0 %v1137_v5  ;;  %v831_v21 = vld [vmem:[%s5664_s5 + $0x68] sm:$0xff]  ;;  %v830_v27 = vld [vmem:[%s5664_s5 + $0x60] sm:$0xff]  ;;  %v1117_v47 = vld [vmem:[%s5672_s12 + $0x158] sm:$0xff] }
 0x168   : > { %2677 = vmatprep.subr.mxu1 %v1265_v6  ;;  %2229 = vmatpush1.msra.mxu0 %v1136_v7  ;;  %v835_v29 = vld [vmem:[%s5664_s5 + $0x88] sm:$0xff]  ;;  %v834_v35 = vld [vmem:[%s5664_s5 + $0x80] sm:$0xff]  ;;  %v1245_v48 = vld [vmem:[%s5672_s12 + $0x558] sm:$0xff] }
 0x169   : > { %2678 = vmatpush1.msra.mxu1 %v1264_v8  ;;  %1400 = vmatprep.mubr.f32.mxu0 %v823_v9  ;;  %v839_v37 = vld [vmem:[%s5664_s5 + $0xa8] sm:$0xff]  ;;  %v838_v43 = vld [vmem:[%s5664_s5 + $0xa0] sm:$0xff]  ;;  %v1116_v49 = vld [vmem:[%s5672_s12 + $0x150] sm:$0xff] }
 0x16a   : > { %1849 = vmatprep.mubr.f32.mxu1 %v825_v10  ;;  %1401 = vmatmul.mubr.f32.gmra.mxu0 %v822_v11  ;;  %v843_v45 = vld [vmem:[%s5664_s5 + $0xc8] sm:$0xff]  ;;  %v1244_v50 = vld [vmem:[%s5672_s12 + $0x550] sm:$0xff]  ;;  %v842_v51 = vld [vmem:[%s5664_s5 + $0xc0] sm:$0xff] }
 0x16b   : > { %1850 = vmatmul.mubr.f32.gmra.mxu1 %v824_v12  ;;  %1406 = vmatprep.mubr.f32.mxu0 %v827_v13  ;;  %v844_v52 = vld [vmem:[%s5664_s5 + $0xd0] sm:$0xff]  ;;  %v847_v53 = vld [vmem:[%s5664_s5 + $0xe8] sm:$0xff]  ;;  %v849_v54 = vld [vmem:[%s5664_s5 + $0xf8] sm:$0xff] }
 0x16c   : > { %1855 = vmatprep.mubr.f32.mxu1 %v829_v14  ;;  %2230 = vmatprep.subr.mxu0 %v1133_v15  ;;  %v1113_v55 = vld [vmem:[%s5672_s12 + $0x138] sm:$0xff]  ;;  %v1112_v57 = vld [vmem:[%s5672_s12 + $0x130] sm:$0xff]  ;;  %v846_v59 = vld [vmem:[%s5664_s5 + $0xe0] sm:$0xff] }
 0x16d   : > { %2679 = vmatprep.subr.mxu1 %v1261_v16  ;;  %2231 = vmatpush1.msra.mxu0 %v1132_v17  ;;  %v1241_v56 = vld [vmem:[%s5672_s12 + $0x538] sm:$0xff]  ;;  %v1240_v58 = vld [vmem:[%s5672_s12 + $0x530] sm:$0xff]  ;;  %v851_v61 = vld [vmem:[%s5664_s5 + $0x108] sm:$0xff] }
 0x16e   : > { %2680 = vmatpush1.msra.mxu1 %v1260_v18  ;;  %1407 = vmatmul.mubr.f32.gmra.mxu0 %v826_v19  ;;  %v848_v60 = vld [vmem:[%s5664_s5 + $0xf0] sm:$0xff]  ;;  %v853_v62 = vld [vmem:[%s5664_s5 + $0x118] sm:$0xff]  ;;  %v850_v3 = vld [vmem:[%s5664_s5 + $0x100] sm:$0xff] }
 0x16f   : > { %1856 = vmatmul.mubr.f32.gmra.mxu1 %v828_v20  ;;  %1412 = vmatprep.mubr.f32.mxu0 %v831_v21  ;;  %v1109_v63 = vld [vmem:[%s5672_s12 + $0x118] sm:$0xff]  ;;  %v1108_v1 = vld [vmem:[%s5672_s12 + $0x110] sm:$0xff]  ;;  %v855_v5 = vld [vmem:[%s5664_s5 + $0x128] sm:$0xff] }
 0x170   : > { %1861 = vmatprep.mubr.f32.mxu1 %v833_v22  ;;  %2232 = vmatprep.subr.mxu0 %v1129_v23  ;;  %v1237_v0 = vld [vmem:[%s5672_s12 + $0x518] sm:$0xff]  ;;  %v1236_v2 = vld [vmem:[%s5672_s12 + $0x510] sm:$0xff]  ;;  %v854_v11 = vld [vmem:[%s5664_s5 + $0x120] sm:$0xff] }
 0x171   : > { %2681 = vmatprep.subr.mxu1 %v1257_v24  ;;  %2233 = vmatpush1.msra.mxu0 %v1128_v25  ;;  %v852_v4 = vld [vmem:[%s5664_s5 + $0x110] sm:$0xff]  ;;  %v857_v6 = vld [vmem:[%s5664_s5 + $0x138] sm:$0xff]  ;;  %v859_v13 = vld [vmem:[%s5664_s5 + $0x148] sm:$0xff] }
 0x172   : > { %2682 = vmatpush1.msra.mxu1 %v1256_v26  ;;  %1413 = vmatmul.mubr.f32.gmra.mxu0 %v830_v27  ;;  %v1105_v7 = vld [vmem:[%s5672_s12 + $0xf8] sm:$0xff]  ;;  %v1104_v9 = vld [vmem:[%s5672_s12 + $0xf0] sm:$0xff]  ;;  %v858_v19 = vld [vmem:[%s5664_s5 + $0x140] sm:$0xff] }
 0x173   : > { %1862 = vmatmul.mubr.f32.gmra.mxu1 %v832_v28  ;;  %1418 = vmatprep.mubr.f32.mxu0 %v835_v29  ;;  %v1233_v8 = vld [vmem:[%s5672_s12 + $0x4f8] sm:$0xff]  ;;  %v1232_v10 = vld [vmem:[%s5672_s12 + $0x4f0] sm:$0xff]  ;;  %v863_v21 = vld [vmem:[%s5664_s5 + $0x168] sm:$0xff] }
 0x174   : > { %1867 = vmatprep.mubr.f32.mxu1 %v837_v30  ;;  %2234 = vmatprep.subr.mxu0 %v1125_v31  ;;  %v856_v12 = vld [vmem:[%s5664_s5 + $0x130] sm:$0xff]  ;;  %v861_v14 = vld [vmem:[%s5664_s5 + $0x158] sm:$0xff]  ;;  %v862_v27 = vld [vmem:[%s5664_s5 + $0x160] sm:$0xff] }
 0x175   : > { %2683 = vmatprep.subr.mxu1 %v1253_v32  ;;  %2235 = vmatpush1.msra.mxu0 %v1124_v33  ;;  %v1101_v15 = vld [vmem:[%s5672_s12 + $0xd8] sm:$0xff]  ;;  %v1100_v17 = vld [vmem:[%s5672_s12 + $0xd0] sm:$0xff]  ;;  %v867_v29 = vld [vmem:[%s5664_s5 + $0x188] sm:$0xff] }
 0x176   : > { %2684 = vmatpush1.msra.mxu1 %v1252_v34  ;;  %1419 = vmatmul.mubr.f32.gmra.mxu0 %v834_v35  ;;  %v1229_v16 = vld [vmem:[%s5672_s12 + $0x4d8] sm:$0xff]  ;;  %v1228_v18 = vld [vmem:[%s5672_s12 + $0x4d0] sm:$0xff]  ;;  %v866_v35 = vld [vmem:[%s5664_s5 + $0x180] sm:$0xff] }
 0x177   : > { %1868 = vmatmul.mubr.f32.gmra.mxu1 %v836_v36  ;;  %1424 = vmatprep.mubr.f32.mxu0 %v839_v37  ;;  %v860_v20 = vld [vmem:[%s5664_s5 + $0x150] sm:$0xff]  ;;  %v865_v22 = vld [vmem:[%s5664_s5 + $0x178] sm:$0xff]  ;;  %v871_v37 = vld [vmem:[%s5664_s5 + $0x1a8] sm:$0xff] }
 0x178   : > { %1873 = vmatprep.mubr.f32.mxu1 %v841_v38  ;;  %2236 = vmatprep.subr.mxu0 %v1121_v39  ;;  %v1097_v23 = vld [vmem:[%s5672_s12 + $0xb8] sm:$0xff]  ;;  %v1096_v25 = vld [vmem:[%s5672_s12 + $0xb0] sm:$0xff] }
 0x179   : > { %2685 = vmatprep.subr.mxu1 %v1249_v40  ;;  %2237 = vmatpush1.msra.mxu0 %v1120_v41  ;;  %v1225_v24 = vld [vmem:[%s5672_s12 + $0x4b8] sm:$0xff]  ;;  %v1224_v26 = vld [vmem:[%s5672_s12 + $0x4b0] sm:$0xff] }
 0x17a   : > { %2686 = vmatpush1.msra.mxu1 %v1248_v42  ;;  %1425 = vmatmul.mubr.f32.gmra.mxu0 %v838_v43  ;;  %v864_v28 = vld [vmem:[%s5664_s5 + $0x170] sm:$0xff]  ;;  %v869_v30 = vld [vmem:[%s5664_s5 + $0x198] sm:$0xff]  ;;  %v870_v43 = vld [vmem:[%s5664_s5 + $0x1a0] sm:$0xff] }
 0x17b   : > { %1874 = vmatmul.mubr.f32.gmra.mxu1 %v840_v44  ;;  %1430 = vmatprep.mubr.f32.mxu0 %v843_v45  ;;  %v1093_v31 = vld [vmem:[%s5672_s12 + $0x98] sm:$0xff]  ;;  %v1092_v33 = vld [vmem:[%s5672_s12 + $0x90] sm:$0xff]  ;;  %v875_v45 = vld [vmem:[%s5664_s5 + $0x1c8] sm:$0xff] }
 0x17c   : > { %1879 = vmatprep.mubr.f32.mxu1 %v845_v46  ;;  %2238 = vmatprep.subr.mxu0 %v1117_v47  ;;  %v1221_v32 = vld [vmem:[%s5672_s12 + $0x498] sm:$0xff]  ;;  %v1220_v34 = vld [vmem:[%s5672_s12 + $0x490] sm:$0xff] }
 0x17d   : > { %2687 = vmatprep.subr.mxu1 %v1245_v48  ;;  %2239 = vmatpush1.msra.mxu0 %v1116_v49  ;;  %v868_v36 = vld [vmem:[%s5664_s5 + $0x190] sm:$0xff]  ;;  %v873_v38 = vld [vmem:[%s5664_s5 + $0x1b8] sm:$0xff] }
 0x17e   : > { %2688 = vmatpush1.msra.mxu1 %v1244_v50  ;;  %1431 = vmatmul.mubr.f32.gmra.mxu0 %v842_v51  ;;  %v1089_v39 = vld [vmem:[%s5672_s12 + $0x78] sm:$0xff]  ;;  %v1088_v41 = vld [vmem:[%s5672_s12 + $0x70] sm:$0xff]  ;;  %v874_v51 = vld [vmem:[%s5664_s5 + $0x1c0] sm:$0xff] }
 0x17f   : > { %1880 = vmatmul.mubr.f32.gmra.mxu1 %v844_v52  ;;  %1436 = vmatprep.mubr.f32.mxu0 %v847_v53  ;;  %v1217_v40 = vld [vmem:[%s5672_s12 + $0x478] sm:$0xff]  ;;  %v1216_v42 = vld [vmem:[%s5672_s12 + $0x470] sm:$0xff]  ;;  %v879_v53 = vld [vmem:[%s5664_s5 + $0x1e8] sm:$0xff] }
 0x180   : > { %1885 = vmatprep.mubr.f32.mxu1 %v849_v54  ;;  %2240 = vmatprep.subr.mxu0 %v1113_v55  ;;  %v872_v44 = vld [vmem:[%s5664_s5 + $0x1b0] sm:$0xff]  ;;  %v877_v46 = vld [vmem:[%s5664_s5 + $0x1d8] sm:$0xff] }
 0x181   : > { %2689 = vmatprep.subr.mxu1 %v1241_v56  ;;  %2241 = vmatpush1.msra.mxu0 %v1112_v57  ;;  %v1085_v47 = vld [vmem:[%s5672_s12 + $0x58] sm:$0xff]  ;;  %v1084_v49 = vld [vmem:[%s5672_s12 + $0x50] sm:$0xff] }
 0x182   : > { %2690 = vmatpush1.msra.mxu1 %v1240_v58  ;;  %1437 = vmatmul.mubr.f32.gmra.mxu0 %v846_v59  ;;  %v1213_v48 = vld [vmem:[%s5672_s12 + $0x458] sm:$0xff]  ;;  %v1212_v50 = vld [vmem:[%s5672_s12 + $0x450] sm:$0xff]  ;;  %v878_v59 = vld [vmem:[%s5664_s5 + $0x1e0] sm:$0xff] }
 0x183   : > { %1886 = vmatmul.mubr.f32.gmra.mxu1 %v848_v60  ;;  %1442 = vmatprep.mubr.f32.mxu0 %v851_v61  ;;  %v876_v52 = vld [vmem:[%s5664_s5 + $0x1d0] sm:$0xff]  ;;  %v881_v54 = vld [vmem:[%s5664_s5 + $0x1f8] sm:$0xff]  ;;  %v883_v61 = vld [vmem:[%s5664_s5 + $0x208] sm:$0xff] }
 0x184   : > { %1891 = vmatprep.mubr.f32.mxu1 %v853_v62  ;;  %2242 = vmatprep.subr.mxu0 %v1109_v63  ;;  %v1081_v55 = vld [vmem:[%s5672_s12 + $0x38] sm:$0xff]  ;;  %v1080_v57 = vld [vmem:[%s5672_s12 + $0x30] sm:$0xff] }
 0x185   : > { %2691 = vmatprep.subr.mxu1 %v1237_v0  ;;  %2243 = vmatpush1.msra.mxu0 %v1108_v1  ;;  %v1209_v56 = vld [vmem:[%s5672_s12 + $0x438] sm:$0xff]  ;;  %v1208_v58 = vld [vmem:[%s5672_s12 + $0x430] sm:$0xff] }
 0x186   : > { %2692 = vmatpush1.msra.mxu1 %v1236_v2  ;;  %1443 = vmatmul.mubr.f32.gmra.mxu0 %v850_v3  ;;  %v880_v60 = vld [vmem:[%s5664_s5 + $0x1f0] sm:$0xff]  ;;  %v885_v62 = vld [vmem:[%s5664_s5 + $0x218] sm:$0xff]  ;;  %v882_v3 = vld [vmem:[%s5664_s5 + $0x200] sm:$0xff] }
 0x187   : > { %1892 = vmatmul.mubr.f32.gmra.mxu1 %v852_v4  ;;  %1448 = vmatprep.mubr.f32.mxu0 %v855_v5  ;;  %v1077_v63 = vld [vmem:[%s5672_s12 + $0x18] sm:$0xff]  ;;  %v1076_v1 = vld [vmem:[%s5672_s12 + $0x10] sm:$0xff]  ;;  %v887_v5 = vld [vmem:[%s5664_s5 + $0x228] sm:$0xff] }
 0x188   : > { %1897 = vmatprep.mubr.f32.mxu1 %v857_v6  ;;  %2244 = vmatprep.subr.mxu0 %v1105_v7  ;;  %v1205_v0 = vld [vmem:[%s5672_s12 + $0x418] sm:$0xff]  ;;  %v1204_v2 = vld [vmem:[%s5672_s12 + $0x410] sm:$0xff] }
 0x189   : > { %2693 = vmatprep.subr.mxu1 %v1233_v8  ;;  %2245 = vmatpush1.msra.mxu0 %v1104_v9  ;;  %v884_v4 = vld [vmem:[%s5664_s5 + $0x210] sm:$0xff]  ;;  %v889_v6 = vld [vmem:[%s5664_s5 + $0x238] sm:$0xff] }
 0x18a   : > { %2694 = vmatpush1.msra.mxu1 %v1232_v10  ;;  %1449 = vmatmul.mubr.f32.gmra.mxu0 %v854_v11  ;;  %v1201_v7 = vld [vmem:[%s5672_s12 + $0x3f8] sm:$0xff]  ;;  %v1200_v9 = vld [vmem:[%s5672_s12 + $0x3f0] sm:$0xff]  ;;  %v886_v11 = vld [vmem:[%s5664_s5 + $0x220] sm:$0xff] }
 0x18b   : > { %1898 = vmatmul.mubr.f32.gmra.mxu1 %v856_v12  ;;  %1454 = vmatprep.mubr.f32.mxu0 %v859_v13  ;;  %v1329_v8 = vld [vmem:[%s5672_s12 + $0x7f8] sm:$0xff]  ;;  %v1328_v10 = vld [vmem:[%s5672_s12 + $0x7f0] sm:$0xff]  ;;  %v891_v13 = vld [vmem:[%s5664_s5 + $0x248] sm:$0xff] }
 0x18c   : > { %1903 = vmatprep.mubr.f32.mxu1 %v861_v14  ;;  %2246 = vmatprep.subr.mxu0 %v1101_v15  ;;  %v888_v12 = vld [vmem:[%s5664_s5 + $0x230] sm:$0xff]  ;;  %v893_v14 = vld [vmem:[%s5664_s5 + $0x258] sm:$0xff] }
 0x18d   : > { %2695 = vmatprep.subr.mxu1 %v1229_v16  ;;  %2247 = vmatpush1.msra.mxu0 %v1100_v17  ;;  %v1197_v15 = vld [vmem:[%s5672_s12 + $0x3d8] sm:$0xff]  ;;  %v1196_v17 = vld [vmem:[%s5672_s12 + $0x3d0] sm:$0xff] }
 0x18e   : > { %2696 = vmatpush1.msra.mxu1 %v1228_v18  ;;  %1455 = vmatmul.mubr.f32.gmra.mxu0 %v858_v19  ;;  %v1325_v16 = vld [vmem:[%s5672_s12 + $0x7d8] sm:$0xff]  ;;  %v1324_v18 = vld [vmem:[%s5672_s12 + $0x7d0] sm:$0xff]  ;;  %v890_v19 = vld [vmem:[%s5664_s5 + $0x240] sm:$0xff] }
 0x18f   : > { %1904 = vmatmul.mubr.f32.gmra.mxu1 %v860_v20  ;;  %1460 = vmatprep.mubr.f32.mxu0 %v863_v21  ;;  %v892_v20 = vld [vmem:[%s5664_s5 + $0x250] sm:$0xff]  ;;  %v895_v21 = vld [vmem:[%s5664_s5 + $0x268] sm:$0xff] }
 0x190   : > { %1909 = vmatprep.mubr.f32.mxu1 %v865_v22  ;;  %2248 = vmatprep.subr.mxu0 %v1097_v23  ;;  %v897_v22 = vld [vmem:[%s5664_s5 + $0x278] sm:$0xff] }
 0x191   : > { %2697 = vmatprep.subr.mxu1 %v1225_v24  ;;  %2249 = vmatpush1.msra.mxu0 %v1096_v25  ;;  %v1193_v23 = vld [vmem:[%s5672_s12 + $0x3b8] sm:$0xff]  ;;  %v1192_v25 = vld [vmem:[%s5672_s12 + $0x3b0] sm:$0xff] }
 0x192   : > { %2698 = vmatpush1.msra.mxu1 %v1224_v26  ;;  %1461 = vmatmul.mubr.f32.gmra.mxu0 %v862_v27  ;;  %v1321_v24 = vld [vmem:[%s5672_s12 + $0x7b8] sm:$0xff]  ;;  %v1320_v26 = vld [vmem:[%s5672_s12 + $0x7b0] sm:$0xff]  ;;  %v894_v27 = vld [vmem:[%s5664_s5 + $0x260] sm:$0xff] }
 0x193   : > { %1910 = vmatmul.mubr.f32.gmra.mxu1 %v864_v28  ;;  %1466 = vmatprep.mubr.f32.mxu0 %v867_v29  ;;  %v896_v28 = vld [vmem:[%s5664_s5 + $0x270] sm:$0xff]  ;;  %v899_v29 = vld [vmem:[%s5664_s5 + $0x288] sm:$0xff] }
 0x194   : > { %1915 = vmatprep.mubr.f32.mxu1 %v869_v30  ;;  %2250 = vmatprep.subr.mxu0 %v1093_v31  ;;  %v901_v30 = vld [vmem:[%s5664_s5 + $0x298] sm:$0xff] }
 0x195   : > { %2699 = vmatprep.subr.mxu1 %v1221_v32  ;;  %2251 = vmatpush1.msra.mxu0 %v1092_v33  ;;  %v1189_v31 = vld [vmem:[%s5672_s12 + $0x398] sm:$0xff]  ;;  %v1188_v33 = vld [vmem:[%s5672_s12 + $0x390] sm:$0xff] }
 0x196   : > { %2700 = vmatpush1.msra.mxu1 %v1220_v34  ;;  %1467 = vmatmul.mubr.f32.gmra.mxu0 %v866_v35  ;;  %v1317_v32 = vld [vmem:[%s5672_s12 + $0x798] sm:$0xff]  ;;  %v1316_v34 = vld [vmem:[%s5672_s12 + $0x790] sm:$0xff]  ;;  %v898_v35 = vld [vmem:[%s5664_s5 + $0x280] sm:$0xff] }
 0x197   : > { %1916 = vmatmul.mubr.f32.gmra.mxu1 %v868_v36  ;;  %1472 = vmatprep.mubr.f32.mxu0 %v871_v37  ;;  %v900_v36 = vld [vmem:[%s5664_s5 + $0x290] sm:$0xff]  ;;  %v903_v37 = vld [vmem:[%s5664_s5 + $0x2a8] sm:$0xff] }
 0x198   : > { %1921 = vmatprep.mubr.f32.mxu1 %v873_v38  ;;  %2252 = vmatprep.subr.mxu0 %v1089_v39  ;;  %v905_v38 = vld [vmem:[%s5664_s5 + $0x2b8] sm:$0xff] }
 0x199   : > { %2701 = vmatprep.subr.mxu1 %v1217_v40  ;;  %2253 = vmatpush1.msra.mxu0 %v1088_v41  ;;  %v1185_v39 = vld [vmem:[%s5672_s12 + $0x378] sm:$0xff]  ;;  %v1184_v41 = vld [vmem:[%s5672_s12 + $0x370] sm:$0xff] }
 0x19a   : > { %2702 = vmatpush1.msra.mxu1 %v1216_v42  ;;  %1473 = vmatmul.mubr.f32.gmra.mxu0 %v870_v43  ;;  %v1313_v40 = vld [vmem:[%s5672_s12 + $0x778] sm:$0xff]  ;;  %v1312_v42 = vld [vmem:[%s5672_s12 + $0x770] sm:$0xff]  ;;  %v902_v43 = vld [vmem:[%s5664_s5 + $0x2a0] sm:$0xff] }
 0x19b   : > { %1922 = vmatmul.mubr.f32.gmra.mxu1 %v872_v44  ;;  %1478 = vmatprep.mubr.f32.mxu0 %v875_v45  ;;  %v904_v44 = vld [vmem:[%s5664_s5 + $0x2b0] sm:$0xff]  ;;  %v907_v45 = vld [vmem:[%s5664_s5 + $0x2c8] sm:$0xff] }
 0x19c   : > { %1927 = vmatprep.mubr.f32.mxu1 %v877_v46  ;;  %2254 = vmatprep.subr.mxu0 %v1085_v47  ;;  %v909_v46 = vld [vmem:[%s5664_s5 + $0x2d8] sm:$0xff] }
 0x19d   : > { %2703 = vmatprep.subr.mxu1 %v1213_v48  ;;  %2255 = vmatpush1.msra.mxu0 %v1084_v49  ;;  %v1181_v47 = vld [vmem:[%s5672_s12 + $0x358] sm:$0xff]  ;;  %v1180_v49 = vld [vmem:[%s5672_s12 + $0x350] sm:$0xff] }
 0x19e   : > { %2704 = vmatpush1.msra.mxu1 %v1212_v50  ;;  %1479 = vmatmul.mubr.f32.gmra.mxu0 %v874_v51  ;;  %v1309_v48 = vld [vmem:[%s5672_s12 + $0x758] sm:$0xff]  ;;  %v1308_v50 = vld [vmem:[%s5672_s12 + $0x750] sm:$0xff]  ;;  %v906_v51 = vld [vmem:[%s5664_s5 + $0x2c0] sm:$0xff] }
 0x19f   : > { %1928 = vmatmul.mubr.f32.gmra.mxu1 %v876_v52  ;;  %1484 = vmatprep.mubr.f32.mxu0 %v879_v53  ;;  %v908_v52 = vld [vmem:[%s5664_s5 + $0x2d0] sm:$0xff]  ;;  %v911_v53 = vld [vmem:[%s5664_s5 + $0x2e8] sm:$0xff] }
 0x1a0   : > { %1933 = vmatprep.mubr.f32.mxu1 %v881_v54  ;;  %2256 = vmatprep.subr.mxu0 %v1081_v55  ;;  %v913_v54 = vld [vmem:[%s5664_s5 + $0x2f8] sm:$0xff] }
 0x1a1   : > { %2705 = vmatprep.subr.mxu1 %v1209_v56  ;;  %2257 = vmatpush1.msra.mxu0 %v1080_v57  ;;  %v1177_v55 = vld [vmem:[%s5672_s12 + $0x338] sm:$0xff]  ;;  %v1176_v57 = vld [vmem:[%s5672_s12 + $0x330] sm:$0xff] }
 0x1a2   : > { %2706 = vmatpush1.msra.mxu1 %v1208_v58  ;;  %1485 = vmatmul.mubr.f32.gmra.mxu0 %v878_v59  ;;  %v1305_v56 = vld [vmem:[%s5672_s12 + $0x738] sm:$0xff]  ;;  %v1304_v58 = vld [vmem:[%s5672_s12 + $0x730] sm:$0xff]  ;;  %v910_v59 = vld [vmem:[%s5664_s5 + $0x2e0] sm:$0xff] }
 0x1a3   : > { %1934 = vmatmul.mubr.f32.gmra.mxu1 %v880_v60  ;;  %1490 = vmatprep.mubr.f32.mxu0 %v883_v61  ;;  %v912_v60 = vld [vmem:[%s5664_s5 + $0x2f0] sm:$0xff]  ;;  %v915_v61 = vld [vmem:[%s5664_s5 + $0x308] sm:$0xff] }
 0x1a4   : > { %1939 = vmatprep.mubr.f32.mxu1 %v885_v62  ;;  %2258 = vmatprep.subr.mxu0 %v1077_v63  ;;  %v917_v62 = vld [vmem:[%s5664_s5 + $0x318] sm:$0xff] }
 0x1a5   : > { %2707 = vmatprep.subr.mxu1 %v1205_v0  ;;  %2259 = vmatpush1.msra.mxu0 %v1076_v1  ;;  %v1173_v63 = vld [vmem:[%s5672_s12 + $0x318] sm:$0xff]  ;;  %v1172_v1 = vld [vmem:[%s5672_s12 + $0x310] sm:$0xff] }
 0x1a6   : > { %2708 = vmatpush1.msra.mxu1 %v1204_v2  ;;  %1491 = vmatmul.mubr.f32.gmra.mxu0 %v882_v3  ;;  %v1301_v0 = vld [vmem:[%s5672_s12 + $0x718] sm:$0xff]  ;;  %v1300_v2 = vld [vmem:[%s5672_s12 + $0x710] sm:$0xff]  ;;  %v914_v3 = vld [vmem:[%s5664_s5 + $0x300] sm:$0xff] }
 0x1a7   : > { %1940 = vmatmul.mubr.f32.gmra.mxu1 %v884_v4  ;;  %1496 = vmatprep.mubr.f32.mxu0 %v887_v5  ;;  %v916_v4 = vld [vmem:[%s5664_s5 + $0x310] sm:$0xff]  ;;  %v919_v5 = vld [vmem:[%s5664_s5 + $0x328] sm:$0xff] }
 0x1a8   : > { %1945 = vmatprep.mubr.f32.mxu1 %v889_v6  ;;  %2260 = vmatprep.subr.mxu0 %v1201_v7  ;;  %v921_v6 = vld [vmem:[%s5664_s5 + $0x338] sm:$0xff] }
 0x1a9   : > { %2709 = vmatprep.subr.mxu1 %v1329_v8  ;;  %2261 = vmatpush2.msra.mxu0 %v1200_v9  ;;  %v1169_v7 = vld [vmem:[%s5672_s12 + $0x2f8] sm:$0xff]  ;;  %v1168_v9 = vld [vmem:[%s5672_s12 + $0x2f0] sm:$0xff] }
 0x1aa   : > { %2710 = vmatpush2.msra.mxu1 %v1328_v10  ;;  %1497 = vmatmul.mubr.f32.gmra.mxu0 %v886_v11  ;;  %v1297_v8 = vld [vmem:[%s5672_s12 + $0x6f8] sm:$0xff]  ;;  %v1296_v10 = vld [vmem:[%s5672_s12 + $0x6f0] sm:$0xff]  ;;  %v918_v11 = vld [vmem:[%s5664_s5 + $0x320] sm:$0xff] }
 0x1ab   : > { %1946 = vmatmul.mubr.f32.gmra.mxu1 %v888_v12  ;;  %1502 = vmatprep.mubr.f32.mxu0 %v891_v13  ;;  %v920_v12 = vld [vmem:[%s5664_s5 + $0x330] sm:$0xff]  ;;  %v923_v13 = vld [vmem:[%s5664_s5 + $0x348] sm:$0xff] }
 0x1ac   : > { %1951 = vmatprep.mubr.f32.mxu1 %v893_v14  ;;  %2262 = vmatprep.subr.mxu0 %v1197_v15  ;;  %v925_v14 = vld [vmem:[%s5664_s5 + $0x358] sm:$0xff] }
 0x1ad   : > { %2711 = vmatprep.subr.mxu1 %v1325_v16  ;;  %2263 = vmatpush2.msra.mxu0 %v1196_v17  ;;  %v1165_v15 = vld [vmem:[%s5672_s12 + $0x2d8] sm:$0xff]  ;;  %v1164_v17 = vld [vmem:[%s5672_s12 + $0x2d0] sm:$0xff] }
 0x1ae   : > { %2712 = vmatpush2.msra.mxu1 %v1324_v18  ;;  %1503 = vmatmul.mubr.f32.gmra.mxu0 %v890_v19  ;;  %v1293_v16 = vld [vmem:[%s5672_s12 + $0x6d8] sm:$0xff]  ;;  %v1292_v18 = vld [vmem:[%s5672_s12 + $0x6d0] sm:$0xff]  ;;  %v922_v19 = vld [vmem:[%s5664_s5 + $0x340] sm:$0xff] }
 0x1af   : > { %1952 = vmatmul.mubr.f32.gmra.mxu1 %v892_v20  ;;  %1508 = vmatprep.mubr.f32.mxu0 %v895_v21  ;;  %v924_v20 = vld [vmem:[%s5664_s5 + $0x350] sm:$0xff]  ;;  %v927_v21 = vld [vmem:[%s5664_s5 + $0x368] sm:$0xff] }
 0x1b0   : > { %1957 = vmatprep.mubr.f32.mxu1 %v897_v22  ;;  %2264 = vmatprep.subr.mxu0 %v1193_v23  ;;  %v929_v22 = vld [vmem:[%s5664_s5 + $0x378] sm:$0xff] }
 0x1b1   : > { %2713 = vmatprep.subr.mxu1 %v1321_v24  ;;  %2265 = vmatpush2.msra.mxu0 %v1192_v25  ;;  %v1161_v23 = vld [vmem:[%s5672_s12 + $0x2b8] sm:$0xff]  ;;  %v1160_v25 = vld [vmem:[%s5672_s12 + $0x2b0] sm:$0xff] }
 0x1b2   : > { %2714 = vmatpush2.msra.mxu1 %v1320_v26  ;;  %1509 = vmatmul.mubr.f32.gmra.mxu0 %v894_v27  ;;  %v1289_v24 = vld [vmem:[%s5672_s12 + $0x6b8] sm:$0xff]  ;;  %v1288_v26 = vld [vmem:[%s5672_s12 + $0x6b0] sm:$0xff]  ;;  %v926_v27 = vld [vmem:[%s5664_s5 + $0x360] sm:$0xff] }
 0x1b3   : > { %1958 = vmatmul.mubr.f32.gmra.mxu1 %v896_v28  ;;  %1514 = vmatprep.mubr.f32.mxu0 %v899_v29  ;;  %v928_v28 = vld [vmem:[%s5664_s5 + $0x370] sm:$0xff]  ;;  %v931_v29 = vld [vmem:[%s5664_s5 + $0x388] sm:$0xff] }
 0x1b4   : > { %1963 = vmatprep.mubr.f32.mxu1 %v901_v30  ;;  %2266 = vmatprep.subr.mxu0 %v1189_v31  ;;  %v933_v30 = vld [vmem:[%s5664_s5 + $0x398] sm:$0xff] }
 0x1b5   : > { %2715 = vmatprep.subr.mxu1 %v1317_v32  ;;  %2267 = vmatpush2.msra.mxu0 %v1188_v33  ;;  %v1157_v31 = vld [vmem:[%s5672_s12 + $0x298] sm:$0xff]  ;;  %v1156_v33 = vld [vmem:[%s5672_s12 + $0x290] sm:$0xff] }
 0x1b6   : > { %2716 = vmatpush2.msra.mxu1 %v1316_v34  ;;  %1515 = vmatmul.mubr.f32.gmra.mxu0 %v898_v35  ;;  %v1285_v32 = vld [vmem:[%s5672_s12 + $0x698] sm:$0xff]  ;;  %v1284_v34 = vld [vmem:[%s5672_s12 + $0x690] sm:$0xff]  ;;  %v930_v35 = vld [vmem:[%s5664_s5 + $0x380] sm:$0xff] }
 0x1b7   : > { %1964 = vmatmul.mubr.f32.gmra.mxu1 %v900_v36  ;;  %1520 = vmatprep.mubr.f32.mxu0 %v903_v37  ;;  %v932_v36 = vld [vmem:[%s5664_s5 + $0x390] sm:$0xff]  ;;  %v935_v37 = vld [vmem:[%s5664_s5 + $0x3a8] sm:$0xff] }
 0x1b8   : > { %1969 = vmatprep.mubr.f32.mxu1 %v905_v38  ;;  %2268 = vmatprep.subr.mxu0 %v1185_v39  ;;  %v937_v38 = vld [vmem:[%s5664_s5 + $0x3b8] sm:$0xff] }
 0x1b9   : > { %2717 = vmatprep.subr.mxu1 %v1313_v40  ;;  %2269 = vmatpush2.msra.mxu0 %v1184_v41  ;;  %v1153_v39 = vld [vmem:[%s5672_s12 + $0x278] sm:$0xff]  ;;  %v1152_v41 = vld [vmem:[%s5672_s12 + $0x270] sm:$0xff] }
 0x1ba   : > { %2718 = vmatpush2.msra.mxu1 %v1312_v42  ;;  %1521 = vmatmul.mubr.f32.gmra.mxu0 %v902_v43  ;;  %v1281_v40 = vld [vmem:[%s5672_s12 + $0x678] sm:$0xff]  ;;  %v1280_v42 = vld [vmem:[%s5672_s12 + $0x670] sm:$0xff]  ;;  %v934_v43 = vld [vmem:[%s5664_s5 + $0x3a0] sm:$0xff] }
 0x1bb   : > { %1970 = vmatmul.mubr.f32.gmra.mxu1 %v904_v44  ;;  %1526 = vmatprep.mubr.f32.mxu0 %v907_v45  ;;  %v936_v44 = vld [vmem:[%s5664_s5 + $0x3b0] sm:$0xff]  ;;  %v939_v45 = vld [vmem:[%s5664_s5 + $0x3c8] sm:$0xff] }
 0x1bc   : > { %1975 = vmatprep.mubr.f32.mxu1 %v909_v46  ;;  %2270 = vmatprep.subr.mxu0 %v1181_v47  ;;  %v941_v46 = vld [vmem:[%s5664_s5 + $0x3d8] sm:$0xff] }
 0x1bd   : > { %2719 = vmatprep.subr.mxu1 %v1309_v48  ;;  %2271 = vmatpush2.msra.mxu0 %v1180_v49  ;;  %v1149_v47 = vld [vmem:[%s5672_s12 + $0x258] sm:$0xff]  ;;  %v1148_v49 = vld [vmem:[%s5672_s12 + $0x250] sm:$0xff] }
 0x1be   : > { %2720 = vmatpush2.msra.mxu1 %v1308_v50  ;;  %1527 = vmatmul.mubr.f32.gmra.mxu0 %v906_v51  ;;  %v1277_v48 = vld [vmem:[%s5672_s12 + $0x658] sm:$0xff]  ;;  %v1276_v50 = vld [vmem:[%s5672_s12 + $0x650] sm:$0xff]  ;;  %v938_v51 = vld [vmem:[%s5664_s5 + $0x3c0] sm:$0xff] }
 0x1bf   : > { %1976 = vmatmul.mubr.f32.gmra.mxu1 %v908_v52  ;;  %1532 = vmatprep.mubr.f32.mxu0 %v911_v53  ;;  %v940_v52 = vld [vmem:[%s5664_s5 + $0x3d0] sm:$0xff]  ;;  %v943_v53 = vld [vmem:[%s5664_s5 + $0x3e8] sm:$0xff] }
 0x1c0   : > { %1981 = vmatprep.mubr.f32.mxu1 %v913_v54  ;;  %2272 = vmatprep.subr.mxu0 %v1177_v55  ;;  %v945_v54 = vld [vmem:[%s5664_s5 + $0x3f8] sm:$0xff] }
 0x1c1   : > { %2721 = vmatprep.subr.mxu1 %v1305_v56  ;;  %2273 = vmatpush2.msra.mxu0 %v1176_v57  ;;  %v1145_v55 = vld [vmem:[%s5672_s12 + $0x238] sm:$0xff]  ;;  %v1144_v57 = vld [vmem:[%s5672_s12 + $0x230] sm:$0xff] }
 0x1c2   : > { %2722 = vmatpush2.msra.mxu1 %v1304_v58  ;;  %1533 = vmatmul.mubr.f32.gmra.mxu0 %v910_v59  ;;  %v1273_v56 = vld [vmem:[%s5672_s12 + $0x638] sm:$0xff]  ;;  %v1272_v58 = vld [vmem:[%s5672_s12 + $0x630] sm:$0xff]  ;;  %v942_v59 = vld [vmem:[%s5664_s5 + $0x3e0] sm:$0xff] }
 0x1c3   : > { %1982 = vmatmul.mubr.f32.gmra.mxu1 %v912_v60  ;;  %1538 = vmatprep.mubr.f32.mxu0 %v915_v61  ;;  %v944_v60 = vld [vmem:[%s5664_s5 + $0x3f0] sm:$0xff]  ;;  %v947_v61 = vld [vmem:[%s5664_s5 + $0x408] sm:$0xff] }
 0x1c4   : > { %1987 = vmatprep.mubr.f32.mxu1 %v917_v62  ;;  %2274 = vmatprep.subr.mxu0 %v1173_v63  ;;  %v949_v62 = vld [vmem:[%s5664_s5 + $0x418] sm:$0xff]  ;;  %v946_v63 = vld [vmem:[%s5664_s5 + $0x400] sm:$0xff] }
 0x1c5   : > { %2723 = vmatprep.subr.mxu1 %v1301_v0  ;;  %2275 = vmatpush2.msra.mxu0 %v1172_v1  ;;  %v948_v0 = vld [vmem:[%s5664_s5 + $0x410] sm:$0xff]  ;;  %v1141_v1 = vld [vmem:[%s5672_s12 + $0x218] sm:$0xff] }
 0x1c6   : > { %2724 = vmatpush2.msra.mxu1 %v1300_v2  ;;  %1539 = vmatmul.mubr.f32.gmra.mxu0 %v914_v3  ;;  %v1269_v2 = vld [vmem:[%s5672_s12 + $0x618] sm:$0xff]  ;;  %v1140_v3 = vld [vmem:[%s5672_s12 + $0x210] sm:$0xff] }
 0x1c7   : > { %1988 = vmatmul.mubr.f32.gmra.mxu1 %v916_v4  ;;  %1544 = vmatprep.mubr.f32.mxu0 %v919_v5  ;;  %v951_v4 = vld [vmem:[%s5664_s5 + $0x428] sm:$0xff]  ;;  %v953_v5 = vld [vmem:[%s5664_s5 + $0x438] sm:$0xff] }
 0x1c8   : > { %1993 = vmatprep.mubr.f32.mxu1 %v921_v6  ;;  %2276 = vmatprep.subr.mxu0 %v1169_v7  ;;  %v1268_v6 = vld [vmem:[%s5672_s12 + $0x610] sm:$0xff]  ;;  %v950_v7 = vld [vmem:[%s5664_s5 + $0x420] sm:$0xff] }
 0x1c9   : > { %2725 = vmatprep.subr.mxu1 %v1297_v8  ;;  %2277 = vmatpush2.msra.mxu0 %v1168_v9  ;;  %v952_v8 = vld [vmem:[%s5664_s5 + $0x430] sm:$0xff]  ;;  %v955_v9 = vld [vmem:[%s5664_s5 + $0x448] sm:$0xff] }
 0x1ca   : > { %2726 = vmatpush2.msra.mxu1 %v1296_v10  ;;  %1545 = vmatmul.mubr.f32.gmra.mxu0 %v918_v11  ;;  %v957_v10 = vld [vmem:[%s5664_s5 + $0x458] sm:$0xff]  ;;  %v954_v11 = vld [vmem:[%s5664_s5 + $0x440] sm:$0xff] }
 0x1cb   : > { %1994 = vmatmul.mubr.f32.gmra.mxu1 %v920_v12  ;;  %1550 = vmatprep.mubr.f32.mxu0 %v923_v13  ;;  %v956_v12 = vld [vmem:[%s5664_s5 + $0x450] sm:$0xff]  ;;  %v959_v13 = vld [vmem:[%s5664_s5 + $0x468] sm:$0xff] }
 0x1cc   : > { %1999 = vmatprep.mubr.f32.mxu1 %v925_v14  ;;  %2278 = vmatprep.subr.mxu0 %v1165_v15  ;;  %v961_v14 = vld [vmem:[%s5664_s5 + $0x478] sm:$0xff]  ;;  %v958_v15 = vld [vmem:[%s5664_s5 + $0x460] sm:$0xff] }
 0x1cd   : > { %2727 = vmatprep.subr.mxu1 %v1293_v16  ;;  %2279 = vmatpush2.msra.mxu0 %v1164_v17  ;;  %v960_v16 = vld [vmem:[%s5664_s5 + $0x470] sm:$0xff]  ;;  %v963_v17 = vld [vmem:[%s5664_s5 + $0x488] sm:$0xff] }
 0x1ce   : > { %2728 = vmatpush2.msra.mxu1 %v1292_v18  ;;  %1551 = vmatmul.mubr.f32.gmra.mxu0 %v922_v19  ;;  %v965_v18 = vld [vmem:[%s5664_s5 + $0x498] sm:$0xff]  ;;  %v962_v19 = vld [vmem:[%s5664_s5 + $0x480] sm:$0xff] }
 0x1cf   : > { %2000 = vmatmul.mubr.f32.gmra.mxu1 %v924_v20  ;;  %1556 = vmatprep.mubr.f32.mxu0 %v927_v21  ;;  %v964_v20 = vld [vmem:[%s5664_s5 + $0x490] sm:$0xff]  ;;  %v967_v21 = vld [vmem:[%s5664_s5 + $0x4a8] sm:$0xff] }
 0x1d0   : > { %2005 = vmatprep.mubr.f32.mxu1 %v929_v22  ;;  %2280 = vmatprep.subr.mxu0 %v1161_v23  ;;  %v969_v22 = vld [vmem:[%s5664_s5 + $0x4b8] sm:$0xff]  ;;  %v966_v23 = vld [vmem:[%s5664_s5 + $0x4a0] sm:$0xff] }
 0x1d1   : > { %2729 = vmatprep.subr.mxu1 %v1289_v24  ;;  %2281 = vmatpush2.msra.mxu0 %v1160_v25  ;;  %v968_v24 = vld [vmem:[%s5664_s5 + $0x4b0] sm:$0xff]  ;;  %v971_v25 = vld [vmem:[%s5664_s5 + $0x4c8] sm:$0xff] }
 0x1d2   : > { %2730 = vmatpush2.msra.mxu1 %v1288_v26  ;;  %1557 = vmatmul.mubr.f32.gmra.mxu0 %v926_v27  ;;  %v973_v26 = vld [vmem:[%s5664_s5 + $0x4d8] sm:$0xff]  ;;  %v970_v27 = vld [vmem:[%s5664_s5 + $0x4c0] sm:$0xff] }
 0x1d3   : > { %2006 = vmatmul.mubr.f32.gmra.mxu1 %v928_v28  ;;  %1562 = vmatprep.mubr.f32.mxu0 %v931_v29  ;;  %v972_v28 = vld [vmem:[%s5664_s5 + $0x4d0] sm:$0xff]  ;;  %v975_v29 = vld [vmem:[%s5664_s5 + $0x4e8] sm:$0xff] }
 0x1d4   : > { %2011 = vmatprep.mubr.f32.mxu1 %v933_v30  ;;  %2282 = vmatprep.subr.mxu0 %v1157_v31  ;;  %v977_v30 = vld [vmem:[%s5664_s5 + $0x4f8] sm:$0xff]  ;;  %v974_v31 = vld [vmem:[%s5664_s5 + $0x4e0] sm:$0xff] }
 0x1d5   : > { %2731 = vmatprep.subr.mxu1 %v1285_v32  ;;  %2283 = vmatpush2.msra.mxu0 %v1156_v33  ;;  %v976_v32 = vld [vmem:[%s5664_s5 + $0x4f0] sm:$0xff]  ;;  %v979_v33 = vld [vmem:[%s5664_s5 + $0x508] sm:$0xff] }
 0x1d6   : > { %2732 = vmatpush2.msra.mxu1 %v1284_v34  ;;  %1563 = vmatmul.mubr.f32.gmra.mxu0 %v930_v35  ;;  %v981_v34 = vld [vmem:[%s5664_s5 + $0x518] sm:$0xff]  ;;  %v978_v35 = vld [vmem:[%s5664_s5 + $0x500] sm:$0xff] }
 0x1d7   : > { %2012 = vmatmul.mubr.f32.gmra.mxu1 %v932_v36  ;;  %1568 = vmatprep.mubr.f32.mxu0 %v935_v37  ;;  %v980_v36 = vld [vmem:[%s5664_s5 + $0x510] sm:$0xff]  ;;  %v983_v37 = vld [vmem:[%s5664_s5 + $0x528] sm:$0xff] }
 0x1d8   : > { %2017 = vmatprep.mubr.f32.mxu1 %v937_v38  ;;  %2284 = vmatprep.subr.mxu0 %v1153_v39  ;;  %v985_v38 = vld [vmem:[%s5664_s5 + $0x538] sm:$0xff]  ;;  %v982_v39 = vld [vmem:[%s5664_s5 + $0x520] sm:$0xff] }
 0x1d9   : > { %2733 = vmatprep.subr.mxu1 %v1281_v40  ;;  %2285 = vmatpush2.msra.mxu0 %v1152_v41  ;;  %v984_v40 = vld [vmem:[%s5664_s5 + $0x530] sm:$0xff]  ;;  %v987_v41 = vld [vmem:[%s5664_s5 + $0x548] sm:$0xff] }
 0x1da   : > { %2734 = vmatpush2.msra.mxu1 %v1280_v42  ;;  %1569 = vmatmul.mubr.f32.gmra.mxu0 %v934_v43  ;;  %v989_v42 = vld [vmem:[%s5664_s5 + $0x558] sm:$0xff]  ;;  %v986_v43 = vld [vmem:[%s5664_s5 + $0x540] sm:$0xff] }
 0x1db   : > { %2018 = vmatmul.mubr.f32.gmra.mxu1 %v936_v44  ;;  %1574 = vmatprep.mubr.f32.mxu0 %v939_v45  ;;  %v988_v44 = vld [vmem:[%s5664_s5 + $0x550] sm:$0xff]  ;;  %v991_v45 = vld [vmem:[%s5664_s5 + $0x568] sm:$0xff] }
 0x1dc   : > { %2023 = vmatprep.mubr.f32.mxu1 %v941_v46  ;;  %2286 = vmatprep.subr.mxu0 %v1149_v47  ;;  %v993_v46 = vld [vmem:[%s5664_s5 + $0x578] sm:$0xff]  ;;  %v990_v47 = vld [vmem:[%s5664_s5 + $0x560] sm:$0xff] }
 0x1dd   : > { %2735 = vmatprep.subr.mxu1 %v1277_v48  ;;  %2287 = vmatpush2.msra.mxu0 %v1148_v49  ;;  %v992_v48 = vld [vmem:[%s5664_s5 + $0x570] sm:$0xff]  ;;  %v995_v49 = vld [vmem:[%s5664_s5 + $0x588] sm:$0xff] }
 0x1de   : > { %2736 = vmatpush2.msra.mxu1 %v1276_v50  ;;  %1575 = vmatmul.mubr.f32.gmra.mxu0 %v938_v51  ;;  %v997_v50 = vld [vmem:[%s5664_s5 + $0x598] sm:$0xff]  ;;  %v994_v51 = vld [vmem:[%s5664_s5 + $0x580] sm:$0xff] }
 0x1df   : > { %2024 = vmatmul.mubr.f32.gmra.mxu1 %v940_v52  ;;  %1580 = vmatprep.mubr.f32.mxu0 %v943_v53  ;;  %v996_v52 = vld [vmem:[%s5664_s5 + $0x590] sm:$0xff]  ;;  %v999_v53 = vld [vmem:[%s5664_s5 + $0x5a8] sm:$0xff] }
 0x1e0   : > { %2029 = vmatprep.mubr.f32.mxu1 %v945_v54  ;;  %2288 = vmatprep.subr.mxu0 %v1145_v55  ;;  %v1001_v54 = vld [vmem:[%s5664_s5 + $0x5b8] sm:$0xff]  ;;  %v998_v55 = vld [vmem:[%s5664_s5 + $0x5a0] sm:$0xff] }
 0x1e1   : > { %2737 = vmatprep.subr.mxu1 %v1273_v56  ;;  %2289 = vmatpush2.msra.mxu0 %v1144_v57  ;;  %v1000_v56 = vld [vmem:[%s5664_s5 + $0x5b0] sm:$0xff]  ;;  %v1003_v57 = vld [vmem:[%s5664_s5 + $0x5c8] sm:$0xff] }
 0x1e2   : > { %2738 = vmatpush2.msra.mxu1 %v1272_v58  ;;  %1581 = vmatmul.mubr.f32.gmra.mxu0 %v942_v59  ;;  %v1005_v58 = vld [vmem:[%s5664_s5 + $0x5d8] sm:$0xff]  ;;  %v1002_v59 = vld [vmem:[%s5664_s5 + $0x5c0] sm:$0xff] }
 0x1e3   : > { %2030 = vmatmul.mubr.f32.gmra.mxu1 %v944_v60  ;;  %1586 = vmatprep.mubr.f32.mxu0 %v947_v61  ;;  %v1004_v60 = vld [vmem:[%s5664_s5 + $0x5d0] sm:$0xff]  ;;  %v1007_v61 = vld [vmem:[%s5664_s5 + $0x5e8] sm:$0xff] }
 0x1e4   : > { %2035 = vmatprep.mubr.f32.mxu1 %v949_v62  ;;  %2290 = vmatprep.subr.mxu0 %v1141_v1  ;;  %v1009_v62 = vld [vmem:[%s5664_s5 + $0x5f8] sm:$0xff]  ;;  %v1011_v1 = vld [vmem:[%s5664_s5 + $0x608] sm:$0xff] }
 0x1e5   : > { %2739 = vmatprep.subr.mxu1 %v1269_v2  ;;  %2291 = vmatpush2.msra.mxu0 %v1140_v3  ;;  %v1013_v2 = vld [vmem:[%s5664_s5 + $0x618] sm:$0xff]  ;;  %v1010_v3 = vld [vmem:[%s5664_s5 + $0x600] sm:$0xff] }
 0x1e6   : > { %2740 = vmatpush2.msra.mxu1 %v1268_v6  ;;  %1587 = vmatmul.mubr.f32.gmra.mxu0 %v946_v63  ;;  %v1006_v63 = vld [vmem:[%s5664_s5 + $0x5e0] sm:$0xff]  ;;  %v1017_v6 = vld [vmem:[%s5664_s5 + $0x638] sm:$0xff] }
 0x1e7   : > { %2036 = vmatmul.mubr.f32.gmra.mxu1 %v948_v0  ;;  %1592 = vmatprep.mubr.f32.mxu0 %v951_v4  ;;  %v1008_v0 = vld [vmem:[%s5664_s5 + $0x5f0] sm:$0xff] }
 0x1e8   : > { %2041 = vmatprep.mubr.f32.mxu1 %v953_v5  ;;  %v1012_v4 = vld [vmem:[%s5664_s5 + $0x610] sm:$0xff]  ;;  %v1015_v5 = vld [vmem:[%s5664_s5 + $0x628] sm:$0xff] }
 0x1ea   : > { %1593 = vmatmul.mubr.f32.gmra.mxu0 %v950_v7 }
 0x1eb   : > { %2042 = vmatmul.mubr.f32.gmra.mxu1 %v952_v8  ;;  %1598 = vmatprep.mubr.f32.mxu0 %v955_v9  ;;  %v562_v8 = vld [vmem:[%s5689_s24] sm:$0xff] }
 0x1ec   : > { %2047 = vmatprep.mubr.f32.mxu1 %v957_v10 }
 0x1ee   : > { %1599 = vmatmul.mubr.f32.gmra.mxu0 %v954_v11  ;;  %v1014_v11 = vld [vmem:[%s5664_s5 + $0x620] sm:$0xff] }
 0x1ef   : > { %2048 = vmatmul.mubr.f32.gmra.mxu1 %v956_v12  ;;  %1604 = vmatprep.mubr.f32.mxu0 %v959_v13  ;;  %v1016_v12 = vld [vmem:[%s5664_s5 + $0x630] sm:$0xff] }
 0x1f0   : > { %2053 = vmatprep.mubr.f32.mxu1 %v961_v14  ;;  %v563_v14 = vld [vmem:[%s5689_s24 + $0x8] sm:$0xff] }
 0x1f2   : > { %1605 = vmatmul.mubr.f32.gmra.mxu0 %v958_v15 }
 0x1f3   : > { %2054 = vmatmul.mubr.f32.gmra.mxu1 %v960_v16  ;;  %1610 = vmatprep.mubr.f32.mxu0 %v963_v17  ;;  %v1019_v16 = vld [vmem:[%s5664_s5 + $0x648] sm:$0xff]  ;;  %v1021_v17 = vld [vmem:[%s5664_s5 + $0x658] sm:$0xff] }
 0x1f4   : > { %2059 = vmatprep.mubr.f32.mxu1 %v965_v18 }
 0x1f6   : > { %1611 = vmatmul.mubr.f32.gmra.mxu0 %v962_v19 }
 0x1f7   : > { %2060 = vmatmul.mubr.f32.gmra.mxu1 %v964_v20  ;;  %1616 = vmatprep.mubr.f32.mxu0 %v967_v21  ;;  %v566_v21 = vld [vmem:[%s5689_s24 + $0x20] sm:$0xff] }
 0x1f8   : > { %2065 = vmatprep.mubr.f32.mxu1 %v969_v22 }
 0x1fa   : > { %1617 = vmatmul.mubr.f32.gmra.mxu0 %v966_v23 }
 0x1fb   : > { %2066 = vmatmul.mubr.f32.gmra.mxu1 %v968_v24  ;;  %1622 = vmatprep.mubr.f32.mxu0 %v971_v25  ;;  %v1018_v25 = vld [vmem:[%s5664_s5 + $0x640] sm:$0xff] }
 0x1fc   : > { %2071 = vmatprep.mubr.f32.mxu1 %v973_v26  ;;  %v1020_v26 = vld [vmem:[%s5664_s5 + $0x650] sm:$0xff] }
 0x1fe   : > { %1623 = vmatmul.mubr.f32.gmra.mxu0 %v970_v27 }
 0x1ff   : > { %2072 = vmatmul.mubr.f32.gmra.mxu1 %v972_v28  ;;  %1628 = vmatprep.mubr.f32.mxu0 %v975_v29  ;;  %v567_v28 = vld [vmem:[%s5689_s24 + $0x28] sm:$0xff] }
 0x200   : > { %2077 = vmatprep.mubr.f32.mxu1 %v977_v30  ;;  %v1023_v30 = vld [vmem:[%s5664_s5 + $0x668] sm:$0xff] }
 0x202   : > { %1629 = vmatmul.mubr.f32.gmra.mxu0 %v974_v31  ;;  %v1025_v31 = vld [vmem:[%s5664_s5 + $0x678] sm:$0xff] }
 0x203   : > { %2078 = vmatmul.mubr.f32.gmra.mxu1 %v976_v32  ;;  %1634 = vmatprep.mubr.f32.mxu0 %v979_v33 }
 0x204   : > { %2083 = vmatprep.mubr.f32.mxu1 %v981_v34 }
 0x206   : > { %1635 = vmatmul.mubr.f32.gmra.mxu0 %v978_v35  ;;  %v570_v35 = vld [vmem:[%s5689_s24 + $0x40] sm:$0xff] }
 0x207   : > { %2084 = vmatmul.mubr.f32.gmra.mxu1 %v980_v36  ;;  %1640 = vmatprep.mubr.f32.mxu0 %v983_v37 }
 0x208   : > { %2089 = vmatprep.mubr.f32.mxu1 %v985_v38 }
 0x20a   : > { %1641 = vmatmul.mubr.f32.gmra.mxu0 %v982_v39  ;;  %v1022_v39 = vld [vmem:[%s5664_s5 + $0x660] sm:$0xff] }
 0x20b   : > { %2090 = vmatmul.mubr.f32.gmra.mxu1 %v984_v40  ;;  %1646 = vmatprep.mubr.f32.mxu0 %v987_v41  ;;  %v1024_v40 = vld [vmem:[%s5664_s5 + $0x670] sm:$0xff] }
 0x20c   : > { %2095 = vmatprep.mubr.f32.mxu1 %v989_v42  ;;  %v571_v42 = vld [vmem:[%s5689_s24 + $0x48] sm:$0xff] }
 0x20e   : > { %1647 = vmatmul.mubr.f32.gmra.mxu0 %v986_v43 }
 0x20f   : > { %2096 = vmatmul.mubr.f32.gmra.mxu1 %v988_v44  ;;  %1652 = vmatprep.mubr.f32.mxu0 %v991_v45  ;;  %v1027_v44 = vld [vmem:[%s5664_s5 + $0x688] sm:$0xff]  ;;  %v1029_v45 = vld [vmem:[%s5664_s5 + $0x698] sm:$0xff] }
 0x210   : > { %2101 = vmatprep.mubr.f32.mxu1 %v993_v46 }
 0x212   : > { %1653 = vmatmul.mubr.f32.gmra.mxu0 %v990_v47 }
 0x213   : > { %2102 = vmatmul.mubr.f32.gmra.mxu1 %v992_v48  ;;  %1658 = vmatprep.mubr.f32.mxu0 %v995_v49  ;;  %v574_v49 = vld [vmem:[%s5689_s24 + $0x60] sm:$0xff] }
 0x214   : > { %2107 = vmatprep.mubr.f32.mxu1 %v997_v50 }
 0x216   : > { %1659 = vmatmul.mubr.f32.gmra.mxu0 %v994_v51 }
 0x217   : > { %2108 = vmatmul.mubr.f32.gmra.mxu1 %v996_v52  ;;  %1664 = vmatprep.mubr.f32.mxu0 %v999_v53  ;;  %v1026_v53 = vld [vmem:[%s5664_s5 + $0x680] sm:$0xff] }
 0x218   : > { %2113 = vmatprep.mubr.f32.mxu1 %v1001_v54  ;;  %v1028_v54 = vld [vmem:[%s5664_s5 + $0x690] sm:$0xff] }
 0x21a   : > { %1665 = vmatmul.mubr.f32.gmra.mxu0 %v998_v55 }
 0x21b   : > { %2114 = vmatmul.mubr.f32.gmra.mxu1 %v1000_v56  ;;  %1670 = vmatprep.mubr.f32.mxu0 %v1003_v57  ;;  %v575_v56 = vld [vmem:[%s5689_s24 + $0x68] sm:$0xff] }
 0x21c   : > { %2119 = vmatprep.mubr.f32.mxu1 %v1005_v58  ;;  %v1031_v58 = vld [vmem:[%s5664_s5 + $0x6a8] sm:$0xff] }
 0x21e   : > { %1671 = vmatmul.mubr.f32.gmra.mxu0 %v1002_v59  ;;  %v1033_v59 = vld [vmem:[%s5664_s5 + $0x6b8] sm:$0xff] }
 0x21f   : > { %2120 = vmatmul.mubr.f32.gmra.mxu1 %v1004_v60  ;;  %1676 = vmatprep.mubr.f32.mxu0 %v1007_v61 }
 0x220   : > { %2125 = vmatprep.mubr.f32.mxu1 %v1009_v62 }
 0x222   : > { %1677 = vmatmul.mubr.f32.gmra.mxu0 %v1006_v63  ;;  %v578_v63 = vld [vmem:[%s5689_s24 + $0x80] sm:$0xff] }
 0x223   : > { %2126 = vmatmul.mubr.f32.gmra.mxu1 %v1008_v0  ;;  %1682 = vmatprep.mubr.f32.mxu0 %v1011_v1 }
 0x224   : > { %2131 = vmatprep.mubr.f32.mxu1 %v1013_v2 }
 0x226   : > { %v1396_v7 = vpop.f32.mrf.mxu0  ;;  %1683 = vmatmul.mubr.f32.gmra.mxu0 %v1010_v3  ;;  %v1030_v3 = vld [vmem:[%s5664_s5 + $0x6a0] sm:$0xff] }
 0x227   : > { %v1845_v9 = vpop.f32.mrf.mxu1  ;;  %2132 = vmatmul.mubr.f32.gmra.mxu1 %v1012_v4  ;;  %1688 = vmatprep.mubr.f32.mxu0 %v1015_v5  ;;  %v1032_v4 = vld [vmem:[%s5664_s5 + $0x6b0] sm:$0xff] }
 0x228   : > { %v1846_v10 = vadd.f32 %v1845_v9, %v1396_v7  ;;  %2137 = vmatprep.mubr.f32.mxu1 %v1017_v6  ;;  %v1398_v13 = vpop.f32.mrf.mxu0  ;;  %v579_v6 = vld [vmem:[%s5689_s24 + $0x88] sm:$0xff]  ;;  %v1037_v9 = vld [vmem:[%s5664_s5 + $0x6d8] sm:$0xff] }
 0x229   : > { %v1847_v15 = vpop.f32.mrf.mxu1 }
 0x22a   : > { %v3126_v18 = vadd.f32 %v1846_v10, %v562_v8  ;;  %v1848_v19 = vadd.f32 %v1847_v15, %v1398_v13  ;;  %v1402_v20 = vpop.f32.mrf.mxu0  ;;  %1689 = vmatmul.mubr.f32.gmra.mxu0 %v1014_v11  ;;  %v1035_v8 = vld [vmem:[%s5664_s5 + $0x6c8] sm:$0xff] }
 0x22b   : > { %v1851_v22 = vpop.f32.mrf.mxu1  ;;  %2138 = vmatmul.mubr.f32.gmra.mxu1 %v1016_v12  ;;  %1694 = vmatprep.mubr.f32.mxu0 %v1019_v16  ;;  %v582_v13 = vld [vmem:[%s5689_s24 + $0xa0] sm:$0xff] }
 0x22c   : > { %3382 = vst [vmem:[%s5689_s24] sm:$0xff] %v3126_v18  ;;  %v3127_v23 = vadd.f32 %v1848_v19, %v563_v14  ;;  %v1852_v24 = vadd.f32 %v1851_v22, %v1402_v20  ;;  %2143 = vmatprep.mubr.f32.mxu1 %v1021_v17  ;;  %v1404_v27 = vpop.f32.mrf.mxu0  ;;  %v1034_v17 = vld [vmem:[%s5664_s5 + $0x6c0] sm:$0xff]  ;;  %v1036_v18 = vld [vmem:[%s5664_s5 + $0x6d0] sm:$0xff]  ;;  %v1039_v22 = vld [vmem:[%s5664_s5 + $0x6e8] sm:$0xff] }
 0x22d   : > { %v1853_v29 = vpop.f32.mrf.mxu1  ;;  %v583_v20 = vld [vmem:[%s5689_s24 + $0xa8] sm:$0xff] }
 0x22e   : > { %3383 = vst [vmem:[%s5689_s24 + $0x8] sm:$0xff] %v3127_v23  ;;  %v3130_v32 = vadd.f32 %v1852_v24, %v566_v21  ;;  %v1854_v33 = vadd.f32 %v1853_v29, %v1404_v27  ;;  %v1408_v34 = vpop.f32.mrf.mxu0  ;;  %1695 = vmatmul.mubr.f32.gmra.mxu0 %v1018_v25  ;;  %v1041_v23 = vld [vmem:[%s5664_s5 + $0x6f8] sm:$0xff]  ;;  %v586_v27 = vld [vmem:[%s5689_s24 + $0xc0] sm:$0xff] }
 0x22f   : > { %v1857_v36 = vpop.f32.mrf.mxu1  ;;  %2144 = vmatmul.mubr.f32.gmra.mxu1 %v1020_v26  ;;  %1700 = vmatprep.mubr.f32.mxu0 %v1023_v30 }
 0x230   : > { %3386 = vst [vmem:[%s5689_s24 + $0x20] sm:$0xff] %v3130_v32  ;;  %v3131_v37 = vadd.f32 %v1854_v33, %v567_v28  ;;  %v1858_v38 = vadd.f32 %v1857_v36, %v1408_v34  ;;  %2149 = vmatprep.mubr.f32.mxu1 %v1025_v31  ;;  %v1410_v41 = vpop.f32.mrf.mxu0  ;;  %v1038_v31 = vld [vmem:[%s5664_s5 + $0x6e0] sm:$0xff]  ;;  %v1040_v32 = vld [vmem:[%s5664_s5 + $0x6f0] sm:$0xff]  ;;  %v1043_v36 = vld [vmem:[%s5664_s5 + $0x708] sm:$0xff] }
 0x231   : > { %v1859_v43 = vpop.f32.mrf.mxu1  ;;  %v587_v34 = vld [vmem:[%s5689_s24 + $0xc8] sm:$0xff] }
 0x232   : > { %3387 = vst [vmem:[%s5689_s24 + $0x28] sm:$0xff] %v3131_v37  ;;  %v3134_v46 = vadd.f32 %v1858_v38, %v570_v35  ;;  %v1860_v47 = vadd.f32 %v1859_v43, %v1410_v41  ;;  %v1414_v48 = vpop.f32.mrf.mxu0  ;;  %1701 = vmatmul.mubr.f32.gmra.mxu0 %v1022_v39  ;;  %v1045_v37 = vld [vmem:[%s5664_s5 + $0x718] sm:$0xff]  ;;  %v590_v41 = vld [vmem:[%s5689_s24 + $0xe0] sm:$0xff] }
 0x233   : > { %v1863_v50 = vpop.f32.mrf.mxu1  ;;  %2150 = vmatmul.mubr.f32.gmra.mxu1 %v1024_v40  ;;  %1706 = vmatprep.mubr.f32.mxu0 %v1027_v44 }
 0x234   : > { %3390 = vst [vmem:[%s5689_s24 + $0x40] sm:$0xff] %v3134_v46  ;;  %v3135_v51 = vadd.f32 %v1860_v47, %v571_v42  ;;  %v1864_v52 = vadd.f32 %v1863_v50, %v1414_v48  ;;  %2155 = vmatprep.mubr.f32.mxu1 %v1029_v45  ;;  %v1416_v55 = vpop.f32.mrf.mxu0  ;;  %v1042_v45 = vld [vmem:[%s5664_s5 + $0x700] sm:$0xff]  ;;  %v1044_v46 = vld [vmem:[%s5664_s5 + $0x710] sm:$0xff]  ;;  %v1047_v50 = vld [vmem:[%s5664_s5 + $0x728] sm:$0xff] }
 0x235   : > { %v1865_v57 = vpop.f32.mrf.mxu1  ;;  %v591_v48 = vld [vmem:[%s5689_s24 + $0xe8] sm:$0xff] }
 0x236   : > { %3391 = vst [vmem:[%s5689_s24 + $0x48] sm:$0xff] %v3135_v51  ;;  %v3138_v60 = vadd.f32 %v1864_v52, %v574_v49  ;;  %v1866_v61 = vadd.f32 %v1865_v57, %v1416_v55  ;;  %v1420_v62 = vpop.f32.mrf.mxu0  ;;  %1707 = vmatmul.mubr.f32.gmra.mxu0 %v1026_v53  ;;  %v1049_v51 = vld [vmem:[%s5664_s5 + $0x738] sm:$0xff]  ;;  %v594_v55 = vld [vmem:[%s5689_s24 + $0x100] sm:$0xff] }
 0x237   : > { %v1869_v0 = vpop.f32.mrf.mxu1  ;;  %2156 = vmatmul.mubr.f32.gmra.mxu1 %v1028_v54  ;;  %1712 = vmatprep.mubr.f32.mxu0 %v1031_v58 }
 0x238   : > { %3394 = vst [vmem:[%s5689_s24 + $0x60] sm:$0xff] %v3138_v60  ;;  %v3139_v1 = vadd.f32 %v1866_v61, %v575_v56  ;;  %v1870_v2 = vadd.f32 %v1869_v0, %v1420_v62  ;;  %2161 = vmatprep.mubr.f32.mxu1 %v1033_v59  ;;  %v1422_v5 = vpop.f32.mrf.mxu0  ;;  %v1046_v59 = vld [vmem:[%s5664_s5 + $0x720] sm:$0xff]  ;;  %v1048_v60 = vld [vmem:[%s5664_s5 + $0x730] sm:$0xff]  ;;  %v1051_v0 = vld [vmem:[%s5664_s5 + $0x748] sm:$0xff] }
 0x239   : > { %v1871_v7 = vpop.f32.mrf.mxu1  ;;  %v595_v62 = vld [vmem:[%s5689_s24 + $0x108] sm:$0xff] }
 0x23a   : > { %3395 = vst [vmem:[%s5689_s24 + $0x68] sm:$0xff] %v3139_v1  ;;  %v3142_v10 = vadd.f32 %v1870_v2, %v578_v63  ;;  %v1872_v11 = vadd.f32 %v1871_v7, %v1422_v5  ;;  %v1426_v12 = vpop.f32.mrf.mxu0  ;;  %1713 = vmatmul.mubr.f32.gmra.mxu0 %v1030_v3  ;;  %v1053_v1 = vld [vmem:[%s5664_s5 + $0x758] sm:$0xff]  ;;  %v598_v5 = vld [vmem:[%s5689_s24 + $0x120] sm:$0xff] }
 0x23b   : > { %v1875_v14 = vpop.f32.mrf.mxu1  ;;  %2162 = vmatmul.mubr.f32.gmra.mxu1 %v1032_v4  ;;  %1718 = vmatprep.mubr.f32.mxu0 %v1035_v8 }
 0x23c   : > { %3398 = vst [vmem:[%s5689_s24 + $0x80] sm:$0xff] %v3142_v10  ;;  %v3143_v15 = vadd.f32 %v1872_v11, %v579_v6  ;;  %v1876_v16 = vadd.f32 %v1875_v14, %v1426_v12  ;;  %2167 = vmatprep.mubr.f32.mxu1 %v1037_v9  ;;  %v1428_v19 = vpop.f32.mrf.mxu0  ;;  %v1050_v9 = vld [vmem:[%s5664_s5 + $0x740] sm:$0xff]  ;;  %v1052_v10 = vld [vmem:[%s5664_s5 + $0x750] sm:$0xff]  ;;  %v1055_v14 = vld [vmem:[%s5664_s5 + $0x768] sm:$0xff] }
 0x23d   : > { %v1877_v21 = vpop.f32.mrf.mxu1  ;;  %v599_v12 = vld [vmem:[%s5689_s24 + $0x128] sm:$0xff] }
 0x23e   : > { %3399 = vst [vmem:[%s5689_s24 + $0x88] sm:$0xff] %v3143_v15  ;;  %v3146_v24 = vadd.f32 %v1876_v16, %v582_v13  ;;  %v1878_v25 = vadd.f32 %v1877_v21, %v1428_v19  ;;  %v1432_v26 = vpop.f32.mrf.mxu0  ;;  %1719 = vmatmul.mubr.f32.gmra.mxu0 %v1034_v17  ;;  %v1057_v15 = vld [vmem:[%s5664_s5 + $0x778] sm:$0xff]  ;;  %v602_v19 = vld [vmem:[%s5689_s24 + $0x140] sm:$0xff] }
 0x23f   : > { %v1881_v28 = vpop.f32.mrf.mxu1  ;;  %2168 = vmatmul.mubr.f32.gmra.mxu1 %v1036_v18  ;;  %1724 = vmatprep.mubr.f32.mxu0 %v1039_v22 }
 0x240   : > { %3402 = vst [vmem:[%s5689_s24 + $0xa0] sm:$0xff] %v3146_v24  ;;  %v3147_v29 = vadd.f32 %v1878_v25, %v583_v20  ;;  %v1882_v30 = vadd.f32 %v1881_v28, %v1432_v26  ;;  %2173 = vmatprep.mubr.f32.mxu1 %v1041_v23  ;;  %v1434_v33 = vpop.f32.mrf.mxu0  ;;  %v1054_v23 = vld [vmem:[%s5664_s5 + $0x760] sm:$0xff]  ;;  %v1056_v24 = vld [vmem:[%s5664_s5 + $0x770] sm:$0xff]  ;;  %v1059_v28 = vld [vmem:[%s5664_s5 + $0x788] sm:$0xff] }
 0x241   : > { %v1883_v35 = vpop.f32.mrf.mxu1  ;;  %v603_v26 = vld [vmem:[%s5689_s24 + $0x148] sm:$0xff] }
 0x242   : > { %3403 = vst [vmem:[%s5689_s24 + $0xa8] sm:$0xff] %v3147_v29  ;;  %v3150_v38 = vadd.f32 %v1882_v30, %v586_v27  ;;  %v1884_v39 = vadd.f32 %v1883_v35, %v1434_v33  ;;  %v1438_v40 = vpop.f32.mrf.mxu0  ;;  %1725 = vmatmul.mubr.f32.gmra.mxu0 %v1038_v31  ;;  %v1061_v29 = vld [vmem:[%s5664_s5 + $0x798] sm:$0xff]  ;;  %v606_v33 = vld [vmem:[%s5689_s24 + $0x160] sm:$0xff] }
 0x243   : > { %v1887_v42 = vpop.f32.mrf.mxu1  ;;  %2174 = vmatmul.mubr.f32.gmra.mxu1 %v1040_v32  ;;  %1730 = vmatprep.mubr.f32.mxu0 %v1043_v36 }
 0x244   : > { %3406 = vst [vmem:[%s5689_s24 + $0xc0] sm:$0xff] %v3150_v38  ;;  %v3151_v43 = vadd.f32 %v1884_v39, %v587_v34  ;;  %v1888_v44 = vadd.f32 %v1887_v42, %v1438_v40  ;;  %2179 = vmatprep.mubr.f32.mxu1 %v1045_v37  ;;  %v1440_v47 = vpop.f32.mrf.mxu0  ;;  %v1058_v37 = vld [vmem:[%s5664_s5 + $0x780] sm:$0xff]  ;;  %v1060_v38 = vld [vmem:[%s5664_s5 + $0x790] sm:$0xff]  ;;  %v1063_v42 = vld [vmem:[%s5664_s5 + $0x7a8] sm:$0xff] }
 0x245   : > { %v1889_v49 = vpop.f32.mrf.mxu1  ;;  %v607_v40 = vld [vmem:[%s5689_s24 + $0x168] sm:$0xff] }
 0x246   : > { %3407 = vst [vmem:[%s5689_s24 + $0xc8] sm:$0xff] %v3151_v43  ;;  %v3154_v52 = vadd.f32 %v1888_v44, %v590_v41  ;;  %v1890_v53 = vadd.f32 %v1889_v49, %v1440_v47  ;;  %v1444_v54 = vpop.f32.mrf.mxu0  ;;  %1731 = vmatmul.mubr.f32.gmra.mxu0 %v1042_v45  ;;  %v1065_v43 = vld [vmem:[%s5664_s5 + $0x7b8] sm:$0xff]  ;;  %v610_v47 = vld [vmem:[%s5689_s24 + $0x180] sm:$0xff] }
 0x247   : > { %v1893_v56 = vpop.f32.mrf.mxu1  ;;  %2180 = vmatmul.mubr.f32.gmra.mxu1 %v1044_v46  ;;  %1736 = vmatprep.mubr.f32.mxu0 %v1047_v50 }
 0x248   : > { %3410 = vst [vmem:[%s5689_s24 + $0xe0] sm:$0xff] %v3154_v52  ;;  %v3155_v57 = vadd.f32 %v1890_v53, %v591_v48  ;;  %v1894_v58 = vadd.f32 %v1893_v56, %v1444_v54  ;;  %2185 = vmatprep.mubr.f32.mxu1 %v1049_v51  ;;  %v1446_v61 = vpop.f32.mrf.mxu0  ;;  %v1062_v51 = vld [vmem:[%s5664_s5 + $0x7a0] sm:$0xff]  ;;  %v1064_v52 = vld [vmem:[%s5664_s5 + $0x7b0] sm:$0xff]  ;;  %v1067_v56 = vld [vmem:[%s5664_s5 + $0x7c8] sm:$0xff] }
 0x249   : > { %v1895_v63 = vpop.f32.mrf.mxu1  ;;  %v611_v54 = vld [vmem:[%s5689_s24 + $0x188] sm:$0xff] }
 0x24a   : > { %3411 = vst [vmem:[%s5689_s24 + $0xe8] sm:$0xff] %v3155_v57  ;;  %v3158_v2 = vadd.f32 %v1894_v58, %v594_v55  ;;  %v1896_v3 = vadd.f32 %v1895_v63, %v1446_v61  ;;  %v1450_v4 = vpop.f32.mrf.mxu0  ;;  %1737 = vmatmul.mubr.f32.gmra.mxu0 %v1046_v59  ;;  %v1069_v57 = vld [vmem:[%s5664_s5 + $0x7d8] sm:$0xff]  ;;  %v614_v61 = vld [vmem:[%s5689_s24 + $0x1a0] sm:$0xff] }
 0x24b   : > { %v1899_v6 = vpop.f32.mrf.mxu1  ;;  %2186 = vmatmul.mubr.f32.gmra.mxu1 %v1048_v60  ;;  %1742 = vmatprep.mubr.f32.mxu0 %v1051_v0 }
 0x24c   : > { %3414 = vst [vmem:[%s5689_s24 + $0x100] sm:$0xff] %v3158_v2  ;;  %v3159_v7 = vadd.f32 %v1896_v3, %v595_v62  ;;  %v1900_v8 = vadd.f32 %v1899_v6, %v1450_v4  ;;  %2191 = vmatprep.mubr.f32.mxu1 %v1053_v1  ;;  %v1452_v11 = vpop.f32.mrf.mxu0  ;;  %v1066_v1 = vld [vmem:[%s5664_s5 + $0x7c0] sm:$0xff]  ;;  %v1068_v2 = vld [vmem:[%s5664_s5 + $0x7d0] sm:$0xff]  ;;  %v1071_v6 = vld [vmem:[%s5664_s5 + $0x7e8] sm:$0xff] }
 0x24d   : > { %v1901_v13 = vpop.f32.mrf.mxu1  ;;  %v615_v4 = vld [vmem:[%s5689_s24 + $0x1a8] sm:$0xff] }
 0x24e   : > { %3415 = vst [vmem:[%s5689_s24 + $0x108] sm:$0xff] %v3159_v7  ;;  %v3162_v16 = vadd.f32 %v1900_v8, %v598_v5  ;;  %v1902_v17 = vadd.f32 %v1901_v13, %v1452_v11  ;;  %v1456_v18 = vpop.f32.mrf.mxu0  ;;  %1743 = vmatmul.mubr.f32.gmra.mxu0 %v1050_v9  ;;  %v1073_v7 = vld [vmem:[%s5664_s5 + $0x7f8] sm:$0xff]  ;;  %v618_v11 = vld [vmem:[%s5689_s24 + $0x1c0] sm:$0xff] }
 0x24f   : > { %v1905_v20 = vpop.f32.mrf.mxu1  ;;  %2192 = vmatmul.mubr.f32.gmra.mxu1 %v1052_v10  ;;  %1748 = vmatprep.mubr.f32.mxu0 %v1055_v14 }
 0x250   : > { %3418 = vst [vmem:[%s5689_s24 + $0x120] sm:$0xff] %v3162_v16  ;;  %v3163_v21 = vadd.f32 %v1902_v17, %v599_v12  ;;  %v1906_v22 = vadd.f32 %v1905_v20, %v1456_v18  ;;  %2197 = vmatprep.mubr.f32.mxu1 %v1057_v15  ;;  %v1458_v25 = vpop.f32.mrf.mxu0  ;;  %v1070_v15 = vld [vmem:[%s5664_s5 + $0x7e0] sm:$0xff]  ;;  %v1072_v16 = vld [vmem:[%s5664_s5 + $0x7f0] sm:$0xff] }
 0x251   : > { %v1907_v27 = vpop.f32.mrf.mxu1  ;;  %v619_v18 = vld [vmem:[%s5689_s24 + $0x1c8] sm:$0xff] }
 0x252   : > { %3419 = vst [vmem:[%s5689_s24 + $0x128] sm:$0xff] %v3163_v21  ;;  %v3166_v30 = vadd.f32 %v1906_v22, %v602_v19  ;;  %v1908_v31 = vadd.f32 %v1907_v27, %v1458_v25  ;;  %v1462_v32 = vpop.f32.mrf.mxu0  ;;  %1749 = vmatmul.mubr.f32.gmra.mxu0 %v1054_v23  ;;  %v622_v23 = vld [vmem:[%s5689_s24 + $0x1e0] sm:$0xff] }
 0x253   : > { %v1911_v34 = vpop.f32.mrf.mxu1  ;;  %2198 = vmatmul.mubr.f32.gmra.mxu1 %v1056_v24  ;;  %1754 = vmatprep.mubr.f32.mxu0 %v1059_v28  ;;  %v4809_v27 = vld [vmem:[%s5664_s5 + $0x8] sm:$0xff]  ;;  %v4810_v28 = vld [vmem:[%s5664_s5 + $0x18] sm:$0xff] }
 0x254   : > { %3422 = vst [vmem:[%s5689_s24 + $0x140] sm:$0xff] %v3166_v30  ;;  %v3167_v35 = vadd.f32 %v1908_v31, %v603_v26  ;;  %v1912_v36 = vadd.f32 %v1911_v34, %v1462_v32  ;;  %2203 = vmatprep.mubr.f32.mxu1 %v1061_v29  ;;  %v1464_v39 = vpop.f32.mrf.mxu0  ;;  %v623_v30 = vld [vmem:[%s5689_s24 + $0x1e8] sm:$0xff] }
 0x255   : > { %v1913_v41 = vpop.f32.mrf.mxu1 }
 0x256   : > { %3423 = vst [vmem:[%s5689_s24 + $0x148] sm:$0xff] %v3167_v35  ;;  %v3170_v44 = vadd.f32 %v1912_v36, %v606_v33  ;;  %v1914_v45 = vadd.f32 %v1913_v41, %v1464_v39  ;;  %v1468_v46 = vpop.f32.mrf.mxu0  ;;  %1755 = vmatmul.mubr.f32.gmra.mxu0 %v1058_v37  ;;  %v626_v35 = vld [vmem:[%s5689_s24 + $0x200] sm:$0xff]  ;;  %v4811_v37 = vld [vmem:[%s5664_s5] sm:$0xff] }
 0x257   : > { %v1917_v48 = vpop.f32.mrf.mxu1  ;;  %2204 = vmatmul.mubr.f32.gmra.mxu1 %v1060_v38  ;;  %1760 = vmatprep.mubr.f32.mxu0 %v1063_v42  ;;  %v4812_v38 = vld [vmem:[%s5664_s5 + $0x10] sm:$0xff]  ;;  %v4813_v41 = vld [vmem:[%s5664_s5 + $0x28] sm:$0xff]  ;;  %v4814_v42 = vld [vmem:[%s5664_s5 + $0x38] sm:$0xff] }
 0x258   : > { %3426 = vst [vmem:[%s5689_s24 + $0x160] sm:$0xff] %v3170_v44  ;;  %v3171_v49 = vadd.f32 %v1914_v45, %v607_v40  ;;  %v1918_v50 = vadd.f32 %v1917_v48, %v1468_v46  ;;  %2209 = vmatprep.mubr.f32.mxu1 %v1065_v43  ;;  %v1470_v53 = vpop.f32.mrf.mxu0  ;;  %v627_v44 = vld [vmem:[%s5689_s24 + $0x208] sm:$0xff] }
 0x259   : > { %v1919_v55 = vpop.f32.mrf.mxu1 }
 0x25a   : > { %3427 = vst [vmem:[%s5689_s24 + $0x168] sm:$0xff] %v3171_v49  ;;  %v3174_v58 = vadd.f32 %v1918_v50, %v610_v47  ;;  %v1920_v59 = vadd.f32 %v1919_v55, %v1470_v53  ;;  %v1474_v60 = vpop.f32.mrf.mxu0  ;;  %1761 = vmatmul.mubr.f32.gmra.mxu0 %v1062_v51  ;;  %v630_v49 = vld [vmem:[%s5689_s24 + $0x220] sm:$0xff]  ;;  %v4815_v51 = vld [vmem:[%s5664_s5 + $0x20] sm:$0xff] }
 0x25b   : > { %v1923_v62 = vpop.f32.mrf.mxu1  ;;  %2210 = vmatmul.mubr.f32.gmra.mxu1 %v1064_v52  ;;  %1766 = vmatprep.mubr.f32.mxu0 %v1067_v56  ;;  %v4816_v52 = vld [vmem:[%s5664_s5 + $0x30] sm:$0xff]  ;;  %v4817_v55 = vld [vmem:[%s5664_s5 + $0x48] sm:$0xff]  ;;  %v4818_v56 = vld [vmem:[%s5664_s5 + $0x58] sm:$0xff] }
 0x25c   : > { %3430 = vst [vmem:[%s5689_s24 + $0x180] sm:$0xff] %v3174_v58  ;;  %v3175_v63 = vadd.f32 %v1920_v59, %v611_v54  ;;  %v1924_v0 = vadd.f32 %v1923_v62, %v1474_v60  ;;  %2215 = vmatprep.mubr.f32.mxu1 %v1069_v57  ;;  %v1476_v3 = vpop.f32.mrf.mxu0  ;;  %v631_v58 = vld [vmem:[%s5689_s24 + $0x228] sm:$0xff] }
 0x25d   : > { %v1925_v5 = vpop.f32.mrf.mxu1 }
 0x25e   : > { %3431 = vst [vmem:[%s5689_s24 + $0x188] sm:$0xff] %v3175_v63  ;;  %v3178_v8 = vadd.f32 %v1924_v0, %v614_v61  ;;  %v1926_v9 = vadd.f32 %v1925_v5, %v1476_v3  ;;  %v1480_v10 = vpop.f32.mrf.mxu0  ;;  %1767 = vmatmul.mubr.f32.gmra.mxu0 %v1066_v1  ;;  %v634_v63 = vld [vmem:[%s5689_s24 + $0x240] sm:$0xff]  ;;  %v4819_v1 = vld [vmem:[%s5664_s5 + $0x40] sm:$0xff] }
 0x25f   : > { %v1929_v12 = vpop.f32.mrf.mxu1  ;;  %2216 = vmatmul.mubr.f32.gmra.mxu1 %v1068_v2  ;;  %1772 = vmatprep.mubr.f32.mxu0 %v1071_v6  ;;  %v4820_v2 = vld [vmem:[%s5664_s5 + $0x50] sm:$0xff]  ;;  %v4821_v5 = vld [vmem:[%s5664_s5 + $0x68] sm:$0xff]  ;;  %v4822_v6 = vld [vmem:[%s5664_s5 + $0x78] sm:$0xff] }
 0x260   : > { %3434 = vst [vmem:[%s5689_s24 + $0x1a0] sm:$0xff] %v3178_v8  ;;  %v3179_v13 = vadd.f32 %v1926_v9, %v615_v4  ;;  %v1930_v14 = vadd.f32 %v1929_v12, %v1480_v10  ;;  %2221 = vmatprep.mubr.f32.mxu1 %v1073_v7  ;;  %v1482_v17 = vpop.f32.mrf.mxu0  ;;  %v635_v8 = vld [vmem:[%s5689_s24 + $0x248] sm:$0xff] }
 0x261   : > { %v1931_v19 = vpop.f32.mrf.mxu1 }
 0x262   : > { %3435 = vst [vmem:[%s5689_s24 + $0x1a8] sm:$0xff] %v3179_v13  ;;  %v3182_v20 = vadd.f32 %v1930_v14, %v618_v11  ;;  %v1932_v21 = vadd.f32 %v1931_v19, %v1482_v17  ;;  %v1486_v22 = vpop.f32.mrf.mxu0  ;;  %1773 = vmatmul.mubr.f32.gmra.mxu0 %v1070_v15  ;;  %v638_v13 = vld [vmem:[%s5689_s24 + $0x260] sm:$0xff]  ;;  %v4823_v15 = vld [vmem:[%s5664_s5 + $0x60] sm:$0xff] }
 0x263   : > { %v1935_v24 = vpop.f32.mrf.mxu1  ;;  %2222 = vmatmul.mubr.f32.gmra.mxu1 %v1072_v16  ;;  %2292 = vmatprep.mubr.f32.mxu0 %v4809_v27  ;;  %v4824_v16 = vld [vmem:[%s5664_s5 + $0x70] sm:$0xff]  ;;  %v4825_v19 = vld [vmem:[%s5664_s5 + $0x88] sm:$0xff] }
 0x264   : > { %3438 = vst [vmem:[%s5689_s24 + $0x1c0] sm:$0xff] %v3182_v20  ;;  %v3183_v25 = vadd.f32 %v1932_v21, %v619_v18  ;;  %v1936_v26 = vadd.f32 %v1935_v24, %v1486_v22  ;;  %2741 = vmatprep.mubr.f32.mxu1 %v4810_v28  ;;  %v1488_v29 = vpop.f32.mrf.mxu0  ;;  %v4826_v20 = vld [vmem:[%s5664_s5 + $0x98] sm:$0xff]  ;;  %v639_v22 = vld [vmem:[%s5689_s24 + $0x268] sm:$0xff]  ;;  %v642_v27 = vld [vmem:[%s5689_s24 + $0x280] sm:$0xff] }
 0x265   : > { %v1937_v31 = vpop.f32.mrf.mxu1 }
 0x266   : > { %3439 = vst [vmem:[%s5689_s24 + $0x1c8] sm:$0xff] %v3183_v25  ;;  %v3186_v32 = vadd.f32 %v1936_v26, %v622_v23  ;;  %v1938_v33 = vadd.f32 %v1937_v31, %v1488_v29  ;;  %v1492_v34 = vpop.f32.mrf.mxu0  ;;  %2293 = vmatmul.mubr.f32.vlgmr.msra.gmra.mxu0 %v4811_v37  ;;  %v4827_v29 = vld [vmem:[%s5664_s5 + $0x80] sm:$0xff] }
 0x267   : > { %v1941_v36 = vpop.f32.mrf.mxu1  ;;  %2742 = vmatmul.mubr.f32.vlgmr.msra.gmra.mxu1 %v4812_v38  ;;  %2298 = vmatprep.mubr.f32.mxu0 %v4813_v41  ;;  %v646_v41 = vld [vmem:[%s5689_s24 + $0x2a0] sm:$0xff] }
 0x268   : > { %3442 = vst [vmem:[%s5689_s24 + $0x1e0] sm:$0xff] %v3186_v32  ;;  %v3187_v39 = vadd.f32 %v1938_v33, %v623_v30  ;;  %v1942_v40 = vadd.f32 %v1941_v36, %v1492_v34  ;;  %2747 = vmatprep.mubr.f32.mxu1 %v4814_v42  ;;  %v1494_v43 = vpop.f32.mrf.mxu0  ;;  %v4828_v30 = vld [vmem:[%s5664_s5 + $0x90] sm:$0xff]  ;;  %v4829_v33 = vld [vmem:[%s5664_s5 + $0xa8] sm:$0xff]  ;;  %v4830_v34 = vld [vmem:[%s5664_s5 + $0xb8] sm:$0xff] }
 0x269   : > { %v1943_v45 = vpop.f32.mrf.mxu1  ;;  %v643_v36 = vld [vmem:[%s5689_s24 + $0x288] sm:$0xff] }
 0x26a   : > { %3443 = vst [vmem:[%s5689_s24 + $0x1e8] sm:$0xff] %v3187_v39  ;;  %v3190_v46 = vadd.f32 %v1942_v40, %v626_v35  ;;  %v1944_v47 = vadd.f32 %v1943_v45, %v1494_v43  ;;  %v1498_v48 = vpop.f32.mrf.mxu0  ;;  %2299 = vmatmul.mubr.f32.gmra.mxu0 %v4815_v51  ;;  %v4831_v43 = vld [vmem:[%s5664_s5 + $0xa0] sm:$0xff] }
 0x26b   : > { %v1947_v50 = vpop.f32.mrf.mxu1  ;;  %2748 = vmatmul.mubr.f32.gmra.mxu1 %v4816_v52  ;;  %2304 = vmatprep.mubr.f32.mxu0 %v4817_v55  ;;  %v650_v55 = vld [vmem:[%s5689_s24 + $0x2c0] sm:$0xff] }
 0x26c   : > { %3446 = vst [vmem:[%s5689_s24 + $0x200] sm:$0xff] %v3190_v46  ;;  %v3191_v53 = vadd.f32 %v1944_v47, %v627_v44  ;;  %v1948_v54 = vadd.f32 %v1947_v50, %v1498_v48  ;;  %2753 = vmatprep.mubr.f32.mxu1 %v4818_v56  ;;  %v1500_v57 = vpop.f32.mrf.mxu0  ;;  %v4832_v44 = vld [vmem:[%s5664_s5 + $0xb0] sm:$0xff]  ;;  %v4833_v47 = vld [vmem:[%s5664_s5 + $0xc8] sm:$0xff]  ;;  %v4834_v48 = vld [vmem:[%s5664_s5 + $0xd8] sm:$0xff] }
 0x26d   : > { %v1949_v59 = vpop.f32.mrf.mxu1  ;;  %v647_v50 = vld [vmem:[%s5689_s24 + $0x2a8] sm:$0xff] }
 0x26e   : > { %3447 = vst [vmem:[%s5689_s24 + $0x208] sm:$0xff] %v3191_v53  ;;  %v3194_v60 = vadd.f32 %v1948_v54, %v630_v49  ;;  %v1950_v61 = vadd.f32 %v1949_v59, %v1500_v57  ;;  %v1504_v62 = vpop.f32.mrf.mxu0  ;;  %2305 = vmatmul.mubr.f32.gmra.mxu0 %v4819_v1  ;;  %v4835_v57 = vld [vmem:[%s5664_s5 + $0xc0] sm:$0xff] }
 0x26f   : > { %v1953_v0 = vpop.f32.mrf.mxu1  ;;  %2754 = vmatmul.mubr.f32.gmra.mxu1 %v4820_v2  ;;  %2310 = vmatprep.mubr.f32.mxu0 %v4821_v5  ;;  %v654_v5 = vld [vmem:[%s5689_s24 + $0x2e0] sm:$0xff] }
 0x270   : > { %3450 = vst [vmem:[%s5689_s24 + $0x220] sm:$0xff] %v3194_v60  ;;  %v3195_v3 = vadd.f32 %v1950_v61, %v631_v58  ;;  %v1954_v4 = vadd.f32 %v1953_v0, %v1504_v62  ;;  %2759 = vmatprep.mubr.f32.mxu1 %v4822_v6  ;;  %v1506_v7 = vpop.f32.mrf.mxu0  ;;  %v4836_v58 = vld [vmem:[%s5664_s5 + $0xd0] sm:$0xff]  ;;  %v4837_v61 = vld [vmem:[%s5664_s5 + $0xe8] sm:$0xff]  ;;  %v4838_v62 = vld [vmem:[%s5664_s5 + $0xf8] sm:$0xff] }
 0x271   : > { %v1955_v9 = vpop.f32.mrf.mxu1  ;;  %v651_v0 = vld [vmem:[%s5689_s24 + $0x2c8] sm:$0xff] }
 0x272   : > { %3451 = vst [vmem:[%s5689_s24 + $0x228] sm:$0xff] %v3195_v3  ;;  %v3198_v10 = vadd.f32 %v1954_v4, %v634_v63  ;;  %v1956_v11 = vadd.f32 %v1955_v9, %v1506_v7  ;;  %v1510_v12 = vpop.f32.mrf.mxu0  ;;  %2311 = vmatmul.mubr.f32.gmra.mxu0 %v4823_v15  ;;  %v4839_v7 = vld [vmem:[%s5664_s5 + $0xe0] sm:$0xff] }
 0x273   : > { %v1959_v14 = vpop.f32.mrf.mxu1  ;;  %2760 = vmatmul.mubr.f32.gmra.mxu1 %v4824_v16  ;;  %2316 = vmatprep.mubr.f32.mxu0 %v4825_v19  ;;  %v658_v19 = vld [vmem:[%s5689_s24 + $0x300] sm:$0xff] }
 0x274   : > { %3454 = vst [vmem:[%s5689_s24 + $0x240] sm:$0xff] %v3198_v10  ;;  %v3199_v17 = vadd.f32 %v1956_v11, %v635_v8  ;;  %v1960_v18 = vadd.f32 %v1959_v14, %v1510_v12  ;;  %2765 = vmatprep.mubr.f32.mxu1 %v4826_v20  ;;  %v1512_v21 = vpop.f32.mrf.mxu0  ;;  %v4840_v8 = vld [vmem:[%s5664_s5 + $0xf0] sm:$0xff]  ;;  %v4841_v11 = vld [vmem:[%s5664_s5 + $0x108] sm:$0xff]  ;;  %v4842_v12 = vld [vmem:[%s5664_s5 + $0x118] sm:$0xff] }
 0x275   : > { %v1961_v23 = vpop.f32.mrf.mxu1  ;;  %v655_v14 = vld [vmem:[%s5689_s24 + $0x2e8] sm:$0xff] }
 0x276   : > { %3455 = vst [vmem:[%s5689_s24 + $0x248] sm:$0xff] %v3199_v17  ;;  %v3202_v24 = vadd.f32 %v1960_v18, %v638_v13  ;;  %v1962_v25 = vadd.f32 %v1961_v23, %v1512_v21  ;;  %v1516_v26 = vpop.f32.mrf.mxu0  ;;  %2317 = vmatmul.mubr.f32.gmra.mxu0 %v4827_v29  ;;  %v4843_v21 = vld [vmem:[%s5664_s5 + $0x100] sm:$0xff] }
 0x277   : > { %v1965_v28 = vpop.f32.mrf.mxu1  ;;  %2766 = vmatmul.mubr.f32.gmra.mxu1 %v4828_v30  ;;  %2322 = vmatprep.mubr.f32.mxu0 %v4829_v33  ;;  %v662_v33 = vld [vmem:[%s5689_s24 + $0x320] sm:$0xff] }
 0x278   : > { %3458 = vst [vmem:[%s5689_s24 + $0x260] sm:$0xff] %v3202_v24  ;;  %v3203_v31 = vadd.f32 %v1962_v25, %v639_v22  ;;  %v1966_v32 = vadd.f32 %v1965_v28, %v1516_v26  ;;  %2771 = vmatprep.mubr.f32.mxu1 %v4830_v34  ;;  %v1518_v35 = vpop.f32.mrf.mxu0  ;;  %v4844_v22 = vld [vmem:[%s5664_s5 + $0x110] sm:$0xff]  ;;  %v4845_v25 = vld [vmem:[%s5664_s5 + $0x128] sm:$0xff]  ;;  %v4846_v26 = vld [vmem:[%s5664_s5 + $0x138] sm:$0xff] }
 0x279   : > { %v1967_v37 = vpop.f32.mrf.mxu1  ;;  %v659_v28 = vld [vmem:[%s5689_s24 + $0x308] sm:$0xff] }
 0x27a   : > { %3459 = vst [vmem:[%s5689_s24 + $0x268] sm:$0xff] %v3203_v31  ;;  %v3206_v38 = vadd.f32 %v1966_v32, %v642_v27  ;;  %v1968_v39 = vadd.f32 %v1967_v37, %v1518_v35  ;;  %v1522_v40 = vpop.f32.mrf.mxu0  ;;  %2323 = vmatmul.mubr.f32.gmra.mxu0 %v4831_v43  ;;  %v4847_v35 = vld [vmem:[%s5664_s5 + $0x120] sm:$0xff] }
 0x27b   : > { %v1971_v42 = vpop.f32.mrf.mxu1  ;;  %2772 = vmatmul.mubr.f32.gmra.mxu1 %v4832_v44  ;;  %2328 = vmatprep.mubr.f32.mxu0 %v4833_v47  ;;  %v666_v47 = vld [vmem:[%s5689_s24 + $0x340] sm:$0xff] }
 0x27c   : > { %3462 = vst [vmem:[%s5689_s24 + $0x280] sm:$0xff] %v3206_v38  ;;  %v3207_v45 = vadd.f32 %v1968_v39, %v643_v36  ;;  %v1972_v46 = vadd.f32 %v1971_v42, %v1522_v40  ;;  %2777 = vmatprep.mubr.f32.mxu1 %v4834_v48  ;;  %v1524_v49 = vpop.f32.mrf.mxu0  ;;  %v4848_v36 = vld [vmem:[%s5664_s5 + $0x130] sm:$0xff]  ;;  %v4849_v39 = vld [vmem:[%s5664_s5 + $0x148] sm:$0xff]  ;;  %v4850_v40 = vld [vmem:[%s5664_s5 + $0x158] sm:$0xff] }
 0x27d   : > { %v1973_v51 = vpop.f32.mrf.mxu1  ;;  %v663_v42 = vld [vmem:[%s5689_s24 + $0x328] sm:$0xff] }
 0x27e   : > { %3463 = vst [vmem:[%s5689_s24 + $0x288] sm:$0xff] %v3207_v45  ;;  %v3210_v52 = vadd.f32 %v1972_v46, %v646_v41  ;;  %v1974_v53 = vadd.f32 %v1973_v51, %v1524_v49  ;;  %v1528_v54 = vpop.f32.mrf.mxu0  ;;  %2329 = vmatmul.mubr.f32.gmra.mxu0 %v4835_v57  ;;  %v4851_v49 = vld [vmem:[%s5664_s5 + $0x140] sm:$0xff] }
 0x27f   : > { %v1977_v56 = vpop.f32.mrf.mxu1  ;;  %2778 = vmatmul.mubr.f32.gmra.mxu1 %v4836_v58  ;;  %2334 = vmatprep.mubr.f32.mxu0 %v4837_v61  ;;  %v670_v61 = vld [vmem:[%s5689_s24 + $0x360] sm:$0xff] }
 0x280   : > { %3466 = vst [vmem:[%s5689_s24 + $0x2a0] sm:$0xff] %v3210_v52  ;;  %v3211_v59 = vadd.f32 %v1974_v53, %v647_v50  ;;  %v1978_v60 = vadd.f32 %v1977_v56, %v1528_v54  ;;  %2783 = vmatprep.mubr.f32.mxu1 %v4838_v62  ;;  %v1530_v63 = vpop.f32.mrf.mxu0  ;;  %v4852_v50 = vld [vmem:[%s5664_s5 + $0x150] sm:$0xff]  ;;  %v4853_v53 = vld [vmem:[%s5664_s5 + $0x168] sm:$0xff]  ;;  %v4854_v54 = vld [vmem:[%s5664_s5 + $0x178] sm:$0xff] }
 0x281   : > { %v1979_v1 = vpop.f32.mrf.mxu1  ;;  %v667_v56 = vld [vmem:[%s5689_s24 + $0x348] sm:$0xff] }
 0x282   : > { %3467 = vst [vmem:[%s5689_s24 + $0x2a8] sm:$0xff] %v3211_v59  ;;  %v3214_v2 = vadd.f32 %v1978_v60, %v650_v55  ;;  %v1980_v3 = vadd.f32 %v1979_v1, %v1530_v63  ;;  %v1534_v4 = vpop.f32.mrf.mxu0  ;;  %2335 = vmatmul.mubr.f32.gmra.mxu0 %v4839_v7  ;;  %v4855_v63 = vld [vmem:[%s5664_s5 + $0x160] sm:$0xff] }
 0x283   : > { %v1983_v6 = vpop.f32.mrf.mxu1  ;;  %2784 = vmatmul.mubr.f32.gmra.mxu1 %v4840_v8  ;;  %2340 = vmatprep.mubr.f32.mxu0 %v4841_v11  ;;  %v674_v11 = vld [vmem:[%s5689_s24 + $0x380] sm:$0xff] }
 0x284   : > { %3470 = vst [vmem:[%s5689_s24 + $0x2c0] sm:$0xff] %v3214_v2  ;;  %v3215_v9 = vadd.f32 %v1980_v3, %v651_v0  ;;  %v1984_v10 = vadd.f32 %v1983_v6, %v1534_v4  ;;  %2789 = vmatprep.mubr.f32.mxu1 %v4842_v12  ;;  %v1536_v13 = vpop.f32.mrf.mxu0  ;;  %v4856_v0 = vld [vmem:[%s5664_s5 + $0x170] sm:$0xff]  ;;  %v4857_v3 = vld [vmem:[%s5664_s5 + $0x188] sm:$0xff]  ;;  %v4858_v4 = vld [vmem:[%s5664_s5 + $0x198] sm:$0xff] }
 0x285   : > { %v1985_v15 = vpop.f32.mrf.mxu1  ;;  %v671_v6 = vld [vmem:[%s5689_s24 + $0x368] sm:$0xff] }
 0x286   : > { %3471 = vst [vmem:[%s5689_s24 + $0x2c8] sm:$0xff] %v3215_v9  ;;  %v3218_v16 = vadd.f32 %v1984_v10, %v654_v5  ;;  %v1986_v17 = vadd.f32 %v1985_v15, %v1536_v13  ;;  %v1540_v18 = vpop.f32.mrf.mxu0  ;;  %2341 = vmatmul.mubr.f32.gmra.mxu0 %v4843_v21  ;;  %v4859_v13 = vld [vmem:[%s5664_s5 + $0x180] sm:$0xff] }
 0x287   : > { %v1989_v20 = vpop.f32.mrf.mxu1  ;;  %2790 = vmatmul.mubr.f32.gmra.mxu1 %v4844_v22  ;;  %2346 = vmatprep.mubr.f32.mxu0 %v4845_v25  ;;  %v678_v25 = vld [vmem:[%s5689_s24 + $0x3a0] sm:$0xff] }
 0x288   : > { %3474 = vst [vmem:[%s5689_s24 + $0x2e0] sm:$0xff] %v3218_v16  ;;  %v3219_v23 = vadd.f32 %v1986_v17, %v655_v14  ;;  %v1990_v24 = vadd.f32 %v1989_v20, %v1540_v18  ;;  %2795 = vmatprep.mubr.f32.mxu1 %v4846_v26  ;;  %v1542_v27 = vpop.f32.mrf.mxu0  ;;  %v4860_v14 = vld [vmem:[%s5664_s5 + $0x190] sm:$0xff]  ;;  %v4861_v17 = vld [vmem:[%s5664_s5 + $0x1a8] sm:$0xff]  ;;  %v4862_v18 = vld [vmem:[%s5664_s5 + $0x1b8] sm:$0xff] }
 0x289   : > { %v1991_v29 = vpop.f32.mrf.mxu1  ;;  %v675_v20 = vld [vmem:[%s5689_s24 + $0x388] sm:$0xff] }
 0x28a   : > { %3475 = vst [vmem:[%s5689_s24 + $0x2e8] sm:$0xff] %v3219_v23  ;;  %v3222_v30 = vadd.f32 %v1990_v24, %v658_v19  ;;  %v1992_v31 = vadd.f32 %v1991_v29, %v1542_v27  ;;  %v1546_v32 = vpop.f32.mrf.mxu0  ;;  %2347 = vmatmul.mubr.f32.gmra.mxu0 %v4847_v35  ;;  %v4863_v27 = vld [vmem:[%s5664_s5 + $0x1a0] sm:$0xff] }
 0x28b   : > { %v1995_v34 = vpop.f32.mrf.mxu1  ;;  %2796 = vmatmul.mubr.f32.gmra.mxu1 %v4848_v36  ;;  %2352 = vmatprep.mubr.f32.mxu0 %v4849_v39  ;;  %v682_v39 = vld [vmem:[%s5689_s24 + $0x3c0] sm:$0xff] }
 0x28c   : > { %3478 = vst [vmem:[%s5689_s24 + $0x300] sm:$0xff] %v3222_v30  ;;  %v3223_v37 = vadd.f32 %v1992_v31, %v659_v28  ;;  %v1996_v38 = vadd.f32 %v1995_v34, %v1546_v32  ;;  %2801 = vmatprep.mubr.f32.mxu1 %v4850_v40  ;;  %v1548_v41 = vpop.f32.mrf.mxu0  ;;  %v4864_v28 = vld [vmem:[%s5664_s5 + $0x1b0] sm:$0xff]  ;;  %v4865_v31 = vld [vmem:[%s5664_s5 + $0x1c8] sm:$0xff]  ;;  %v4866_v32 = vld [vmem:[%s5664_s5 + $0x1d8] sm:$0xff] }
 0x28d   : > { %v1997_v43 = vpop.f32.mrf.mxu1  ;;  %v679_v34 = vld [vmem:[%s5689_s24 + $0x3a8] sm:$0xff] }
 0x28e   : > { %3479 = vst [vmem:[%s5689_s24 + $0x308] sm:$0xff] %v3223_v37  ;;  %v3226_v44 = vadd.f32 %v1996_v38, %v662_v33  ;;  %v1998_v45 = vadd.f32 %v1997_v43, %v1548_v41  ;;  %v1552_v46 = vpop.f32.mrf.mxu0  ;;  %2353 = vmatmul.mubr.f32.gmra.mxu0 %v4851_v49  ;;  %v4867_v41 = vld [vmem:[%s5664_s5 + $0x1c0] sm:$0xff] }
 0x28f   : > { %v2001_v48 = vpop.f32.mrf.mxu1  ;;  %2802 = vmatmul.mubr.f32.gmra.mxu1 %v4852_v50  ;;  %2358 = vmatprep.mubr.f32.mxu0 %v4853_v53  ;;  %v686_v53 = vld [vmem:[%s5689_s24 + $0x3e0] sm:$0xff] }
 0x290   : > { %3482 = vst [vmem:[%s5689_s24 + $0x320] sm:$0xff] %v3226_v44  ;;  %v3227_v51 = vadd.f32 %v1998_v45, %v663_v42  ;;  %v2002_v52 = vadd.f32 %v2001_v48, %v1552_v46  ;;  %2807 = vmatprep.mubr.f32.mxu1 %v4854_v54  ;;  %v1554_v55 = vpop.f32.mrf.mxu0  ;;  %v4868_v42 = vld [vmem:[%s5664_s5 + $0x1d0] sm:$0xff]  ;;  %v4869_v45 = vld [vmem:[%s5664_s5 + $0x1e8] sm:$0xff]  ;;  %v4870_v46 = vld [vmem:[%s5664_s5 + $0x1f8] sm:$0xff] }
 0x291   : > { %v2003_v57 = vpop.f32.mrf.mxu1  ;;  %v683_v48 = vld [vmem:[%s5689_s24 + $0x3c8] sm:$0xff] }
 0x292   : > { %3483 = vst [vmem:[%s5689_s24 + $0x328] sm:$0xff] %v3227_v51  ;;  %v3230_v58 = vadd.f32 %v2002_v52, %v666_v47  ;;  %v2004_v59 = vadd.f32 %v2003_v57, %v1554_v55  ;;  %v1558_v60 = vpop.f32.mrf.mxu0  ;;  %2359 = vmatmul.mubr.f32.gmra.mxu0 %v4855_v63  ;;  %v4871_v55 = vld [vmem:[%s5664_s5 + $0x1e0] sm:$0xff] }
 0x293   : > { %v2007_v62 = vpop.f32.mrf.mxu1  ;;  %2808 = vmatmul.mubr.f32.gmra.mxu1 %v4856_v0  ;;  %2364 = vmatprep.mubr.f32.mxu0 %v4857_v3  ;;  %v690_v3 = vld [vmem:[%s5689_s24 + $0x400] sm:$0xff] }
 0x294   : > { %3486 = vst [vmem:[%s5689_s24 + $0x340] sm:$0xff] %v3230_v58  ;;  %v3231_v1 = vadd.f32 %v2004_v59, %v667_v56  ;;  %v2008_v2 = vadd.f32 %v2007_v62, %v1558_v60  ;;  %2813 = vmatprep.mubr.f32.mxu1 %v4858_v4  ;;  %v1560_v5 = vpop.f32.mrf.mxu0  ;;  %v4872_v56 = vld [vmem:[%s5664_s5 + $0x1f0] sm:$0xff]  ;;  %v4873_v59 = vld [vmem:[%s5664_s5 + $0x208] sm:$0xff]  ;;  %v4874_v60 = vld [vmem:[%s5664_s5 + $0x218] sm:$0xff] }
 0x295   : > { %v2009_v7 = vpop.f32.mrf.mxu1  ;;  %v687_v62 = vld [vmem:[%s5689_s24 + $0x3e8] sm:$0xff] }
 0x296   : > { %3487 = vst [vmem:[%s5689_s24 + $0x348] sm:$0xff] %v3231_v1  ;;  %v3234_v8 = vadd.f32 %v2008_v2, %v670_v61  ;;  %v2010_v9 = vadd.f32 %v2009_v7, %v1560_v5  ;;  %v1564_v10 = vpop.f32.mrf.mxu0  ;;  %2365 = vmatmul.mubr.f32.gmra.mxu0 %v4859_v13  ;;  %v4875_v5 = vld [vmem:[%s5664_s5 + $0x200] sm:$0xff] }
 0x297   : > { %v2013_v12 = vpop.f32.mrf.mxu1  ;;  %2814 = vmatmul.mubr.f32.gmra.mxu1 %v4860_v14  ;;  %2370 = vmatprep.mubr.f32.mxu0 %v4861_v17  ;;  %v694_v17 = vld [vmem:[%s5689_s24 + $0x420] sm:$0xff] }
 0x298   : > { %3490 = vst [vmem:[%s5689_s24 + $0x360] sm:$0xff] %v3234_v8  ;;  %v3235_v15 = vadd.f32 %v2010_v9, %v671_v6  ;;  %v2014_v16 = vadd.f32 %v2013_v12, %v1564_v10  ;;  %2819 = vmatprep.mubr.f32.mxu1 %v4862_v18  ;;  %v1566_v19 = vpop.f32.mrf.mxu0  ;;  %v4876_v6 = vld [vmem:[%s5664_s5 + $0x210] sm:$0xff]  ;;  %v4877_v9 = vld [vmem:[%s5664_s5 + $0x228] sm:$0xff]  ;;  %v4878_v10 = vld [vmem:[%s5664_s5 + $0x238] sm:$0xff] }
 0x299   : > { %v2015_v21 = vpop.f32.mrf.mxu1  ;;  %v691_v12 = vld [vmem:[%s5689_s24 + $0x408] sm:$0xff] }
 0x29a   : > { %3491 = vst [vmem:[%s5689_s24 + $0x368] sm:$0xff] %v3235_v15  ;;  %v3238_v22 = vadd.f32 %v2014_v16, %v674_v11  ;;  %v2016_v23 = vadd.f32 %v2015_v21, %v1566_v19  ;;  %v1570_v24 = vpop.f32.mrf.mxu0  ;;  %2371 = vmatmul.mubr.f32.gmra.mxu0 %v4863_v27  ;;  %v4879_v19 = vld [vmem:[%s5664_s5 + $0x220] sm:$0xff] }
 0x29b   : > { %v2019_v26 = vpop.f32.mrf.mxu1  ;;  %2820 = vmatmul.mubr.f32.gmra.mxu1 %v4864_v28  ;;  %2376 = vmatprep.mubr.f32.mxu0 %v4865_v31  ;;  %v698_v31 = vld [vmem:[%s5689_s24 + $0x440] sm:$0xff] }
 0x29c   : > { %3494 = vst [vmem:[%s5689_s24 + $0x380] sm:$0xff] %v3238_v22  ;;  %v3239_v29 = vadd.f32 %v2016_v23, %v675_v20  ;;  %v2020_v30 = vadd.f32 %v2019_v26, %v1570_v24  ;;  %2825 = vmatprep.mubr.f32.mxu1 %v4866_v32  ;;  %v1572_v33 = vpop.f32.mrf.mxu0  ;;  %v4880_v20 = vld [vmem:[%s5664_s5 + $0x230] sm:$0xff]  ;;  %v4881_v23 = vld [vmem:[%s5664_s5 + $0x248] sm:$0xff]  ;;  %v4882_v24 = vld [vmem:[%s5664_s5 + $0x258] sm:$0xff] }
 0x29d   : > { %v2021_v35 = vpop.f32.mrf.mxu1  ;;  %v695_v26 = vld [vmem:[%s5689_s24 + $0x428] sm:$0xff] }
 0x29e   : > { %3495 = vst [vmem:[%s5689_s24 + $0x388] sm:$0xff] %v3239_v29  ;;  %v3242_v36 = vadd.f32 %v2020_v30, %v678_v25  ;;  %v2022_v37 = vadd.f32 %v2021_v35, %v1572_v33  ;;  %v1576_v38 = vpop.f32.mrf.mxu0  ;;  %2377 = vmatmul.mubr.f32.gmra.mxu0 %v4867_v41  ;;  %v4883_v33 = vld [vmem:[%s5664_s5 + $0x240] sm:$0xff] }
 0x29f   : > { %v2025_v40 = vpop.f32.mrf.mxu1  ;;  %2826 = vmatmul.mubr.f32.gmra.mxu1 %v4868_v42  ;;  %2382 = vmatprep.mubr.f32.mxu0 %v4869_v45  ;;  %v702_v45 = vld [vmem:[%s5689_s24 + $0x460] sm:$0xff] }
 0x2a0   : > { %3498 = vst [vmem:[%s5689_s24 + $0x3a0] sm:$0xff] %v3242_v36  ;;  %v3243_v43 = vadd.f32 %v2022_v37, %v679_v34  ;;  %v2026_v44 = vadd.f32 %v2025_v40, %v1576_v38  ;;  %2831 = vmatprep.mubr.f32.mxu1 %v4870_v46  ;;  %v1578_v47 = vpop.f32.mrf.mxu0  ;;  %v4884_v34 = vld [vmem:[%s5664_s5 + $0x250] sm:$0xff]  ;;  %v4885_v37 = vld [vmem:[%s5664_s5 + $0x268] sm:$0xff]  ;;  %v4886_v38 = vld [vmem:[%s5664_s5 + $0x278] sm:$0xff] }
 0x2a1   : > { %v2027_v49 = vpop.f32.mrf.mxu1  ;;  %v699_v40 = vld [vmem:[%s5689_s24 + $0x448] sm:$0xff] }
 0x2a2   : > { %3499 = vst [vmem:[%s5689_s24 + $0x3a8] sm:$0xff] %v3243_v43  ;;  %v3246_v50 = vadd.f32 %v2026_v44, %v682_v39  ;;  %v2028_v51 = vadd.f32 %v2027_v49, %v1578_v47  ;;  %v1582_v52 = vpop.f32.mrf.mxu0  ;;  %2383 = vmatmul.mubr.f32.gmra.mxu0 %v4871_v55  ;;  %v4887_v47 = vld [vmem:[%s5664_s5 + $0x260] sm:$0xff] }
 0x2a3   : > { %v2031_v54 = vpop.f32.mrf.mxu1  ;;  %2832 = vmatmul.mubr.f32.gmra.mxu1 %v4872_v56  ;;  %2388 = vmatprep.mubr.f32.mxu0 %v4873_v59  ;;  %v706_v59 = vld [vmem:[%s5689_s24 + $0x480] sm:$0xff] }
 0x2a4   : > { %3502 = vst [vmem:[%s5689_s24 + $0x3c0] sm:$0xff] %v3246_v50  ;;  %v3247_v57 = vadd.f32 %v2028_v51, %v683_v48  ;;  %v2032_v58 = vadd.f32 %v2031_v54, %v1582_v52  ;;  %2837 = vmatprep.mubr.f32.mxu1 %v4874_v60  ;;  %v1584_v61 = vpop.f32.mrf.mxu0  ;;  %v4888_v48 = vld [vmem:[%s5664_s5 + $0x270] sm:$0xff]  ;;  %v4889_v51 = vld [vmem:[%s5664_s5 + $0x288] sm:$0xff]  ;;  %v4890_v52 = vld [vmem:[%s5664_s5 + $0x298] sm:$0xff] }
 0x2a5   : > { %v2033_v63 = vpop.f32.mrf.mxu1  ;;  %v703_v54 = vld [vmem:[%s5689_s24 + $0x468] sm:$0xff] }
 0x2a6   : > { %3503 = vst [vmem:[%s5689_s24 + $0x3c8] sm:$0xff] %v3247_v57  ;;  %v3250_v0 = vadd.f32 %v2032_v58, %v686_v53  ;;  %v2034_v1 = vadd.f32 %v2033_v63, %v1584_v61  ;;  %v1588_v2 = vpop.f32.mrf.mxu0  ;;  %2389 = vmatmul.mubr.f32.gmra.mxu0 %v4875_v5  ;;  %v4891_v61 = vld [vmem:[%s5664_s5 + $0x280] sm:$0xff] }
 0x2a7   : > { %v2037_v4 = vpop.f32.mrf.mxu1  ;;  %2838 = vmatmul.mubr.f32.gmra.mxu1 %v4876_v6  ;;  %2394 = vmatprep.mubr.f32.mxu0 %v4877_v9  ;;  %v710_v9 = vld [vmem:[%s5689_s24 + $0x4a0] sm:$0xff] }
 0x2a8   : > { %3506 = vst [vmem:[%s5689_s24 + $0x3e0] sm:$0xff] %v3250_v0  ;;  %v3251_v7 = vadd.f32 %v2034_v1, %v687_v62  ;;  %v2038_v8 = vadd.f32 %v2037_v4, %v1588_v2  ;;  %2843 = vmatprep.mubr.f32.mxu1 %v4878_v10  ;;  %v1590_v11 = vpop.f32.mrf.mxu0  ;;  %v4892_v62 = vld [vmem:[%s5664_s5 + $0x290] sm:$0xff]  ;;  %v4893_v1 = vld [vmem:[%s5664_s5 + $0x2a8] sm:$0xff]  ;;  %v4894_v2 = vld [vmem:[%s5664_s5 + $0x2b8] sm:$0xff] }
 0x2a9   : > { %v2039_v13 = vpop.f32.mrf.mxu1  ;;  %v707_v4 = vld [vmem:[%s5689_s24 + $0x488] sm:$0xff] }
 0x2aa   : > { %3507 = vst [vmem:[%s5689_s24 + $0x3e8] sm:$0xff] %v3251_v7  ;;  %v3254_v14 = vadd.f32 %v2038_v8, %v690_v3  ;;  %v2040_v15 = vadd.f32 %v2039_v13, %v1590_v11  ;;  %v1594_v16 = vpop.f32.mrf.mxu0  ;;  %2395 = vmatmul.mubr.f32.gmra.mxu0 %v4879_v19  ;;  %v4895_v11 = vld [vmem:[%s5664_s5 + $0x2a0] sm:$0xff] }
 0x2ab   : > { %v2043_v18 = vpop.f32.mrf.mxu1  ;;  %2844 = vmatmul.mubr.f32.gmra.mxu1 %v4880_v20  ;;  %2400 = vmatprep.mubr.f32.mxu0 %v4881_v23  ;;  %v714_v23 = vld [vmem:[%s5689_s24 + $0x4c0] sm:$0xff] }
 0x2ac   : > { %3510 = vst [vmem:[%s5689_s24 + $0x400] sm:$0xff] %v3254_v14  ;;  %v3255_v21 = vadd.f32 %v2040_v15, %v691_v12  ;;  %v2044_v22 = vadd.f32 %v2043_v18, %v1594_v16  ;;  %2849 = vmatprep.mubr.f32.mxu1 %v4882_v24  ;;  %v1596_v25 = vpop.f32.mrf.mxu0  ;;  %v4896_v12 = vld [vmem:[%s5664_s5 + $0x2b0] sm:$0xff]  ;;  %v4897_v15 = vld [vmem:[%s5664_s5 + $0x2c8] sm:$0xff]  ;;  %v4898_v16 = vld [vmem:[%s5664_s5 + $0x2d8] sm:$0xff] }
 0x2ad   : > { %v2045_v27 = vpop.f32.mrf.mxu1  ;;  %v711_v18 = vld [vmem:[%s5689_s24 + $0x4a8] sm:$0xff] }
 0x2ae   : > { %3511 = vst [vmem:[%s5689_s24 + $0x408] sm:$0xff] %v3255_v21  ;;  %v3258_v28 = vadd.f32 %v2044_v22, %v694_v17  ;;  %v2046_v29 = vadd.f32 %v2045_v27, %v1596_v25  ;;  %v1600_v30 = vpop.f32.mrf.mxu0  ;;  %2401 = vmatmul.mubr.f32.gmra.mxu0 %v4883_v33  ;;  %v4899_v25 = vld [vmem:[%s5664_s5 + $0x2c0] sm:$0xff] }
 0x2af   : > { %v2049_v32 = vpop.f32.mrf.mxu1  ;;  %2850 = vmatmul.mubr.f32.gmra.mxu1 %v4884_v34  ;;  %2406 = vmatprep.mubr.f32.mxu0 %v4885_v37  ;;  %v718_v37 = vld [vmem:[%s5689_s24 + $0x4e0] sm:$0xff] }
 0x2b0   : > { %3514 = vst [vmem:[%s5689_s24 + $0x420] sm:$0xff] %v3258_v28  ;;  %v3259_v35 = vadd.f32 %v2046_v29, %v695_v26  ;;  %v2050_v36 = vadd.f32 %v2049_v32, %v1600_v30  ;;  %2855 = vmatprep.mubr.f32.mxu1 %v4886_v38  ;;  %v1602_v39 = vpop.f32.mrf.mxu0  ;;  %v4900_v26 = vld [vmem:[%s5664_s5 + $0x2d0] sm:$0xff]  ;;  %v4901_v29 = vld [vmem:[%s5664_s5 + $0x2e8] sm:$0xff]  ;;  %v4902_v30 = vld [vmem:[%s5664_s5 + $0x2f8] sm:$0xff] }
 0x2b1   : > { %v2051_v41 = vpop.f32.mrf.mxu1  ;;  %v715_v32 = vld [vmem:[%s5689_s24 + $0x4c8] sm:$0xff] }
 0x2b2   : > { %3515 = vst [vmem:[%s5689_s24 + $0x428] sm:$0xff] %v3259_v35  ;;  %v3262_v42 = vadd.f32 %v2050_v36, %v698_v31  ;;  %v2052_v43 = vadd.f32 %v2051_v41, %v1602_v39  ;;  %v1606_v44 = vpop.f32.mrf.mxu0  ;;  %2407 = vmatmul.mubr.f32.gmra.mxu0 %v4887_v47  ;;  %v4903_v39 = vld [vmem:[%s5664_s5 + $0x2e0] sm:$0xff] }
 0x2b3   : > { %v2055_v46 = vpop.f32.mrf.mxu1  ;;  %2856 = vmatmul.mubr.f32.gmra.mxu1 %v4888_v48  ;;  %2412 = vmatprep.mubr.f32.mxu0 %v4889_v51  ;;  %v722_v51 = vld [vmem:[%s5689_s24 + $0x500] sm:$0xff] }
 0x2b4   : > { %3518 = vst [vmem:[%s5689_s24 + $0x440] sm:$0xff] %v3262_v42  ;;  %v3263_v49 = vadd.f32 %v2052_v43, %v699_v40  ;;  %v2056_v50 = vadd.f32 %v2055_v46, %v1606_v44  ;;  %2861 = vmatprep.mubr.f32.mxu1 %v4890_v52  ;;  %v1608_v53 = vpop.f32.mrf.mxu0  ;;  %v4904_v40 = vld [vmem:[%s5664_s5 + $0x2f0] sm:$0xff]  ;;  %v4905_v43 = vld [vmem:[%s5664_s5 + $0x308] sm:$0xff]  ;;  %v4906_v44 = vld [vmem:[%s5664_s5 + $0x318] sm:$0xff] }
 0x2b5   : > { %v2057_v55 = vpop.f32.mrf.mxu1  ;;  %v719_v46 = vld [vmem:[%s5689_s24 + $0x4e8] sm:$0xff] }
 0x2b6   : > { %3519 = vst [vmem:[%s5689_s24 + $0x448] sm:$0xff] %v3263_v49  ;;  %v3266_v56 = vadd.f32 %v2056_v50, %v702_v45  ;;  %v2058_v57 = vadd.f32 %v2057_v55, %v1608_v53  ;;  %v1612_v58 = vpop.f32.mrf.mxu0  ;;  %2413 = vmatmul.mubr.f32.gmra.mxu0 %v4891_v61  ;;  %v4907_v53 = vld [vmem:[%s5664_s5 + $0x300] sm:$0xff] }
 0x2b7   : > { %v2061_v60 = vpop.f32.mrf.mxu1  ;;  %2862 = vmatmul.mubr.f32.gmra.mxu1 %v4892_v62  ;;  %2418 = vmatprep.mubr.f32.mxu0 %v4893_v1  ;;  %v726_v1 = vld [vmem:[%s5689_s24 + $0x520] sm:$0xff] }
 0x2b8   : > { %3522 = vst [vmem:[%s5689_s24 + $0x460] sm:$0xff] %v3266_v56  ;;  %v3267_v63 = vadd.f32 %v2058_v57, %v703_v54  ;;  %v2062_v0 = vadd.f32 %v2061_v60, %v1612_v58  ;;  %2867 = vmatprep.mubr.f32.mxu1 %v4894_v2  ;;  %v1614_v3 = vpop.f32.mrf.mxu0  ;;  %v4908_v54 = vld [vmem:[%s5664_s5 + $0x310] sm:$0xff]  ;;  %v4909_v57 = vld [vmem:[%s5664_s5 + $0x328] sm:$0xff]  ;;  %v4910_v58 = vld [vmem:[%s5664_s5 + $0x338] sm:$0xff] }
 0x2b9   : > { %v2063_v5 = vpop.f32.mrf.mxu1  ;;  %v723_v60 = vld [vmem:[%s5689_s24 + $0x508] sm:$0xff] }
 0x2ba   : > { %3523 = vst [vmem:[%s5689_s24 + $0x468] sm:$0xff] %v3267_v63  ;;  %v3270_v6 = vadd.f32 %v2062_v0, %v706_v59  ;;  %v2064_v7 = vadd.f32 %v2063_v5, %v1614_v3  ;;  %v1618_v8 = vpop.f32.mrf.mxu0  ;;  %2419 = vmatmul.mubr.f32.gmra.mxu0 %v4895_v11  ;;  %v4911_v3 = vld [vmem:[%s5664_s5 + $0x320] sm:$0xff] }
 0x2bb   : > { %v2067_v10 = vpop.f32.mrf.mxu1  ;;  %2868 = vmatmul.mubr.f32.gmra.mxu1 %v4896_v12  ;;  %2424 = vmatprep.mubr.f32.mxu0 %v4897_v15  ;;  %v730_v15 = vld [vmem:[%s5689_s24 + $0x540] sm:$0xff] }
 0x2bc   : > { %3526 = vst [vmem:[%s5689_s24 + $0x480] sm:$0xff] %v3270_v6  ;;  %v3271_v13 = vadd.f32 %v2064_v7, %v707_v4  ;;  %v2068_v14 = vadd.f32 %v2067_v10, %v1618_v8  ;;  %2873 = vmatprep.mubr.f32.mxu1 %v4898_v16  ;;  %v1620_v17 = vpop.f32.mrf.mxu0  ;;  %v4912_v4 = vld [vmem:[%s5664_s5 + $0x330] sm:$0xff]  ;;  %v4913_v7 = vld [vmem:[%s5664_s5 + $0x348] sm:$0xff]  ;;  %v4914_v8 = vld [vmem:[%s5664_s5 + $0x358] sm:$0xff] }
 0x2bd   : > { %v2069_v19 = vpop.f32.mrf.mxu1  ;;  %v727_v10 = vld [vmem:[%s5689_s24 + $0x528] sm:$0xff] }
 0x2be   : > { %3527 = vst [vmem:[%s5689_s24 + $0x488] sm:$0xff] %v3271_v13  ;;  %v3274_v20 = vadd.f32 %v2068_v14, %v710_v9  ;;  %v2070_v21 = vadd.f32 %v2069_v19, %v1620_v17  ;;  %v1624_v22 = vpop.f32.mrf.mxu0  ;;  %2425 = vmatmul.mubr.f32.gmra.mxu0 %v4899_v25  ;;  %v4915_v17 = vld [vmem:[%s5664_s5 + $0x340] sm:$0xff] }
 0x2bf   : > { %v2073_v24 = vpop.f32.mrf.mxu1  ;;  %2874 = vmatmul.mubr.f32.gmra.mxu1 %v4900_v26  ;;  %2430 = vmatprep.mubr.f32.mxu0 %v4901_v29  ;;  %v734_v29 = vld [vmem:[%s5689_s24 + $0x560] sm:$0xff] }
 0x2c0   : > { %3530 = vst [vmem:[%s5689_s24 + $0x4a0] sm:$0xff] %v3274_v20  ;;  %v3275_v27 = vadd.f32 %v2070_v21, %v711_v18  ;;  %v2074_v28 = vadd.f32 %v2073_v24, %v1624_v22  ;;  %2879 = vmatprep.mubr.f32.mxu1 %v4902_v30  ;;  %v1626_v31 = vpop.f32.mrf.mxu0  ;;  %v4916_v18 = vld [vmem:[%s5664_s5 + $0x350] sm:$0xff]  ;;  %v4917_v21 = vld [vmem:[%s5664_s5 + $0x368] sm:$0xff]  ;;  %v4918_v22 = vld [vmem:[%s5664_s5 + $0x378] sm:$0xff] }
 0x2c1   : > { %v2075_v33 = vpop.f32.mrf.mxu1  ;;  %v731_v24 = vld [vmem:[%s5689_s24 + $0x548] sm:$0xff] }
 0x2c2   : > { %3531 = vst [vmem:[%s5689_s24 + $0x4a8] sm:$0xff] %v3275_v27  ;;  %v3278_v34 = vadd.f32 %v2074_v28, %v714_v23  ;;  %v2076_v35 = vadd.f32 %v2075_v33, %v1626_v31  ;;  %v1630_v36 = vpop.f32.mrf.mxu0  ;;  %2431 = vmatmul.mubr.f32.gmra.mxu0 %v4903_v39  ;;  %v4919_v31 = vld [vmem:[%s5664_s5 + $0x360] sm:$0xff] }
 0x2c3   : > { %v2079_v38 = vpop.f32.mrf.mxu1  ;;  %2880 = vmatmul.mubr.f32.gmra.mxu1 %v4904_v40  ;;  %2436 = vmatprep.mubr.f32.mxu0 %v4905_v43  ;;  %v738_v43 = vld [vmem:[%s5689_s24 + $0x580] sm:$0xff] }
 0x2c4   : > { %3534 = vst [vmem:[%s5689_s24 + $0x4c0] sm:$0xff] %v3278_v34  ;;  %v3279_v41 = vadd.f32 %v2076_v35, %v715_v32  ;;  %v2080_v42 = vadd.f32 %v2079_v38, %v1630_v36  ;;  %2885 = vmatprep.mubr.f32.mxu1 %v4906_v44  ;;  %v1632_v45 = vpop.f32.mrf.mxu0  ;;  %v4920_v32 = vld [vmem:[%s5664_s5 + $0x370] sm:$0xff]  ;;  %v4921_v35 = vld [vmem:[%s5664_s5 + $0x388] sm:$0xff]  ;;  %v4922_v36 = vld [vmem:[%s5664_s5 + $0x398] sm:$0xff] }
 0x2c5   : > { %v2081_v47 = vpop.f32.mrf.mxu1  ;;  %v735_v38 = vld [vmem:[%s5689_s24 + $0x568] sm:$0xff] }
 0x2c6   : > { %3535 = vst [vmem:[%s5689_s24 + $0x4c8] sm:$0xff] %v3279_v41  ;;  %v3282_v48 = vadd.f32 %v2080_v42, %v718_v37  ;;  %v2082_v49 = vadd.f32 %v2081_v47, %v1632_v45  ;;  %v1636_v50 = vpop.f32.mrf.mxu0  ;;  %2437 = vmatmul.mubr.f32.gmra.mxu0 %v4907_v53  ;;  %v4923_v45 = vld [vmem:[%s5664_s5 + $0x380] sm:$0xff] }
 0x2c7   : > { %v2085_v52 = vpop.f32.mrf.mxu1  ;;  %2886 = vmatmul.mubr.f32.gmra.mxu1 %v4908_v54  ;;  %2442 = vmatprep.mubr.f32.mxu0 %v4909_v57  ;;  %v742_v57 = vld [vmem:[%s5689_s24 + $0x5a0] sm:$0xff] }
 0x2c8   : > { %3538 = vst [vmem:[%s5689_s24 + $0x4e0] sm:$0xff] %v3282_v48  ;;  %v3283_v55 = vadd.f32 %v2082_v49, %v719_v46  ;;  %v2086_v56 = vadd.f32 %v2085_v52, %v1636_v50  ;;  %2891 = vmatprep.mubr.f32.mxu1 %v4910_v58  ;;  %v1638_v59 = vpop.f32.mrf.mxu0  ;;  %v4924_v46 = vld [vmem:[%s5664_s5 + $0x390] sm:$0xff]  ;;  %v4925_v49 = vld [vmem:[%s5664_s5 + $0x3a8] sm:$0xff]  ;;  %v4926_v50 = vld [vmem:[%s5664_s5 + $0x3b8] sm:$0xff] }
 0x2c9   : > { %v2087_v61 = vpop.f32.mrf.mxu1  ;;  %v739_v52 = vld [vmem:[%s5689_s24 + $0x588] sm:$0xff] }
 0x2ca   : > { %3539 = vst [vmem:[%s5689_s24 + $0x4e8] sm:$0xff] %v3283_v55  ;;  %v3286_v62 = vadd.f32 %v2086_v56, %v722_v51  ;;  %v2088_v63 = vadd.f32 %v2087_v61, %v1638_v59  ;;  %v1642_v0 = vpop.f32.mrf.mxu0  ;;  %2443 = vmatmul.mubr.f32.gmra.mxu0 %v4911_v3  ;;  %v4927_v59 = vld [vmem:[%s5664_s5 + $0x3a0] sm:$0xff] }
 0x2cb   : > { %v2091_v2 = vpop.f32.mrf.mxu1  ;;  %2892 = vmatmul.mubr.f32.gmra.mxu1 %v4912_v4  ;;  %2448 = vmatprep.mubr.f32.mxu0 %v4913_v7  ;;  %v746_v7 = vld [vmem:[%s5689_s24 + $0x5c0] sm:$0xff] }
 0x2cc   : > { %3542 = vst [vmem:[%s5689_s24 + $0x500] sm:$0xff] %v3286_v62  ;;  %v3287_v5 = vadd.f32 %v2088_v63, %v723_v60  ;;  %v2092_v6 = vadd.f32 %v2091_v2, %v1642_v0  ;;  %2897 = vmatprep.mubr.f32.mxu1 %v4914_v8  ;;  %v1644_v9 = vpop.f32.mrf.mxu0  ;;  %v4928_v60 = vld [vmem:[%s5664_s5 + $0x3b0] sm:$0xff]  ;;  %v4929_v63 = vld [vmem:[%s5664_s5 + $0x3c8] sm:$0xff]  ;;  %v4930_v0 = vld [vmem:[%s5664_s5 + $0x3d8] sm:$0xff] }
 0x2cd   : > { %v2093_v11 = vpop.f32.mrf.mxu1  ;;  %v743_v2 = vld [vmem:[%s5689_s24 + $0x5a8] sm:$0xff] }
 0x2ce   : > { %3543 = vst [vmem:[%s5689_s24 + $0x508] sm:$0xff] %v3287_v5  ;;  %v3290_v12 = vadd.f32 %v2092_v6, %v726_v1  ;;  %v2094_v13 = vadd.f32 %v2093_v11, %v1644_v9  ;;  %v1648_v14 = vpop.f32.mrf.mxu0  ;;  %2449 = vmatmul.mubr.f32.gmra.mxu0 %v4915_v17  ;;  %v4931_v9 = vld [vmem:[%s5664_s5 + $0x3c0] sm:$0xff] }
 0x2cf   : > { %v2097_v16 = vpop.f32.mrf.mxu1  ;;  %2898 = vmatmul.mubr.f32.gmra.mxu1 %v4916_v18  ;;  %2454 = vmatprep.mubr.f32.mxu0 %v4917_v21  ;;  %v750_v21 = vld [vmem:[%s5689_s24 + $0x5e0] sm:$0xff] }
 0x2d0   : > { %3546 = vst [vmem:[%s5689_s24 + $0x520] sm:$0xff] %v3290_v12  ;;  %v3291_v19 = vadd.f32 %v2094_v13, %v727_v10  ;;  %v2098_v20 = vadd.f32 %v2097_v16, %v1648_v14  ;;  %2903 = vmatprep.mubr.f32.mxu1 %v4918_v22  ;;  %v1650_v23 = vpop.f32.mrf.mxu0  ;;  %v4932_v10 = vld [vmem:[%s5664_s5 + $0x3d0] sm:$0xff]  ;;  %v4933_v13 = vld [vmem:[%s5664_s5 + $0x3e8] sm:$0xff]  ;;  %v4934_v14 = vld [vmem:[%s5664_s5 + $0x3f8] sm:$0xff] }
 0x2d1   : > { %v2099_v25 = vpop.f32.mrf.mxu1  ;;  %v747_v16 = vld [vmem:[%s5689_s24 + $0x5c8] sm:$0xff] }
 0x2d2   : > { %3547 = vst [vmem:[%s5689_s24 + $0x528] sm:$0xff] %v3291_v19  ;;  %v3294_v26 = vadd.f32 %v2098_v20, %v730_v15  ;;  %v2100_v27 = vadd.f32 %v2099_v25, %v1650_v23  ;;  %v1654_v28 = vpop.f32.mrf.mxu0  ;;  %2455 = vmatmul.mubr.f32.gmra.mxu0 %v4919_v31  ;;  %v4935_v23 = vld [vmem:[%s5664_s5 + $0x3e0] sm:$0xff] }
 0x2d3   : > { %v2103_v30 = vpop.f32.mrf.mxu1  ;;  %2904 = vmatmul.mubr.f32.gmra.mxu1 %v4920_v32  ;;  %2460 = vmatprep.mubr.f32.mxu0 %v4921_v35  ;;  %v754_v35 = vld [vmem:[%s5689_s24 + $0x600] sm:$0xff] }
 0x2d4   : > { %3550 = vst [vmem:[%s5689_s24 + $0x540] sm:$0xff] %v3294_v26  ;;  %v3295_v33 = vadd.f32 %v2100_v27, %v731_v24  ;;  %v2104_v34 = vadd.f32 %v2103_v30, %v1654_v28  ;;  %2909 = vmatprep.mubr.f32.mxu1 %v4922_v36  ;;  %v1656_v37 = vpop.f32.mrf.mxu0  ;;  %v4936_v24 = vld [vmem:[%s5664_s5 + $0x3f0] sm:$0xff]  ;;  %v4937_v27 = vld [vmem:[%s5664_s5 + $0x408] sm:$0xff]  ;;  %v4938_v28 = vld [vmem:[%s5664_s5 + $0x418] sm:$0xff] }
 0x2d5   : > { %v2105_v39 = vpop.f32.mrf.mxu1  ;;  %v751_v30 = vld [vmem:[%s5689_s24 + $0x5e8] sm:$0xff] }
 0x2d6   : > { %3551 = vst [vmem:[%s5689_s24 + $0x548] sm:$0xff] %v3295_v33  ;;  %v3298_v40 = vadd.f32 %v2104_v34, %v734_v29  ;;  %v2106_v41 = vadd.f32 %v2105_v39, %v1656_v37  ;;  %v1660_v42 = vpop.f32.mrf.mxu0  ;;  %2461 = vmatmul.mubr.f32.gmra.mxu0 %v4923_v45  ;;  %v4939_v37 = vld [vmem:[%s5664_s5 + $0x400] sm:$0xff] }
 0x2d7   : > { %v2109_v44 = vpop.f32.mrf.mxu1  ;;  %2910 = vmatmul.mubr.f32.gmra.mxu1 %v4924_v46  ;;  %2466 = vmatprep.mubr.f32.mxu0 %v4925_v49  ;;  %v758_v49 = vld [vmem:[%s5689_s24 + $0x620] sm:$0xff] }
 0x2d8   : > { %3554 = vst [vmem:[%s5689_s24 + $0x560] sm:$0xff] %v3298_v40  ;;  %v3299_v47 = vadd.f32 %v2106_v41, %v735_v38  ;;  %v2110_v48 = vadd.f32 %v2109_v44, %v1660_v42  ;;  %2915 = vmatprep.mubr.f32.mxu1 %v4926_v50  ;;  %v1662_v51 = vpop.f32.mrf.mxu0  ;;  %v4940_v38 = vld [vmem:[%s5664_s5 + $0x410] sm:$0xff]  ;;  %v4941_v41 = vld [vmem:[%s5664_s5 + $0x428] sm:$0xff]  ;;  %v4942_v42 = vld [vmem:[%s5664_s5 + $0x438] sm:$0xff] }
 0x2d9   : > { %v2111_v53 = vpop.f32.mrf.mxu1  ;;  %v755_v44 = vld [vmem:[%s5689_s24 + $0x608] sm:$0xff] }
 0x2da   : > { %3555 = vst [vmem:[%s5689_s24 + $0x568] sm:$0xff] %v3299_v47  ;;  %v3302_v54 = vadd.f32 %v2110_v48, %v738_v43  ;;  %v2112_v55 = vadd.f32 %v2111_v53, %v1662_v51  ;;  %v1666_v56 = vpop.f32.mrf.mxu0  ;;  %2467 = vmatmul.mubr.f32.gmra.mxu0 %v4927_v59  ;;  %v4943_v51 = vld [vmem:[%s5664_s5 + $0x420] sm:$0xff] }
 0x2db   : > { %v2115_v58 = vpop.f32.mrf.mxu1  ;;  %2916 = vmatmul.mubr.f32.gmra.mxu1 %v4928_v60  ;;  %2472 = vmatprep.mubr.f32.mxu0 %v4929_v63  ;;  %v762_v63 = vld [vmem:[%s5689_s24 + $0x640] sm:$0xff] }
 0x2dc   : > { %3558 = vst [vmem:[%s5689_s24 + $0x580] sm:$0xff] %v3302_v54  ;;  %v3303_v61 = vadd.f32 %v2112_v55, %v739_v52  ;;  %v2116_v62 = vadd.f32 %v2115_v58, %v1666_v56  ;;  %2921 = vmatprep.mubr.f32.mxu1 %v4930_v0  ;;  %v1668_v1 = vpop.f32.mrf.mxu0  ;;  %v4944_v52 = vld [vmem:[%s5664_s5 + $0x430] sm:$0xff]  ;;  %v4945_v55 = vld [vmem:[%s5664_s5 + $0x448] sm:$0xff]  ;;  %v4946_v56 = vld [vmem:[%s5664_s5 + $0x458] sm:$0xff] }
 0x2dd   : > { %v2117_v3 = vpop.f32.mrf.mxu1  ;;  %v759_v58 = vld [vmem:[%s5689_s24 + $0x628] sm:$0xff] }
 0x2de   : > { %3559 = vst [vmem:[%s5689_s24 + $0x588] sm:$0xff] %v3303_v61  ;;  %v3306_v4 = vadd.f32 %v2116_v62, %v742_v57  ;;  %v2118_v5 = vadd.f32 %v2117_v3, %v1668_v1  ;;  %v1672_v6 = vpop.f32.mrf.mxu0  ;;  %2473 = vmatmul.mubr.f32.gmra.mxu0 %v4931_v9  ;;  %v4947_v1 = vld [vmem:[%s5664_s5 + $0x440] sm:$0xff] }
 0x2df   : > { %v2121_v8 = vpop.f32.mrf.mxu1  ;;  %2922 = vmatmul.mubr.f32.gmra.mxu1 %v4932_v10  ;;  %2478 = vmatprep.mubr.f32.mxu0 %v4933_v13  ;;  %v766_v13 = vld [vmem:[%s5689_s24 + $0x660] sm:$0xff] }
 0x2e0   : > { %3562 = vst [vmem:[%s5689_s24 + $0x5a0] sm:$0xff] %v3306_v4  ;;  %v3307_v11 = vadd.f32 %v2118_v5, %v743_v2  ;;  %v2122_v12 = vadd.f32 %v2121_v8, %v1672_v6  ;;  %2927 = vmatprep.mubr.f32.mxu1 %v4934_v14  ;;  %v1674_v15 = vpop.f32.mrf.mxu0  ;;  %v4948_v2 = vld [vmem:[%s5664_s5 + $0x450] sm:$0xff]  ;;  %v4949_v5 = vld [vmem:[%s5664_s5 + $0x468] sm:$0xff]  ;;  %v4950_v6 = vld [vmem:[%s5664_s5 + $0x478] sm:$0xff] }
 0x2e1   : > { %v2123_v17 = vpop.f32.mrf.mxu1  ;;  %v763_v8 = vld [vmem:[%s5689_s24 + $0x648] sm:$0xff] }
 0x2e2   : > { %3563 = vst [vmem:[%s5689_s24 + $0x5a8] sm:$0xff] %v3307_v11  ;;  %v3310_v18 = vadd.f32 %v2122_v12, %v746_v7  ;;  %v2124_v19 = vadd.f32 %v2123_v17, %v1674_v15  ;;  %v1678_v20 = vpop.f32.mrf.mxu0  ;;  %2479 = vmatmul.mubr.f32.gmra.mxu0 %v4935_v23  ;;  %v4951_v15 = vld [vmem:[%s5664_s5 + $0x460] sm:$0xff] }
 0x2e3   : > { %v2127_v22 = vpop.f32.mrf.mxu1  ;;  %2928 = vmatmul.mubr.f32.gmra.mxu1 %v4936_v24  ;;  %2484 = vmatprep.mubr.f32.mxu0 %v4937_v27  ;;  %v770_v27 = vld [vmem:[%s5689_s24 + $0x680] sm:$0xff] }
 0x2e4   : > { %3566 = vst [vmem:[%s5689_s24 + $0x5c0] sm:$0xff] %v3310_v18  ;;  %v3311_v25 = vadd.f32 %v2124_v19, %v747_v16  ;;  %v2128_v26 = vadd.f32 %v2127_v22, %v1678_v20  ;;  %2933 = vmatprep.mubr.f32.mxu1 %v4938_v28  ;;  %v1680_v29 = vpop.f32.mrf.mxu0  ;;  %v4952_v16 = vld [vmem:[%s5664_s5 + $0x470] sm:$0xff]  ;;  %v4953_v19 = vld [vmem:[%s5664_s5 + $0x488] sm:$0xff]  ;;  %v4954_v20 = vld [vmem:[%s5664_s5 + $0x498] sm:$0xff] }
 0x2e5   : > { %v2129_v31 = vpop.f32.mrf.mxu1  ;;  %v767_v22 = vld [vmem:[%s5689_s24 + $0x668] sm:$0xff] }
 0x2e6   : > { %3567 = vst [vmem:[%s5689_s24 + $0x5c8] sm:$0xff] %v3311_v25  ;;  %v3314_v32 = vadd.f32 %v2128_v26, %v750_v21  ;;  %v2130_v33 = vadd.f32 %v2129_v31, %v1680_v29  ;;  %v1684_v34 = vpop.f32.mrf.mxu0  ;;  %2485 = vmatmul.mubr.f32.gmra.mxu0 %v4939_v37  ;;  %v4955_v29 = vld [vmem:[%s5664_s5 + $0x480] sm:$0xff] }
 0x2e7   : > { %v2133_v36 = vpop.f32.mrf.mxu1  ;;  %2934 = vmatmul.mubr.f32.gmra.mxu1 %v4940_v38  ;;  %2490 = vmatprep.mubr.f32.mxu0 %v4941_v41  ;;  %v774_v41 = vld [vmem:[%s5689_s24 + $0x6a0] sm:$0xff] }
 0x2e8   : > { %3570 = vst [vmem:[%s5689_s24 + $0x5e0] sm:$0xff] %v3314_v32  ;;  %v3315_v39 = vadd.f32 %v2130_v33, %v751_v30  ;;  %v2134_v40 = vadd.f32 %v2133_v36, %v1684_v34  ;;  %2939 = vmatprep.mubr.f32.mxu1 %v4942_v42  ;;  %v1686_v43 = vpop.f32.mrf.mxu0  ;;  %v4956_v30 = vld [vmem:[%s5664_s5 + $0x490] sm:$0xff]  ;;  %v4957_v33 = vld [vmem:[%s5664_s5 + $0x4a8] sm:$0xff]  ;;  %v4958_v34 = vld [vmem:[%s5664_s5 + $0x4b8] sm:$0xff] }
 0x2e9   : > { %v2135_v45 = vpop.f32.mrf.mxu1  ;;  %v771_v36 = vld [vmem:[%s5689_s24 + $0x688] sm:$0xff] }
 0x2ea   : > { %3571 = vst [vmem:[%s5689_s24 + $0x5e8] sm:$0xff] %v3315_v39  ;;  %v3318_v46 = vadd.f32 %v2134_v40, %v754_v35  ;;  %v2136_v47 = vadd.f32 %v2135_v45, %v1686_v43  ;;  %v1690_v48 = vpop.f32.mrf.mxu0  ;;  %2491 = vmatmul.mubr.f32.gmra.mxu0 %v4943_v51  ;;  %v4959_v43 = vld [vmem:[%s5664_s5 + $0x4a0] sm:$0xff] }
 0x2eb   : > { %v2139_v50 = vpop.f32.mrf.mxu1  ;;  %2940 = vmatmul.mubr.f32.gmra.mxu1 %v4944_v52  ;;  %2496 = vmatprep.mubr.f32.mxu0 %v4945_v55  ;;  %v778_v55 = vld [vmem:[%s5689_s24 + $0x6c0] sm:$0xff] }
 0x2ec   : > { %3574 = vst [vmem:[%s5689_s24 + $0x600] sm:$0xff] %v3318_v46  ;;  %v3319_v53 = vadd.f32 %v2136_v47, %v755_v44  ;;  %v2140_v54 = vadd.f32 %v2139_v50, %v1690_v48  ;;  %2945 = vmatprep.mubr.f32.mxu1 %v4946_v56  ;;  %v1692_v57 = vpop.f32.mrf.mxu0  ;;  %v4960_v44 = vld [vmem:[%s5664_s5 + $0x4b0] sm:$0xff]  ;;  %v4961_v47 = vld [vmem:[%s5664_s5 + $0x4c8] sm:$0xff]  ;;  %v4962_v48 = vld [vmem:[%s5664_s5 + $0x4d8] sm:$0xff] }
 0x2ed   : > { %v2141_v59 = vpop.f32.mrf.mxu1  ;;  %v775_v50 = vld [vmem:[%s5689_s24 + $0x6a8] sm:$0xff] }
 0x2ee   : > { %3575 = vst [vmem:[%s5689_s24 + $0x608] sm:$0xff] %v3319_v53  ;;  %v3322_v60 = vadd.f32 %v2140_v54, %v758_v49  ;;  %v2142_v61 = vadd.f32 %v2141_v59, %v1692_v57  ;;  %v1696_v62 = vpop.f32.mrf.mxu0  ;;  %2497 = vmatmul.mubr.f32.gmra.mxu0 %v4947_v1  ;;  %v4963_v57 = vld [vmem:[%s5664_s5 + $0x4c0] sm:$0xff] }
 0x2ef   : > { %v2145_v0 = vpop.f32.mrf.mxu1  ;;  %2946 = vmatmul.mubr.f32.gmra.mxu1 %v4948_v2  ;;  %2502 = vmatprep.mubr.f32.mxu0 %v4949_v5  ;;  %v782_v5 = vld [vmem:[%s5689_s24 + $0x6e0] sm:$0xff] }
 0x2f0   : > { %3578 = vst [vmem:[%s5689_s24 + $0x620] sm:$0xff] %v3322_v60  ;;  %v3323_v3 = vadd.f32 %v2142_v61, %v759_v58  ;;  %v2146_v4 = vadd.f32 %v2145_v0, %v1696_v62  ;;  %2951 = vmatprep.mubr.f32.mxu1 %v4950_v6  ;;  %v1698_v7 = vpop.f32.mrf.mxu0  ;;  %v4964_v58 = vld [vmem:[%s5664_s5 + $0x4d0] sm:$0xff]  ;;  %v4965_v61 = vld [vmem:[%s5664_s5 + $0x4e8] sm:$0xff]  ;;  %v4966_v62 = vld [vmem:[%s5664_s5 + $0x4f8] sm:$0xff] }
 0x2f1   : > { %v2147_v9 = vpop.f32.mrf.mxu1  ;;  %v779_v0 = vld [vmem:[%s5689_s24 + $0x6c8] sm:$0xff] }
 0x2f2   : > { %3579 = vst [vmem:[%s5689_s24 + $0x628] sm:$0xff] %v3323_v3  ;;  %v3326_v10 = vadd.f32 %v2146_v4, %v762_v63  ;;  %v2148_v11 = vadd.f32 %v2147_v9, %v1698_v7  ;;  %v1702_v12 = vpop.f32.mrf.mxu0  ;;  %2503 = vmatmul.mubr.f32.gmra.mxu0 %v4951_v15  ;;  %v4967_v7 = vld [vmem:[%s5664_s5 + $0x4e0] sm:$0xff] }
 0x2f3   : > { %v2151_v14 = vpop.f32.mrf.mxu1  ;;  %2952 = vmatmul.mubr.f32.gmra.mxu1 %v4952_v16  ;;  %2508 = vmatprep.mubr.f32.mxu0 %v4953_v19  ;;  %v786_v19 = vld [vmem:[%s5689_s24 + $0x700] sm:$0xff] }
 0x2f4   : > { %3582 = vst [vmem:[%s5689_s24 + $0x640] sm:$0xff] %v3326_v10  ;;  %v3327_v17 = vadd.f32 %v2148_v11, %v763_v8  ;;  %v2152_v18 = vadd.f32 %v2151_v14, %v1702_v12  ;;  %2957 = vmatprep.mubr.f32.mxu1 %v4954_v20  ;;  %v1704_v21 = vpop.f32.mrf.mxu0  ;;  %v4968_v8 = vld [vmem:[%s5664_s5 + $0x4f0] sm:$0xff]  ;;  %v4969_v11 = vld [vmem:[%s5664_s5 + $0x508] sm:$0xff]  ;;  %v4970_v12 = vld [vmem:[%s5664_s5 + $0x518] sm:$0xff] }
 0x2f5   : > { %v2153_v23 = vpop.f32.mrf.mxu1  ;;  %v783_v14 = vld [vmem:[%s5689_s24 + $0x6e8] sm:$0xff] }
 0x2f6   : > { %3583 = vst [vmem:[%s5689_s24 + $0x648] sm:$0xff] %v3327_v17  ;;  %v3330_v24 = vadd.f32 %v2152_v18, %v766_v13  ;;  %v2154_v25 = vadd.f32 %v2153_v23, %v1704_v21  ;;  %v1708_v26 = vpop.f32.mrf.mxu0  ;;  %2509 = vmatmul.mubr.f32.gmra.mxu0 %v4955_v29  ;;  %v4971_v21 = vld [vmem:[%s5664_s5 + $0x500] sm:$0xff] }
 0x2f7   : > { %v2157_v28 = vpop.f32.mrf.mxu1  ;;  %2958 = vmatmul.mubr.f32.gmra.mxu1 %v4956_v30  ;;  %2514 = vmatprep.mubr.f32.mxu0 %v4957_v33  ;;  %v790_v33 = vld [vmem:[%s5689_s24 + $0x720] sm:$0xff] }
 0x2f8   : > { %3586 = vst [vmem:[%s5689_s24 + $0x660] sm:$0xff] %v3330_v24  ;;  %v3331_v31 = vadd.f32 %v2154_v25, %v767_v22  ;;  %v2158_v32 = vadd.f32 %v2157_v28, %v1708_v26  ;;  %2963 = vmatprep.mubr.f32.mxu1 %v4958_v34  ;;  %v1710_v35 = vpop.f32.mrf.mxu0  ;;  %v4972_v22 = vld [vmem:[%s5664_s5 + $0x510] sm:$0xff]  ;;  %v4973_v25 = vld [vmem:[%s5664_s5 + $0x528] sm:$0xff]  ;;  %v4974_v26 = vld [vmem:[%s5664_s5 + $0x538] sm:$0xff] }
 0x2f9   : > { %v2159_v37 = vpop.f32.mrf.mxu1  ;;  %v787_v28 = vld [vmem:[%s5689_s24 + $0x708] sm:$0xff] }
 0x2fa   : > { %3587 = vst [vmem:[%s5689_s24 + $0x668] sm:$0xff] %v3331_v31  ;;  %v3334_v38 = vadd.f32 %v2158_v32, %v770_v27  ;;  %v2160_v39 = vadd.f32 %v2159_v37, %v1710_v35  ;;  %v1714_v40 = vpop.f32.mrf.mxu0  ;;  %2515 = vmatmul.mubr.f32.gmra.mxu0 %v4959_v43  ;;  %v4975_v35 = vld [vmem:[%s5664_s5 + $0x520] sm:$0xff] }
 0x2fb   : > { %v2163_v42 = vpop.f32.mrf.mxu1  ;;  %2964 = vmatmul.mubr.f32.gmra.mxu1 %v4960_v44  ;;  %2520 = vmatprep.mubr.f32.mxu0 %v4961_v47  ;;  %v794_v47 = vld [vmem:[%s5689_s24 + $0x740] sm:$0xff] }
 0x2fc   : > { %3590 = vst [vmem:[%s5689_s24 + $0x680] sm:$0xff] %v3334_v38  ;;  %v3335_v45 = vadd.f32 %v2160_v39, %v771_v36  ;;  %v2164_v46 = vadd.f32 %v2163_v42, %v1714_v40  ;;  %2969 = vmatprep.mubr.f32.mxu1 %v4962_v48  ;;  %v1716_v49 = vpop.f32.mrf.mxu0  ;;  %v4976_v36 = vld [vmem:[%s5664_s5 + $0x530] sm:$0xff]  ;;  %v4977_v39 = vld [vmem:[%s5664_s5 + $0x548] sm:$0xff]  ;;  %v4978_v40 = vld [vmem:[%s5664_s5 + $0x558] sm:$0xff] }
 0x2fd   : > { %v2165_v51 = vpop.f32.mrf.mxu1  ;;  %v791_v42 = vld [vmem:[%s5689_s24 + $0x728] sm:$0xff] }
 0x2fe   : > { %3591 = vst [vmem:[%s5689_s24 + $0x688] sm:$0xff] %v3335_v45  ;;  %v3338_v52 = vadd.f32 %v2164_v46, %v774_v41  ;;  %v2166_v53 = vadd.f32 %v2165_v51, %v1716_v49  ;;  %v1720_v54 = vpop.f32.mrf.mxu0  ;;  %2521 = vmatmul.mubr.f32.gmra.mxu0 %v4963_v57  ;;  %v4979_v49 = vld [vmem:[%s5664_s5 + $0x540] sm:$0xff] }
 0x2ff   : > { %v2169_v56 = vpop.f32.mrf.mxu1  ;;  %2970 = vmatmul.mubr.f32.gmra.mxu1 %v4964_v58  ;;  %2526 = vmatprep.mubr.f32.mxu0 %v4965_v61  ;;  %v798_v61 = vld [vmem:[%s5689_s24 + $0x760] sm:$0xff] }
 0x300   : > { %3594 = vst [vmem:[%s5689_s24 + $0x6a0] sm:$0xff] %v3338_v52  ;;  %v3339_v59 = vadd.f32 %v2166_v53, %v775_v50  ;;  %v2170_v60 = vadd.f32 %v2169_v56, %v1720_v54  ;;  %2975 = vmatprep.mubr.f32.mxu1 %v4966_v62  ;;  %v1722_v63 = vpop.f32.mrf.mxu0  ;;  %v4980_v50 = vld [vmem:[%s5664_s5 + $0x550] sm:$0xff]  ;;  %v4981_v53 = vld [vmem:[%s5664_s5 + $0x568] sm:$0xff]  ;;  %v4982_v54 = vld [vmem:[%s5664_s5 + $0x578] sm:$0xff] }
 0x301   : > { %v2171_v1 = vpop.f32.mrf.mxu1  ;;  %v795_v56 = vld [vmem:[%s5689_s24 + $0x748] sm:$0xff] }
 0x302   : > { %3595 = vst [vmem:[%s5689_s24 + $0x6a8] sm:$0xff] %v3339_v59  ;;  %v3342_v2 = vadd.f32 %v2170_v60, %v778_v55  ;;  %v2172_v3 = vadd.f32 %v2171_v1, %v1722_v63  ;;  %v1726_v4 = vpop.f32.mrf.mxu0  ;;  %2527 = vmatmul.mubr.f32.gmra.mxu0 %v4967_v7  ;;  %v4983_v63 = vld [vmem:[%s5664_s5 + $0x560] sm:$0xff] }
 0x303   : > { %v2175_v6 = vpop.f32.mrf.mxu1  ;;  %2976 = vmatmul.mubr.f32.gmra.mxu1 %v4968_v8  ;;  %2532 = vmatprep.mubr.f32.mxu0 %v4969_v11  ;;  %v802_v11 = vld [vmem:[%s5689_s24 + $0x780] sm:$0xff] }
 0x304   : > { %3598 = vst [vmem:[%s5689_s24 + $0x6c0] sm:$0xff] %v3342_v2  ;;  %v3343_v9 = vadd.f32 %v2172_v3, %v779_v0  ;;  %v2176_v10 = vadd.f32 %v2175_v6, %v1726_v4  ;;  %2981 = vmatprep.mubr.f32.mxu1 %v4970_v12  ;;  %v1728_v13 = vpop.f32.mrf.mxu0  ;;  %v4984_v0 = vld [vmem:[%s5664_s5 + $0x570] sm:$0xff]  ;;  %v4985_v3 = vld [vmem:[%s5664_s5 + $0x588] sm:$0xff]  ;;  %v4986_v4 = vld [vmem:[%s5664_s5 + $0x598] sm:$0xff] }
 0x305   : > { %v2177_v15 = vpop.f32.mrf.mxu1  ;;  %v799_v6 = vld [vmem:[%s5689_s24 + $0x768] sm:$0xff] }
 0x306   : > { %3599 = vst [vmem:[%s5689_s24 + $0x6c8] sm:$0xff] %v3343_v9  ;;  %v3346_v16 = vadd.f32 %v2176_v10, %v782_v5  ;;  %v2178_v17 = vadd.f32 %v2177_v15, %v1728_v13  ;;  %v1732_v18 = vpop.f32.mrf.mxu0  ;;  %2533 = vmatmul.mubr.f32.gmra.mxu0 %v4971_v21  ;;  %v4987_v13 = vld [vmem:[%s5664_s5 + $0x580] sm:$0xff] }
 0x307   : > { %v2181_v20 = vpop.f32.mrf.mxu1  ;;  %2982 = vmatmul.mubr.f32.gmra.mxu1 %v4972_v22  ;;  %2538 = vmatprep.mubr.f32.mxu0 %v4973_v25  ;;  %v806_v25 = vld [vmem:[%s5689_s24 + $0x7a0] sm:$0xff] }
 0x308   : > { %3602 = vst [vmem:[%s5689_s24 + $0x6e0] sm:$0xff] %v3346_v16  ;;  %v3347_v23 = vadd.f32 %v2178_v17, %v783_v14  ;;  %v2182_v24 = vadd.f32 %v2181_v20, %v1732_v18  ;;  %2987 = vmatprep.mubr.f32.mxu1 %v4974_v26  ;;  %v1734_v27 = vpop.f32.mrf.mxu0  ;;  %v4988_v14 = vld [vmem:[%s5664_s5 + $0x590] sm:$0xff]  ;;  %v4989_v17 = vld [vmem:[%s5664_s5 + $0x5a8] sm:$0xff]  ;;  %v4990_v18 = vld [vmem:[%s5664_s5 + $0x5b8] sm:$0xff] }
 0x309   : > { %v2183_v29 = vpop.f32.mrf.mxu1  ;;  %v803_v20 = vld [vmem:[%s5689_s24 + $0x788] sm:$0xff] }
 0x30a   : > { %3603 = vst [vmem:[%s5689_s24 + $0x6e8] sm:$0xff] %v3347_v23  ;;  %v3350_v30 = vadd.f32 %v2182_v24, %v786_v19  ;;  %v2184_v31 = vadd.f32 %v2183_v29, %v1734_v27  ;;  %v1738_v32 = vpop.f32.mrf.mxu0  ;;  %2539 = vmatmul.mubr.f32.gmra.mxu0 %v4975_v35  ;;  %v4991_v27 = vld [vmem:[%s5664_s5 + $0x5a0] sm:$0xff] }
 0x30b   : > { %v2187_v34 = vpop.f32.mrf.mxu1  ;;  %2988 = vmatmul.mubr.f32.gmra.mxu1 %v4976_v36  ;;  %2544 = vmatprep.mubr.f32.mxu0 %v4977_v39  ;;  %v810_v39 = vld [vmem:[%s5689_s24 + $0x7c0] sm:$0xff] }
 0x30c   : > { %3606 = vst [vmem:[%s5689_s24 + $0x700] sm:$0xff] %v3350_v30  ;;  %v3351_v37 = vadd.f32 %v2184_v31, %v787_v28  ;;  %v2188_v38 = vadd.f32 %v2187_v34, %v1738_v32  ;;  %2993 = vmatprep.mubr.f32.mxu1 %v4978_v40  ;;  %v1740_v41 = vpop.f32.mrf.mxu0  ;;  %v4992_v28 = vld [vmem:[%s5664_s5 + $0x5b0] sm:$0xff]  ;;  %v4993_v31 = vld [vmem:[%s5664_s5 + $0x5c8] sm:$0xff]  ;;  %v4994_v32 = vld [vmem:[%s5664_s5 + $0x5d8] sm:$0xff] }
 0x30d   : > { %v2189_v43 = vpop.f32.mrf.mxu1  ;;  %v807_v34 = vld [vmem:[%s5689_s24 + $0x7a8] sm:$0xff] }
 0x30e   : > { %3607 = vst [vmem:[%s5689_s24 + $0x708] sm:$0xff] %v3351_v37  ;;  %v3354_v44 = vadd.f32 %v2188_v38, %v790_v33  ;;  %v2190_v45 = vadd.f32 %v2189_v43, %v1740_v41  ;;  %v1744_v46 = vpop.f32.mrf.mxu0  ;;  %2545 = vmatmul.mubr.f32.gmra.mxu0 %v4979_v49  ;;  %v4995_v41 = vld [vmem:[%s5664_s5 + $0x5c0] sm:$0xff] }
 0x30f   : > { %v2193_v48 = vpop.f32.mrf.mxu1  ;;  %2994 = vmatmul.mubr.f32.gmra.mxu1 %v4980_v50  ;;  %2550 = vmatprep.mubr.f32.mxu0 %v4981_v53  ;;  %v814_v53 = vld [vmem:[%s5689_s24 + $0x7e0] sm:$0xff] }
 0x310   : > { %3610 = vst [vmem:[%s5689_s24 + $0x720] sm:$0xff] %v3354_v44  ;;  %v3355_v51 = vadd.f32 %v2190_v45, %v791_v42  ;;  %v2194_v52 = vadd.f32 %v2193_v48, %v1744_v46  ;;  %2999 = vmatprep.mubr.f32.mxu1 %v4982_v54  ;;  %v1746_v55 = vpop.f32.mrf.mxu0  ;;  %v4996_v42 = vld [vmem:[%s5664_s5 + $0x5d0] sm:$0xff]  ;;  %v4997_v45 = vld [vmem:[%s5664_s5 + $0x5e8] sm:$0xff]  ;;  %v4998_v46 = vld [vmem:[%s5664_s5 + $0x5f8] sm:$0xff] }
 0x311   : > { %v2195_v57 = vpop.f32.mrf.mxu1  ;;  %v811_v48 = vld [vmem:[%s5689_s24 + $0x7c8] sm:$0xff] }
 0x312   : > { %3611 = vst [vmem:[%s5689_s24 + $0x728] sm:$0xff] %v3355_v51  ;;  %v3358_v58 = vadd.f32 %v2194_v52, %v794_v47  ;;  %v2196_v59 = vadd.f32 %v2195_v57, %v1746_v55  ;;  %v1750_v60 = vpop.f32.mrf.mxu0  ;;  %2551 = vmatmul.mubr.f32.gmra.mxu0 %v4983_v63  ;;  %v4999_v55 = vld [vmem:[%s5664_s5 + $0x5e0] sm:$0xff] }
 0x313   : > { %v2199_v62 = vpop.f32.mrf.mxu1  ;;  %3000 = vmatmul.mubr.f32.gmra.mxu1 %v4984_v0  ;;  %2556 = vmatprep.mubr.f32.mxu0 %v4985_v3  ;;  %v5003_v3 = vld [vmem:[%s5664_s5 + $0x600] sm:$0xff] }
 0x314   : > { %3614 = vst [vmem:[%s5689_s24 + $0x740] sm:$0xff] %v3358_v58  ;;  %v3359_v1 = vadd.f32 %v2196_v59, %v795_v56  ;;  %v2200_v2 = vadd.f32 %v2199_v62, %v1750_v60  ;;  %3005 = vmatprep.mubr.f32.mxu1 %v4986_v4  ;;  %v1752_v5 = vpop.f32.mrf.mxu0  ;;  %v5000_v56 = vld [vmem:[%s5664_s5 + $0x5f0] sm:$0xff]  ;;  %v5001_v59 = vld [vmem:[%s5664_s5 + $0x608] sm:$0xff]  ;;  %v5002_v60 = vld [vmem:[%s5664_s5 + $0x618] sm:$0xff] }
 0x315   : > { %v2201_v7 = vpop.f32.mrf.mxu1  ;;  %v815_v62 = vld [vmem:[%s5689_s24 + $0x7e8] sm:$0xff]  ;;  %v564_v4 = vld [vmem:[%s5689_s24 + $0x10] sm:$0xff] }
 0x316   : > { %3615 = vst [vmem:[%s5689_s24 + $0x748] sm:$0xff] %v3359_v1  ;;  %v3362_v8 = vadd.f32 %v2200_v2, %v798_v61  ;;  %v2202_v9 = vadd.f32 %v2201_v7, %v1752_v5  ;;  %v1756_v10 = vpop.f32.mrf.mxu0  ;;  %2557 = vmatmul.mubr.f32.gmra.mxu0 %v4987_v13 }
 0x317   : > { %v2205_v12 = vpop.f32.mrf.mxu1  ;;  %3006 = vmatmul.mubr.f32.gmra.mxu1 %v4988_v14  ;;  %2562 = vmatprep.mubr.f32.mxu0 %v4989_v17  ;;  %v5007_v17 = vld [vmem:[%s5664_s5 + $0x620] sm:$0xff] }
 0x318   : > { %3618 = vst [vmem:[%s5689_s24 + $0x760] sm:$0xff] %v3362_v8  ;;  %v3363_v15 = vadd.f32 %v2202_v9, %v799_v6  ;;  %v2206_v16 = vadd.f32 %v2205_v12, %v1756_v10  ;;  %3011 = vmatprep.mubr.f32.mxu1 %v4990_v18  ;;  %v1758_v19 = vpop.f32.mrf.mxu0  ;;  %v5004_v6 = vld [vmem:[%s5664_s5 + $0x610] sm:$0xff]  ;;  %v5005_v9 = vld [vmem:[%s5664_s5 + $0x628] sm:$0xff]  ;;  %v5006_v10 = vld [vmem:[%s5664_s5 + $0x638] sm:$0xff] }
 0x319   : > { %v2207_v21 = vpop.f32.mrf.mxu1  ;;  %v565_v12 = vld [vmem:[%s5689_s24 + $0x18] sm:$0xff]  ;;  %v568_v18 = vld [vmem:[%s5689_s24 + $0x30] sm:$0xff] }
 0x31a   : > { %3619 = vst [vmem:[%s5689_s24 + $0x768] sm:$0xff] %v3363_v15  ;;  %v3366_v22 = vadd.f32 %v2206_v16, %v802_v11  ;;  %v2208_v23 = vadd.f32 %v2207_v21, %v1758_v19  ;;  %v1762_v24 = vpop.f32.mrf.mxu0  ;;  %2563 = vmatmul.mubr.f32.gmra.mxu0 %v4991_v27 }
 0x31b   : > { %v2211_v26 = vpop.f32.mrf.mxu1  ;;  %3012 = vmatmul.mubr.f32.gmra.mxu1 %v4992_v28  ;;  %2568 = vmatprep.mubr.f32.mxu0 %v4993_v31  ;;  %v5011_v31 = vld [vmem:[%s5664_s5 + $0x640] sm:$0xff] }
 0x31c   : > { %3622 = vst [vmem:[%s5689_s24 + $0x780] sm:$0xff] %v3366_v22  ;;  %v3367_v29 = vadd.f32 %v2208_v23, %v803_v20  ;;  %v2212_v30 = vadd.f32 %v2211_v26, %v1762_v24  ;;  %3017 = vmatprep.mubr.f32.mxu1 %v4994_v32  ;;  %v1764_v33 = vpop.f32.mrf.mxu0  ;;  %v5008_v20 = vld [vmem:[%s5664_s5 + $0x630] sm:$0xff]  ;;  %v5009_v23 = vld [vmem:[%s5664_s5 + $0x648] sm:$0xff]  ;;  %v5010_v24 = vld [vmem:[%s5664_s5 + $0x658] sm:$0xff] }
 0x31d   : > { %v2213_v35 = vpop.f32.mrf.mxu1  ;;  %v569_v26 = vld [vmem:[%s5689_s24 + $0x38] sm:$0xff]  ;;  %v572_v32 = vld [vmem:[%s5689_s24 + $0x50] sm:$0xff] }
 0x31e   : > { %3623 = vst [vmem:[%s5689_s24 + $0x788] sm:$0xff] %v3367_v29  ;;  %v3370_v36 = vadd.f32 %v2212_v30, %v806_v25  ;;  %v2214_v37 = vadd.f32 %v2213_v35, %v1764_v33  ;;  %v1768_v38 = vpop.f32.mrf.mxu0  ;;  %2569 = vmatmul.mubr.f32.gmra.mxu0 %v4995_v41 }
 0x31f   : > { %v2217_v40 = vpop.f32.mrf.mxu1  ;;  %3018 = vmatmul.mubr.f32.gmra.mxu1 %v4996_v42  ;;  %2574 = vmatprep.mubr.f32.mxu0 %v4997_v45  ;;  %v5015_v45 = vld [vmem:[%s5664_s5 + $0x660] sm:$0xff] }
 0x320   : > { %3626 = vst [vmem:[%s5689_s24 + $0x7a0] sm:$0xff] %v3370_v36  ;;  %v3371_v43 = vadd.f32 %v2214_v37, %v807_v34  ;;  %v2218_v44 = vadd.f32 %v2217_v40, %v1768_v38  ;;  %3023 = vmatprep.mubr.f32.mxu1 %v4998_v46  ;;  %v1770_v47 = vpop.f32.mrf.mxu0  ;;  %v5012_v34 = vld [vmem:[%s5664_s5 + $0x650] sm:$0xff]  ;;  %v5013_v37 = vld [vmem:[%s5664_s5 + $0x668] sm:$0xff]  ;;  %v5014_v38 = vld [vmem:[%s5664_s5 + $0x678] sm:$0xff] }
 0x321   : > { %v2219_v49 = vpop.f32.mrf.mxu1  ;;  %v573_v40 = vld [vmem:[%s5689_s24 + $0x58] sm:$0xff]  ;;  %v576_v46 = vld [vmem:[%s5689_s24 + $0x70] sm:$0xff] }
 0x322   : > { %3627 = vst [vmem:[%s5689_s24 + $0x7a8] sm:$0xff] %v3371_v43  ;;  %v3374_v50 = vadd.f32 %v2218_v44, %v810_v39  ;;  %v2220_v51 = vadd.f32 %v2219_v49, %v1770_v47  ;;  %v1774_v52 = vpop.f32.mrf.mxu0  ;;  %2575 = vmatmul.mubr.f32.gmra.mxu0 %v4999_v55 }
 0x323   : > { %v2223_v54 = vpop.f32.mrf.mxu1  ;;  %3024 = vmatmul.mubr.f32.gmra.mxu1 %v5000_v56  ;;  %2580 = vmatprep.mubr.f32.mxu0 %v5001_v59  ;;  %v5019_v59 = vld [vmem:[%s5664_s5 + $0x680] sm:$0xff] }
 0x324   : > { %3630 = vst [vmem:[%s5689_s24 + $0x7c0] sm:$0xff] %v3374_v50  ;;  %v3375_v57 = vadd.f32 %v2220_v51, %v811_v48  ;;  %v2224_v58 = vadd.f32 %v2223_v54, %v1774_v52  ;;  %3029 = vmatprep.mubr.f32.mxu1 %v5002_v60  ;;  %v1776_v61 = vpop.f32.mrf.mxu0  ;;  %v5016_v48 = vld [vmem:[%s5664_s5 + $0x670] sm:$0xff]  ;;  %v5017_v51 = vld [vmem:[%s5664_s5 + $0x688] sm:$0xff]  ;;  %v5018_v52 = vld [vmem:[%s5664_s5 + $0x698] sm:$0xff] }
 0x325   : > { %v2225_v63 = vpop.f32.mrf.mxu1  ;;  %v577_v54 = vld [vmem:[%s5689_s24 + $0x78] sm:$0xff]  ;;  %v580_v60 = vld [vmem:[%s5689_s24 + $0x90] sm:$0xff] }
 0x326   : > { %3631 = vst [vmem:[%s5689_s24 + $0x7c8] sm:$0xff] %v3375_v57  ;;  %v3378_v0 = vadd.f32 %v2224_v58, %v814_v53  ;;  %v2226_v1 = vadd.f32 %v2225_v63, %v1776_v61  ;;  %v2294_v2 = vpop.f32.mrf.mxu0  ;;  %2581 = vmatmul.mubr.f32.gmra.mxu0 %v5003_v3 }
 0x327   : > { %v2743_v5 = vpop.f32.mrf.mxu1  ;;  %3030 = vmatmul.mubr.f32.gmra.mxu1 %v5004_v6  ;;  %2586 = vmatprep.mubr.f32.mxu0 %v5005_v9  ;;  %v5023_v9 = vld [vmem:[%s5664_s5 + $0x6a0] sm:$0xff] }
 0x328   : > { %3634 = vst [vmem:[%s5689_s24 + $0x7e0] sm:$0xff] %v3378_v0  ;;  %v3379_v7 = vadd.f32 %v2226_v1, %v815_v62  ;;  %v2744_v8 = vadd.f32 %v2743_v5, %v2294_v2  ;;  %3035 = vmatprep.mubr.f32.mxu1 %v5006_v10  ;;  %v2296_v11 = vpop.f32.mrf.mxu0  ;;  %v5020_v62 = vld [vmem:[%s5664_s5 + $0x690] sm:$0xff]  ;;  %v5021_v1 = vld [vmem:[%s5664_s5 + $0x6a8] sm:$0xff]  ;;  %v5022_v2 = vld [vmem:[%s5664_s5 + $0x6b8] sm:$0xff] }
 0x329   : > { %v2745_v13 = vpop.f32.mrf.mxu1  ;;  %v584_v10 = vld [vmem:[%s5689_s24 + $0xb0] sm:$0xff] }
 0x32a   : > { %3635 = vst [vmem:[%s5689_s24 + $0x7e8] sm:$0xff] %v3379_v7  ;;  %v3128_v14 = vadd.f32 %v2744_v8, %v564_v4  ;;  %v2746_v15 = vadd.f32 %v2745_v13, %v2296_v11  ;;  %v2300_v16 = vpop.f32.mrf.mxu0  ;;  %2587 = vmatmul.mubr.f32.gmra.mxu0 %v5007_v17  ;;  %v581_v4 = vld [vmem:[%s5689_s24 + $0x98] sm:$0xff] }
 0x32b   : > { %v2749_v19 = vpop.f32.mrf.mxu1  ;;  %3036 = vmatmul.mubr.f32.gmra.mxu1 %v5008_v20  ;;  %2592 = vmatprep.mubr.f32.mxu0 %v5009_v23  ;;  %v5027_v23 = vld [vmem:[%s5664_s5 + $0x6c0] sm:$0xff] }
 0x32c   : > { %3384 = vst [vmem:[%s5689_s24 + $0x10] sm:$0xff] %v3128_v14  ;;  %v3129_v21 = vadd.f32 %v2746_v15, %v565_v12  ;;  %v2750_v22 = vadd.f32 %v2749_v19, %v2300_v16  ;;  %3041 = vmatprep.mubr.f32.mxu1 %v5010_v24  ;;  %v2302_v25 = vpop.f32.mrf.mxu0  ;;  %v5024_v12 = vld [vmem:[%s5664_s5 + $0x6b0] sm:$0xff]  ;;  %v5025_v15 = vld [vmem:[%s5664_s5 + $0x6c8] sm:$0xff]  ;;  %v5026_v16 = vld [vmem:[%s5664_s5 + $0x6d8] sm:$0xff] }
 0x32d   : > { %v2751_v27 = vpop.f32.mrf.mxu1  ;;  %v588_v24 = vld [vmem:[%s5689_s24 + $0xd0] sm:$0xff] }
 0x32e   : > { %3385 = vst [vmem:[%s5689_s24 + $0x18] sm:$0xff] %v3129_v21  ;;  %v3132_v28 = vadd.f32 %v2750_v22, %v568_v18  ;;  %v2752_v29 = vadd.f32 %v2751_v27, %v2302_v25  ;;  %v2306_v30 = vpop.f32.mrf.mxu0  ;;  %2593 = vmatmul.mubr.f32.gmra.mxu0 %v5011_v31  ;;  %v585_v18 = vld [vmem:[%s5689_s24 + $0xb8] sm:$0xff] }
 0x32f   : > { %v2755_v33 = vpop.f32.mrf.mxu1  ;;  %3042 = vmatmul.mubr.f32.gmra.mxu1 %v5012_v34  ;;  %2598 = vmatprep.mubr.f32.mxu0 %v5013_v37  ;;  %v5031_v37 = vld [vmem:[%s5664_s5 + $0x6e0] sm:$0xff] }
 0x330   : > { %3388 = vst [vmem:[%s5689_s24 + $0x30] sm:$0xff] %v3132_v28  ;;  %v3133_v35 = vadd.f32 %v2752_v29, %v569_v26  ;;  %v2756_v36 = vadd.f32 %v2755_v33, %v2306_v30  ;;  %3047 = vmatprep.mubr.f32.mxu1 %v5014_v38  ;;  %v2308_v39 = vpop.f32.mrf.mxu0  ;;  %v5028_v26 = vld [vmem:[%s5664_s5 + $0x6d0] sm:$0xff]  ;;  %v5029_v29 = vld [vmem:[%s5664_s5 + $0x6e8] sm:$0xff]  ;;  %v5030_v30 = vld [vmem:[%s5664_s5 + $0x6f8] sm:$0xff] }
 0x331   : > { %v2757_v41 = vpop.f32.mrf.mxu1  ;;  %v592_v38 = vld [vmem:[%s5689_s24 + $0xf0] sm:$0xff] }
 0x332   : > { %3389 = vst [vmem:[%s5689_s24 + $0x38] sm:$0xff] %v3133_v35  ;;  %v3136_v42 = vadd.f32 %v2756_v36, %v572_v32  ;;  %v2758_v43 = vadd.f32 %v2757_v41, %v2308_v39  ;;  %v2312_v44 = vpop.f32.mrf.mxu0  ;;  %2599 = vmatmul.mubr.f32.gmra.mxu0 %v5015_v45  ;;  %v589_v32 = vld [vmem:[%s5689_s24 + $0xd8] sm:$0xff] }
 0x333   : > { %v2761_v47 = vpop.f32.mrf.mxu1  ;;  %3048 = vmatmul.mubr.f32.gmra.mxu1 %v5016_v48  ;;  %2604 = vmatprep.mubr.f32.mxu0 %v5017_v51  ;;  %v5035_v51 = vld [vmem:[%s5664_s5 + $0x700] sm:$0xff] }
 0x334   : > { %3392 = vst [vmem:[%s5689_s24 + $0x50] sm:$0xff] %v3136_v42  ;;  %v3137_v49 = vadd.f32 %v2758_v43, %v573_v40  ;;  %v2762_v50 = vadd.f32 %v2761_v47, %v2312_v44  ;;  %3053 = vmatprep.mubr.f32.mxu1 %v5018_v52  ;;  %v2314_v53 = vpop.f32.mrf.mxu0  ;;  %v5032_v40 = vld [vmem:[%s5664_s5 + $0x6f0] sm:$0xff]  ;;  %v5033_v43 = vld [vmem:[%s5664_s5 + $0x708] sm:$0xff]  ;;  %v5034_v44 = vld [vmem:[%s5664_s5 + $0x718] sm:$0xff] }
 0x335   : > { %v2763_v55 = vpop.f32.mrf.mxu1  ;;  %v596_v52 = vld [vmem:[%s5689_s24 + $0x110] sm:$0xff] }
 0x336   : > { %3393 = vst [vmem:[%s5689_s24 + $0x58] sm:$0xff] %v3137_v49  ;;  %v3140_v56 = vadd.f32 %v2762_v50, %v576_v46  ;;  %v2764_v57 = vadd.f32 %v2763_v55, %v2314_v53  ;;  %v2318_v58 = vpop.f32.mrf.mxu0  ;;  %2605 = vmatmul.mubr.f32.gmra.mxu0 %v5019_v59  ;;  %v593_v46 = vld [vmem:[%s5689_s24 + $0xf8] sm:$0xff] }
 0x337   : > { %v2767_v61 = vpop.f32.mrf.mxu1  ;;  %3054 = vmatmul.mubr.f32.gmra.mxu1 %v5020_v62  ;;  %2610 = vmatprep.mubr.f32.mxu0 %v5021_v1  ;;  %v5039_v1 = vld [vmem:[%s5664_s5 + $0x720] sm:$0xff] }
 0x338   : > { %3396 = vst [vmem:[%s5689_s24 + $0x70] sm:$0xff] %v3140_v56  ;;  %v3141_v63 = vadd.f32 %v2764_v57, %v577_v54  ;;  %v2768_v0 = vadd.f32 %v2767_v61, %v2318_v58  ;;  %3059 = vmatprep.mubr.f32.mxu1 %v5022_v2  ;;  %v2320_v3 = vpop.f32.mrf.mxu0  ;;  %v5036_v54 = vld [vmem:[%s5664_s5 + $0x710] sm:$0xff]  ;;  %v5037_v57 = vld [vmem:[%s5664_s5 + $0x728] sm:$0xff]  ;;  %v5038_v58 = vld [vmem:[%s5664_s5 + $0x738] sm:$0xff] }
 0x339   : > { %v2769_v5 = vpop.f32.mrf.mxu1  ;;  %v600_v2 = vld [vmem:[%s5689_s24 + $0x130] sm:$0xff] }
 0x33a   : > { %3397 = vst [vmem:[%s5689_s24 + $0x78] sm:$0xff] %v3141_v63  ;;  %v3144_v6 = vadd.f32 %v2768_v0, %v580_v60  ;;  %v2770_v7 = vadd.f32 %v2769_v5, %v2320_v3  ;;  %v2324_v8 = vpop.f32.mrf.mxu0  ;;  %2611 = vmatmul.mubr.f32.gmra.mxu0 %v5023_v9  ;;  %v597_v60 = vld [vmem:[%s5689_s24 + $0x118] sm:$0xff] }
 0x33b   : > { %v2773_v11 = vpop.f32.mrf.mxu1  ;;  %3060 = vmatmul.mubr.f32.gmra.mxu1 %v5024_v12  ;;  %2616 = vmatprep.mubr.f32.mxu0 %v5025_v15  ;;  %v5043_v15 = vld [vmem:[%s5664_s5 + $0x740] sm:$0xff] }
 0x33c   : > { %3400 = vst [vmem:[%s5689_s24 + $0x90] sm:$0xff] %v3144_v6  ;;  %v3145_v13 = vadd.f32 %v2770_v7, %v581_v4  ;;  %v2774_v14 = vadd.f32 %v2773_v11, %v2324_v8  ;;  %3065 = vmatprep.mubr.f32.mxu1 %v5026_v16  ;;  %v2326_v17 = vpop.f32.mrf.mxu0  ;;  %v5040_v4 = vld [vmem:[%s5664_s5 + $0x730] sm:$0xff]  ;;  %v5041_v7 = vld [vmem:[%s5664_s5 + $0x748] sm:$0xff]  ;;  %v5042_v8 = vld [vmem:[%s5664_s5 + $0x758] sm:$0xff] }
 0x33d   : > { %v2775_v19 = vpop.f32.mrf.mxu1  ;;  %v604_v16 = vld [vmem:[%s5689_s24 + $0x150] sm:$0xff] }
 0x33e   : > { %3401 = vst [vmem:[%s5689_s24 + $0x98] sm:$0xff] %v3145_v13  ;;  %v3148_v20 = vadd.f32 %v2774_v14, %v584_v10  ;;  %v2776_v21 = vadd.f32 %v2775_v19, %v2326_v17  ;;  %v2330_v22 = vpop.f32.mrf.mxu0  ;;  %2617 = vmatmul.mubr.f32.gmra.mxu0 %v5027_v23  ;;  %v601_v10 = vld [vmem:[%s5689_s24 + $0x138] sm:$0xff] }
 0x33f   : > { %v2779_v25 = vpop.f32.mrf.mxu1  ;;  %3066 = vmatmul.mubr.f32.gmra.mxu1 %v5028_v26  ;;  %2622 = vmatprep.mubr.f32.mxu0 %v5029_v29  ;;  %v5047_v29 = vld [vmem:[%s5664_s5 + $0x760] sm:$0xff] }
 0x340   : > { %3404 = vst [vmem:[%s5689_s24 + $0xb0] sm:$0xff] %v3148_v20  ;;  %v3149_v27 = vadd.f32 %v2776_v21, %v585_v18  ;;  %v2780_v28 = vadd.f32 %v2779_v25, %v2330_v22  ;;  %3071 = vmatprep.mubr.f32.mxu1 %v5030_v30  ;;  %v2332_v31 = vpop.f32.mrf.mxu0  ;;  %v5044_v18 = vld [vmem:[%s5664_s5 + $0x750] sm:$0xff]  ;;  %v5045_v21 = vld [vmem:[%s5664_s5 + $0x768] sm:$0xff]  ;;  %v5046_v22 = vld [vmem:[%s5664_s5 + $0x778] sm:$0xff] }
 0x341   : > { %v2781_v33 = vpop.f32.mrf.mxu1  ;;  %v608_v30 = vld [vmem:[%s5689_s24 + $0x170] sm:$0xff] }
 0x342   : > { %3405 = vst [vmem:[%s5689_s24 + $0xb8] sm:$0xff] %v3149_v27  ;;  %v3152_v34 = vadd.f32 %v2780_v28, %v588_v24  ;;  %v2782_v35 = vadd.f32 %v2781_v33, %v2332_v31  ;;  %v2336_v36 = vpop.f32.mrf.mxu0  ;;  %2623 = vmatmul.mubr.f32.gmra.mxu0 %v5031_v37  ;;  %v605_v24 = vld [vmem:[%s5689_s24 + $0x158] sm:$0xff] }
 0x343   : > { %v2785_v39 = vpop.f32.mrf.mxu1  ;;  %3072 = vmatmul.mubr.f32.gmra.mxu1 %v5032_v40  ;;  %2628 = vmatprep.mubr.f32.mxu0 %v5033_v43  ;;  %v5051_v43 = vld [vmem:[%s5664_s5 + $0x780] sm:$0xff] }
 0x344   : > { %3408 = vst [vmem:[%s5689_s24 + $0xd0] sm:$0xff] %v3152_v34  ;;  %v3153_v41 = vadd.f32 %v2782_v35, %v589_v32  ;;  %v2786_v42 = vadd.f32 %v2785_v39, %v2336_v36  ;;  %3077 = vmatprep.mubr.f32.mxu1 %v5034_v44  ;;  %v2338_v45 = vpop.f32.mrf.mxu0  ;;  %v5048_v32 = vld [vmem:[%s5664_s5 + $0x770] sm:$0xff]  ;;  %v5049_v35 = vld [vmem:[%s5664_s5 + $0x788] sm:$0xff]  ;;  %v5050_v36 = vld [vmem:[%s5664_s5 + $0x798] sm:$0xff] }
 0x345   : > { %v2787_v47 = vpop.f32.mrf.mxu1  ;;  %v612_v44 = vld [vmem:[%s5689_s24 + $0x190] sm:$0xff] }
 0x346   : > { %3409 = vst [vmem:[%s5689_s24 + $0xd8] sm:$0xff] %v3153_v41  ;;  %v3156_v48 = vadd.f32 %v2786_v42, %v592_v38  ;;  %v2788_v49 = vadd.f32 %v2787_v47, %v2338_v45  ;;  %v2342_v50 = vpop.f32.mrf.mxu0  ;;  %2629 = vmatmul.mubr.f32.gmra.mxu0 %v5035_v51  ;;  %v609_v38 = vld [vmem:[%s5689_s24 + $0x178] sm:$0xff] }
 0x347   : > { %v2791_v53 = vpop.f32.mrf.mxu1  ;;  %3078 = vmatmul.mubr.f32.gmra.mxu1 %v5036_v54  ;;  %2634 = vmatprep.mubr.f32.mxu0 %v5037_v57  ;;  %v5055_v57 = vld [vmem:[%s5664_s5 + $0x7a0] sm:$0xff] }
 0x348   : > { %3412 = vst [vmem:[%s5689_s24 + $0xf0] sm:$0xff] %v3156_v48  ;;  %v3157_v55 = vadd.f32 %v2788_v49, %v593_v46  ;;  %v2792_v56 = vadd.f32 %v2791_v53, %v2342_v50  ;;  %3083 = vmatprep.mubr.f32.mxu1 %v5038_v58  ;;  %v2344_v59 = vpop.f32.mrf.mxu0  ;;  %v5052_v46 = vld [vmem:[%s5664_s5 + $0x790] sm:$0xff]  ;;  %v5053_v49 = vld [vmem:[%s5664_s5 + $0x7a8] sm:$0xff]  ;;  %v5054_v50 = vld [vmem:[%s5664_s5 + $0x7b8] sm:$0xff] }
 0x349   : > { %v2793_v61 = vpop.f32.mrf.mxu1  ;;  %v616_v58 = vld [vmem:[%s5689_s24 + $0x1b0] sm:$0xff] }
 0x34a   : > { %3413 = vst [vmem:[%s5689_s24 + $0xf8] sm:$0xff] %v3157_v55  ;;  %v3160_v62 = vadd.f32 %v2792_v56, %v596_v52  ;;  %v2794_v63 = vadd.f32 %v2793_v61, %v2344_v59  ;;  %v2348_v0 = vpop.f32.mrf.mxu0  ;;  %2635 = vmatmul.mubr.f32.gmra.mxu0 %v5039_v1  ;;  %v613_v52 = vld [vmem:[%s5689_s24 + $0x198] sm:$0xff] }
 0x34b   : > { %v2797_v3 = vpop.f32.mrf.mxu1  ;;  %3084 = vmatmul.mubr.f32.gmra.mxu1 %v5040_v4  ;;  %2640 = vmatprep.mubr.f32.mxu0 %v5041_v7  ;;  %v5059_v7 = vld [vmem:[%s5664_s5 + $0x7c0] sm:$0xff] }
 0x34c   : > { %3416 = vst [vmem:[%s5689_s24 + $0x110] sm:$0xff] %v3160_v62  ;;  %v3161_v5 = vadd.f32 %v2794_v63, %v597_v60  ;;  %v2798_v6 = vadd.f32 %v2797_v3, %v2348_v0  ;;  %3089 = vmatprep.mubr.f32.mxu1 %v5042_v8  ;;  %v2350_v9 = vpop.f32.mrf.mxu0  ;;  %v5056_v60 = vld [vmem:[%s5664_s5 + $0x7b0] sm:$0xff]  ;;  %v5057_v63 = vld [vmem:[%s5664_s5 + $0x7c8] sm:$0xff]  ;;  %v5058_v0 = vld [vmem:[%s5664_s5 + $0x7d8] sm:$0xff] }
 0x34d   : > { %v2799_v11 = vpop.f32.mrf.mxu1  ;;  %v620_v8 = vld [vmem:[%s5689_s24 + $0x1d0] sm:$0xff] }
 0x34e   : > { %3417 = vst [vmem:[%s5689_s24 + $0x118] sm:$0xff] %v3161_v5  ;;  %v3164_v12 = vadd.f32 %v2798_v6, %v600_v2  ;;  %v2800_v13 = vadd.f32 %v2799_v11, %v2350_v9  ;;  %v2354_v14 = vpop.f32.mrf.mxu0  ;;  %2641 = vmatmul.mubr.f32.gmra.mxu0 %v5043_v15  ;;  %v617_v2 = vld [vmem:[%s5689_s24 + $0x1b8] sm:$0xff] }
 0x34f   : > { %v2803_v17 = vpop.f32.mrf.mxu1  ;;  %3090 = vmatmul.mubr.f32.gmra.mxu1 %v5044_v18  ;;  %2646 = vmatprep.mubr.f32.mxu0 %v5045_v21  ;;  %v5063_v21 = vld [vmem:[%s5664_s5 + $0x7e0] sm:$0xff] }
 0x350   : > { %3420 = vst [vmem:[%s5689_s24 + $0x130] sm:$0xff] %v3164_v12  ;;  %v3165_v19 = vadd.f32 %v2800_v13, %v601_v10  ;;  %v2804_v20 = vadd.f32 %v2803_v17, %v2354_v14  ;;  %3095 = vmatprep.mubr.f32.mxu1 %v5046_v22  ;;  %v2356_v23 = vpop.f32.mrf.mxu0  ;;  %v5060_v10 = vld [vmem:[%s5664_s5 + $0x7d0] sm:$0xff]  ;;  %v5061_v13 = vld [vmem:[%s5664_s5 + $0x7e8] sm:$0xff]  ;;  %v5062_v14 = vld [vmem:[%s5664_s5 + $0x7f8] sm:$0xff] }
 0x351   : > { %v2805_v25 = vpop.f32.mrf.mxu1  ;;  %v624_v22 = vld [vmem:[%s5689_s24 + $0x1f0] sm:$0xff] }
 0x352   : > { %3421 = vst [vmem:[%s5689_s24 + $0x138] sm:$0xff] %v3165_v19  ;;  %v3168_v26 = vadd.f32 %v2804_v20, %v604_v16  ;;  %v2806_v27 = vadd.f32 %v2805_v25, %v2356_v23  ;;  %v2360_v28 = vpop.f32.mrf.mxu0  ;;  %2647 = vmatmul.mubr.f32.gmra.mxu0 %v5047_v29  ;;  %v621_v16 = vld [vmem:[%s5689_s24 + $0x1d8] sm:$0xff] }
 0x353   : > { %v2809_v31 = vpop.f32.mrf.mxu1  ;;  %3096 = vmatmul.mubr.f32.gmra.mxu1 %v5048_v32  ;;  %2652 = vmatprep.mubr.f32.mxu0 %v5049_v35 }
 0x354   : > { %3424 = vst [vmem:[%s5689_s24 + $0x150] sm:$0xff] %v3168_v26  ;;  %v3169_v33 = vadd.f32 %v2806_v27, %v605_v24  ;;  %v2810_v34 = vadd.f32 %v2809_v31, %v2360_v28  ;;  %3101 = vmatprep.mubr.f32.mxu1 %v5050_v36  ;;  %v2362_v37 = vpop.f32.mrf.mxu0  ;;  %v5064_v24 = vld [vmem:[%s5664_s5 + $0x7f0] sm:$0xff]  ;;  %v625_v28 = vld [vmem:[%s5689_s24 + $0x1f8] sm:$0xff] }
 0x355   : > { %v2811_v39 = vpop.f32.mrf.mxu1 }
 0x356   : > { %3425 = vst [vmem:[%s5689_s24 + $0x158] sm:$0xff] %v3169_v33  ;;  %v3172_v40 = vadd.f32 %v2810_v34, %v608_v30  ;;  %v2812_v41 = vadd.f32 %v2811_v39, %v2362_v37  ;;  %v2366_v42 = vpop.f32.mrf.mxu0  ;;  %2653 = vmatmul.mubr.f32.gmra.mxu0 %v5051_v43  ;;  %v628_v33 = vld [vmem:[%s5689_s24 + $0x210] sm:$0xff] }
 0x357   : > { %v2815_v45 = vpop.f32.mrf.mxu1  ;;  %3102 = vmatmul.mubr.f32.gmra.mxu1 %v5052_v46  ;;  %2658 = vmatprep.mubr.f32.mxu0 %v5053_v49  ;;  %v632_v43 = vld [vmem:[%s5689_s24 + $0x230] sm:$0xff] }
 0x358   : > { %3428 = vst [vmem:[%s5689_s24 + $0x170] sm:$0xff] %v3172_v40  ;;  %v3173_v47 = vadd.f32 %v2812_v41, %v609_v38  ;;  %v2816_v48 = vadd.f32 %v2815_v45, %v2366_v42  ;;  %3107 = vmatprep.mubr.f32.mxu1 %v5054_v50  ;;  %v2368_v51 = vpop.f32.mrf.mxu0  ;;  %v629_v38 = vld [vmem:[%s5689_s24 + $0x218] sm:$0xff] }
 0x359   : > { %v2817_v53 = vpop.f32.mrf.mxu1 }
 0x35a   : > { %3429 = vst [vmem:[%s5689_s24 + $0x178] sm:$0xff] %v3173_v47  ;;  %v3176_v54 = vadd.f32 %v2816_v48, %v612_v44  ;;  %v2818_v55 = vadd.f32 %v2817_v53, %v2368_v51  ;;  %v2372_v56 = vpop.f32.mrf.mxu0  ;;  %2659 = vmatmul.mubr.f32.gmra.mxu0 %v5055_v57  ;;  %v633_v48 = vld [vmem:[%s5689_s24 + $0x238] sm:$0xff]  ;;  %v636_v53 = vld [vmem:[%s5689_s24 + $0x250] sm:$0xff] }
 0x35b   : > { %v2821_v59 = vpop.f32.mrf.mxu1  ;;  %3108 = vmatmul.mubr.f32.gmra.mxu1 %v5056_v60  ;;  %2664 = vmatprep.mubr.f32.mxu0 %v5057_v63  ;;  %v640_v63 = vld [vmem:[%s5689_s24 + $0x270] sm:$0xff] }
 0x35c   : > { %3432 = vst [vmem:[%s5689_s24 + $0x190] sm:$0xff] %v3176_v54  ;;  %v3177_v61 = vadd.f32 %v2818_v55, %v613_v52  ;;  %v2822_v62 = vadd.f32 %v2821_v59, %v2372_v56  ;;  %3113 = vmatprep.mubr.f32.mxu1 %v5058_v0  ;;  %v2374_v1 = vpop.f32.mrf.mxu0 }
 0x35d   : > { %v2823_v3 = vpop.f32.mrf.mxu1 }
 0x35e   : > { %3433 = vst [vmem:[%s5689_s24 + $0x198] sm:$0xff] %v3177_v61  ;;  %v3180_v4 = vadd.f32 %v2822_v62, %v616_v58  ;;  %v2824_v5 = vadd.f32 %v2823_v3, %v2374_v1  ;;  %v2378_v6 = vpop.f32.mrf.mxu0  ;;  %2665 = vmatmul.mubr.f32.gmra.mxu0 %v5059_v7  ;;  %v637_v58 = vld [vmem:[%s5689_s24 + $0x258] sm:$0xff] }
 0x35f   : > { %v2827_v9 = vpop.f32.mrf.mxu1  ;;  %3114 = vmatmul.mubr.f32.gmra.mxu1 %v5060_v10  ;;  %2670 = vmatprep.mubr.f32.mxu0 %v5061_v13 }
 0x360   : > { %3436 = vst [vmem:[%s5689_s24 + $0x1b0] sm:$0xff] %v3180_v4  ;;  %v3181_v11 = vadd.f32 %v2824_v5, %v617_v2  ;;  %v2828_v12 = vadd.f32 %v2827_v9, %v2378_v6  ;;  %3119 = vmatprep.mubr.f32.mxu1 %v5062_v14  ;;  %v2380_v15 = vpop.f32.mrf.mxu0  ;;  %v641_v4 = vld [vmem:[%s5689_s24 + $0x278] sm:$0xff]  ;;  %v644_v9 = vld [vmem:[%s5689_s24 + $0x290] sm:$0xff] }
 0x361   : > { %v2829_v17 = vpop.f32.mrf.mxu1  ;;  %v645_v14 = vld [vmem:[%s5689_s24 + $0x298] sm:$0xff] }
 0x362   : > { %3437 = vst [vmem:[%s5689_s24 + $0x1b8] sm:$0xff] %v3181_v11  ;;  %v3184_v18 = vadd.f32 %v2828_v12, %v620_v8  ;;  %v2830_v19 = vadd.f32 %v2829_v17, %v2380_v15  ;;  %v2384_v20 = vpop.f32.mrf.mxu0  ;;  %2671 = vmatmul.mubr.f32.gmra.mxu0 %v5063_v21 }
 0x363   : > { %v2833_v23 = vpop.f32.mrf.mxu1  ;;  %3120 = vmatmul.mubr.f32.gmra.mxu1 %v5064_v24  ;;  %v649_v24 = vld [vmem:[%s5689_s24 + $0x2b8] sm:$0xff] }
 0x364   : > { %3440 = vst [vmem:[%s5689_s24 + $0x1d0] sm:$0xff] %v3184_v18  ;;  %v3185_v25 = vadd.f32 %v2830_v19, %v621_v16  ;;  %v2834_v26 = vadd.f32 %v2833_v23, %v2384_v20  ;;  %v2386_v27 = vpop.f32.mrf.mxu0  ;;  %v648_v19 = vld [vmem:[%s5689_s24 + $0x2b0] sm:$0xff] }
 0x365   : > { %v2835_v29 = vpop.f32.mrf.mxu1 }
 0x366   : > { %3441 = vst [vmem:[%s5689_s24 + $0x1d8] sm:$0xff] %v3185_v25  ;;  %v3188_v30 = vadd.f32 %v2834_v26, %v624_v22  ;;  %v2836_v31 = vadd.f32 %v2835_v29, %v2386_v27  ;;  %v2390_v32 = vpop.f32.mrf.mxu0  ;;  %v652_v29 = vld [vmem:[%s5689_s24 + $0x2d0] sm:$0xff] }
 0x367   : > { %v2839_v34 = vpop.f32.mrf.mxu1 }
 0x368   : > { %3444 = vst [vmem:[%s5689_s24 + $0x1f0] sm:$0xff] %v3188_v30  ;;  %v3189_v35 = vadd.f32 %v2836_v31, %v625_v28  ;;  %v2840_v36 = vadd.f32 %v2839_v34, %v2390_v32  ;;  %v2392_v37 = vpop.f32.mrf.mxu0  ;;  %v653_v34 = vld [vmem:[%s5689_s24 + $0x2d8] sm:$0xff] }
 0x369   : > { %v2841_v39 = vpop.f32.mrf.mxu1 }
 0x36a   : > { %3445 = vst [vmem:[%s5689_s24 + $0x1f8] sm:$0xff] %v3189_v35  ;;  %v3192_v40 = vadd.f32 %v2840_v36, %v628_v33  ;;  %v2842_v41 = vadd.f32 %v2841_v39, %v2392_v37  ;;  %v2396_v42 = vpop.f32.mrf.mxu0  ;;  %v656_v39 = vld [vmem:[%s5689_s24 + $0x2f0] sm:$0xff] }
 0x36b   : > { %v2845_v44 = vpop.f32.mrf.mxu1 }
 0x36c   : > { %3448 = vst [vmem:[%s5689_s24 + $0x210] sm:$0xff] %v3192_v40  ;;  %v3193_v45 = vadd.f32 %v2842_v41, %v629_v38  ;;  %v2846_v46 = vadd.f32 %v2845_v44, %v2396_v42  ;;  %v2398_v47 = vpop.f32.mrf.mxu0  ;;  %v657_v44 = vld [vmem:[%s5689_s24 + $0x2f8] sm:$0xff] }
 0x36d   : > { %v2847_v49 = vpop.f32.mrf.mxu1 }
 0x36e   : > { %3449 = vst [vmem:[%s5689_s24 + $0x218] sm:$0xff] %v3193_v45  ;;  %v3196_v50 = vadd.f32 %v2846_v46, %v632_v43  ;;  %v2848_v51 = vadd.f32 %v2847_v49, %v2398_v47  ;;  %v2402_v52 = vpop.f32.mrf.mxu0  ;;  %v660_v49 = vld [vmem:[%s5689_s24 + $0x310] sm:$0xff] }
 0x36f   : > { %v2851_v54 = vpop.f32.mrf.mxu1 }
 0x370   : > { %3452 = vst [vmem:[%s5689_s24 + $0x230] sm:$0xff] %v3196_v50  ;;  %v3197_v55 = vadd.f32 %v2848_v51, %v633_v48  ;;  %v2852_v56 = vadd.f32 %v2851_v54, %v2402_v52  ;;  %v2404_v57 = vpop.f32.mrf.mxu0  ;;  %v661_v54 = vld [vmem:[%s5689_s24 + $0x318] sm:$0xff] }
 0x371   : > { %v2853_v59 = vpop.f32.mrf.mxu1 }
 0x372   : > { %3453 = vst [vmem:[%s5689_s24 + $0x238] sm:$0xff] %v3197_v55  ;;  %v3200_v60 = vadd.f32 %v2852_v56, %v636_v53  ;;  %v2854_v61 = vadd.f32 %v2853_v59, %v2404_v57  ;;  %v2408_v62 = vpop.f32.mrf.mxu0  ;;  %v664_v59 = vld [vmem:[%s5689_s24 + $0x330] sm:$0xff] }
 0x373   : > { %v2857_v0 = vpop.f32.mrf.mxu1 }
 0x374   : > { %3456 = vst [vmem:[%s5689_s24 + $0x250] sm:$0xff] %v3200_v60  ;;  %v3201_v1 = vadd.f32 %v2854_v61, %v637_v58  ;;  %v2858_v2 = vadd.f32 %v2857_v0, %v2408_v62  ;;  %v2410_v3 = vpop.f32.mrf.mxu0  ;;  %v665_v0 = vld [vmem:[%s5689_s24 + $0x338] sm:$0xff] }
 0x375   : > { %v2859_v5 = vpop.f32.mrf.mxu1 }
 0x376   : > { %3457 = vst [vmem:[%s5689_s24 + $0x258] sm:$0xff] %v3201_v1  ;;  %v3204_v6 = vadd.f32 %v2858_v2, %v640_v63  ;;  %v2860_v7 = vadd.f32 %v2859_v5, %v2410_v3  ;;  %v2414_v8 = vpop.f32.mrf.mxu0  ;;  %v668_v5 = vld [vmem:[%s5689_s24 + $0x350] sm:$0xff] }
 0x377   : > { %v2863_v10 = vpop.f32.mrf.mxu1 }
 0x378   : > { %3460 = vst [vmem:[%s5689_s24 + $0x270] sm:$0xff] %v3204_v6  ;;  %v3205_v11 = vadd.f32 %v2860_v7, %v641_v4  ;;  %v2864_v12 = vadd.f32 %v2863_v10, %v2414_v8  ;;  %v2416_v13 = vpop.f32.mrf.mxu0  ;;  %v669_v10 = vld [vmem:[%s5689_s24 + $0x358] sm:$0xff] }
 0x379   : > { %v2865_v15 = vpop.f32.mrf.mxu1 }
 0x37a   : > { %3461 = vst [vmem:[%s5689_s24 + $0x278] sm:$0xff] %v3205_v11  ;;  %v3208_v16 = vadd.f32 %v2864_v12, %v644_v9  ;;  %v2866_v17 = vadd.f32 %v2865_v15, %v2416_v13  ;;  %v2420_v18 = vpop.f32.mrf.mxu0  ;;  %v672_v15 = vld [vmem:[%s5689_s24 + $0x370] sm:$0xff] }
 0x37b   : > { %v2869_v20 = vpop.f32.mrf.mxu1 }
 0x37c   : > { %3464 = vst [vmem:[%s5689_s24 + $0x290] sm:$0xff] %v3208_v16  ;;  %v3209_v21 = vadd.f32 %v2866_v17, %v645_v14  ;;  %v2870_v22 = vadd.f32 %v2869_v20, %v2420_v18  ;;  %v2422_v23 = vpop.f32.mrf.mxu0  ;;  %v673_v20 = vld [vmem:[%s5689_s24 + $0x378] sm:$0xff] }
 0x37d   : > { %v2871_v25 = vpop.f32.mrf.mxu1 }
 0x37e   : > { %3465 = vst [vmem:[%s5689_s24 + $0x298] sm:$0xff] %v3209_v21  ;;  %v3212_v26 = vadd.f32 %v2870_v22, %v648_v19  ;;  %v2872_v27 = vadd.f32 %v2871_v25, %v2422_v23  ;;  %v2426_v28 = vpop.f32.mrf.mxu0  ;;  %v676_v25 = vld [vmem:[%s5689_s24 + $0x390] sm:$0xff] }
 0x37f   : > { %v2875_v30 = vpop.f32.mrf.mxu1 }
 0x380   : > { %3468 = vst [vmem:[%s5689_s24 + $0x2b0] sm:$0xff] %v3212_v26  ;;  %v3213_v31 = vadd.f32 %v2872_v27, %v649_v24  ;;  %v2876_v32 = vadd.f32 %v2875_v30, %v2426_v28  ;;  %v2428_v33 = vpop.f32.mrf.mxu0  ;;  %v677_v30 = vld [vmem:[%s5689_s24 + $0x398] sm:$0xff] }
 0x381   : > { %v2877_v35 = vpop.f32.mrf.mxu1 }
 0x382   : > { %3469 = vst [vmem:[%s5689_s24 + $0x2b8] sm:$0xff] %v3213_v31  ;;  %v3216_v36 = vadd.f32 %v2876_v32, %v652_v29  ;;  %v2878_v37 = vadd.f32 %v2877_v35, %v2428_v33  ;;  %v2432_v38 = vpop.f32.mrf.mxu0  ;;  %v680_v35 = vld [vmem:[%s5689_s24 + $0x3b0] sm:$0xff] }
 0x383   : > { %v2881_v40 = vpop.f32.mrf.mxu1 }
 0x384   : > { %3472 = vst [vmem:[%s5689_s24 + $0x2d0] sm:$0xff] %v3216_v36  ;;  %v3217_v41 = vadd.f32 %v2878_v37, %v653_v34  ;;  %v2882_v42 = vadd.f32 %v2881_v40, %v2432_v38  ;;  %v2434_v43 = vpop.f32.mrf.mxu0  ;;  %v681_v40 = vld [vmem:[%s5689_s24 + $0x3b8] sm:$0xff] }
 0x385   : > { %v2883_v45 = vpop.f32.mrf.mxu1 }
 0x386   : > { %3473 = vst [vmem:[%s5689_s24 + $0x2d8] sm:$0xff] %v3217_v41  ;;  %v3220_v46 = vadd.f32 %v2882_v42, %v656_v39  ;;  %v2884_v47 = vadd.f32 %v2883_v45, %v2434_v43  ;;  %v2438_v48 = vpop.f32.mrf.mxu0  ;;  %v684_v45 = vld [vmem:[%s5689_s24 + $0x3d0] sm:$0xff] }
 0x387   : > { %v2887_v50 = vpop.f32.mrf.mxu1 }
 0x388   : > { %3476 = vst [vmem:[%s5689_s24 + $0x2f0] sm:$0xff] %v3220_v46  ;;  %v3221_v51 = vadd.f32 %v2884_v47, %v657_v44  ;;  %v2888_v52 = vadd.f32 %v2887_v50, %v2438_v48  ;;  %v2440_v53 = vpop.f32.mrf.mxu0  ;;  %v685_v50 = vld [vmem:[%s5689_s24 + $0x3d8] sm:$0xff] }
 0x389   : > { %v2889_v55 = vpop.f32.mrf.mxu1 }
 0x38a   : > { %3477 = vst [vmem:[%s5689_s24 + $0x2f8] sm:$0xff] %v3221_v51  ;;  %v3224_v56 = vadd.f32 %v2888_v52, %v660_v49  ;;  %v2890_v57 = vadd.f32 %v2889_v55, %v2440_v53  ;;  %v2444_v58 = vpop.f32.mrf.mxu0  ;;  %v688_v55 = vld [vmem:[%s5689_s24 + $0x3f0] sm:$0xff] }
 0x38b   : > { %v2893_v60 = vpop.f32.mrf.mxu1 }
 0x38c   : > { %3480 = vst [vmem:[%s5689_s24 + $0x310] sm:$0xff] %v3224_v56  ;;  %v3225_v61 = vadd.f32 %v2890_v57, %v661_v54  ;;  %v2894_v62 = vadd.f32 %v2893_v60, %v2444_v58  ;;  %v2446_v63 = vpop.f32.mrf.mxu0  ;;  %v689_v60 = vld [vmem:[%s5689_s24 + $0x3f8] sm:$0xff] }
 0x38d   : > { %v2895_v1 = vpop.f32.mrf.mxu1 }
 0x38e   : > { %3481 = vst [vmem:[%s5689_s24 + $0x318] sm:$0xff] %v3225_v61  ;;  %v3228_v2 = vadd.f32 %v2894_v62, %v664_v59  ;;  %v2896_v3 = vadd.f32 %v2895_v1, %v2446_v63  ;;  %v2450_v4 = vpop.f32.mrf.mxu0  ;;  %v692_v1 = vld [vmem:[%s5689_s24 + $0x410] sm:$0xff] }
 0x38f   : > { %v2899_v6 = vpop.f32.mrf.mxu1 }
 0x390   : > { %3484 = vst [vmem:[%s5689_s24 + $0x330] sm:$0xff] %v3228_v2  ;;  %v3229_v7 = vadd.f32 %v2896_v3, %v665_v0  ;;  %v2900_v8 = vadd.f32 %v2899_v6, %v2450_v4  ;;  %v2452_v9 = vpop.f32.mrf.mxu0  ;;  %v693_v6 = vld [vmem:[%s5689_s24 + $0x418] sm:$0xff] }
 0x391   : > { %v2901_v11 = vpop.f32.mrf.mxu1 }
 0x392   : > { %3485 = vst [vmem:[%s5689_s24 + $0x338] sm:$0xff] %v3229_v7  ;;  %v3232_v12 = vadd.f32 %v2900_v8, %v668_v5  ;;  %v2902_v13 = vadd.f32 %v2901_v11, %v2452_v9  ;;  %v2456_v14 = vpop.f32.mrf.mxu0  ;;  %v696_v11 = vld [vmem:[%s5689_s24 + $0x430] sm:$0xff] }
 0x393   : > { %v2905_v16 = vpop.f32.mrf.mxu1 }
 0x394   : > { %3488 = vst [vmem:[%s5689_s24 + $0x350] sm:$0xff] %v3232_v12  ;;  %v3233_v17 = vadd.f32 %v2902_v13, %v669_v10  ;;  %v2906_v18 = vadd.f32 %v2905_v16, %v2456_v14  ;;  %v2458_v19 = vpop.f32.mrf.mxu0  ;;  %v697_v16 = vld [vmem:[%s5689_s24 + $0x438] sm:$0xff] }
 0x395   : > { %v2907_v21 = vpop.f32.mrf.mxu1 }
 0x396   : > { %3489 = vst [vmem:[%s5689_s24 + $0x358] sm:$0xff] %v3233_v17  ;;  %v3236_v22 = vadd.f32 %v2906_v18, %v672_v15  ;;  %v2908_v23 = vadd.f32 %v2907_v21, %v2458_v19  ;;  %v2462_v24 = vpop.f32.mrf.mxu0  ;;  %v700_v21 = vld [vmem:[%s5689_s24 + $0x450] sm:$0xff] }
 0x397   : > { %v2911_v26 = vpop.f32.mrf.mxu1 }
 0x398   : > { %3492 = vst [vmem:[%s5689_s24 + $0x370] sm:$0xff] %v3236_v22  ;;  %v3237_v27 = vadd.f32 %v2908_v23, %v673_v20  ;;  %v2912_v28 = vadd.f32 %v2911_v26, %v2462_v24  ;;  %v2464_v29 = vpop.f32.mrf.mxu0  ;;  %v701_v26 = vld [vmem:[%s5689_s24 + $0x458] sm:$0xff] }
 0x399   : > { %v2913_v31 = vpop.f32.mrf.mxu1 }
 0x39a   : > { %3493 = vst [vmem:[%s5689_s24 + $0x378] sm:$0xff] %v3237_v27  ;;  %v3240_v32 = vadd.f32 %v2912_v28, %v676_v25  ;;  %v2914_v33 = vadd.f32 %v2913_v31, %v2464_v29  ;;  %v2468_v34 = vpop.f32.mrf.mxu0  ;;  %v704_v31 = vld [vmem:[%s5689_s24 + $0x470] sm:$0xff] }
 0x39b   : > { %v2917_v36 = vpop.f32.mrf.mxu1 }
 0x39c   : > { %3496 = vst [vmem:[%s5689_s24 + $0x390] sm:$0xff] %v3240_v32  ;;  %v3241_v37 = vadd.f32 %v2914_v33, %v677_v30  ;;  %v2918_v38 = vadd.f32 %v2917_v36, %v2468_v34  ;;  %v2470_v39 = vpop.f32.mrf.mxu0  ;;  %v705_v36 = vld [vmem:[%s5689_s24 + $0x478] sm:$0xff] }
 0x39d   : > { %v2919_v41 = vpop.f32.mrf.mxu1 }
 0x39e   : > { %3497 = vst [vmem:[%s5689_s24 + $0x398] sm:$0xff] %v3241_v37  ;;  %v3244_v42 = vadd.f32 %v2918_v38, %v680_v35  ;;  %v2920_v43 = vadd.f32 %v2919_v41, %v2470_v39  ;;  %v2474_v44 = vpop.f32.mrf.mxu0  ;;  %v708_v41 = vld [vmem:[%s5689_s24 + $0x490] sm:$0xff] }
 0x39f   : > { %v2923_v46 = vpop.f32.mrf.mxu1 }
 0x3a0   : > { %3500 = vst [vmem:[%s5689_s24 + $0x3b0] sm:$0xff] %v3244_v42  ;;  %v3245_v47 = vadd.f32 %v2920_v43, %v681_v40  ;;  %v2924_v48 = vadd.f32 %v2923_v46, %v2474_v44  ;;  %v2476_v49 = vpop.f32.mrf.mxu0  ;;  %v709_v46 = vld [vmem:[%s5689_s24 + $0x498] sm:$0xff] }
 0x3a1   : > { %v2925_v51 = vpop.f32.mrf.mxu1 }
 0x3a2   : > { %3501 = vst [vmem:[%s5689_s24 + $0x3b8] sm:$0xff] %v3245_v47  ;;  %v3248_v52 = vadd.f32 %v2924_v48, %v684_v45  ;;  %v2926_v53 = vadd.f32 %v2925_v51, %v2476_v49  ;;  %v2480_v54 = vpop.f32.mrf.mxu0  ;;  %v712_v51 = vld [vmem:[%s5689_s24 + $0x4b0] sm:$0xff] }
 0x3a3   : > { %v2929_v56 = vpop.f32.mrf.mxu1 }
 0x3a4   : > { %3504 = vst [vmem:[%s5689_s24 + $0x3d0] sm:$0xff] %v3248_v52  ;;  %v3249_v57 = vadd.f32 %v2926_v53, %v685_v50  ;;  %v2930_v58 = vadd.f32 %v2929_v56, %v2480_v54  ;;  %v2482_v59 = vpop.f32.mrf.mxu0  ;;  %v713_v56 = vld [vmem:[%s5689_s24 + $0x4b8] sm:$0xff] }
 0x3a5   : > { %v2931_v61 = vpop.f32.mrf.mxu1 }
 0x3a6   : > { %3505 = vst [vmem:[%s5689_s24 + $0x3d8] sm:$0xff] %v3249_v57  ;;  %v3252_v62 = vadd.f32 %v2930_v58, %v688_v55  ;;  %v2932_v63 = vadd.f32 %v2931_v61, %v2482_v59  ;;  %v2486_v0 = vpop.f32.mrf.mxu0  ;;  %v716_v61 = vld [vmem:[%s5689_s24 + $0x4d0] sm:$0xff] }
 0x3a7   : > { %v2935_v2 = vpop.f32.mrf.mxu1 }
 0x3a8   : > { %3508 = vst [vmem:[%s5689_s24 + $0x3f0] sm:$0xff] %v3252_v62  ;;  %v3253_v3 = vadd.f32 %v2932_v63, %v689_v60  ;;  %v2936_v4 = vadd.f32 %v2935_v2, %v2486_v0  ;;  %v2488_v5 = vpop.f32.mrf.mxu0  ;;  %v717_v2 = vld [vmem:[%s5689_s24 + $0x4d8] sm:$0xff] }
 0x3a9   : > { %v2937_v7 = vpop.f32.mrf.mxu1 }
 0x3aa   : > { %3509 = vst [vmem:[%s5689_s24 + $0x3f8] sm:$0xff] %v3253_v3  ;;  %v3256_v8 = vadd.f32 %v2936_v4, %v692_v1  ;;  %v2938_v9 = vadd.f32 %v2937_v7, %v2488_v5  ;;  %v2492_v10 = vpop.f32.mrf.mxu0  ;;  %v720_v7 = vld [vmem:[%s5689_s24 + $0x4f0] sm:$0xff] }
 0x3ab   : > { %v2941_v12 = vpop.f32.mrf.mxu1 }
 0x3ac   : > { %3512 = vst [vmem:[%s5689_s24 + $0x410] sm:$0xff] %v3256_v8  ;;  %v3257_v13 = vadd.f32 %v2938_v9, %v693_v6  ;;  %v2942_v14 = vadd.f32 %v2941_v12, %v2492_v10  ;;  %v2494_v15 = vpop.f32.mrf.mxu0  ;;  %v721_v12 = vld [vmem:[%s5689_s24 + $0x4f8] sm:$0xff] }
 0x3ad   : > { %v2943_v17 = vpop.f32.mrf.mxu1 }
 0x3ae   : > { %3513 = vst [vmem:[%s5689_s24 + $0x418] sm:$0xff] %v3257_v13  ;;  %v3260_v18 = vadd.f32 %v2942_v14, %v696_v11  ;;  %v2944_v19 = vadd.f32 %v2943_v17, %v2494_v15  ;;  %v2498_v20 = vpop.f32.mrf.mxu0  ;;  %v724_v17 = vld [vmem:[%s5689_s24 + $0x510] sm:$0xff] }
 0x3af   : > { %v2947_v22 = vpop.f32.mrf.mxu1 }
 0x3b0   : > { %3516 = vst [vmem:[%s5689_s24 + $0x430] sm:$0xff] %v3260_v18  ;;  %v3261_v23 = vadd.f32 %v2944_v19, %v697_v16  ;;  %v2948_v24 = vadd.f32 %v2947_v22, %v2498_v20  ;;  %v2500_v25 = vpop.f32.mrf.mxu0  ;;  %v725_v22 = vld [vmem:[%s5689_s24 + $0x518] sm:$0xff] }
 0x3b1   : > { %v2949_v27 = vpop.f32.mrf.mxu1 }
 0x3b2   : > { %3517 = vst [vmem:[%s5689_s24 + $0x438] sm:$0xff] %v3261_v23  ;;  %v3264_v28 = vadd.f32 %v2948_v24, %v700_v21  ;;  %v2950_v29 = vadd.f32 %v2949_v27, %v2500_v25  ;;  %v2504_v30 = vpop.f32.mrf.mxu0  ;;  %v728_v27 = vld [vmem:[%s5689_s24 + $0x530] sm:$0xff] }
 0x3b3   : > { %v2953_v32 = vpop.f32.mrf.mxu1 }
 0x3b4   : > { %3520 = vst [vmem:[%s5689_s24 + $0x450] sm:$0xff] %v3264_v28  ;;  %v3265_v33 = vadd.f32 %v2950_v29, %v701_v26  ;;  %v2954_v34 = vadd.f32 %v2953_v32, %v2504_v30  ;;  %v2506_v35 = vpop.f32.mrf.mxu0  ;;  %v729_v32 = vld [vmem:[%s5689_s24 + $0x538] sm:$0xff] }
 0x3b5   : > { %v2955_v37 = vpop.f32.mrf.mxu1 }
 0x3b6   : > { %3521 = vst [vmem:[%s5689_s24 + $0x458] sm:$0xff] %v3265_v33  ;;  %v3268_v38 = vadd.f32 %v2954_v34, %v704_v31  ;;  %v2956_v39 = vadd.f32 %v2955_v37, %v2506_v35  ;;  %v2510_v40 = vpop.f32.mrf.mxu0  ;;  %v732_v37 = vld [vmem:[%s5689_s24 + $0x550] sm:$0xff] }
 0x3b7   : > { %v2959_v42 = vpop.f32.mrf.mxu1 }
 0x3b8   : > { %3524 = vst [vmem:[%s5689_s24 + $0x470] sm:$0xff] %v3268_v38  ;;  %v3269_v43 = vadd.f32 %v2956_v39, %v705_v36  ;;  %v2960_v44 = vadd.f32 %v2959_v42, %v2510_v40  ;;  %v2512_v45 = vpop.f32.mrf.mxu0  ;;  %v733_v42 = vld [vmem:[%s5689_s24 + $0x558] sm:$0xff] }
 0x3b9   : > { %v2961_v47 = vpop.f32.mrf.mxu1 }
 0x3ba   : > { %3525 = vst [vmem:[%s5689_s24 + $0x478] sm:$0xff] %v3269_v43  ;;  %v3272_v48 = vadd.f32 %v2960_v44, %v708_v41  ;;  %v2962_v49 = vadd.f32 %v2961_v47, %v2512_v45  ;;  %v2516_v50 = vpop.f32.mrf.mxu0  ;;  %v736_v47 = vld [vmem:[%s5689_s24 + $0x570] sm:$0xff] }
 0x3bb   : > { %v2965_v52 = vpop.f32.mrf.mxu1 }
 0x3bc   : > { %3528 = vst [vmem:[%s5689_s24 + $0x490] sm:$0xff] %v3272_v48  ;;  %v3273_v53 = vadd.f32 %v2962_v49, %v709_v46  ;;  %v2966_v54 = vadd.f32 %v2965_v52, %v2516_v50  ;;  %v2518_v55 = vpop.f32.mrf.mxu0  ;;  %v737_v52 = vld [vmem:[%s5689_s24 + $0x578] sm:$0xff] }
 0x3bd   : > { %v2967_v57 = vpop.f32.mrf.mxu1 }
 0x3be   : > { %3529 = vst [vmem:[%s5689_s24 + $0x498] sm:$0xff] %v3273_v53  ;;  %v3276_v58 = vadd.f32 %v2966_v54, %v712_v51  ;;  %v2968_v59 = vadd.f32 %v2967_v57, %v2518_v55  ;;  %v2522_v60 = vpop.f32.mrf.mxu0  ;;  %v740_v57 = vld [vmem:[%s5689_s24 + $0x590] sm:$0xff] }
 0x3bf   : > { %v2971_v62 = vpop.f32.mrf.mxu1 }
 0x3c0   : > { %3532 = vst [vmem:[%s5689_s24 + $0x4b0] sm:$0xff] %v3276_v58  ;;  %v3277_v63 = vadd.f32 %v2968_v59, %v713_v56  ;;  %v2972_v0 = vadd.f32 %v2971_v62, %v2522_v60  ;;  %v2524_v1 = vpop.f32.mrf.mxu0  ;;  %v741_v62 = vld [vmem:[%s5689_s24 + $0x598] sm:$0xff] }
 0x3c1   : > { %v2973_v3 = vpop.f32.mrf.mxu1 }
 0x3c2   : > { %3533 = vst [vmem:[%s5689_s24 + $0x4b8] sm:$0xff] %v3277_v63  ;;  %v3280_v4 = vadd.f32 %v2972_v0, %v716_v61  ;;  %v2974_v5 = vadd.f32 %v2973_v3, %v2524_v1  ;;  %v2528_v6 = vpop.f32.mrf.mxu0  ;;  %v744_v3 = vld [vmem:[%s5689_s24 + $0x5b0] sm:$0xff] }
 0x3c3   : > { %v2977_v8 = vpop.f32.mrf.mxu1 }
 0x3c4   : > { %3536 = vst [vmem:[%s5689_s24 + $0x4d0] sm:$0xff] %v3280_v4  ;;  %v3281_v9 = vadd.f32 %v2974_v5, %v717_v2  ;;  %v2978_v10 = vadd.f32 %v2977_v8, %v2528_v6  ;;  %v2530_v11 = vpop.f32.mrf.mxu0  ;;  %v745_v8 = vld [vmem:[%s5689_s24 + $0x5b8] sm:$0xff] }
 0x3c5   : > { %v2979_v13 = vpop.f32.mrf.mxu1 }
 0x3c6   : > { %3537 = vst [vmem:[%s5689_s24 + $0x4d8] sm:$0xff] %v3281_v9  ;;  %v3284_v14 = vadd.f32 %v2978_v10, %v720_v7  ;;  %v2980_v15 = vadd.f32 %v2979_v13, %v2530_v11  ;;  %v2534_v16 = vpop.f32.mrf.mxu0  ;;  %v748_v13 = vld [vmem:[%s5689_s24 + $0x5d0] sm:$0xff] }
 0x3c7   : > { %v2983_v18 = vpop.f32.mrf.mxu1 }
 0x3c8   : > { %3540 = vst [vmem:[%s5689_s24 + $0x4f0] sm:$0xff] %v3284_v14  ;;  %v3285_v19 = vadd.f32 %v2980_v15, %v721_v12  ;;  %v2984_v20 = vadd.f32 %v2983_v18, %v2534_v16  ;;  %v2536_v21 = vpop.f32.mrf.mxu0  ;;  %v749_v18 = vld [vmem:[%s5689_s24 + $0x5d8] sm:$0xff] }
 0x3c9   : > { %v2985_v23 = vpop.f32.mrf.mxu1 }
 0x3ca   : > { %3541 = vst [vmem:[%s5689_s24 + $0x4f8] sm:$0xff] %v3285_v19  ;;  %v3288_v24 = vadd.f32 %v2984_v20, %v724_v17  ;;  %v2986_v25 = vadd.f32 %v2985_v23, %v2536_v21  ;;  %v2540_v26 = vpop.f32.mrf.mxu0  ;;  %v752_v23 = vld [vmem:[%s5689_s24 + $0x5f0] sm:$0xff] }
 0x3cb   : > { %v2989_v28 = vpop.f32.mrf.mxu1 }
 0x3cc   : > { %3544 = vst [vmem:[%s5689_s24 + $0x510] sm:$0xff] %v3288_v24  ;;  %v3289_v29 = vadd.f32 %v2986_v25, %v725_v22  ;;  %v2990_v30 = vadd.f32 %v2989_v28, %v2540_v26  ;;  %v2542_v31 = vpop.f32.mrf.mxu0  ;;  %v753_v28 = vld [vmem:[%s5689_s24 + $0x5f8] sm:$0xff] }
 0x3cd   : > { %v2991_v33 = vpop.f32.mrf.mxu1 }
 0x3ce   : > { %3545 = vst [vmem:[%s5689_s24 + $0x518] sm:$0xff] %v3289_v29  ;;  %v3292_v34 = vadd.f32 %v2990_v30, %v728_v27  ;;  %v2992_v35 = vadd.f32 %v2991_v33, %v2542_v31  ;;  %v2546_v36 = vpop.f32.mrf.mxu0  ;;  %v756_v33 = vld [vmem:[%s5689_s24 + $0x610] sm:$0xff] }
 0x3cf   : > { %v2995_v38 = vpop.f32.mrf.mxu1 }
 0x3d0   : > { %3548 = vst [vmem:[%s5689_s24 + $0x530] sm:$0xff] %v3292_v34  ;;  %v3293_v39 = vadd.f32 %v2992_v35, %v729_v32  ;;  %v2996_v40 = vadd.f32 %v2995_v38, %v2546_v36  ;;  %v2548_v41 = vpop.f32.mrf.mxu0  ;;  %v757_v38 = vld [vmem:[%s5689_s24 + $0x618] sm:$0xff] }
 0x3d1   : > { %v2997_v43 = vpop.f32.mrf.mxu1 }
 0x3d2   : > { %3549 = vst [vmem:[%s5689_s24 + $0x538] sm:$0xff] %v3293_v39  ;;  %v3296_v44 = vadd.f32 %v2996_v40, %v732_v37  ;;  %v2998_v45 = vadd.f32 %v2997_v43, %v2548_v41  ;;  %v2552_v46 = vpop.f32.mrf.mxu0  ;;  %v760_v43 = vld [vmem:[%s5689_s24 + $0x630] sm:$0xff] }
 0x3d3   : > { %v3001_v48 = vpop.f32.mrf.mxu1 }
 0x3d4   : > { %3552 = vst [vmem:[%s5689_s24 + $0x550] sm:$0xff] %v3296_v44  ;;  %v3297_v49 = vadd.f32 %v2998_v45, %v733_v42  ;;  %v3002_v50 = vadd.f32 %v3001_v48, %v2552_v46  ;;  %v2554_v51 = vpop.f32.mrf.mxu0  ;;  %v761_v48 = vld [vmem:[%s5689_s24 + $0x638] sm:$0xff] }
 0x3d5   : > { %v3003_v53 = vpop.f32.mrf.mxu1 }
 0x3d6   : > { %3553 = vst [vmem:[%s5689_s24 + $0x558] sm:$0xff] %v3297_v49  ;;  %v3300_v54 = vadd.f32 %v3002_v50, %v736_v47  ;;  %v3004_v55 = vadd.f32 %v3003_v53, %v2554_v51  ;;  %v2558_v56 = vpop.f32.mrf.mxu0  ;;  %v764_v53 = vld [vmem:[%s5689_s24 + $0x650] sm:$0xff] }
 0x3d7   : > { %v3007_v58 = vpop.f32.mrf.mxu1 }
 0x3d8   : > { %3556 = vst [vmem:[%s5689_s24 + $0x570] sm:$0xff] %v3300_v54  ;;  %v3301_v59 = vadd.f32 %v3004_v55, %v737_v52  ;;  %v3008_v60 = vadd.f32 %v3007_v58, %v2558_v56  ;;  %v2560_v61 = vpop.f32.mrf.mxu0  ;;  %v765_v58 = vld [vmem:[%s5689_s24 + $0x658] sm:$0xff] }
 0x3d9   : > { %v3009_v63 = vpop.f32.mrf.mxu1 }
 0x3da   : > { %3557 = vst [vmem:[%s5689_s24 + $0x578] sm:$0xff] %v3301_v59  ;;  %v3304_v0 = vadd.f32 %v3008_v60, %v740_v57  ;;  %v3010_v1 = vadd.f32 %v3009_v63, %v2560_v61  ;;  %v2564_v2 = vpop.f32.mrf.mxu0  ;;  %v768_v63 = vld [vmem:[%s5689_s24 + $0x670] sm:$0xff] }
 0x3db   : > { %v3013_v4 = vpop.f32.mrf.mxu1 }
 0x3dc   : > { %3560 = vst [vmem:[%s5689_s24 + $0x590] sm:$0xff] %v3304_v0  ;;  %v3305_v5 = vadd.f32 %v3010_v1, %v741_v62  ;;  %v3014_v6 = vadd.f32 %v3013_v4, %v2564_v2  ;;  %v2566_v7 = vpop.f32.mrf.mxu0  ;;  %v769_v4 = vld [vmem:[%s5689_s24 + $0x678] sm:$0xff] }
 0x3dd   : > { %v3015_v9 = vpop.f32.mrf.mxu1 }
 0x3de   : > { %3561 = vst [vmem:[%s5689_s24 + $0x598] sm:$0xff] %v3305_v5  ;;  %v3308_v10 = vadd.f32 %v3014_v6, %v744_v3  ;;  %v3016_v11 = vadd.f32 %v3015_v9, %v2566_v7  ;;  %v2570_v12 = vpop.f32.mrf.mxu0  ;;  %v772_v9 = vld [vmem:[%s5689_s24 + $0x690] sm:$0xff] }
 0x3df   : > { %v3019_v14 = vpop.f32.mrf.mxu1 }
 0x3e0   : > { %3564 = vst [vmem:[%s5689_s24 + $0x5b0] sm:$0xff] %v3308_v10  ;;  %v3309_v15 = vadd.f32 %v3016_v11, %v745_v8  ;;  %v3020_v16 = vadd.f32 %v3019_v14, %v2570_v12  ;;  %v2572_v17 = vpop.f32.mrf.mxu0  ;;  %v773_v14 = vld [vmem:[%s5689_s24 + $0x698] sm:$0xff] }
 0x3e1   : > { %v3021_v19 = vpop.f32.mrf.mxu1 }
 0x3e2   : > { %3565 = vst [vmem:[%s5689_s24 + $0x5b8] sm:$0xff] %v3309_v15  ;;  %v3312_v20 = vadd.f32 %v3020_v16, %v748_v13  ;;  %v3022_v21 = vadd.f32 %v3021_v19, %v2572_v17  ;;  %v2576_v22 = vpop.f32.mrf.mxu0  ;;  %v776_v19 = vld [vmem:[%s5689_s24 + $0x6b0] sm:$0xff] }
 0x3e3   : > { %v3025_v24 = vpop.f32.mrf.mxu1 }
 0x3e4   : > { %3568 = vst [vmem:[%s5689_s24 + $0x5d0] sm:$0xff] %v3312_v20  ;;  %v3313_v25 = vadd.f32 %v3022_v21, %v749_v18  ;;  %v3026_v26 = vadd.f32 %v3025_v24, %v2576_v22  ;;  %v2578_v27 = vpop.f32.mrf.mxu0  ;;  %v777_v24 = vld [vmem:[%s5689_s24 + $0x6b8] sm:$0xff] }
 0x3e5   : > { %v3027_v29 = vpop.f32.mrf.mxu1 }
 0x3e6   : > { %3569 = vst [vmem:[%s5689_s24 + $0x5d8] sm:$0xff] %v3313_v25  ;;  %v3316_v30 = vadd.f32 %v3026_v26, %v752_v23  ;;  %v3028_v31 = vadd.f32 %v3027_v29, %v2578_v27  ;;  %v2582_v32 = vpop.f32.mrf.mxu0  ;;  %v780_v29 = vld [vmem:[%s5689_s24 + $0x6d0] sm:$0xff] }
 0x3e7   : > { %v3031_v34 = vpop.f32.mrf.mxu1 }
 0x3e8   : > { %3572 = vst [vmem:[%s5689_s24 + $0x5f0] sm:$0xff] %v3316_v30  ;;  %v3317_v35 = vadd.f32 %v3028_v31, %v753_v28  ;;  %v3032_v36 = vadd.f32 %v3031_v34, %v2582_v32  ;;  %v2584_v37 = vpop.f32.mrf.mxu0  ;;  %v781_v34 = vld [vmem:[%s5689_s24 + $0x6d8] sm:$0xff] }
 0x3e9   : > { %v3033_v39 = vpop.f32.mrf.mxu1 }
 0x3ea   : > { %3573 = vst [vmem:[%s5689_s24 + $0x5f8] sm:$0xff] %v3317_v35  ;;  %v3320_v40 = vadd.f32 %v3032_v36, %v756_v33  ;;  %v3034_v41 = vadd.f32 %v3033_v39, %v2584_v37  ;;  %v2588_v42 = vpop.f32.mrf.mxu0  ;;  %v784_v39 = vld [vmem:[%s5689_s24 + $0x6f0] sm:$0xff] }
 0x3eb   : > { %v3037_v44 = vpop.f32.mrf.mxu1 }
 0x3ec   : > { %3576 = vst [vmem:[%s5689_s24 + $0x610] sm:$0xff] %v3320_v40  ;;  %v3321_v45 = vadd.f32 %v3034_v41, %v757_v38  ;;  %v3038_v46 = vadd.f32 %v3037_v44, %v2588_v42  ;;  %v2590_v47 = vpop.f32.mrf.mxu0  ;;  %v785_v44 = vld [vmem:[%s5689_s24 + $0x6f8] sm:$0xff] }
 0x3ed   : > { %v3039_v49 = vpop.f32.mrf.mxu1 }
 0x3ee   : > { %3577 = vst [vmem:[%s5689_s24 + $0x618] sm:$0xff] %v3321_v45  ;;  %v3324_v50 = vadd.f32 %v3038_v46, %v760_v43  ;;  %v3040_v51 = vadd.f32 %v3039_v49, %v2590_v47  ;;  %v2594_v52 = vpop.f32.mrf.mxu0  ;;  %v788_v49 = vld [vmem:[%s5689_s24 + $0x710] sm:$0xff] }
 0x3ef   : > { %v3043_v54 = vpop.f32.mrf.mxu1 }
 0x3f0   : > { %3580 = vst [vmem:[%s5689_s24 + $0x630] sm:$0xff] %v3324_v50  ;;  %v3325_v55 = vadd.f32 %v3040_v51, %v761_v48  ;;  %v3044_v56 = vadd.f32 %v3043_v54, %v2594_v52  ;;  %v2596_v57 = vpop.f32.mrf.mxu0  ;;  %v789_v54 = vld [vmem:[%s5689_s24 + $0x718] sm:$0xff] }
 0x3f1   : > { %v3045_v59 = vpop.f32.mrf.mxu1 }
 0x3f2   : > { %3581 = vst [vmem:[%s5689_s24 + $0x638] sm:$0xff] %v3325_v55  ;;  %v3328_v60 = vadd.f32 %v3044_v56, %v764_v53  ;;  %v3046_v61 = vadd.f32 %v3045_v59, %v2596_v57  ;;  %v2600_v62 = vpop.f32.mrf.mxu0  ;;  %v792_v59 = vld [vmem:[%s5689_s24 + $0x730] sm:$0xff] }
 0x3f3   : > { %v3049_v0 = vpop.f32.mrf.mxu1 }
 0x3f4   : > { %3584 = vst [vmem:[%s5689_s24 + $0x650] sm:$0xff] %v3328_v60  ;;  %v3329_v1 = vadd.f32 %v3046_v61, %v765_v58  ;;  %v3050_v2 = vadd.f32 %v3049_v0, %v2600_v62  ;;  %v2602_v3 = vpop.f32.mrf.mxu0  ;;  %v793_v0 = vld [vmem:[%s5689_s24 + $0x738] sm:$0xff] }
 0x3f5   : > { %v3051_v5 = vpop.f32.mrf.mxu1 }
 0x3f6   : > { %3585 = vst [vmem:[%s5689_s24 + $0x658] sm:$0xff] %v3329_v1  ;;  %v3332_v6 = vadd.f32 %v3050_v2, %v768_v63  ;;  %v3052_v7 = vadd.f32 %v3051_v5, %v2602_v3  ;;  %v2606_v8 = vpop.f32.mrf.mxu0  ;;  %v796_v5 = vld [vmem:[%s5689_s24 + $0x750] sm:$0xff] }
 0x3f7   : > { %v3055_v10 = vpop.f32.mrf.mxu1 }
 0x3f8   : > { %3588 = vst [vmem:[%s5689_s24 + $0x670] sm:$0xff] %v3332_v6  ;;  %v3333_v11 = vadd.f32 %v3052_v7, %v769_v4  ;;  %v3056_v12 = vadd.f32 %v3055_v10, %v2606_v8  ;;  %v2608_v13 = vpop.f32.mrf.mxu0  ;;  %v797_v10 = vld [vmem:[%s5689_s24 + $0x758] sm:$0xff] }
 0x3f9   : > { %v3057_v15 = vpop.f32.mrf.mxu1 }
 0x3fa   : > { %3589 = vst [vmem:[%s5689_s24 + $0x678] sm:$0xff] %v3333_v11  ;;  %v3336_v16 = vadd.f32 %v3056_v12, %v772_v9  ;;  %v3058_v17 = vadd.f32 %v3057_v15, %v2608_v13  ;;  %v2612_v18 = vpop.f32.mrf.mxu0  ;;  %v800_v15 = vld [vmem:[%s5689_s24 + $0x770] sm:$0xff] }
 0x3fb   : > { %v3061_v20 = vpop.f32.mrf.mxu1 }
 0x3fc   : > { %3592 = vst [vmem:[%s5689_s24 + $0x690] sm:$0xff] %v3336_v16  ;;  %v3337_v21 = vadd.f32 %v3058_v17, %v773_v14  ;;  %v3062_v22 = vadd.f32 %v3061_v20, %v2612_v18  ;;  %v2614_v23 = vpop.f32.mrf.mxu0  ;;  %v801_v20 = vld [vmem:[%s5689_s24 + $0x778] sm:$0xff] }
 0x3fd   : > { %v3063_v25 = vpop.f32.mrf.mxu1 }
 0x3fe   : > { %3593 = vst [vmem:[%s5689_s24 + $0x698] sm:$0xff] %v3337_v21  ;;  %v3340_v26 = vadd.f32 %v3062_v22, %v776_v19  ;;  %v3064_v27 = vadd.f32 %v3063_v25, %v2614_v23  ;;  %v2618_v28 = vpop.f32.mrf.mxu0  ;;  %v804_v25 = vld [vmem:[%s5689_s24 + $0x790] sm:$0xff] }
 0x3ff   : > { %v3067_v30 = vpop.f32.mrf.mxu1 }
 0x400   : > { %3596 = vst [vmem:[%s5689_s24 + $0x6b0] sm:$0xff] %v3340_v26  ;;  %v3341_v31 = vadd.f32 %v3064_v27, %v777_v24  ;;  %v3068_v32 = vadd.f32 %v3067_v30, %v2618_v28  ;;  %v2620_v33 = vpop.f32.mrf.mxu0  ;;  %v805_v30 = vld [vmem:[%s5689_s24 + $0x798] sm:$0xff] }
 0x401   : > { %v3069_v35 = vpop.f32.mrf.mxu1 }
 0x402   : > { %3597 = vst [vmem:[%s5689_s24 + $0x6b8] sm:$0xff] %v3341_v31  ;;  %v3344_v36 = vadd.f32 %v3068_v32, %v780_v29  ;;  %v3070_v37 = vadd.f32 %v3069_v35, %v2620_v33  ;;  %v2624_v38 = vpop.f32.mrf.mxu0  ;;  %v808_v35 = vld [vmem:[%s5689_s24 + $0x7b0] sm:$0xff] }
 0x403   : > { %v3073_v40 = vpop.f32.mrf.mxu1 }
 0x404   : > { %3600 = vst [vmem:[%s5689_s24 + $0x6d0] sm:$0xff] %v3344_v36  ;;  %v3345_v41 = vadd.f32 %v3070_v37, %v781_v34  ;;  %v3074_v42 = vadd.f32 %v3073_v40, %v2624_v38  ;;  %v2626_v43 = vpop.f32.mrf.mxu0  ;;  %v809_v40 = vld [vmem:[%s5689_s24 + $0x7b8] sm:$0xff] }
 0x405   : > { %v3075_v45 = vpop.f32.mrf.mxu1 }
 0x406   : > { %3601 = vst [vmem:[%s5689_s24 + $0x6d8] sm:$0xff] %v3345_v41  ;;  %v3348_v46 = vadd.f32 %v3074_v42, %v784_v39  ;;  %v3076_v47 = vadd.f32 %v3075_v45, %v2626_v43  ;;  %v2630_v48 = vpop.f32.mrf.mxu0  ;;  %v812_v45 = vld [vmem:[%s5689_s24 + $0x7d0] sm:$0xff] }
 0x407   : > { %v3079_v50 = vpop.f32.mrf.mxu1 }
 0x408   : > { %3604 = vst [vmem:[%s5689_s24 + $0x6f0] sm:$0xff] %v3348_v46  ;;  %v3349_v51 = vadd.f32 %v3076_v47, %v785_v44  ;;  %v3080_v52 = vadd.f32 %v3079_v50, %v2630_v48  ;;  %v2632_v53 = vpop.f32.mrf.mxu0  ;;  %v813_v50 = vld [vmem:[%s5689_s24 + $0x7d8] sm:$0xff] }
 0x409   : > { %v3081_v55 = vpop.f32.mrf.mxu1 }
 0x40a   : > { %3605 = vst [vmem:[%s5689_s24 + $0x6f8] sm:$0xff] %v3349_v51  ;;  %v3352_v56 = vadd.f32 %v3080_v52, %v788_v49  ;;  %v3082_v57 = vadd.f32 %v3081_v55, %v2632_v53  ;;  %v2636_v58 = vpop.f32.mrf.mxu0  ;;  %v816_v55 = vld [vmem:[%s5689_s24 + $0x7f0] sm:$0xff] }
 0x40b   : > { %v3085_v60 = vpop.f32.mrf.mxu1 }
 0x40c   : > { %3608 = vst [vmem:[%s5689_s24 + $0x710] sm:$0xff] %v3352_v56  ;;  %v3353_v61 = vadd.f32 %v3082_v57, %v789_v54  ;;  %v3086_v62 = vadd.f32 %v3085_v60, %v2636_v58  ;;  %v2638_v63 = vpop.f32.mrf.mxu0  ;;  %v817_v60 = vld [vmem:[%s5689_s24 + $0x7f8] sm:$0xff] }
 0x40d   : > { %v3087_v1 = vpop.f32.mrf.mxu1 }
 0x40e   : > { %3609 = vst [vmem:[%s5689_s24 + $0x718] sm:$0xff] %v3353_v61  ;;  %v3356_v2 = vadd.f32 %v3086_v62, %v792_v59  ;;  %v3088_v3 = vadd.f32 %v3087_v1, %v2638_v63  ;;  %v2642_v4 = vpop.f32.mrf.mxu0 }
 0x40f   : > { %v3091_v6 = vpop.f32.mrf.mxu1 }
 0x410   : > { %3612 = vst [vmem:[%s5689_s24 + $0x730] sm:$0xff] %v3356_v2  ;;  %v3357_v7 = vadd.f32 %v3088_v3, %v793_v0  ;;  %v3092_v8 = vadd.f32 %v3091_v6, %v2642_v4  ;;  %v2644_v9 = vpop.f32.mrf.mxu0 }
 0x411   : > { %v3093_v11 = vpop.f32.mrf.mxu1 }
 0x412   : > { %3613 = vst [vmem:[%s5689_s24 + $0x738] sm:$0xff] %v3357_v7  ;;  %v3360_v12 = vadd.f32 %v3092_v8, %v796_v5  ;;  %v3094_v13 = vadd.f32 %v3093_v11, %v2644_v9  ;;  %v2648_v14 = vpop.f32.mrf.mxu0 }
 0x413   : > { %v3097_v16 = vpop.f32.mrf.mxu1 }
 0x414   : > { %3616 = vst [vmem:[%s5689_s24 + $0x750] sm:$0xff] %v3360_v12  ;;  %v3361_v17 = vadd.f32 %v3094_v13, %v797_v10  ;;  %v3098_v18 = vadd.f32 %v3097_v16, %v2648_v14  ;;  %v2650_v19 = vpop.f32.mrf.mxu0 }
 0x415   : > { %v3099_v21 = vpop.f32.mrf.mxu1 }
 0x416   : > { %3617 = vst [vmem:[%s5689_s24 + $0x758] sm:$0xff] %v3361_v17  ;;  %v3364_v22 = vadd.f32 %v3098_v18, %v800_v15  ;;  %v3100_v23 = vadd.f32 %v3099_v21, %v2650_v19  ;;  %v2654_v24 = vpop.f32.mrf.mxu0 }
 0x417   : > { %v3103_v26 = vpop.f32.mrf.mxu1 }
 0x418   : > { %3620 = vst [vmem:[%s5689_s24 + $0x770] sm:$0xff] %v3364_v22  ;;  %v3365_v27 = vadd.f32 %v3100_v23, %v801_v20  ;;  %v3104_v28 = vadd.f32 %v3103_v26, %v2654_v24  ;;  %v2656_v29 = vpop.f32.mrf.mxu0 }
 0x419   : > { %v3105_v31 = vpop.f32.mrf.mxu1 }
 0x41a   : > { %3621 = vst [vmem:[%s5689_s24 + $0x778] sm:$0xff] %v3365_v27  ;;  %v3368_v32 = vadd.f32 %v3104_v28, %v804_v25  ;;  %v3106_v33 = vadd.f32 %v3105_v31, %v2656_v29  ;;  %v2660_v34 = vpop.f32.mrf.mxu0 }
 0x41b   : > { %v3109_v36 = vpop.f32.mrf.mxu1 }
 0x41c   : > { %3624 = vst [vmem:[%s5689_s24 + $0x790] sm:$0xff] %v3368_v32  ;;  %v3369_v37 = vadd.f32 %v3106_v33, %v805_v30  ;;  %v3110_v38 = vadd.f32 %v3109_v36, %v2660_v34  ;;  %v2662_v39 = vpop.f32.mrf.mxu0 }
 0x41d   : > { %v3111_v41 = vpop.f32.mrf.mxu1 }
 0x41e   : > { %3625 = vst [vmem:[%s5689_s24 + $0x798] sm:$0xff] %v3369_v37  ;;  %v3372_v42 = vadd.f32 %v3110_v38, %v808_v35  ;;  %v3112_v43 = vadd.f32 %v3111_v41, %v2662_v39  ;;  %v2666_v44 = vpop.f32.mrf.mxu0 }
 0x41f   : > { %v3115_v46 = vpop.f32.mrf.mxu1 }
 0x420   : > { %3628 = vst [vmem:[%s5689_s24 + $0x7b0] sm:$0xff] %v3372_v42  ;;  %v3373_v47 = vadd.f32 %v3112_v43, %v809_v40  ;;  %v3116_v48 = vadd.f32 %v3115_v46, %v2666_v44  ;;  %v2668_v49 = vpop.f32.mrf.mxu0 }
 0x421   : > { %v3117_v51 = vpop.f32.mrf.mxu1 }
 0x422   : > { %3629 = vst [vmem:[%s5689_s24 + $0x7b8] sm:$0xff] %v3373_v47  ;;  %v3376_v52 = vadd.f32 %v3116_v48, %v812_v45  ;;  %v3118_v53 = vadd.f32 %v3117_v51, %v2668_v49  ;;  %v2672_v54 = vpop.f32.mrf.mxu0 }
 0x423   : > { %v3121_v56 = vpop.f32.mrf.mxu1 }
 0x424   : > { %3632 = vst [vmem:[%s5689_s24 + $0x7d0] sm:$0xff] %v3376_v52  ;;  %v3377_v57 = vadd.f32 %v3118_v53, %v813_v50  ;;  %v3122_v58 = vadd.f32 %v3121_v56, %v2672_v54  ;;  %v2674_v59 = vpop.f32.mrf.mxu0 }
 0x425   : > { %v3123_v61 = vpop.f32.mrf.mxu1 }
 0x426   : > { %3633 = vst [vmem:[%s5689_s24 + $0x7d8] sm:$0xff] %v3377_v57  ;;  %v3380_v62 = vadd.f32 %v3122_v58, %v816_v55  ;;  %v3124_v63 = vadd.f32 %v3123_v61, %v2674_v59  ;;  %3641 = sbr.rel (%p4614_p3) target bundleno = 1205 (0x4b5), region = 52 }
 0x428   : > { %3636 = vst [vmem:[%s5689_s24 + $0x7f0] sm:$0xff] %v3380_v62  ;;  %v3381_v0 = vadd.f32 %v3124_v63, %v817_v60 }
 0x42a   : > { %3637 = vst [vmem:[%s5689_s24 + $0x7f8] sm:$0xff] %v3381_v0 }
 0x42b   : > { %v3900_v1 = vlaneseq  ;;  %v3898_v2 = vld [vmem:[%s262_s19] sm:$0xf]  ;;  %v3642_v4 = vld [vmem:[%s5689_s24] sm:$0xff]  ;;  %v3643_v5 = vld [vmem:[%s5689_s24 + $0x8] sm:$0xff] }
 0x42c   : > { %v3644_v6 = vld [vmem:[%s5689_s24 + $0x10] sm:$0xff]  ;;  %v3645_v7 = vld [vmem:[%s5689_s24 + $0x18] sm:$0xff]  ;;  %v3646_v12 = vld [vmem:[%s5689_s24 + $0x20] sm:$0xff] }
 0x42d   : > { %v3901_v3 = vshrl.u32 %v3900_v1, 7  ;;  %v3647_v13 = vld [vmem:[%s5689_s24 + $0x28] sm:$0xff]  ;;  %v3648_v14 = vld [vmem:[%s5689_s24 + $0x30] sm:$0xff]  ;;  %v3649_v15 = vld [vmem:[%s5689_s24 + $0x38] sm:$0xff] }
 0x42e   : > { %v3650_v16 = vld [vmem:[%s5689_s24 + $0x40] sm:$0xff]  ;;  %v3651_v17 = vld [vmem:[%s5689_s24 + $0x48] sm:$0xff]  ;;  %v3652_v18 = vld [vmem:[%s5689_s24 + $0x50] sm:$0xff] }
 0x42f   : > { %v3902_v8 = vsub.s32 0, %v3901_v3  ;;  %v3906_v9 = vsub.s32 1, %v3901_v3  ;;  %v3910_v10 = vsub.s32 2, %v3901_v3  ;;  %v3914_v11 = vsub.s32 3, %v3901_v3  ;;  %v3653_v19 = vld [vmem:[%s5689_s24 + $0x58] sm:$0xff]  ;;  %v3654_v24 = vld [vmem:[%s5689_s24 + $0x60] sm:$0xff] }
 0x430   : > { %v3655_v25 = vld [vmem:[%s5689_s24 + $0x68] sm:$0xff]  ;;  %v3656_v26 = vld [vmem:[%s5689_s24 + $0x70] sm:$0xff]  ;;  %v3657_v27 = vld [vmem:[%s5689_s24 + $0x78] sm:$0xff] }
 0x431   : > { %v7499_v20 = vrot.slane %v3898_v2, %v3902_v8  ;;  %v7501_v21 = vrot.slane %v3898_v2, %v3906_v9  ;;  %v7503_v22 = vrot.slane %v3898_v2, %v3910_v10  ;;  %v7505_v23 = vrot.slane %v3898_v2, %v3914_v11  ;;  %v3658_v28 = vld [vmem:[%s5689_s24 + $0x80] sm:$0xff]  ;;  %v3659_v29 = vld [vmem:[%s5689_s24 + $0x88] sm:$0xff]  ;;  %v3660_v30 = vld [vmem:[%s5689_s24 + $0x90] sm:$0xff] }
 0x432   : > { %v3661_v31 = vld [vmem:[%s5689_s24 + $0x98] sm:$0xff]  ;;  %v3662_v36 = vld [vmem:[%s5689_s24 + $0xa0] sm:$0xff]  ;;  %v3663_v37 = vld [vmem:[%s5689_s24 + $0xa8] sm:$0xff] }
 0x433   : > { %v3920_v32 = vadd.f32 %v7499_v20, %v3642_v4  ;;  %v3921_v33 = vadd.f32 %v7501_v21, %v3643_v5  ;;  %v3922_v34 = vadd.f32 %v7503_v22, %v3644_v6  ;;  %v3923_v35 = vadd.f32 %v7505_v23, %v3645_v7  ;;  %v3664_v38 = vld [vmem:[%s5689_s24 + $0xb0] sm:$0xff]  ;;  %v3665_v39 = vld [vmem:[%s5689_s24 + $0xb8] sm:$0xff]  ;;  %v3666_v44 = vld [vmem:[%s5689_s24 + $0xc0] sm:$0xff] }
 0x434   : > { %v3924_v40 = vadd.f32 %v7499_v20, %v3646_v12  ;;  %v3925_v41 = vadd.f32 %v7501_v21, %v3647_v13  ;;  %v3926_v42 = vadd.f32 %v7503_v22, %v3648_v14  ;;  %v3927_v43 = vadd.f32 %v7505_v23, %v3649_v15  ;;  %v3667_v45 = vld [vmem:[%s5689_s24 + $0xc8] sm:$0xff]  ;;  %v3668_v46 = vld [vmem:[%s5689_s24 + $0xd0] sm:$0xff]  ;;  %v3669_v47 = vld [vmem:[%s5689_s24 + $0xd8] sm:$0xff] }
 0x435   : > { %4176 = vst [vmem:[%s5689_s24] sm:$0xff] %v3920_v32  ;;  %4177 = vst [vmem:[%s5689_s24 + $0x8] sm:$0xff] %v3921_v33  ;;  %v3928_v48 = vadd.f32 %v7499_v20, %v3650_v16  ;;  %v3929_v49 = vadd.f32 %v7501_v21, %v3651_v17  ;;  %v3930_v50 = vadd.f32 %v7503_v22, %v3652_v18  ;;  %v3670_v52 = vld [vmem:[%s5689_s24 + $0xe0] sm:$0xff]  ;;  %v3671_v53 = vld [vmem:[%s5689_s24 + $0xe8] sm:$0xff] }
 0x436   : > { %4178 = vst [vmem:[%s5689_s24 + $0x10] sm:$0xff] %v3922_v34  ;;  %4179 = vst [vmem:[%s5689_s24 + $0x18] sm:$0xff] %v3923_v35  ;;  %v3931_v51 = vadd.f32 %v7505_v23, %v3653_v19  ;;  %v3672_v54 = vld [vmem:[%s5689_s24 + $0xf0] sm:$0xff]  ;;  %v3932_v55 = vadd.f32 %v7499_v20, %v3654_v24  ;;  %v3933_v56 = vadd.f32 %v7501_v21, %v3655_v25  ;;  %v3673_v59 = vld [vmem:[%s5689_s24 + $0xf8] sm:$0xff] }
 0x437   : > { %4180 = vst [vmem:[%s5689_s24 + $0x20] sm:$0xff] %v3924_v40  ;;  %4181 = vst [vmem:[%s5689_s24 + $0x28] sm:$0xff] %v3925_v41  ;;  %v3934_v57 = vadd.f32 %v7503_v22, %v3656_v26  ;;  %v3935_v58 = vadd.f32 %v7505_v23, %v3657_v27  ;;  %v3674_v60 = vld [vmem:[%s5689_s24 + $0x100] sm:$0xff]  ;;  %v3675_v61 = vld [vmem:[%s5689_s24 + $0x108] sm:$0xff]  ;;  %v3936_v62 = vadd.f32 %v7499_v20, %v3658_v28 }
 0x438   : > { %4182 = vst [vmem:[%s5689_s24 + $0x30] sm:$0xff] %v3926_v42  ;;  %4183 = vst [vmem:[%s5689_s24 + $0x38] sm:$0xff] %v3927_v43  ;;  %v3937_v63 = vadd.f32 %v7501_v21, %v3659_v29  ;;  %v3938_v0 = vadd.f32 %v7503_v22, %v3660_v30  ;;  %v3939_v1 = vadd.f32 %v7505_v23, %v3661_v31  ;;  %v3676_v2 = vld [vmem:[%s5689_s24 + $0x110] sm:$0xff]  ;;  %v3677_v3 = vld [vmem:[%s5689_s24 + $0x118] sm:$0xff] }
 0x439   : > { %4184 = vst [vmem:[%s5689_s24 + $0x40] sm:$0xff] %v3928_v48  ;;  %4185 = vst [vmem:[%s5689_s24 + $0x48] sm:$0xff] %v3929_v49  ;;  %v3678_v4 = vld [vmem:[%s5689_s24 + $0x120] sm:$0xff]  ;;  %v3940_v5 = vadd.f32 %v7499_v20, %v3662_v36  ;;  %v3941_v6 = vadd.f32 %v7501_v21, %v3663_v37  ;;  %v3942_v7 = vadd.f32 %v7503_v22, %v3664_v38  ;;  %v3679_v9 = vld [vmem:[%s5689_s24 + $0x128] sm:$0xff] }
 0x43a   : > { %4186 = vst [vmem:[%s5689_s24 + $0x50] sm:$0xff] %v3930_v50  ;;  %4187 = vst [vmem:[%s5689_s24 + $0x58] sm:$0xff] %v3931_v51  ;;  %v3943_v8 = vadd.f32 %v7505_v23, %v3665_v39  ;;  %v3680_v10 = vld [vmem:[%s5689_s24 + $0x130] sm:$0xff]  ;;  %v3681_v11 = vld [vmem:[%s5689_s24 + $0x138] sm:$0xff]  ;;  %v3944_v12 = vadd.f32 %v7499_v20, %v3666_v44  ;;  %v3945_v13 = vadd.f32 %v7501_v21, %v3667_v45 }
 0x43b   : > { %4188 = vst [vmem:[%s5689_s24 + $0x60] sm:$0xff] %v3932_v55  ;;  %4189 = vst [vmem:[%s5689_s24 + $0x68] sm:$0xff] %v3933_v56  ;;  %v3946_v14 = vadd.f32 %v7503_v22, %v3668_v46  ;;  %v3947_v15 = vadd.f32 %v7505_v23, %v3669_v47  ;;  %v3682_v16 = vld [vmem:[%s5689_s24 + $0x140] sm:$0xff]  ;;  %v3683_v17 = vld [vmem:[%s5689_s24 + $0x148] sm:$0xff]  ;;  %v3948_v19 = vadd.f32 %v7499_v20, %v3670_v52 }
 0x43c   : > { %4190 = vst [vmem:[%s5689_s24 + $0x70] sm:$0xff] %v3934_v57  ;;  %4191 = vst [vmem:[%s5689_s24 + $0x78] sm:$0xff] %v3935_v58  ;;  %v3684_v18 = vld [vmem:[%s5689_s24 + $0x150] sm:$0xff]  ;;  %v3949_v24 = vadd.f32 %v7501_v21, %v3671_v53  ;;  %v3950_v25 = vadd.f32 %v7503_v22, %v3672_v54  ;;  %v3951_v26 = vadd.f32 %v7505_v23, %v3673_v59  ;;  %v3685_v27 = vld [vmem:[%s5689_s24 + $0x158] sm:$0xff] }
 0x43d   : > { %4192 = vst [vmem:[%s5689_s24 + $0x80] sm:$0xff] %v3936_v62  ;;  %4193 = vst [vmem:[%s5689_s24 + $0x88] sm:$0xff] %v3937_v63  ;;  %v3686_v28 = vld [vmem:[%s5689_s24 + $0x160] sm:$0xff]  ;;  %v3687_v29 = vld [vmem:[%s5689_s24 + $0x168] sm:$0xff]  ;;  %v3952_v30 = vadd.f32 %v7499_v20, %v3674_v60  ;;  %v3953_v31 = vadd.f32 %v7501_v21, %v3675_v61  ;;  %v3954_v32 = vadd.f32 %v7503_v22, %v3676_v2 }
 0x43e   : > { %4194 = vst [vmem:[%s5689_s24 + $0x90] sm:$0xff] %v3938_v0  ;;  %4195 = vst [vmem:[%s5689_s24 + $0x98] sm:$0xff] %v3939_v1  ;;  %v3955_v33 = vadd.f32 %v7505_v23, %v3677_v3  ;;  %v3688_v34 = vld [vmem:[%s5689_s24 + $0x170] sm:$0xff]  ;;  %v3689_v35 = vld [vmem:[%s5689_s24 + $0x178] sm:$0xff]  ;;  %v3956_v37 = vadd.f32 %v7499_v20, %v3678_v4  ;;  %v3957_v38 = vadd.f32 %v7501_v21, %v3679_v9 }
 0x43f   : > { %4196 = vst [vmem:[%s5689_s24 + $0xa0] sm:$0xff] %v3940_v5  ;;  %4197 = vst [vmem:[%s5689_s24 + $0xa8] sm:$0xff] %v3941_v6  ;;  %v3690_v36 = vld [vmem:[%s5689_s24 + $0x180] sm:$0xff]  ;;  %v3958_v39 = vadd.f32 %v7503_v22, %v3680_v10  ;;  %v3959_v40 = vadd.f32 %v7505_v23, %v3681_v11  ;;  %v3691_v41 = vld [vmem:[%s5689_s24 + $0x188] sm:$0xff]  ;;  %v3960_v44 = vadd.f32 %v7499_v20, %v3682_v16 }
 0x440   : > { %4198 = vst [vmem:[%s5689_s24 + $0xb0] sm:$0xff] %v3942_v7  ;;  %4199 = vst [vmem:[%s5689_s24 + $0xb8] sm:$0xff] %v3943_v8  ;;  %v3692_v42 = vld [vmem:[%s5689_s24 + $0x190] sm:$0xff]  ;;  %v3693_v43 = vld [vmem:[%s5689_s24 + $0x198] sm:$0xff]  ;;  %v3961_v45 = vadd.f32 %v7501_v21, %v3683_v17  ;;  %v3962_v46 = vadd.f32 %v7503_v22, %v3684_v18  ;;  %v3963_v47 = vadd.f32 %v7505_v23, %v3685_v27 }
 0x441   : > { %4200 = vst [vmem:[%s5689_s24 + $0xc0] sm:$0xff] %v3944_v12  ;;  %4201 = vst [vmem:[%s5689_s24 + $0xc8] sm:$0xff] %v3945_v13  ;;  %v3694_v48 = vld [vmem:[%s5689_s24 + $0x1a0] sm:$0xff]  ;;  %v3695_v49 = vld [vmem:[%s5689_s24 + $0x1a8] sm:$0xff]  ;;  %v3964_v51 = vadd.f32 %v7499_v20, %v3686_v28  ;;  %v3965_v52 = vadd.f32 %v7501_v21, %v3687_v29  ;;  %v3966_v53 = vadd.f32 %v7503_v22, %v3688_v34 }
 0x442   : > { %4202 = vst [vmem:[%s5689_s24 + $0xd0] sm:$0xff] %v3946_v14  ;;  %4203 = vst [vmem:[%s5689_s24 + $0xd8] sm:$0xff] %v3947_v15  ;;  %v3696_v50 = vld [vmem:[%s5689_s24 + $0x1b0] sm:$0xff]  ;;  %v3967_v54 = vadd.f32 %v7505_v23, %v3689_v35  ;;  %v3697_v55 = vld [vmem:[%s5689_s24 + $0x1b8] sm:$0xff]  ;;  %v3968_v58 = vadd.f32 %v7499_v20, %v3690_v36  ;;  %v3969_v59 = vadd.f32 %v7501_v21, %v3691_v41 }
 0x443   : > { %4204 = vst [vmem:[%s5689_s24 + $0xe0] sm:$0xff] %v3948_v19  ;;  %4205 = vst [vmem:[%s5689_s24 + $0xe8] sm:$0xff] %v3949_v24  ;;  %v3698_v56 = vld [vmem:[%s5689_s24 + $0x1c0] sm:$0xff]  ;;  %v3699_v57 = vld [vmem:[%s5689_s24 + $0x1c8] sm:$0xff]  ;;  %v3970_v60 = vadd.f32 %v7503_v22, %v3692_v42  ;;  %v3971_v61 = vadd.f32 %v7505_v23, %v3693_v43  ;;  %v3972_v1 = vadd.f32 %v7499_v20, %v3694_v48 }
 0x444   : > { %4206 = vst [vmem:[%s5689_s24 + $0xf0] sm:$0xff] %v3950_v25  ;;  %4207 = vst [vmem:[%s5689_s24 + $0xf8] sm:$0xff] %v3951_v26  ;;  %v3700_v62 = vld [vmem:[%s5689_s24 + $0x1d0] sm:$0xff]  ;;  %v3701_v63 = vld [vmem:[%s5689_s24 + $0x1d8] sm:$0xff]  ;;  %v3973_v2 = vadd.f32 %v7501_v21, %v3695_v49  ;;  %v3974_v3 = vadd.f32 %v7503_v22, %v3696_v50  ;;  %v3975_v4 = vadd.f32 %v7505_v23, %v3697_v55 }
 0x445   : > { %4208 = vst [vmem:[%s5689_s24 + $0x100] sm:$0xff] %v3952_v30  ;;  %4209 = vst [vmem:[%s5689_s24 + $0x108] sm:$0xff] %v3953_v31  ;;  %v3702_v0 = vld [vmem:[%s5689_s24 + $0x1e0] sm:$0xff]  ;;  %v3703_v5 = vld [vmem:[%s5689_s24 + $0x1e8] sm:$0xff]  ;;  %v3976_v8 = vadd.f32 %v7499_v20, %v3698_v56  ;;  %v3977_v9 = vadd.f32 %v7501_v21, %v3699_v57  ;;  %v3978_v10 = vadd.f32 %v7503_v22, %v3700_v62 }
 0x446   : > { %4210 = vst [vmem:[%s5689_s24 + $0x110] sm:$0xff] %v3954_v32  ;;  %4211 = vst [vmem:[%s5689_s24 + $0x118] sm:$0xff] %v3955_v33  ;;  %v3704_v6 = vld [vmem:[%s5689_s24 + $0x1f0] sm:$0xff]  ;;  %v3705_v7 = vld [vmem:[%s5689_s24 + $0x1f8] sm:$0xff]  ;;  %v3979_v11 = vadd.f32 %v7505_v23, %v3701_v63  ;;  %v3980_v15 = vadd.f32 %v7499_v20, %v3702_v0  ;;  %v3981_v16 = vadd.f32 %v7501_v21, %v3703_v5 }
 0x447   : > { %4212 = vst [vmem:[%s5689_s24 + $0x120] sm:$0xff] %v3956_v37  ;;  %4213 = vst [vmem:[%s5689_s24 + $0x128] sm:$0xff] %v3957_v38  ;;  %v3706_v12 = vld [vmem:[%s5689_s24 + $0x200] sm:$0xff]  ;;  %v3707_v13 = vld [vmem:[%s5689_s24 + $0x208] sm:$0xff]  ;;  %v3982_v17 = vadd.f32 %v7503_v22, %v3704_v6  ;;  %v3983_v18 = vadd.f32 %v7505_v23, %v3705_v7 }
 0x448   : > { %4214 = vst [vmem:[%s5689_s24 + $0x130] sm:$0xff] %v3958_v39  ;;  %4215 = vst [vmem:[%s5689_s24 + $0x138] sm:$0xff] %v3959_v40  ;;  %v3708_v14 = vld [vmem:[%s5689_s24 + $0x210] sm:$0xff]  ;;  %v3709_v19 = vld [vmem:[%s5689_s24 + $0x218] sm:$0xff]  ;;  %v3984_v26 = vadd.f32 %v7499_v20, %v3706_v12  ;;  %v3985_v27 = vadd.f32 %v7501_v21, %v3707_v13 }
 0x449   : > { %4216 = vst [vmem:[%s5689_s24 + $0x140] sm:$0xff] %v3960_v44  ;;  %4217 = vst [vmem:[%s5689_s24 + $0x148] sm:$0xff] %v3961_v45  ;;  %v3710_v24 = vld [vmem:[%s5689_s24 + $0x220] sm:$0xff]  ;;  %v3711_v25 = vld [vmem:[%s5689_s24 + $0x228] sm:$0xff]  ;;  %v3986_v28 = vadd.f32 %v7503_v22, %v3708_v14  ;;  %v3987_v29 = vadd.f32 %v7505_v23, %v3709_v19 }
 0x44a   : > { %4218 = vst [vmem:[%s5689_s24 + $0x150] sm:$0xff] %v3962_v46  ;;  %4219 = vst [vmem:[%s5689_s24 + $0x158] sm:$0xff] %v3963_v47  ;;  %v3712_v30 = vld [vmem:[%s5689_s24 + $0x230] sm:$0xff]  ;;  %v3713_v31 = vld [vmem:[%s5689_s24 + $0x238] sm:$0xff]  ;;  %v3988_v33 = vadd.f32 %v7499_v20, %v3710_v24  ;;  %v3989_v34 = vadd.f32 %v7501_v21, %v3711_v25 }
 0x44b   : > { %4220 = vst [vmem:[%s5689_s24 + $0x160] sm:$0xff] %v3964_v51  ;;  %4221 = vst [vmem:[%s5689_s24 + $0x168] sm:$0xff] %v3965_v52  ;;  %v3714_v32 = vld [vmem:[%s5689_s24 + $0x240] sm:$0xff]  ;;  %v3990_v35 = vadd.f32 %v7503_v22, %v3712_v30  ;;  %v3991_v36 = vadd.f32 %v7505_v23, %v3713_v31  ;;  %v3715_v37 = vld [vmem:[%s5689_s24 + $0x248] sm:$0xff] }
 0x44c   : > { %4222 = vst [vmem:[%s5689_s24 + $0x170] sm:$0xff] %v3966_v53  ;;  %4223 = vst [vmem:[%s5689_s24 + $0x178] sm:$0xff] %v3967_v54  ;;  %v3716_v38 = vld [vmem:[%s5689_s24 + $0x250] sm:$0xff]  ;;  %v3717_v39 = vld [vmem:[%s5689_s24 + $0x258] sm:$0xff]  ;;  %v3992_v40 = vadd.f32 %v7499_v20, %v3714_v32  ;;  %v3993_v41 = vadd.f32 %v7501_v21, %v3715_v37 }
 0x44d   : > { %4224 = vst [vmem:[%s5689_s24 + $0x180] sm:$0xff] %v3968_v58  ;;  %4225 = vst [vmem:[%s5689_s24 + $0x188] sm:$0xff] %v3969_v59  ;;  %v3994_v42 = vadd.f32 %v7503_v22, %v3716_v38  ;;  %v3995_v43 = vadd.f32 %v7505_v23, %v3717_v39  ;;  %v3718_v44 = vld [vmem:[%s5689_s24 + $0x260] sm:$0xff]  ;;  %v3719_v45 = vld [vmem:[%s5689_s24 + $0x268] sm:$0xff] }
 0x44e   : > { %4226 = vst [vmem:[%s5689_s24 + $0x190] sm:$0xff] %v3970_v60  ;;  %4227 = vst [vmem:[%s5689_s24 + $0x198] sm:$0xff] %v3971_v61  ;;  %v3720_v46 = vld [vmem:[%s5689_s24 + $0x270] sm:$0xff]  ;;  %v3996_v47 = vadd.f32 %v7499_v20, %v3718_v44  ;;  %v3997_v48 = vadd.f32 %v7501_v21, %v3719_v45  ;;  %v3721_v50 = vld [vmem:[%s5689_s24 + $0x278] sm:$0xff] }
 0x44f   : > { %4228 = vst [vmem:[%s5689_s24 + $0x1a0] sm:$0xff] %v3972_v1  ;;  %4229 = vst [vmem:[%s5689_s24 + $0x1a8] sm:$0xff] %v3973_v2  ;;  %v3998_v49 = vadd.f32 %v7503_v22, %v3720_v46  ;;  %v3722_v51 = vld [vmem:[%s5689_s24 + $0x280] sm:$0xff]  ;;  %v3723_v52 = vld [vmem:[%s5689_s24 + $0x288] sm:$0xff]  ;;  %v3999_v53 = vadd.f32 %v7505_v23, %v3721_v50 }
 0x450   : > { %4230 = vst [vmem:[%s5689_s24 + $0x1b0] sm:$0xff] %v3974_v3  ;;  %4231 = vst [vmem:[%s5689_s24 + $0x1b8] sm:$0xff] %v3975_v4  ;;  %v4000_v54 = vadd.f32 %v7499_v20, %v3722_v51  ;;  %v4001_v55 = vadd.f32 %v7501_v21, %v3723_v52  ;;  %v3724_v56 = vld [vmem:[%s5689_s24 + $0x290] sm:$0xff]  ;;  %v3725_v57 = vld [vmem:[%s5689_s24 + $0x298] sm:$0xff] }
 0x451   : > { %4232 = vst [vmem:[%s5689_s24 + $0x1c0] sm:$0xff] %v3976_v8  ;;  %4233 = vst [vmem:[%s5689_s24 + $0x1c8] sm:$0xff] %v3977_v9  ;;  %v3726_v58 = vld [vmem:[%s5689_s24 + $0x2a0] sm:$0xff]  ;;  %v4002_v59 = vadd.f32 %v7503_v22, %v3724_v56  ;;  %v4003_v60 = vadd.f32 %v7505_v23, %v3725_v57  ;;  %v3727_v62 = vld [vmem:[%s5689_s24 + $0x2a8] sm:$0xff] }
 0x452   : > { %4234 = vst [vmem:[%s5689_s24 + $0x1d0] sm:$0xff] %v3978_v10  ;;  %4235 = vst [vmem:[%s5689_s24 + $0x1d8] sm:$0xff] %v3979_v11  ;;  %v4004_v61 = vadd.f32 %v7499_v20, %v3726_v58  ;;  %v3728_v63 = vld [vmem:[%s5689_s24 + $0x2b0] sm:$0xff]  ;;  %v3729_v0 = vld [vmem:[%s5689_s24 + $0x2b8] sm:$0xff]  ;;  %v4005_v1 = vadd.f32 %v7501_v21, %v3727_v62 }
 0x453   : > { %4236 = vst [vmem:[%s5689_s24 + $0x1e0] sm:$0xff] %v3980_v15  ;;  %4237 = vst [vmem:[%s5689_s24 + $0x1e8] sm:$0xff] %v3981_v16  ;;  %v4006_v2 = vadd.f32 %v7503_v22, %v3728_v63  ;;  %v4007_v3 = vadd.f32 %v7505_v23, %v3729_v0  ;;  %v3730_v4 = vld [vmem:[%s5689_s24 + $0x2c0] sm:$0xff]  ;;  %v3731_v5 = vld [vmem:[%s5689_s24 + $0x2c8] sm:$0xff] }
 0x454   : > { %4238 = vst [vmem:[%s5689_s24 + $0x1f0] sm:$0xff] %v3982_v17  ;;  %4239 = vst [vmem:[%s5689_s24 + $0x1f8] sm:$0xff] %v3983_v18  ;;  %v3732_v6 = vld [vmem:[%s5689_s24 + $0x2d0] sm:$0xff]  ;;  %v4008_v7 = vadd.f32 %v7499_v20, %v3730_v4  ;;  %v4009_v8 = vadd.f32 %v7501_v21, %v3731_v5  ;;  %v3733_v10 = vld [vmem:[%s5689_s24 + $0x2d8] sm:$0xff] }
 0x455   : > { %4240 = vst [vmem:[%s5689_s24 + $0x200] sm:$0xff] %v3984_v26  ;;  %4241 = vst [vmem:[%s5689_s24 + $0x208] sm:$0xff] %v3985_v27  ;;  %v4010_v9 = vadd.f32 %v7503_v22, %v3732_v6  ;;  %v3734_v11 = vld [vmem:[%s5689_s24 + $0x2e0] sm:$0xff]  ;;  %v3735_v12 = vld [vmem:[%s5689_s24 + $0x2e8] sm:$0xff]  ;;  %v4011_v13 = vadd.f32 %v7505_v23, %v3733_v10 }
 0x456   : > { %4242 = vst [vmem:[%s5689_s24 + $0x210] sm:$0xff] %v3986_v28  ;;  %4243 = vst [vmem:[%s5689_s24 + $0x218] sm:$0xff] %v3987_v29  ;;  %v4012_v14 = vadd.f32 %v7499_v20, %v3734_v11  ;;  %v4013_v15 = vadd.f32 %v7501_v21, %v3735_v12  ;;  %v3736_v16 = vld [vmem:[%s5689_s24 + $0x2f0] sm:$0xff]  ;;  %v3737_v17 = vld [vmem:[%s5689_s24 + $0x2f8] sm:$0xff] }
 0x457   : > { %4244 = vst [vmem:[%s5689_s24 + $0x220] sm:$0xff] %v3988_v33  ;;  %4245 = vst [vmem:[%s5689_s24 + $0x228] sm:$0xff] %v3989_v34  ;;  %v3738_v18 = vld [vmem:[%s5689_s24 + $0x300] sm:$0xff]  ;;  %v4014_v19 = vadd.f32 %v7503_v22, %v3736_v16  ;;  %v4015_v24 = vadd.f32 %v7505_v23, %v3737_v17  ;;  %v3739_v26 = vld [vmem:[%s5689_s24 + $0x308] sm:$0xff] }
 0x458   : > { %4246 = vst [vmem:[%s5689_s24 + $0x230] sm:$0xff] %v3990_v35  ;;  %4247 = vst [vmem:[%s5689_s24 + $0x238] sm:$0xff] %v3991_v36  ;;  %v4016_v25 = vadd.f32 %v7499_v20, %v3738_v18  ;;  %v3740_v27 = vld [vmem:[%s5689_s24 + $0x310] sm:$0xff]  ;;  %v3741_v28 = vld [vmem:[%s5689_s24 + $0x318] sm:$0xff]  ;;  %v4017_v29 = vadd.f32 %v7501_v21, %v3739_v26 }
 0x459   : > { %4248 = vst [vmem:[%s5689_s24 + $0x240] sm:$0xff] %v3992_v40  ;;  %4249 = vst [vmem:[%s5689_s24 + $0x248] sm:$0xff] %v3993_v41  ;;  %v4018_v30 = vadd.f32 %v7503_v22, %v3740_v27  ;;  %v4019_v31 = vadd.f32 %v7505_v23, %v3741_v28  ;;  %v3742_v32 = vld [vmem:[%s5689_s24 + $0x320] sm:$0xff]  ;;  %v3743_v33 = vld [vmem:[%s5689_s24 + $0x328] sm:$0xff] }
 0x45a   : > { %4250 = vst [vmem:[%s5689_s24 + $0x250] sm:$0xff] %v3994_v42  ;;  %4251 = vst [vmem:[%s5689_s24 + $0x258] sm:$0xff] %v3995_v43  ;;  %v3744_v34 = vld [vmem:[%s5689_s24 + $0x330] sm:$0xff]  ;;  %v4020_v35 = vadd.f32 %v7499_v20, %v3742_v32  ;;  %v4021_v36 = vadd.f32 %v7501_v21, %v3743_v33  ;;  %v3745_v38 = vld [vmem:[%s5689_s24 + $0x338] sm:$0xff] }
 0x45b   : > { %4252 = vst [vmem:[%s5689_s24 + $0x260] sm:$0xff] %v3996_v47  ;;  %4253 = vst [vmem:[%s5689_s24 + $0x268] sm:$0xff] %v3997_v48  ;;  %v4022_v37 = vadd.f32 %v7503_v22, %v3744_v34  ;;  %v3746_v39 = vld [vmem:[%s5689_s24 + $0x340] sm:$0xff]  ;;  %v3747_v40 = vld [vmem:[%s5689_s24 + $0x348] sm:$0xff]  ;;  %v4023_v41 = vadd.f32 %v7505_v23, %v3745_v38 }
 0x45c   : > { %4254 = vst [vmem:[%s5689_s24 + $0x270] sm:$0xff] %v3998_v49  ;;  %4255 = vst [vmem:[%s5689_s24 + $0x278] sm:$0xff] %v3999_v53  ;;  %v4024_v42 = vadd.f32 %v7499_v20, %v3746_v39  ;;  %v4025_v43 = vadd.f32 %v7501_v21, %v3747_v40  ;;  %v3748_v44 = vld [vmem:[%s5689_s24 + $0x350] sm:$0xff]  ;;  %v3749_v45 = vld [vmem:[%s5689_s24 + $0x358] sm:$0xff] }
 0x45d   : > { %4256 = vst [vmem:[%s5689_s24 + $0x280] sm:$0xff] %v4000_v54  ;;  %4257 = vst [vmem:[%s5689_s24 + $0x288] sm:$0xff] %v4001_v55  ;;  %v3750_v46 = vld [vmem:[%s5689_s24 + $0x360] sm:$0xff]  ;;  %v4026_v47 = vadd.f32 %v7503_v22, %v3748_v44  ;;  %v4027_v48 = vadd.f32 %v7505_v23, %v3749_v45  ;;  %v3751_v50 = vld [vmem:[%s5689_s24 + $0x368] sm:$0xff] }
 0x45e   : > { %4258 = vst [vmem:[%s5689_s24 + $0x290] sm:$0xff] %v4002_v59  ;;  %4259 = vst [vmem:[%s5689_s24 + $0x298] sm:$0xff] %v4003_v60  ;;  %v4028_v49 = vadd.f32 %v7499_v20, %v3750_v46  ;;  %v3752_v51 = vld [vmem:[%s5689_s24 + $0x370] sm:$0xff]  ;;  %v3753_v52 = vld [vmem:[%s5689_s24 + $0x378] sm:$0xff]  ;;  %v4029_v53 = vadd.f32 %v7501_v21, %v3751_v50 }
 0x45f   : > { %4260 = vst [vmem:[%s5689_s24 + $0x2a0] sm:$0xff] %v4004_v61  ;;  %4261 = vst [vmem:[%s5689_s24 + $0x2a8] sm:$0xff] %v4005_v1  ;;  %v4030_v54 = vadd.f32 %v7503_v22, %v3752_v51  ;;  %v4031_v55 = vadd.f32 %v7505_v23, %v3753_v52  ;;  %v3754_v56 = vld [vmem:[%s5689_s24 + $0x380] sm:$0xff]  ;;  %v3755_v57 = vld [vmem:[%s5689_s24 + $0x388] sm:$0xff] }
 0x460   : > { %4262 = vst [vmem:[%s5689_s24 + $0x2b0] sm:$0xff] %v4006_v2  ;;  %4263 = vst [vmem:[%s5689_s24 + $0x2b8] sm:$0xff] %v4007_v3  ;;  %v3756_v58 = vld [vmem:[%s5689_s24 + $0x390] sm:$0xff]  ;;  %v4032_v59 = vadd.f32 %v7499_v20, %v3754_v56  ;;  %v4033_v60 = vadd.f32 %v7501_v21, %v3755_v57  ;;  %v3757_v62 = vld [vmem:[%s5689_s24 + $0x398] sm:$0xff] }
 0x461   : > { %4264 = vst [vmem:[%s5689_s24 + $0x2c0] sm:$0xff] %v4008_v7  ;;  %4265 = vst [vmem:[%s5689_s24 + $0x2c8] sm:$0xff] %v4009_v8  ;;  %v4034_v61 = vadd.f32 %v7503_v22, %v3756_v58  ;;  %v3758_v63 = vld [vmem:[%s5689_s24 + $0x3a0] sm:$0xff]  ;;  %v3759_v0 = vld [vmem:[%s5689_s24 + $0x3a8] sm:$0xff]  ;;  %v4035_v1 = vadd.f32 %v7505_v23, %v3757_v62 }
 0x462   : > { %4266 = vst [vmem:[%s5689_s24 + $0x2d0] sm:$0xff] %v4010_v9  ;;  %4267 = vst [vmem:[%s5689_s24 + $0x2d8] sm:$0xff] %v4011_v13  ;;  %v4036_v2 = vadd.f32 %v7499_v20, %v3758_v63  ;;  %v4037_v3 = vadd.f32 %v7501_v21, %v3759_v0  ;;  %v3760_v4 = vld [vmem:[%s5689_s24 + $0x3b0] sm:$0xff]  ;;  %v3761_v5 = vld [vmem:[%s5689_s24 + $0x3b8] sm:$0xff] }
 0x463   : > { %4268 = vst [vmem:[%s5689_s24 + $0x2e0] sm:$0xff] %v4012_v14  ;;  %4269 = vst [vmem:[%s5689_s24 + $0x2e8] sm:$0xff] %v4013_v15  ;;  %v3762_v6 = vld [vmem:[%s5689_s24 + $0x3c0] sm:$0xff]  ;;  %v4038_v7 = vadd.f32 %v7503_v22, %v3760_v4  ;;  %v4039_v8 = vadd.f32 %v7505_v23, %v3761_v5  ;;  %v3763_v10 = vld [vmem:[%s5689_s24 + $0x3c8] sm:$0xff] }
 0x464   : > { %4270 = vst [vmem:[%s5689_s24 + $0x2f0] sm:$0xff] %v4014_v19  ;;  %4271 = vst [vmem:[%s5689_s24 + $0x2f8] sm:$0xff] %v4015_v24  ;;  %v4040_v9 = vadd.f32 %v7499_v20, %v3762_v6  ;;  %v3764_v11 = vld [vmem:[%s5689_s24 + $0x3d0] sm:$0xff]  ;;  %v3765_v12 = vld [vmem:[%s5689_s24 + $0x3d8] sm:$0xff]  ;;  %v4041_v13 = vadd.f32 %v7501_v21, %v3763_v10 }
 0x465   : > { %4272 = vst [vmem:[%s5689_s24 + $0x300] sm:$0xff] %v4016_v25  ;;  %4273 = vst [vmem:[%s5689_s24 + $0x308] sm:$0xff] %v4017_v29  ;;  %v4042_v14 = vadd.f32 %v7503_v22, %v3764_v11  ;;  %v4043_v15 = vadd.f32 %v7505_v23, %v3765_v12  ;;  %v3766_v16 = vld [vmem:[%s5689_s24 + $0x3e0] sm:$0xff]  ;;  %v3767_v17 = vld [vmem:[%s5689_s24 + $0x3e8] sm:$0xff] }
 0x466   : > { %4274 = vst [vmem:[%s5689_s24 + $0x310] sm:$0xff] %v4018_v30  ;;  %4275 = vst [vmem:[%s5689_s24 + $0x318] sm:$0xff] %v4019_v31  ;;  %v3768_v18 = vld [vmem:[%s5689_s24 + $0x3f0] sm:$0xff]  ;;  %v4044_v19 = vadd.f32 %v7499_v20, %v3766_v16  ;;  %v4045_v24 = vadd.f32 %v7501_v21, %v3767_v17  ;;  %v3769_v26 = vld [vmem:[%s5689_s24 + $0x3f8] sm:$0xff] }
 0x467   : > { %4276 = vst [vmem:[%s5689_s24 + $0x320] sm:$0xff] %v4020_v35  ;;  %4277 = vst [vmem:[%s5689_s24 + $0x328] sm:$0xff] %v4021_v36  ;;  %v4046_v25 = vadd.f32 %v7503_v22, %v3768_v18  ;;  %v3770_v27 = vld [vmem:[%s5689_s24 + $0x400] sm:$0xff]  ;;  %v3771_v28 = vld [vmem:[%s5689_s24 + $0x408] sm:$0xff]  ;;  %v4047_v29 = vadd.f32 %v7505_v23, %v3769_v26 }
 0x468   : > { %4278 = vst [vmem:[%s5689_s24 + $0x330] sm:$0xff] %v4022_v37  ;;  %4279 = vst [vmem:[%s5689_s24 + $0x338] sm:$0xff] %v4023_v41  ;;  %v4048_v30 = vadd.f32 %v7499_v20, %v3770_v27  ;;  %v4049_v31 = vadd.f32 %v7501_v21, %v3771_v28  ;;  %v3772_v32 = vld [vmem:[%s5689_s24 + $0x410] sm:$0xff]  ;;  %v3773_v33 = vld [vmem:[%s5689_s24 + $0x418] sm:$0xff] }
 0x469   : > { %4280 = vst [vmem:[%s5689_s24 + $0x340] sm:$0xff] %v4024_v42  ;;  %4281 = vst [vmem:[%s5689_s24 + $0x348] sm:$0xff] %v4025_v43  ;;  %v3774_v34 = vld [vmem:[%s5689_s24 + $0x420] sm:$0xff]  ;;  %v4050_v35 = vadd.f32 %v7503_v22, %v3772_v32  ;;  %v4051_v36 = vadd.f32 %v7505_v23, %v3773_v33  ;;  %v3775_v38 = vld [vmem:[%s5689_s24 + $0x428] sm:$0xff] }
 0x46a   : > { %4282 = vst [vmem:[%s5689_s24 + $0x350] sm:$0xff] %v4026_v47  ;;  %4283 = vst [vmem:[%s5689_s24 + $0x358] sm:$0xff] %v4027_v48  ;;  %v4052_v37 = vadd.f32 %v7499_v20, %v3774_v34  ;;  %v3776_v39 = vld [vmem:[%s5689_s24 + $0x430] sm:$0xff]  ;;  %v3777_v40 = vld [vmem:[%s5689_s24 + $0x438] sm:$0xff]  ;;  %v4053_v41 = vadd.f32 %v7501_v21, %v3775_v38 }
 0x46b   : > { %4284 = vst [vmem:[%s5689_s24 + $0x360] sm:$0xff] %v4028_v49  ;;  %4285 = vst [vmem:[%s5689_s24 + $0x368] sm:$0xff] %v4029_v53  ;;  %v4054_v42 = vadd.f32 %v7503_v22, %v3776_v39  ;;  %v4055_v43 = vadd.f32 %v7505_v23, %v3777_v40  ;;  %v3778_v44 = vld [vmem:[%s5689_s24 + $0x440] sm:$0xff]  ;;  %v3779_v45 = vld [vmem:[%s5689_s24 + $0x448] sm:$0xff] }
 0x46c   : > { %4286 = vst [vmem:[%s5689_s24 + $0x370] sm:$0xff] %v4030_v54  ;;  %4287 = vst [vmem:[%s5689_s24 + $0x378] sm:$0xff] %v4031_v55  ;;  %v3780_v46 = vld [vmem:[%s5689_s24 + $0x450] sm:$0xff]  ;;  %v4056_v47 = vadd.f32 %v7499_v20, %v3778_v44  ;;  %v4057_v48 = vadd.f32 %v7501_v21, %v3779_v45  ;;  %v3781_v50 = vld [vmem:[%s5689_s24 + $0x458] sm:$0xff] }
 0x46d   : > { %4288 = vst [vmem:[%s5689_s24 + $0x380] sm:$0xff] %v4032_v59  ;;  %4289 = vst [vmem:[%s5689_s24 + $0x388] sm:$0xff] %v4033_v60  ;;  %v4058_v49 = vadd.f32 %v7503_v22, %v3780_v46  ;;  %v3782_v51 = vld [vmem:[%s5689_s24 + $0x460] sm:$0xff]  ;;  %v3783_v52 = vld [vmem:[%s5689_s24 + $0x468] sm:$0xff]  ;;  %v4059_v53 = vadd.f32 %v7505_v23, %v3781_v50 }
 0x46e   : > { %4290 = vst [vmem:[%s5689_s24 + $0x390] sm:$0xff] %v4034_v61  ;;  %4291 = vst [vmem:[%s5689_s24 + $0x398] sm:$0xff] %v4035_v1  ;;  %v4060_v54 = vadd.f32 %v7499_v20, %v3782_v51  ;;  %v4061_v55 = vadd.f32 %v7501_v21, %v3783_v52  ;;  %v3784_v56 = vld [vmem:[%s5689_s24 + $0x470] sm:$0xff]  ;;  %v3785_v57 = vld [vmem:[%s5689_s24 + $0x478] sm:$0xff] }
 0x46f   : > { %4292 = vst [vmem:[%s5689_s24 + $0x3a0] sm:$0xff] %v4036_v2  ;;  %4293 = vst [vmem:[%s5689_s24 + $0x3a8] sm:$0xff] %v4037_v3  ;;  %v3786_v58 = vld [vmem:[%s5689_s24 + $0x480] sm:$0xff]  ;;  %v4062_v59 = vadd.f32 %v7503_v22, %v3784_v56  ;;  %v4063_v60 = vadd.f32 %v7505_v23, %v3785_v57  ;;  %v3787_v62 = vld [vmem:[%s5689_s24 + $0x488] sm:$0xff] }
 0x470   : > { %4294 = vst [vmem:[%s5689_s24 + $0x3b0] sm:$0xff] %v4038_v7  ;;  %4295 = vst [vmem:[%s5689_s24 + $0x3b8] sm:$0xff] %v4039_v8  ;;  %v4064_v61 = vadd.f32 %v7499_v20, %v3786_v58  ;;  %v3788_v63 = vld [vmem:[%s5689_s24 + $0x490] sm:$0xff]  ;;  %v3789_v0 = vld [vmem:[%s5689_s24 + $0x498] sm:$0xff]  ;;  %v4065_v1 = vadd.f32 %v7501_v21, %v3787_v62 }
 0x471   : > { %4296 = vst [vmem:[%s5689_s24 + $0x3c0] sm:$0xff] %v4040_v9  ;;  %4297 = vst [vmem:[%s5689_s24 + $0x3c8] sm:$0xff] %v4041_v13  ;;  %v4066_v2 = vadd.f32 %v7503_v22, %v3788_v63  ;;  %v4067_v3 = vadd.f32 %v7505_v23, %v3789_v0  ;;  %v3790_v4 = vld [vmem:[%s5689_s24 + $0x4a0] sm:$0xff]  ;;  %v3791_v5 = vld [vmem:[%s5689_s24 + $0x4a8] sm:$0xff] }
 0x472   : > { %4298 = vst [vmem:[%s5689_s24 + $0x3d0] sm:$0xff] %v4042_v14  ;;  %4299 = vst [vmem:[%s5689_s24 + $0x3d8] sm:$0xff] %v4043_v15  ;;  %v3792_v6 = vld [vmem:[%s5689_s24 + $0x4b0] sm:$0xff]  ;;  %v4068_v7 = vadd.f32 %v7499_v20, %v3790_v4  ;;  %v4069_v8 = vadd.f32 %v7501_v21, %v3791_v5  ;;  %v3793_v10 = vld [vmem:[%s5689_s24 + $0x4b8] sm:$0xff] }
 0x473   : > { %4300 = vst [vmem:[%s5689_s24 + $0x3e0] sm:$0xff] %v4044_v19  ;;  %4301 = vst [vmem:[%s5689_s24 + $0x3e8] sm:$0xff] %v4045_v24  ;;  %v4070_v9 = vadd.f32 %v7503_v22, %v3792_v6  ;;  %v3794_v11 = vld [vmem:[%s5689_s24 + $0x4c0] sm:$0xff]  ;;  %v3795_v12 = vld [vmem:[%s5689_s24 + $0x4c8] sm:$0xff]  ;;  %v4071_v13 = vadd.f32 %v7505_v23, %v3793_v10 }
 0x474   : > { %4302 = vst [vmem:[%s5689_s24 + $0x3f0] sm:$0xff] %v4046_v25  ;;  %4303 = vst [vmem:[%s5689_s24 + $0x3f8] sm:$0xff] %v4047_v29  ;;  %v4072_v14 = vadd.f32 %v7499_v20, %v3794_v11  ;;  %v4073_v15 = vadd.f32 %v7501_v21, %v3795_v12  ;;  %v3796_v16 = vld [vmem:[%s5689_s24 + $0x4d0] sm:$0xff]  ;;  %v3797_v17 = vld [vmem:[%s5689_s24 + $0x4d8] sm:$0xff] }
 0x475   : > { %4304 = vst [vmem:[%s5689_s24 + $0x400] sm:$0xff] %v4048_v30  ;;  %4305 = vst [vmem:[%s5689_s24 + $0x408] sm:$0xff] %v4049_v31  ;;  %v3798_v18 = vld [vmem:[%s5689_s24 + $0x4e0] sm:$0xff]  ;;  %v4074_v19 = vadd.f32 %v7503_v22, %v3796_v16  ;;  %v4075_v24 = vadd.f32 %v7505_v23, %v3797_v17  ;;  %v3799_v26 = vld [vmem:[%s5689_s24 + $0x4e8] sm:$0xff] }
 0x476   : > { %4306 = vst [vmem:[%s5689_s24 + $0x410] sm:$0xff] %v4050_v35  ;;  %4307 = vst [vmem:[%s5689_s24 + $0x418] sm:$0xff] %v4051_v36  ;;  %v4076_v25 = vadd.f32 %v7499_v20, %v3798_v18  ;;  %v3800_v27 = vld [vmem:[%s5689_s24 + $0x4f0] sm:$0xff]  ;;  %v3801_v28 = vld [vmem:[%s5689_s24 + $0x4f8] sm:$0xff]  ;;  %v4077_v29 = vadd.f32 %v7501_v21, %v3799_v26 }
 0x477   : > { %4308 = vst [vmem:[%s5689_s24 + $0x420] sm:$0xff] %v4052_v37  ;;  %4309 = vst [vmem:[%s5689_s24 + $0x428] sm:$0xff] %v4053_v41  ;;  %v4078_v30 = vadd.f32 %v7503_v22, %v3800_v27  ;;  %v4079_v31 = vadd.f32 %v7505_v23, %v3801_v28  ;;  %v3802_v32 = vld [vmem:[%s5689_s24 + $0x500] sm:$0xff]  ;;  %v3803_v33 = vld [vmem:[%s5689_s24 + $0x508] sm:$0xff] }
 0x478   : > { %4310 = vst [vmem:[%s5689_s24 + $0x430] sm:$0xff] %v4054_v42  ;;  %4311 = vst [vmem:[%s5689_s24 + $0x438] sm:$0xff] %v4055_v43  ;;  %v3804_v34 = vld [vmem:[%s5689_s24 + $0x510] sm:$0xff]  ;;  %v4080_v35 = vadd.f32 %v7499_v20, %v3802_v32  ;;  %v4081_v36 = vadd.f32 %v7501_v21, %v3803_v33  ;;  %v3805_v38 = vld [vmem:[%s5689_s24 + $0x518] sm:$0xff] }
 0x479   : > { %4312 = vst [vmem:[%s5689_s24 + $0x440] sm:$0xff] %v4056_v47  ;;  %4313 = vst [vmem:[%s5689_s24 + $0x448] sm:$0xff] %v4057_v48  ;;  %v4082_v37 = vadd.f32 %v7503_v22, %v3804_v34  ;;  %v3806_v39 = vld [vmem:[%s5689_s24 + $0x520] sm:$0xff]  ;;  %v3807_v40 = vld [vmem:[%s5689_s24 + $0x528] sm:$0xff]  ;;  %v4083_v41 = vadd.f32 %v7505_v23, %v3805_v38 }
 0x47a   : > { %4314 = vst [vmem:[%s5689_s24 + $0x450] sm:$0xff] %v4058_v49  ;;  %4315 = vst [vmem:[%s5689_s24 + $0x458] sm:$0xff] %v4059_v53  ;;  %v4084_v42 = vadd.f32 %v7499_v20, %v3806_v39  ;;  %v4085_v43 = vadd.f32 %v7501_v21, %v3807_v40  ;;  %v3808_v44 = vld [vmem:[%s5689_s24 + $0x530] sm:$0xff]  ;;  %v3809_v45 = vld [vmem:[%s5689_s24 + $0x538] sm:$0xff] }
 0x47b   : > { %4316 = vst [vmem:[%s5689_s24 + $0x460] sm:$0xff] %v4060_v54  ;;  %4317 = vst [vmem:[%s5689_s24 + $0x468] sm:$0xff] %v4061_v55  ;;  %v3810_v46 = vld [vmem:[%s5689_s24 + $0x540] sm:$0xff]  ;;  %v4086_v47 = vadd.f32 %v7503_v22, %v3808_v44  ;;  %v4087_v48 = vadd.f32 %v7505_v23, %v3809_v45  ;;  %v3811_v50 = vld [vmem:[%s5689_s24 + $0x548] sm:$0xff] }
 0x47c   : > { %4318 = vst [vmem:[%s5689_s24 + $0x470] sm:$0xff] %v4062_v59  ;;  %4319 = vst [vmem:[%s5689_s24 + $0x478] sm:$0xff] %v4063_v60  ;;  %v4088_v49 = vadd.f32 %v7499_v20, %v3810_v46  ;;  %v3812_v51 = vld [vmem:[%s5689_s24 + $0x550] sm:$0xff]  ;;  %v3813_v52 = vld [vmem:[%s5689_s24 + $0x558] sm:$0xff]  ;;  %v4089_v53 = vadd.f32 %v7501_v21, %v3811_v50 }
 0x47d   : > { %4320 = vst [vmem:[%s5689_s24 + $0x480] sm:$0xff] %v4064_v61  ;;  %4321 = vst [vmem:[%s5689_s24 + $0x488] sm:$0xff] %v4065_v1  ;;  %v4090_v54 = vadd.f32 %v7503_v22, %v3812_v51  ;;  %v4091_v55 = vadd.f32 %v7505_v23, %v3813_v52  ;;  %v3814_v56 = vld [vmem:[%s5689_s24 + $0x560] sm:$0xff]  ;;  %v3815_v57 = vld [vmem:[%s5689_s24 + $0x568] sm:$0xff] }
 0x47e   : > { %4322 = vst [vmem:[%s5689_s24 + $0x490] sm:$0xff] %v4066_v2  ;;  %4323 = vst [vmem:[%s5689_s24 + $0x498] sm:$0xff] %v4067_v3  ;;  %v3816_v58 = vld [vmem:[%s5689_s24 + $0x570] sm:$0xff]  ;;  %v4092_v59 = vadd.f32 %v7499_v20, %v3814_v56  ;;  %v4093_v60 = vadd.f32 %v7501_v21, %v3815_v57  ;;  %v3817_v62 = vld [vmem:[%s5689_s24 + $0x578] sm:$0xff] }
 0x47f   : > { %4324 = vst [vmem:[%s5689_s24 + $0x4a0] sm:$0xff] %v4068_v7  ;;  %4325 = vst [vmem:[%s5689_s24 + $0x4a8] sm:$0xff] %v4069_v8  ;;  %v4094_v61 = vadd.f32 %v7503_v22, %v3816_v58  ;;  %v3818_v63 = vld [vmem:[%s5689_s24 + $0x580] sm:$0xff]  ;;  %v3819_v0 = vld [vmem:[%s5689_s24 + $0x588] sm:$0xff]  ;;  %v4095_v1 = vadd.f32 %v7505_v23, %v3817_v62 }
 0x480   : > { %4326 = vst [vmem:[%s5689_s24 + $0x4b0] sm:$0xff] %v4070_v9  ;;  %4327 = vst [vmem:[%s5689_s24 + $0x4b8] sm:$0xff] %v4071_v13  ;;  %v4096_v2 = vadd.f32 %v7499_v20, %v3818_v63  ;;  %v4097_v3 = vadd.f32 %v7501_v21, %v3819_v0  ;;  %v3820_v4 = vld [vmem:[%s5689_s24 + $0x590] sm:$0xff]  ;;  %v3821_v5 = vld [vmem:[%s5689_s24 + $0x598] sm:$0xff] }
 0x481   : > { %4328 = vst [vmem:[%s5689_s24 + $0x4c0] sm:$0xff] %v4072_v14  ;;  %4329 = vst [vmem:[%s5689_s24 + $0x4c8] sm:$0xff] %v4073_v15  ;;  %v3822_v6 = vld [vmem:[%s5689_s24 + $0x5a0] sm:$0xff]  ;;  %v4098_v7 = vadd.f32 %v7503_v22, %v3820_v4  ;;  %v4099_v8 = vadd.f32 %v7505_v23, %v3821_v5  ;;  %v3823_v10 = vld [vmem:[%s5689_s24 + $0x5a8] sm:$0xff] }
 0x482   : > { %4330 = vst [vmem:[%s5689_s24 + $0x4d0] sm:$0xff] %v4074_v19  ;;  %4331 = vst [vmem:[%s5689_s24 + $0x4d8] sm:$0xff] %v4075_v24  ;;  %v4100_v9 = vadd.f32 %v7499_v20, %v3822_v6  ;;  %v3824_v11 = vld [vmem:[%s5689_s24 + $0x5b0] sm:$0xff]  ;;  %v3825_v12 = vld [vmem:[%s5689_s24 + $0x5b8] sm:$0xff]  ;;  %v4101_v13 = vadd.f32 %v7501_v21, %v3823_v10 }
 0x483   : > { %4332 = vst [vmem:[%s5689_s24 + $0x4e0] sm:$0xff] %v4076_v25  ;;  %4333 = vst [vmem:[%s5689_s24 + $0x4e8] sm:$0xff] %v4077_v29  ;;  %v4102_v14 = vadd.f32 %v7503_v22, %v3824_v11  ;;  %v4103_v15 = vadd.f32 %v7505_v23, %v3825_v12  ;;  %v3826_v16 = vld [vmem:[%s5689_s24 + $0x5c0] sm:$0xff]  ;;  %v3827_v17 = vld [vmem:[%s5689_s24 + $0x5c8] sm:$0xff] }
 0x484   : > { %4334 = vst [vmem:[%s5689_s24 + $0x4f0] sm:$0xff] %v4078_v30  ;;  %4335 = vst [vmem:[%s5689_s24 + $0x4f8] sm:$0xff] %v4079_v31  ;;  %v3828_v18 = vld [vmem:[%s5689_s24 + $0x5d0] sm:$0xff]  ;;  %v4104_v19 = vadd.f32 %v7499_v20, %v3826_v16  ;;  %v4105_v24 = vadd.f32 %v7501_v21, %v3827_v17  ;;  %v3829_v26 = vld [vmem:[%s5689_s24 + $0x5d8] sm:$0xff] }
 0x485   : > { %4336 = vst [vmem:[%s5689_s24 + $0x500] sm:$0xff] %v4080_v35  ;;  %4337 = vst [vmem:[%s5689_s24 + $0x508] sm:$0xff] %v4081_v36  ;;  %v4106_v25 = vadd.f32 %v7503_v22, %v3828_v18  ;;  %v3830_v27 = vld [vmem:[%s5689_s24 + $0x5e0] sm:$0xff]  ;;  %v3831_v28 = vld [vmem:[%s5689_s24 + $0x5e8] sm:$0xff]  ;;  %v4107_v29 = vadd.f32 %v7505_v23, %v3829_v26 }
 0x486   : > { %4338 = vst [vmem:[%s5689_s24 + $0x510] sm:$0xff] %v4082_v37  ;;  %4339 = vst [vmem:[%s5689_s24 + $0x518] sm:$0xff] %v4083_v41  ;;  %v4108_v30 = vadd.f32 %v7499_v20, %v3830_v27  ;;  %v4109_v31 = vadd.f32 %v7501_v21, %v3831_v28  ;;  %v3832_v32 = vld [vmem:[%s5689_s24 + $0x5f0] sm:$0xff]  ;;  %v3833_v33 = vld [vmem:[%s5689_s24 + $0x5f8] sm:$0xff] }
 0x487   : > { %4340 = vst [vmem:[%s5689_s24 + $0x520] sm:$0xff] %v4084_v42  ;;  %4341 = vst [vmem:[%s5689_s24 + $0x528] sm:$0xff] %v4085_v43  ;;  %v3834_v34 = vld [vmem:[%s5689_s24 + $0x600] sm:$0xff]  ;;  %v4110_v35 = vadd.f32 %v7503_v22, %v3832_v32  ;;  %v4111_v36 = vadd.f32 %v7505_v23, %v3833_v33  ;;  %v3835_v38 = vld [vmem:[%s5689_s24 + $0x608] sm:$0xff] }
 0x488   : > { %4342 = vst [vmem:[%s5689_s24 + $0x530] sm:$0xff] %v4086_v47  ;;  %4343 = vst [vmem:[%s5689_s24 + $0x538] sm:$0xff] %v4087_v48  ;;  %v4112_v37 = vadd.f32 %v7499_v20, %v3834_v34  ;;  %v3836_v39 = vld [vmem:[%s5689_s24 + $0x610] sm:$0xff]  ;;  %v3837_v40 = vld [vmem:[%s5689_s24 + $0x618] sm:$0xff]  ;;  %v4113_v41 = vadd.f32 %v7501_v21, %v3835_v38 }
 0x489   : > { %4344 = vst [vmem:[%s5689_s24 + $0x540] sm:$0xff] %v4088_v49  ;;  %4345 = vst [vmem:[%s5689_s24 + $0x548] sm:$0xff] %v4089_v53  ;;  %v4114_v42 = vadd.f32 %v7503_v22, %v3836_v39  ;;  %v4115_v43 = vadd.f32 %v7505_v23, %v3837_v40  ;;  %v3838_v44 = vld [vmem:[%s5689_s24 + $0x620] sm:$0xff]  ;;  %v3839_v45 = vld [vmem:[%s5689_s24 + $0x628] sm:$0xff] }
 0x48a   : > { %4346 = vst [vmem:[%s5689_s24 + $0x550] sm:$0xff] %v4090_v54  ;;  %4347 = vst [vmem:[%s5689_s24 + $0x558] sm:$0xff] %v4091_v55  ;;  %v3840_v46 = vld [vmem:[%s5689_s24 + $0x630] sm:$0xff]  ;;  %v4116_v47 = vadd.f32 %v7499_v20, %v3838_v44  ;;  %v4117_v48 = vadd.f32 %v7501_v21, %v3839_v45  ;;  %v3841_v50 = vld [vmem:[%s5689_s24 + $0x638] sm:$0xff] }
 0x48b   : > { %4348 = vst [vmem:[%s5689_s24 + $0x560] sm:$0xff] %v4092_v59  ;;  %4349 = vst [vmem:[%s5689_s24 + $0x568] sm:$0xff] %v4093_v60  ;;  %v4118_v49 = vadd.f32 %v7503_v22, %v3840_v46  ;;  %v3842_v51 = vld [vmem:[%s5689_s24 + $0x640] sm:$0xff]  ;;  %v3843_v52 = vld [vmem:[%s5689_s24 + $0x648] sm:$0xff]  ;;  %v4119_v53 = vadd.f32 %v7505_v23, %v3841_v50 }
 0x48c   : > { %4350 = vst [vmem:[%s5689_s24 + $0x570] sm:$0xff] %v4094_v61  ;;  %4351 = vst [vmem:[%s5689_s24 + $0x578] sm:$0xff] %v4095_v1  ;;  %v4120_v54 = vadd.f32 %v7499_v20, %v3842_v51  ;;  %v4121_v55 = vadd.f32 %v7501_v21, %v3843_v52  ;;  %v3844_v56 = vld [vmem:[%s5689_s24 + $0x650] sm:$0xff]  ;;  %v3845_v57 = vld [vmem:[%s5689_s24 + $0x658] sm:$0xff] }
 0x48d   : > { %4352 = vst [vmem:[%s5689_s24 + $0x580] sm:$0xff] %v4096_v2  ;;  %4353 = vst [vmem:[%s5689_s24 + $0x588] sm:$0xff] %v4097_v3  ;;  %v3846_v58 = vld [vmem:[%s5689_s24 + $0x660] sm:$0xff]  ;;  %v4122_v59 = vadd.f32 %v7503_v22, %v3844_v56  ;;  %v4123_v60 = vadd.f32 %v7505_v23, %v3845_v57  ;;  %v3847_v62 = vld [vmem:[%s5689_s24 + $0x668] sm:$0xff] }
 0x48e   : > { %4354 = vst [vmem:[%s5689_s24 + $0x590] sm:$0xff] %v4098_v7  ;;  %4355 = vst [vmem:[%s5689_s24 + $0x598] sm:$0xff] %v4099_v8  ;;  %v4124_v61 = vadd.f32 %v7499_v20, %v3846_v58  ;;  %v3848_v63 = vld [vmem:[%s5689_s24 + $0x670] sm:$0xff]  ;;  %v3849_v0 = vld [vmem:[%s5689_s24 + $0x678] sm:$0xff]  ;;  %v4125_v1 = vadd.f32 %v7501_v21, %v3847_v62 }
 0x48f   : > { %4356 = vst [vmem:[%s5689_s24 + $0x5a0] sm:$0xff] %v4100_v9  ;;  %4357 = vst [vmem:[%s5689_s24 + $0x5a8] sm:$0xff] %v4101_v13  ;;  %v4126_v2 = vadd.f32 %v7503_v22, %v3848_v63  ;;  %v4127_v3 = vadd.f32 %v7505_v23, %v3849_v0  ;;  %v3850_v4 = vld [vmem:[%s5689_s24 + $0x680] sm:$0xff]  ;;  %v3851_v5 = vld [vmem:[%s5689_s24 + $0x688] sm:$0xff] }
 0x490   : > { %4358 = vst [vmem:[%s5689_s24 + $0x5b0] sm:$0xff] %v4102_v14  ;;  %4359 = vst [vmem:[%s5689_s24 + $0x5b8] sm:$0xff] %v4103_v15  ;;  %v3852_v6 = vld [vmem:[%s5689_s24 + $0x690] sm:$0xff]  ;;  %v4128_v7 = vadd.f32 %v7499_v20, %v3850_v4  ;;  %v4129_v8 = vadd.f32 %v7501_v21, %v3851_v5  ;;  %v3853_v10 = vld [vmem:[%s5689_s24 + $0x698] sm:$0xff] }
 0x491   : > { %4360 = vst [vmem:[%s5689_s24 + $0x5c0] sm:$0xff] %v4104_v19  ;;  %4361 = vst [vmem:[%s5689_s24 + $0x5c8] sm:$0xff] %v4105_v24  ;;  %v4130_v9 = vadd.f32 %v7503_v22, %v3852_v6  ;;  %v3854_v11 = vld [vmem:[%s5689_s24 + $0x6a0] sm:$0xff]  ;;  %v3855_v12 = vld [vmem:[%s5689_s24 + $0x6a8] sm:$0xff]  ;;  %v4131_v13 = vadd.f32 %v7505_v23, %v3853_v10 }
 0x492   : > { %4362 = vst [vmem:[%s5689_s24 + $0x5d0] sm:$0xff] %v4106_v25  ;;  %4363 = vst [vmem:[%s5689_s24 + $0x5d8] sm:$0xff] %v4107_v29  ;;  %v4132_v14 = vadd.f32 %v7499_v20, %v3854_v11  ;;  %v4133_v15 = vadd.f32 %v7501_v21, %v3855_v12  ;;  %v3856_v16 = vld [vmem:[%s5689_s24 + $0x6b0] sm:$0xff]  ;;  %v3857_v17 = vld [vmem:[%s5689_s24 + $0x6b8] sm:$0xff] }
 0x493   : > { %4364 = vst [vmem:[%s5689_s24 + $0x5e0] sm:$0xff] %v4108_v30  ;;  %4365 = vst [vmem:[%s5689_s24 + $0x5e8] sm:$0xff] %v4109_v31  ;;  %v3858_v18 = vld [vmem:[%s5689_s24 + $0x6c0] sm:$0xff]  ;;  %v4134_v19 = vadd.f32 %v7503_v22, %v3856_v16  ;;  %v4135_v24 = vadd.f32 %v7505_v23, %v3857_v17  ;;  %v3859_v26 = vld [vmem:[%s5689_s24 + $0x6c8] sm:$0xff] }
 0x494   : > { %4366 = vst [vmem:[%s5689_s24 + $0x5f0] sm:$0xff] %v4110_v35  ;;  %4367 = vst [vmem:[%s5689_s24 + $0x5f8] sm:$0xff] %v4111_v36  ;;  %v4136_v25 = vadd.f32 %v7499_v20, %v3858_v18  ;;  %v3860_v27 = vld [vmem:[%s5689_s24 + $0x6d0] sm:$0xff]  ;;  %v3861_v28 = vld [vmem:[%s5689_s24 + $0x6d8] sm:$0xff]  ;;  %v4137_v29 = vadd.f32 %v7501_v21, %v3859_v26 }
 0x495   : > { %4368 = vst [vmem:[%s5689_s24 + $0x600] sm:$0xff] %v4112_v37  ;;  %4369 = vst [vmem:[%s5689_s24 + $0x608] sm:$0xff] %v4113_v41  ;;  %v4138_v30 = vadd.f32 %v7503_v22, %v3860_v27  ;;  %v4139_v31 = vadd.f32 %v7505_v23, %v3861_v28  ;;  %v3862_v32 = vld [vmem:[%s5689_s24 + $0x6e0] sm:$0xff]  ;;  %v3863_v33 = vld [vmem:[%s5689_s24 + $0x6e8] sm:$0xff] }
 0x496   : > { %4370 = vst [vmem:[%s5689_s24 + $0x610] sm:$0xff] %v4114_v42  ;;  %4371 = vst [vmem:[%s5689_s24 + $0x618] sm:$0xff] %v4115_v43  ;;  %v3864_v34 = vld [vmem:[%s5689_s24 + $0x6f0] sm:$0xff]  ;;  %v4140_v35 = vadd.f32 %v7499_v20, %v3862_v32  ;;  %v4141_v36 = vadd.f32 %v7501_v21, %v3863_v33  ;;  %v3865_v38 = vld [vmem:[%s5689_s24 + $0x6f8] sm:$0xff] }
 0x497   : > { %4372 = vst [vmem:[%s5689_s24 + $0x620] sm:$0xff] %v4116_v47  ;;  %4373 = vst [vmem:[%s5689_s24 + $0x628] sm:$0xff] %v4117_v48  ;;  %v4142_v37 = vadd.f32 %v7503_v22, %v3864_v34  ;;  %v3866_v39 = vld [vmem:[%s5689_s24 + $0x700] sm:$0xff]  ;;  %v3867_v40 = vld [vmem:[%s5689_s24 + $0x708] sm:$0xff]  ;;  %v4143_v41 = vadd.f32 %v7505_v23, %v3865_v38 }
 0x498   : > { %4374 = vst [vmem:[%s5689_s24 + $0x630] sm:$0xff] %v4118_v49  ;;  %4375 = vst [vmem:[%s5689_s24 + $0x638] sm:$0xff] %v4119_v53  ;;  %v4144_v42 = vadd.f32 %v7499_v20, %v3866_v39  ;;  %v4145_v43 = vadd.f32 %v7501_v21, %v3867_v40  ;;  %v3868_v44 = vld [vmem:[%s5689_s24 + $0x710] sm:$0xff]  ;;  %v3869_v45 = vld [vmem:[%s5689_s24 + $0x718] sm:$0xff] }
 0x499   : > { %4376 = vst [vmem:[%s5689_s24 + $0x640] sm:$0xff] %v4120_v54  ;;  %4377 = vst [vmem:[%s5689_s24 + $0x648] sm:$0xff] %v4121_v55  ;;  %v3870_v46 = vld [vmem:[%s5689_s24 + $0x720] sm:$0xff]  ;;  %v4146_v47 = vadd.f32 %v7503_v22, %v3868_v44  ;;  %v4147_v48 = vadd.f32 %v7505_v23, %v3869_v45  ;;  %v3871_v50 = vld [vmem:[%s5689_s24 + $0x728] sm:$0xff] }
 0x49a   : > { %4378 = vst [vmem:[%s5689_s24 + $0x650] sm:$0xff] %v4122_v59  ;;  %4379 = vst [vmem:[%s5689_s24 + $0x658] sm:$0xff] %v4123_v60  ;;  %v4148_v49 = vadd.f32 %v7499_v20, %v3870_v46  ;;  %v3872_v51 = vld [vmem:[%s5689_s24 + $0x730] sm:$0xff]  ;;  %v3873_v52 = vld [vmem:[%s5689_s24 + $0x738] sm:$0xff]  ;;  %v4149_v53 = vadd.f32 %v7501_v21, %v3871_v50 }
 0x49b   : > { %4380 = vst [vmem:[%s5689_s24 + $0x660] sm:$0xff] %v4124_v61  ;;  %4381 = vst [vmem:[%s5689_s24 + $0x668] sm:$0xff] %v4125_v1  ;;  %v4150_v54 = vadd.f32 %v7503_v22, %v3872_v51  ;;  %v4151_v55 = vadd.f32 %v7505_v23, %v3873_v52  ;;  %v3874_v56 = vld [vmem:[%s5689_s24 + $0x740] sm:$0xff]  ;;  %v3875_v57 = vld [vmem:[%s5689_s24 + $0x748] sm:$0xff] }
 0x49c   : > { %4382 = vst [vmem:[%s5689_s24 + $0x670] sm:$0xff] %v4126_v2  ;;  %4383 = vst [vmem:[%s5689_s24 + $0x678] sm:$0xff] %v4127_v3  ;;  %v3876_v58 = vld [vmem:[%s5689_s24 + $0x750] sm:$0xff]  ;;  %v4152_v59 = vadd.f32 %v7499_v20, %v3874_v56  ;;  %v4153_v60 = vadd.f32 %v7501_v21, %v3875_v57  ;;  %v3877_v62 = vld [vmem:[%s5689_s24 + $0x758] sm:$0xff] }
 0x49d   : > { %4384 = vst [vmem:[%s5689_s24 + $0x680] sm:$0xff] %v4128_v7  ;;  %4385 = vst [vmem:[%s5689_s24 + $0x688] sm:$0xff] %v4129_v8  ;;  %v4154_v61 = vadd.f32 %v7503_v22, %v3876_v58  ;;  %v3878_v63 = vld [vmem:[%s5689_s24 + $0x760] sm:$0xff]  ;;  %v3879_v0 = vld [vmem:[%s5689_s24 + $0x768] sm:$0xff]  ;;  %v4155_v1 = vadd.f32 %v7505_v23, %v3877_v62 }
 0x49e   : > { %4386 = vst [vmem:[%s5689_s24 + $0x690] sm:$0xff] %v4130_v9  ;;  %4387 = vst [vmem:[%s5689_s24 + $0x698] sm:$0xff] %v4131_v13  ;;  %v4156_v2 = vadd.f32 %v7499_v20, %v3878_v63  ;;  %v4157_v3 = vadd.f32 %v7501_v21, %v3879_v0  ;;  %v3880_v4 = vld [vmem:[%s5689_s24 + $0x770] sm:$0xff]  ;;  %v3881_v5 = vld [vmem:[%s5689_s24 + $0x778] sm:$0xff] }
 0x49f   : > { %4388 = vst [vmem:[%s5689_s24 + $0x6a0] sm:$0xff] %v4132_v14  ;;  %4389 = vst [vmem:[%s5689_s24 + $0x6a8] sm:$0xff] %v4133_v15  ;;  %v3882_v6 = vld [vmem:[%s5689_s24 + $0x780] sm:$0xff]  ;;  %v4158_v7 = vadd.f32 %v7503_v22, %v3880_v4  ;;  %v4159_v8 = vadd.f32 %v7505_v23, %v3881_v5  ;;  %v3883_v10 = vld [vmem:[%s5689_s24 + $0x788] sm:$0xff] }
 0x4a0   : > { %4390 = vst [vmem:[%s5689_s24 + $0x6b0] sm:$0xff] %v4134_v19  ;;  %4391 = vst [vmem:[%s5689_s24 + $0x6b8] sm:$0xff] %v4135_v24  ;;  %v4160_v9 = vadd.f32 %v7499_v20, %v3882_v6  ;;  %v3884_v11 = vld [vmem:[%s5689_s24 + $0x790] sm:$0xff]  ;;  %v3885_v12 = vld [vmem:[%s5689_s24 + $0x798] sm:$0xff]  ;;  %v4161_v13 = vadd.f32 %v7501_v21, %v3883_v10 }
 0x4a1   : > { %4392 = vst [vmem:[%s5689_s24 + $0x6c0] sm:$0xff] %v4136_v25  ;;  %4393 = vst [vmem:[%s5689_s24 + $0x6c8] sm:$0xff] %v4137_v29  ;;  %v4162_v14 = vadd.f32 %v7503_v22, %v3884_v11  ;;  %v4163_v15 = vadd.f32 %v7505_v23, %v3885_v12  ;;  %v3886_v16 = vld [vmem:[%s5689_s24 + $0x7a0] sm:$0xff]  ;;  %v3887_v17 = vld [vmem:[%s5689_s24 + $0x7a8] sm:$0xff] }
 0x4a2   : > { %4394 = vst [vmem:[%s5689_s24 + $0x6d0] sm:$0xff] %v4138_v30  ;;  %4395 = vst [vmem:[%s5689_s24 + $0x6d8] sm:$0xff] %v4139_v31  ;;  %v3888_v18 = vld [vmem:[%s5689_s24 + $0x7b0] sm:$0xff]  ;;  %v4164_v19 = vadd.f32 %v7499_v20, %v3886_v16  ;;  %v4165_v24 = vadd.f32 %v7501_v21, %v3887_v17  ;;  %v3889_v26 = vld [vmem:[%s5689_s24 + $0x7b8] sm:$0xff] }
 0x4a3   : > { %4396 = vst [vmem:[%s5689_s24 + $0x6e0] sm:$0xff] %v4140_v35  ;;  %4397 = vst [vmem:[%s5689_s24 + $0x6e8] sm:$0xff] %v4141_v36  ;;  %v4166_v25 = vadd.f32 %v7503_v22, %v3888_v18  ;;  %v3890_v27 = vld [vmem:[%s5689_s24 + $0x7c0] sm:$0xff]  ;;  %v3891_v28 = vld [vmem:[%s5689_s24 + $0x7c8] sm:$0xff]  ;;  %v4167_v29 = vadd.f32 %v7505_v23, %v3889_v26 }
 0x4a4   : > { %4398 = vst [vmem:[%s5689_s24 + $0x6f0] sm:$0xff] %v4142_v37  ;;  %4399 = vst [vmem:[%s5689_s24 + $0x6f8] sm:$0xff] %v4143_v41  ;;  %v4168_v30 = vadd.f32 %v7499_v20, %v3890_v27  ;;  %v4169_v31 = vadd.f32 %v7501_v21, %v3891_v28  ;;  %v3892_v32 = vld [vmem:[%s5689_s24 + $0x7d0] sm:$0xff]  ;;  %v3893_v33 = vld [vmem:[%s5689_s24 + $0x7d8] sm:$0xff] }
 0x4a5   : > { %4400 = vst [vmem:[%s5689_s24 + $0x700] sm:$0xff] %v4144_v42  ;;  %4401 = vst [vmem:[%s5689_s24 + $0x708] sm:$0xff] %v4145_v43  ;;  %v3894_v34 = vld [vmem:[%s5689_s24 + $0x7e0] sm:$0xff]  ;;  %v4170_v35 = vadd.f32 %v7503_v22, %v3892_v32  ;;  %v4171_v36 = vadd.f32 %v7505_v23, %v3893_v33  ;;  %v3895_v38 = vld [vmem:[%s5689_s24 + $0x7e8] sm:$0xff] }
 0x4a6   : > { %4402 = vst [vmem:[%s5689_s24 + $0x710] sm:$0xff] %v4146_v47  ;;  %4403 = vst [vmem:[%s5689_s24 + $0x718] sm:$0xff] %v4147_v48  ;;  %v4172_v37 = vadd.f32 %v7499_v20, %v3894_v34  ;;  %v3896_v39 = vld [vmem:[%s5689_s24 + $0x7f0] sm:$0xff]  ;;  %v3897_v40 = vld [vmem:[%s5689_s24 + $0x7f8] sm:$0xff]  ;;  %v4173_v41 = vadd.f32 %v7501_v21, %v3895_v38 }
 0x4a7   : > { %4404 = vst [vmem:[%s5689_s24 + $0x720] sm:$0xff] %v4148_v49  ;;  %4405 = vst [vmem:[%s5689_s24 + $0x728] sm:$0xff] %v4149_v53  ;;  %v4174_v42 = vadd.f32 %v7503_v22, %v3896_v39  ;;  %v4175_v43 = vadd.f32 %v7505_v23, %v3897_v40 }
 0x4a8   : > { %4406 = vst [vmem:[%s5689_s24 + $0x730] sm:$0xff] %v4150_v54  ;;  %4407 = vst [vmem:[%s5689_s24 + $0x738] sm:$0xff] %v4151_v55 }
 0x4a9   : > { %4408 = vst [vmem:[%s5689_s24 + $0x740] sm:$0xff] %v4152_v59  ;;  %4409 = vst [vmem:[%s5689_s24 + $0x748] sm:$0xff] %v4153_v60 }
 0x4aa   : > { %4410 = vst [vmem:[%s5689_s24 + $0x750] sm:$0xff] %v4154_v61  ;;  %4411 = vst [vmem:[%s5689_s24 + $0x758] sm:$0xff] %v4155_v1 }
 0x4ab   : > { %4412 = vst [vmem:[%s5689_s24 + $0x760] sm:$0xff] %v4156_v2  ;;  %4413 = vst [vmem:[%s5689_s24 + $0x768] sm:$0xff] %v4157_v3 }
 0x4ac   : > { %4414 = vst [vmem:[%s5689_s24 + $0x770] sm:$0xff] %v4158_v7  ;;  %4415 = vst [vmem:[%s5689_s24 + $0x778] sm:$0xff] %v4159_v8 }
 0x4ad   : > { %4416 = vst [vmem:[%s5689_s24 + $0x780] sm:$0xff] %v4160_v9  ;;  %4417 = vst [vmem:[%s5689_s24 + $0x788] sm:$0xff] %v4161_v13 }
 0x4ae   : > { %4418 = vst [vmem:[%s5689_s24 + $0x790] sm:$0xff] %v4162_v14  ;;  %4419 = vst [vmem:[%s5689_s24 + $0x798] sm:$0xff] %v4163_v15 }
 0x4af   : > { %4420 = vst [vmem:[%s5689_s24 + $0x7a0] sm:$0xff] %v4164_v19  ;;  %4421 = vst [vmem:[%s5689_s24 + $0x7a8] sm:$0xff] %v4165_v24 }
 0x4b0   : > { %4422 = vst [vmem:[%s5689_s24 + $0x7b0] sm:$0xff] %v4166_v25  ;;  %4423 = vst [vmem:[%s5689_s24 + $0x7b8] sm:$0xff] %v4167_v29 }
 0x4b1   : > { %4424 = vst [vmem:[%s5689_s24 + $0x7c0] sm:$0xff] %v4168_v30  ;;  %4425 = vst [vmem:[%s5689_s24 + $0x7c8] sm:$0xff] %v4169_v31 }
 0x4b2   : > { %4426 = vst [vmem:[%s5689_s24 + $0x7d0] sm:$0xff] %v4170_v35  ;;  %4427 = vst [vmem:[%s5689_s24 + $0x7d8] sm:$0xff] %v4171_v36 }
 0x4b3   : > { %4428 = vst [vmem:[%s5689_s24 + $0x7e0] sm:$0xff] %v4172_v37  ;;  %4429 = vst [vmem:[%s5689_s24 + $0x7e8] sm:$0xff] %v4173_v41 }
 0x4b4   : > { %4430 = vst [vmem:[%s5689_s24 + $0x7f0] sm:$0xff] %v4174_v42  ;;  %4431 = vst [vmem:[%s5689_s24 + $0x7f8] sm:$0xff] %v4175_v43 }
 0x4b5 PF: > { %s8441_s17 = sld [smem:[#allocation22_spill]]  ;;  %s4449_s0 = sshll.u32 %s5689_s24, 4  ;;  %s8266_s0 = int_to_ptr.vmem [resolvable:$true] %s4449_s0 }
 0x4b6   : > { %s8442_s9 = sld [smem:[#allocation23_spill]]  ;;  %s8275_s19 = scalar_lea.sflag [#allocation4], %s292_s6 }
 0x4b7   : > { %s8444_s13 = sld [smem:[#allocation32_spill]]  ;;  %s5149_s27 = scalar_lea.vmem %s8266_s0, 32768 }
 0x4b8   : > { %p5150_p11 = scmp.ne.s32.totalorder %s8266_s0, %s5149_s27  ;;  %p8446_p9 = scmp.ne.s32.totalorder %s8429_s10, 0 }
 0x4b9   : > { %s5350_s24 = smov [#allocation8]  }
 0x4ba   : > { %p5151_p8 = pnand %p5150_p11, %p8446_p9  ;;  %s5153_s20 = sshll.u32 %s5350_s24, 4  ;;  %s5154_s20 = int_to_ptr.vmem [resolvable:$false] %s5153_s20 }
 0x4bb   : > { %s4617_s11 = sshll.u32 %s8441_s17, 2  ;;  %s5155_s21 = scalar_lea.vmem %s5154_s20, 65536 }
 0x4bc   : > { %s4625_s1 = sshll.u32 %s8442_s9, 9  ;;  %p5152_p1 = pneg %p5151_p8 }
 0x4bd   : > { %s4446_s3 = sadd.s32 %s4625_s1, %s4617_s11  ;;  %s8445_s7 = smov %s8444_s13 }
 0x4be   : > { %s4619_s2 = sshll.u32 %s4446_s3, 7  ;;  %p5156_p0 = scmp.lt.s32.totalorder %s8266_s0, %s5154_s20 }
 0x4bf   : > { %s8271_s18 = scalar_lea.hbm %s8444_s13, %s4619_s2  ;;  %p5157_p2 = scmp.lt.s32.totalorder %s5155_s21, %s5149_s27 }
 0x4c1   : > { %p5158_p12 = por %p5157_p2, %p5156_p0 }
 0x4c3   : > { %p5159_p4 = pnand %p5158_p12, %p5152_p1 }
 0x4c5   : > { %5162 = shalt.err (!%p5159_p4)
}
 0x4c6   : > { %s5163_s6 = scalar_lea.hbm %s8271_s18, 32768  ;;  %s5167_s5 = scalar_lea.hbm %s8445_s7, 131072 }
 0x4c7   : > { %p5164_p13 = scmp.ne.s32.totalorder %s8271_s18, %s5163_s6  ;;  %p5168_p6 = scmp.lt.s32.totalorder %s8271_s18, %s8445_s7 }
 0x4c8   : > { %p5169_p5 = scmp.lt.s32.totalorder %s5167_s5, %s5163_s6 }
 0x4c9   : > { %p5165_p7 = pnand %p5164_p13, %p8446_p9 }
 0x4ca   : > { %p5170_p3 = por %p5169_p5, %p5168_p6 }
 0x4cb   : > { %p5166_p10 = pneg %p5165_p7 }
 0x4cd   : > { %p5171_p11 = pnand %p5170_p3, %p5166_p10 }
 0x4cf   : > { %5174 = shalt.err (!%p5171_p11)
}
 0x4d0   : > { %s5351_s3 = smov 512   ;;  %s5352_s2 = smov 1024  }
 0x4d1   : > { %s5353_s12 = smov 32  }
 0x4d2   : > { %4632 = dma.vmem_to_hbm [thread:$0]  (%p8446_p9), %s8266_s0, 32768, %s8271_s18, %s8275_s19, %s5351_s3, %s5352_s2, %s5353_s12  }
 0x4d3 PF: > { %s8447_s8 = sld [smem:[#allocation13_spill]]  ;;  %p4649_p8 = scmp.ge.s32.totalorder %s5341_s30, 2 }
 0x4d4   : > { %p8448_p1 = scmp.ne.s32.totalorder %s8430_s26, 0 }
 0x4d6   : > { %p4645_p0 = pnand %p4649_p8, %p8448_p1 }
 0x4d8   : > { %p4646_p2 = pneg %p4645_p0 }
 0x4d9   : > { %s4464_s13 = sand.u32 1, %s8447_s8  }
 0x4da   : > { %s4465_s27 = scalar_lea.sflag [#allocation4], %s4464_s13 }
 0x4db   : > { %5264 = dma.done.wait (%p4646_p2), %s4465_s27, 32768  }
 0x4dc   : > { %5266 = vsyncadd (%p4646_p2), %s4465_s27, 4294934528  ;;  %s22_s30 = sadd.s32 1, %s5341_s30   ;;  %s8450_s12 = sld [smem:[#allocation14_spill]] }
 0x4dd   : > { %p8303_p12 = scmp.ge.s32.totalorder %s22_s30, 10   ;;  %s8451_s10 = sld [smem:[#allocation16_spill]] }
 0x4de   : > { %s8452_s0 = sld [smem:[#allocation17_spill]]  ;;  %s8456_s26 = smov %s5569_s15 }
 0x4df   : > { %s8453_s18 = sld [smem:[#allocation19_spill]]  ;;  %s8460_s13 = smov %s5277_s14 }
 0x4e0   : > { %s8454_s19 = sld [smem:[#allocation20_spill]]  ;;  %s8461_s14 = smov %s5572_s16 }
 0x4e1   : > { %s8455_s20 = sld [smem:[#allocation27_spill]]  ;;  %s8465_s17 = smov %s5616_s25 }
 0x4e2   : > { %s8457_s6 = sld [smem:[#allocation24_spill]]  ;;  %s8466_s21 = smov %s5309_s22 }
 0x4e3   : > { %s8458_s27 = sld [smem:[#allocation25_spill]]  ;;  %s8462_s15 = smov %s8451_s10 }
 0x4e4   : > { %s8459_s9 = sld [smem:[#allocation26_spill]]  ;;  %s8464_s16 = smov %s8452_s0 }
 0x4e5   : > { %s8467_s22 = smov %s5313_s23  ;;  %s8468_s23 = smov %s8456_s26 }
 0x4e6   : > { %s8470_s25 = smov %s5333_s28  ;;  %s8471_s26 = smov %s5337_s29 }
 0x4e7   : > { %s8473_s29 = smov %s8481_s4  ;;  %21 = sbr.rel (!%p8303_p12) target bundleno = 20 (0x14), region = 109 }
 0x4e8   : > { %s8469_s24 = smov %s8457_s6 }
 0x4ea   : > { %s8472_s28 = smov %s8459_s9 }
 0x4ec   :  { %4470 = vsyncpa [#allocation3], 1 }
 0x4ed   :  { %4472 = vsyncpa [#allocation3 + $0x1], 1 }
 0x4ee   :  { %4473 = vsyncpa [#allocation6], 1 }
 0x4ef   :  { %4475 = vsyncpa [#allocation6 + $0x1], 1 }
 0x4f0   :  { %4476 = vsyncpa [#allocation4], 1 }
 0x4f1   :  { %4478 = vsyncpa [#allocation4 + $0x1], 1 }

</bundles_post_ra>
